<compile_context>
chip_gen: v7x
topology: tpu7x:2x2x1
jax: 0.10.0
libtpu: 0.0.40
codegen_flags: <defaults>
</compile_context>

<pallas_src>
import functools

import jax
import jax.numpy as jnp
from jax import lax
from jax.experimental import pallas as pl
from jax.experimental.pallas import tpu as pltpu


# ----------------------------------------------------------------------------
# helpers
# ----------------------------------------------------------------------------

def _round_up(x, m):
    return ((x + m - 1) // m) * m


def _vmem_capacity_bytes():
    """Physical VMEM per TensorCore; conservative fallback = v7x (64 MiB)."""
    try:
        info = pltpu.get_tpu_info()
        cap = getattr(info, "vmem_capacity_bytes", None)
        if cap:
            return int(cap)
    except Exception:
        pass
    return 64 * 1024 * 1024


def _pick_time_chunk(T, requested, *, vmem_cap, itemsize, Bp):
    """Time-chunk length. T is padded UP to a multiple of it (never Tt=1)."""
    if requested is None:
        # v7x (64 MiB VMEM): smaller chunk keeps the gx scratch modest;
        # v5e/v6e (128 MiB): larger chunk amortizes per-grid-step overhead.
        requested = 32 if vmem_cap <= (96 << 20) else 64
    Tt = max(1, min(T, int(requested)))
    if itemsize < 4:
        Tt = max(Tt, -(-16 // Bp))       # bf16 blocks need >= 16 sublanes
    return Tt


def _pad_gate_matrix(w, hp, din_p):
    """(Din, 4H) -> (Din_p, 4*Hp), padding each gate block with zeros."""
    din, four_h = w.shape
    h = four_h // 4
    w = w.reshape(din, 4, h)
    w = jnp.pad(w, ((0, din_p - din), (0, 0), (0, hp - h)))
    return w.reshape(din_p, 4 * hp)


def _pad_gate_bias(b, hp):
    """(1, 4H) -> (1, 4*Hp), padding each gate block with zeros."""
    four_h = b.shape[-1]
    h = four_h // 4
    b = b.reshape(1, 4, h)
    b = jnp.pad(b, ((0, 0), (0, 0), (0, hp - h)))
    return b.reshape(1, 4 * hp)


def _const_spec(shape):
    """Whole-array spec for a constant operand; single-buffered (the index_map
    never changes, so default double-buffering would just duplicate VMEM)."""
    n = len(shape)
    imap = lambda g, _n=n: (0,) * _n
    try:
        return pl.BlockSpec(shape, imap, pipeline_mode=pl.Buffered(1))
    except (TypeError, ValueError):      # older jax without pipeline_mode
        return pl.BlockSpec(shape, imap)


# ----------------------------------------------------------------------------
# kernel
# ----------------------------------------------------------------------------

def _make_bilstm_linear_kernel(Tt, Bp, Hp, T_real, G, shared_x, unroll):
    """One chunked bidirectional-LSTM + split-Linear layer kernel."""
    needs_mask = (G * Tt != T_real)      # padded time tail present

    def kernel(*refs):
        if shared_x:                     # G == 1: one x stream serves both dirs
            xf_ref = xb_ref = refs[0]
            rest = refs[1:]
        else:
            xf_ref, xb_ref = refs[:2]
            rest = refs[2:]
        (wih_f_ref, whh_f_ref, b_f_ref,
         wih_b_ref, whh_b_ref, b_b_ref,
         wlin_f_ref, wlin_b_ref, blin_ref,
         yf_ref, yb_ref,
         gxf_s, gxb_s, hf_s, hb_s,
         hf_c, cf_c, hb_c, cb_c) = rest

        g_idx = pl.program_id(0)

        @pl.when(g_idx == 0)
        def _init():
            z = jnp.zeros((Bp, Hp), jnp.float32)
            hf_c[...] = z
            cf_c[...] = z
            hb_c[...] = z
            cb_c[...] = z

        # Hoisted input projection (+ bias): one big MXU matmul per direction.
        gxf_s[...] = (jnp.dot(xf_ref[...], wih_f_ref[...],
                              preferred_element_type=jnp.float32)
                      + b_f_ref[...]).astype(gxf_s.dtype)
        gxb_s[...] = (jnp.dot(xb_ref[...], wih_b_ref[...],
                              preferred_element_type=jnp.float32)
                      + b_b_ref[...]).astype(gxb_s.dtype)

        whh_f = whh_f_ref[...]
        whh_b = whh_b_ref[...]
        mm_dtype = whh_f.dtype

        def sigmoid_t(x):
            # sigmoid(x) = 0.5*tanh(x/2) + 0.5 : one EUP op + VALU FMA instead
            # of exp + divide -- less EUP pressure on the latency-bound chain.
            return 0.5 * jnp.tanh(0.5 * x) + 0.5

        def lstm_step(h, c, gx, whh):
            # Only the small recurrent matmul sits on the serial critical path.
            gates = gx.astype(jnp.float32) + jnp.dot(
                h.astype(mm_dtype), whh, preferred_element_type=jnp.float32)
            i = sigmoid_t(gates[:, 0 * Hp:1 * Hp])       # lane-aligned slices
            f = sigmoid_t(gates[:, 1 * Hp:2 * Hp])
            gg = jnp.tanh(gates[:, 2 * Hp:3 * Hp])
            o = sigmoid_t(gates[:, 3 * Hp:4 * Hp])
            c_new = f * c + i * gg
            h_new = o * jnp.tanh(c_new)
            return h_new, c_new

        bwd_base = (G - 1 - g_idx) * Tt      # global time offset of bwd chunk

        def body(s, carry):
            h_f, c_f, h_b, c_b = carry
            rf = pl.multiple_of(s * Bp, Bp)              # fwd local t = s
            sb = Tt - 1 - s                              # bwd local t
            rb = pl.multiple_of(sb * Bp, Bp)
            # fused: the two independent chains interleave and hide latency
            h_f, c_f = lstm_step(h_f, c_f, gxf_s[pl.ds(rf, Bp), :], whh_f)
            hf_s[pl.ds(rf, Bp), :] = h_f
            h_b, c_b = lstm_step(h_b, c_b, gxb_s[pl.ds(rb, Bp), :], whh_b)
            if needs_mask:
                # Zero the bwd carry while it is still inside the padded tail
                # (t >= T): the first real step t = T-1 then starts from (0,0),
                # exactly matching the unpadded recurrence.
                valid = (bwd_base + sb < T_real).astype(jnp.float32)
                h_b = h_b * valid
                c_b = c_b * valid
            hb_s[pl.ds(rb, Bp), :] = h_b
            return (h_f, c_f, h_b, c_b)

        carry0 = (hf_c[...], cf_c[...], hb_c[...], cb_c[...])
        h_f, c_f, h_b, c_b = lax.fori_loop(0, Tt, body, carry0, unroll=unroll)

        # persist carries for the next time chunk
        hf_c[...] = h_f
        cf_c[...] = c_f
        hb_c[...] = h_b
        cb_c[...] = c_b

        # Split output Linear (no concat / reshape):
        #   y = h_fwd @ Wlin[:H] + h_bwd @ Wlin[H:] + b  (fused later by one add)
        yf_ref[...] = (jnp.dot(hf_s[...].astype(mm_dtype), wlin_f_ref[...],
                               preferred_element_type=jnp.float32)
                       + blin_ref[...]).astype(yf_ref.dtype)
        yb_ref[...] = jnp.dot(hb_s[...].astype(mm_dtype), wlin_b_ref[...],
                              preferred_element_type=jnp.float32
                              ).astype(yb_ref.dtype)

    return kernel


# ----------------------------------------------------------------------------
# wrapper: one cascade layer on an already padded 2-D activation
# ----------------------------------------------------------------------------

def _bilstm_linear_layer_padded(a2d, params, *, T, Tp, Bp, Tt, G,
                                compute_dtype, vmem_cap):
    """Bidirectional LSTM + Linear(2H -> Dout) on a padded (Tp*Bp, Din_p)
    activation (compute dtype). Returns ((Tp*Bp, Dout_p) activation, Dout)."""
    Din = params["wih_f"].shape[0]
    H = params["whh_f"].shape[0]
    Dout = params["wlin"].shape[1]
    Din_p = a2d.shape[1]
    assert Din_p == _round_up(Din, 128)
    Hp = _round_up(H, 128)
    Dout_p = _round_up(Dout, 128)
    cdt = compute_dtype
    cb = jnp.dtype(cdt).itemsize
    row_blk = Tt * Bp

    # ---- parameters padded to (8,128)-aligned shapes (per-gate zero pad) ----
    wih_f = _pad_gate_matrix(params["wih_f"], Hp, Din_p).astype(cdt)
    whh_f = _pad_gate_matrix(params["whh_f"], Hp, Hp).astype(cdt)
    b_f = _pad_gate_bias(params["b_f"], Hp)
    wih_b = _pad_gate_matrix(params["wih_b"], Hp, Din_p).astype(cdt)
    whh_b = _pad_gate_matrix(params["whh_b"], Hp, Hp).astype(cdt)
    b_b = _pad_gate_bias(params["b_b"], Hp)
    wlin = params["wlin"]                                       # (2H, Dout)
    wlin_f = jnp.pad(wlin[:H], ((0, Hp - H), (0, Dout_p - Dout))).astype(cdt)
    wlin_b = jnp.pad(wlin[H:], ((0, Hp - H), (0, Dout_p - Dout))).astype(cdt)
    blin = jnp.pad(params["blin"], ((0, 0), (0, Dout_p - Dout)))

    shared_x = (G == 1)                  # don't stream the identical block twice
    # Guard vreg pressure: full unroll only for small Hp / short chunks.
    unroll = (True if Tt <= 32 else 8) if Hp <= 128 else min(8, max(Tt, 1))
    kernel = _make_bilstm_linear_kernel(Tt, Bp, Hp, T, G, shared_x, unroll)

    xf_spec = pl.BlockSpec((row_blk, Din_p), lambda g: (g, 0))
    xb_spec = pl.BlockSpec((row_blk, Din_p), lambda g: (G - 1 - g, 0))
    yf_spec = pl.BlockSpec((row_blk, Dout_p), lambda g: (g, 0))
    yb_spec = pl.BlockSpec((row_blk, Dout_p), lambda g: (G - 1 - g, 0))

    weights = (wih_f, whh_f, b_f, wih_b, whh_b, b_b, wlin_f, wlin_b, blin)
    if shared_x:
        x_args, x_specs = (a2d,), [xf_spec]
    else:
        x_args, x_specs = (a2d, a2d), [xf_spec, xb_spec]

    scratch_shapes = [
        pltpu.VMEM((row_blk, 4 * Hp), cdt),           # gx fwd (hoisted proj)
        pltpu.VMEM((row_blk, 4 * Hp), cdt),           # gx bwd
        pltpu.VMEM((row_blk, Hp), jnp.float32),       # h history fwd (chunk)
        pltpu.VMEM((row_blk, Hp), jnp.float32),       # h history bwd (chunk)
        pltpu.VMEM((Bp, Hp), jnp.float32),            # h carry fwd
        pltpu.VMEM((Bp, Hp), jnp.float32),            # c carry fwd
        pltpu.VMEM((Bp, Hp), jnp.float32),            # h carry bwd
        pltpu.VMEM((Bp, Hp), jnp.float32),            # c carry bwd
    ]

    # ---- scoped-VMEM budget from what is actually resident -------------------
    #   weights x1 (single-buffered), scratch x1, streamed x/y blocks x2.
    weight_bytes = (sum(int(w.size) for w in
                        (wih_f, whh_f, wih_b, whh_b, wlin_f, wlin_b)) * cb
                    + 8 * (4 * Hp + 4 * Hp + Dout_p) * 4)    # (1,N) f32 biases
    stream_bytes = (len(x_args) * 2 * row_blk * Din_p * cb   # x, double-buffered
                    + 2 * 2 * row_blk * Dout_p * cb)         # yf/yb, double-buf
    scratch_bytes = (2 * row_blk * 4 * Hp * cb
                     + 2 * row_blk * Hp * 4
                     + 4 * Bp * Hp * 4)
    need = weight_bytes + stream_bytes + scratch_bytes
    vmem_bytes = int(need * 1.15) + (4 << 20)                # ~15% + fixed headroom
    vmem_bytes = min(max(vmem_bytes, 24 << 20), int(vmem_cap * 0.9))

    yf, yb = pl.pallas_call(
        kernel,
        out_shape=(jax.ShapeDtypeStruct((Tp * Bp, Dout_p), cdt),
                   jax.ShapeDtypeStruct((Tp * Bp, Dout_p), cdt)),
        grid_spec=pltpu.PrefetchScalarGridSpec(
            num_scalar_prefetch=0,
            grid=(G,),
            in_specs=x_specs + [_const_spec(w.shape) for w in weights],
            out_specs=[yf_spec, yb_spec],
            scratch_shapes=scratch_shapes),
        compiler_params=pltpu.CompilerParams(
            dimension_semantics=("arbitrary",),       # state carried across chunks
            vmem_limit_bytes=vmem_bytes),
    )(*x_args, *weights)

    # One fused XLA add; stays in the padded 2-D compute-dtype layout so the
    # next layer consumes it directly (no slice / re-pad / f32 round trip).
    return yf + yb, Dout


def encoder_with_cascade_rnn(x, layer_params, *, time_chunk=None,
                             compute_dtype=jnp.bfloat16):
    """Equivalent of EncoderWithCascadeRNN.forward (bidirectional, with_linear)."""
    T, B, Din0 = x.shape
    cdt = compute_dtype
    Bp = _round_up(B, 8)
    vmem_cap = _vmem_capacity_bytes()
    Tt = _pick_time_chunk(T, time_chunk, vmem_cap=vmem_cap,
                          itemsize=jnp.dtype(cdt).itemsize, Bp=Bp)
    Tp = _round_up(T, Tt)                # pad T up instead of shrinking the chunk
    G = Tp // Tt

    Din0_p = _round_up(Din0, 128)
    a2d = jnp.pad(x, ((0, Tp - T), (0, Bp - B), (0, Din0_p - Din0))
                  ).astype(cdt).reshape(Tp * Bp, Din0_p)

    Dout = Din0
    for p in layer_params:
        a2d, Dout = _bilstm_linear_layer_padded(
            a2d, p, T=T, Tp=Tp, Bp=Bp, Tt=Tt, G=G,
            compute_dtype=cdt, vmem_cap=vmem_cap)

    Dout_p = a2d.shape[1]
    return a2d.astype(jnp.float32).reshape(Tp, Bp, Dout_p)[:T, :B, :Dout]


# ----------------------------------------------------------------------------
# deterministic init mirroring PyTorch shapes (stored pre-transposed)
# ----------------------------------------------------------------------------

def _uniform(key, shape, k):
    return jax.random.uniform(key, shape, jnp.float32, minval=-k, maxval=k)


def init_layer_params(key, input_size, hidden_size, output_size):
    H = hidden_size
    k_rnn = 1.0 / jnp.sqrt(H)
    keys = jax.random.split(key, 12)
    # nn.LSTM: weight_ih (4H, Din), weight_hh (4H, H), biases (4H,)
    wih_f = _uniform(keys[0], (4 * H, input_size), k_rnn).T          # (Din, 4H)
    whh_f = _uniform(keys[1], (4 * H, H), k_rnn).T                   # (H, 4H)
    b_f = (_uniform(keys[2], (4 * H,), k_rnn)
           + _uniform(keys[3], (4 * H,), k_rnn)).reshape(1, 4 * H)
    wih_b = _uniform(keys[4], (4 * H, input_size), k_rnn).T
    whh_b = _uniform(keys[5], (4 * H, H), k_rnn).T
    b_b = (_uniform(keys[6], (4 * H,), k_rnn)
           + _uniform(keys[7], (4 * H,), k_rnn)).reshape(1, 4 * H)
    # nn.Linear(2H, output_size): weight (Dout, 2H), bias (Dout,)
    k_lin = 1.0 / jnp.sqrt(2 * H)
    wlin = _uniform(keys[8], (output_size, 2 * H), k_lin).T          # (2H, Dout)
    blin = _uniform(keys[9], (output_size,), k_lin).reshape(1, output_size)
    return {"wih_f": wih_f, "whh_f": whh_f, "b_f": b_f,
            "wih_b": wih_b, "whh_b": whh_b, "b_b": b_b,
            "wlin": wlin, "blin": blin}


# ----------------------------------------------------------------------------
# pure-JAX reference (f32) for correctness checking
# ----------------------------------------------------------------------------

def _ref_bilstm_linear(x, p):
    T, B, _ = x.shape
    H = p["whh_f"].shape[0]

    def run(wih, whh, b, reverse):
        def step(carry, x_t):
            h, c = carry
            gates = x_t @ wih + h @ whh + b
            i, f, g, o = jnp.split(gates, 4, axis=-1)
            c = jax.nn.sigmoid(f) * c + jax.nn.sigmoid(i) * jnp.tanh(g)
            h = jax.nn.sigmoid(o) * jnp.tanh(c)
            return (h, c), h
        init = (jnp.zeros((B, H), jnp.float32), jnp.zeros((B, H), jnp.float32))
        _, hs = lax.scan(step, init, x, reverse=reverse)
        return hs

    hf = run(p["wih_f"], p["whh_f"], p["b_f"], reverse=False)
    hb = run(p["wih_b"], p["whh_b"], p["b_b"], reverse=True)
    return jnp.concatenate([hf, hb], axis=-1) @ p["wlin"] + p["blin"]


if __name__ == "__main__":
    # Small, LSTM-cascade-consistent shapes.
    T, B = 8, 2                       # seq_len, batch
    in_channels = 32
    hidden_size = 32
    out_channels = [48, 64]           # with_linear=True so the cascade is well-typed

    root = jax.random.PRNGKey(0)
    kx, k0, k1 = jax.random.split(root, 3)
    x = jax.random.normal(kx, (T, B, in_channels), jnp.float32)

    layer_params = [
        init_layer_params(k0, in_channels, hidden_size, out_channels[0]),
        init_layer_params(k1, out_channels[0], hidden_size, out_channels[1]),
    ]

    # pure-JAX f32 reference
    y_ref = x
    for p in layer_params:
        y_ref = _ref_bilstm_linear(y_ref, p)

    # 1) f32 compute, default chunk: whole sequence in one chunk (shared-x path)
    y1 = jax.jit(functools.partial(encoder_with_cascade_rnn,
                                   layer_params=layer_params,
                                   compute_dtype=jnp.float32))(x)
    # 2) f32 compute, chunk that does not divide T: padded tail + masked bwd carry
    y2 = jax.jit(functools.partial(encoder_with_cascade_rnn,
                                   layer_params=layer_params,
                                   time_chunk=3,
                                   compute_dtype=jnp.float32))(x)
    # 3) default bf16 compute path, multi-chunk streaming
    y3 = jax.jit(functools.partial(encoder_with_cascade_rnn,
                                   layer_params=layer_params,
                                   time_chunk=4))(x)
    jax.block_until_ready((y1, y2, y3))

    assert y1.shape == (T, B, out_channels[-1])
    assert y2.shape == (T, B, out_channels[-1])
    assert y3.shape == (T, B, out_channels[-1])
    assert jnp.allclose(y1, y_ref, atol=2e-2, rtol=2e-2)
    assert jnp.allclose(y2, y_ref, atol=2e-2, rtol=2e-2)
    assert bool(jnp.all(jnp.isfinite(y3)))
    print("KERNEL_OK")
</pallas_src>

<mosaic_0001>
module attributes {stable_mosaic.version = 11 : i64} {
  func.func @kernel(%arg0: i32, %arg1: memref<64x128xf32, #tpu.memory_space<vmem>>, %arg2: memref<128x512xf32, #tpu.memory_space<vmem>>, %arg3: memref<128x512xf32, #tpu.memory_space<vmem>>, %arg4: memref<1x512xf32, #tpu.memory_space<vmem>>, %arg5: memref<128x512xf32, #tpu.memory_space<vmem>>, %arg6: memref<128x512xf32, #tpu.memory_space<vmem>>, %arg7: memref<1x512xf32, #tpu.memory_space<vmem>>, %arg8: memref<128x128xf32, #tpu.memory_space<vmem>>, %arg9: memref<128x128xf32, #tpu.memory_space<vmem>>, %arg10: memref<1x128xf32, #tpu.memory_space<vmem>>, %arg11: memref<64x128xf32, #tpu.memory_space<vmem>>, %arg12: memref<64x128xf32, #tpu.memory_space<vmem>>, %arg13: memref<64x512xf32, #tpu.memory_space<vmem>>, %arg14: memref<64x512xf32, #tpu.memory_space<vmem>>, %arg15: memref<64x128xf32, #tpu.memory_space<vmem>>, %arg16: memref<64x128xf32, #tpu.memory_space<vmem>>, %arg17: memref<8x128xf32, #tpu.memory_space<vmem>>, %arg18: memref<8x128xf32, #tpu.memory_space<vmem>>, %arg19: memref<8x128xf32, #tpu.memory_space<vmem>>, %arg20: memref<8x128xf32, #tpu.memory_space<vmem>>) attributes {dimension_semantics = [#tpu.dimension_semantics<arbitrary>], iteration_bounds = array<i64: 1>, scalar_prefetch = 0 : i64, scratch_operands = 8 : i64, tpu.core_type = #tpu.core_type<tc>, window_params = [{transform_indices = @transform_0, window_bounds = array<i64: 64, 128>}, {pipeline_mode = #tpu.pipeline_mode<synchronous>, transform_indices = @transform_1, window_bounds = array<i64: 128, 512>}, {pipeline_mode = #tpu.pipeline_mode<synchronous>, transform_indices = @transform_2, window_bounds = array<i64: 128, 512>}, {pipeline_mode = #tpu.pipeline_mode<synchronous>, transform_indices = @transform_3, window_bounds = array<i64: 1, 512>}, {pipeline_mode = #tpu.pipeline_mode<synchronous>, transform_indices = @transform_4, window_bounds = array<i64: 128, 512>}, {pipeline_mode = #tpu.pipeline_mode<synchronous>, transform_indices = @transform_5, window_bounds = array<i64: 128, 512>}, {pipeline_mode = #tpu.pipeline_mode<synchronous>, transform_indices = @transform_6, window_bounds = array<i64: 1, 512>}, {pipeline_mode = #tpu.pipeline_mode<synchronous>, transform_indices = @transform_7, window_bounds = array<i64: 128, 128>}, {pipeline_mode = #tpu.pipeline_mode<synchronous>, transform_indices = @transform_8, window_bounds = array<i64: 128, 128>}, {pipeline_mode = #tpu.pipeline_mode<synchronous>, transform_indices = @transform_9, window_bounds = array<i64: 1, 128>}, {transform_indices = @transform_10, window_bounds = array<i64: 64, 128>}, {transform_indices = @transform_11, window_bounds = array<i64: 64, 128>}]} {
    %c0_i32 = arith.constant 0 : i32
    %0 = arith.cmpi eq, %arg0, %c0_i32 : i32
    %1 = arith.extui %0 : i1 to i32
    %c0_i32_0 = arith.constant 0 : i32
    %2 = arith.cmpi ne, %1, %c0_i32_0 : i32
    scf.if %2 {
      %cst_270 = arith.constant 0.000000e+00 : f32
      %670 = vector.broadcast %cst_270 : f32 to vector<8x128xf32>
      %c0_271 = arith.constant 0 : index
      %c0_272 = arith.constant 0 : index
      %671 = vector.load %arg17[%c0_271, %c0_272] : memref<8x128xf32, #tpu.memory_space<vmem>>, vector<8x128xf32>
      tpu.vector_store %arg17[%c0_271, %c0_272], %670 {strides = array<i32>} : memref<8x128xf32, #tpu.memory_space<vmem>>, vector<8x128xf32>,
      %c0_273 = arith.constant 0 : index
      %c0_274 = arith.constant 0 : index
      %672 = vector.load %arg18[%c0_273, %c0_274] : memref<8x128xf32, #tpu.memory_space<vmem>>, vector<8x128xf32>
      tpu.vector_store %arg18[%c0_273, %c0_274], %670 {strides = array<i32>} : memref<8x128xf32, #tpu.memory_space<vmem>>, vector<8x128xf32>,
      %c0_275 = arith.constant 0 : index
      %c0_276 = arith.constant 0 : index
      %673 = vector.load %arg19[%c0_275, %c0_276] : memref<8x128xf32, #tpu.memory_space<vmem>>, vector<8x128xf32>
      tpu.vector_store %arg19[%c0_275, %c0_276], %670 {strides = array<i32>} : memref<8x128xf32, #tpu.memory_space<vmem>>, vector<8x128xf32>,
      %c0_277 = arith.constant 0 : index
      %c0_278 = arith.constant 0 : index
      %674 = vector.load %arg20[%c0_277, %c0_278] : memref<8x128xf32, #tpu.memory_space<vmem>>, vector<8x128xf32>
      tpu.vector_store %arg20[%c0_277, %c0_278], %670 {strides = array<i32>} : memref<8x128xf32, #tpu.memory_space<vmem>>, vector<8x128xf32>,
    } else {
    }
    %c0 = arith.constant 0 : index
    %c0_1 = arith.constant 0 : index
    %3 = vector.load %arg1[%c0, %c0_1] : memref<64x128xf32, #tpu.memory_space<vmem>>, vector<64x128xf32>
    %c0_2 = arith.constant 0 : index
    %c0_3 = arith.constant 0 : index
    %4 = vector.load %arg2[%c0_2, %c0_3] : memref<128x512xf32, #tpu.memory_space<vmem>>, vector<128x512xf32>
    %cst = arith.constant dense<0.000000e+00> : vector<64x512xf32>
    %5 = tpu.matmul %3, %4, %cst {dimension_numbers = #tpu.dot_dimension_numbers<[1], [0], [0], [1], [0, 0, 1, 1], [], []>} : vector<64x128xf32>, vector<128x512xf32>, vector<64x512xf32> -> vector<64x512xf32>
    %c0_4 = arith.constant 0 : index
    %c0_5 = arith.constant 0 : index
    %6 = vector.load %arg4[%c0_4, %c0_5] : memref<1x512xf32, #tpu.memory_space<vmem>>, vector<1x512xf32>
    %7 = vector.broadcast %6 : vector<1x512xf32> to vector<64x512xf32>
    %8 = arith.addf %5, %7 : vector<64x512xf32>
    %c0_6 = arith.constant 0 : index
    %c0_7 = arith.constant 0 : index
    %9 = vector.load %arg13[%c0_6, %c0_7] : memref<64x512xf32, #tpu.memory_space<vmem>>, vector<64x512xf32>
    tpu.vector_store %arg13[%c0_6, %c0_7], %8 {strides = array<i32>} : memref<64x512xf32, #tpu.memory_space<vmem>>, vector<64x512xf32>,
    %c0_8 = arith.constant 0 : index
    %c0_9 = arith.constant 0 : index
    %10 = vector.load %arg1[%c0_8, %c0_9] : memref<64x128xf32, #tpu.memory_space<vmem>>, vector<64x128xf32>
    %c0_10 = arith.constant 0 : index
    %c0_11 = arith.constant 0 : index
    %11 = vector.load %arg5[%c0_10, %c0_11] : memref<128x512xf32, #tpu.memory_space<vmem>>, vector<128x512xf32>
    %cst_12 = arith.constant dense<0.000000e+00> : vector<64x512xf32>
    %12 = tpu.matmul %10, %11, %cst_12 {dimension_numbers = #tpu.dot_dimension_numbers<[1], [0], [0], [1], [0, 0, 1, 1], [], []>} : vector<64x128xf32>, vector<128x512xf32>, vector<64x512xf32> -> vector<64x512xf32>
    %c0_13 = arith.constant 0 : index
    %c0_14 = arith.constant 0 : index
    %13 = vector.load %arg7[%c0_13, %c0_14] : memref<1x512xf32, #tpu.memory_space<vmem>>, vector<1x512xf32>
    %14 = vector.broadcast %13 : vector<1x512xf32> to vector<64x512xf32>
    %15 = arith.addf %12, %14 : vector<64x512xf32>
    %c0_15 = arith.constant 0 : index
    %c0_16 = arith.constant 0 : index
    %16 = vector.load %arg14[%c0_15, %c0_16] : memref<64x512xf32, #tpu.memory_space<vmem>>, vector<64x512xf32>
    tpu.vector_store %arg14[%c0_15, %c0_16], %15 {strides = array<i32>} : memref<64x512xf32, #tpu.memory_space<vmem>>, vector<64x512xf32>,
    %c0_17 = arith.constant 0 : index
    %c0_18 = arith.constant 0 : index
    %17 = vector.load %arg3[%c0_17, %c0_18] : memref<128x512xf32, #tpu.memory_space<vmem>>, vector<128x512xf32>
    %c0_19 = arith.constant 0 : index
    %c0_20 = arith.constant 0 : index
    %18 = vector.load %arg6[%c0_19, %c0_20] : memref<128x512xf32, #tpu.memory_space<vmem>>, vector<128x512xf32>
    %c0_21 = arith.constant 0 : index
    %c0_22 = arith.constant 0 : index
    %19 = vector.load %arg17[%c0_21, %c0_22] : memref<8x128xf32, #tpu.memory_space<vmem>>, vector<8x128xf32>
    %c0_23 = arith.constant 0 : index
    %c0_24 = arith.constant 0 : index
    %20 = vector.load %arg18[%c0_23, %c0_24] : memref<8x128xf32, #tpu.memory_space<vmem>>, vector<8x128xf32>
    %c0_25 = arith.constant 0 : index
    %c0_26 = arith.constant 0 : index
    %21 = vector.load %arg19[%c0_25, %c0_26] : memref<8x128xf32, #tpu.memory_space<vmem>>, vector<8x128xf32>
    %c0_27 = arith.constant 0 : index
    %c0_28 = arith.constant 0 : index
    %22 = vector.load %arg20[%c0_27, %c0_28] : memref<8x128xf32, #tpu.memory_space<vmem>>, vector<8x128xf32>
    %c0_i32_29 = arith.constant 0 : i32
    %c8_i32 = arith.constant 8 : i32
    %23 = arith.muli %c0_i32_29, %c8_i32 : i32
    %24 = tpu.assume_multiple %23, 8 : i32
    %c7_i32 = arith.constant 7 : i32
    %25 = arith.subi %c7_i32, %c0_i32_29 : i32
    %c8_i32_30 = arith.constant 8 : i32
    %26 = arith.muli %25, %c8_i32_30 : i32
    %27 = tpu.assume_multiple %26, 8 : i32
    %28 = arith.index_cast %24 : i32 to index
    %c0_31 = arith.constant 0 : index
    %29 = vector.load %arg13[%28, %c0_31] : memref<64x512xf32, #tpu.memory_space<vmem>>, vector<8x512xf32>
    %cst_32 = arith.constant dense<0.000000e+00> : vector<8x512xf32>
    %30 = tpu.matmul %19, %17, %cst_32 {dimension_numbers = #tpu.dot_dimension_numbers<[1], [0], [0], [1], [0, 0, 1, 1], [], []>} : vector<8x128xf32>, vector<128x512xf32>, vector<8x512xf32> -> vector<8x512xf32>
    %31 = arith.addf %29, %30 : vector<8x512xf32>
    %32 = vector.extract_strided_slice %31 {offsets = [0, 0], sizes = [8, 128], strides = [1, 1]} : vector<8x512xf32> to vector<8x128xf32>
    %cst_33 = arith.constant 5.000000e-01 : f32
    %33 = vector.broadcast %cst_33 : f32 to vector<8x128xf32>
    %34 = arith.mulf %33, %32 : vector<8x128xf32>
    %35 = math.tanh %34 : vector<8x128xf32>
    %cst_34 = arith.constant 5.000000e-01 : f32
    %36 = vector.broadcast %cst_34 : f32 to vector<8x128xf32>
    %37 = arith.mulf %36, %35 : vector<8x128xf32>
    %cst_35 = arith.constant 5.000000e-01 : f32
    %38 = vector.broadcast %cst_35 : f32 to vector<8x128xf32>
    %39 = arith.addf %37, %38 : vector<8x128xf32>
    %40 = vector.extract_strided_slice %31 {offsets = [0, 128], sizes = [8, 128], strides = [1, 1]} : vector<8x512xf32> to vector<8x128xf32>
    %cst_36 = arith.constant 5.000000e-01 : f32
    %41 = vector.broadcast %cst_36 : f32 to vector<8x128xf32>
    %42 = arith.mulf %41, %40 : vector<8x128xf32>
    %43 = math.tanh %42 : vector<8x128xf32>
    %cst_37 = arith.constant 5.000000e-01 : f32
    %44 = vector.broadcast %cst_37 : f32 to vector<8x128xf32>
    %45 = arith.mulf %44, %43 : vector<8x128xf32>
    %cst_38 = arith.constant 5.000000e-01 : f32
    %46 = vector.broadcast %cst_38 : f32 to vector<8x128xf32>
    %47 = arith.addf %45, %46 : vector<8x128xf32>
    %48 = vector.extract_strided_slice %31 {offsets = [0, 256], sizes = [8, 128], strides = [1, 1]} : vector<8x512xf32> to vector<8x128xf32>
    %49 = math.tanh %48 : vector<8x128xf32>
    %50 = vector.extract_strided_slice %31 {offsets = [0, 384], sizes = [8, 128], strides = [1, 1]} : vector<8x512xf32> to vector<8x128xf32>
    %cst_39 = arith.constant 5.000000e-01 : f32
    %51 = vector.broadcast %cst_39 : f32 to vector<8x128xf32>
    %52 = arith.mulf %51, %50 : vector<8x128xf32>
    %53 = math.tanh %52 : vector<8x128xf32>
    %cst_40 = arith.constant 5.000000e-01 : f32
    %54 = vector.broadcast %cst_40 : f32 to vector<8x128xf32>
    %55 = arith.mulf %54, %53 : vector<8x128xf32>
    %cst_41 = arith.constant 5.000000e-01 : f32
    %56 = vector.broadcast %cst_41 : f32 to vector<8x128xf32>
    %57 = arith.addf %55, %56 : vector<8x128xf32>
    %58 = arith.mulf %47, %20 : vector<8x128xf32>
    %59 = arith.mulf %39, %49 : vector<8x128xf32>
    %60 = arith.addf %58, %59 : vector<8x128xf32>
    %61 = math.tanh %60 : vector<8x128xf32>
    %62 = arith.mulf %57, %61 : vector<8x128xf32>
    %63 = arith.index_cast %24 : i32 to index
    %c0_42 = arith.constant 0 : index
    %64 = vector.load %arg15[%63, %c0_42] : memref<64x128xf32, #tpu.memory_space<vmem>>, vector<8x128xf32>
    tpu.vector_store %arg15[%63, %c0_42], %62 {strides = array<i32>} : memref<64x128xf32, #tpu.memory_space<vmem>>, vector<8x128xf32>,
    %65 = arith.index_cast %27 : i32 to index
    %c0_43 = arith.constant 0 : index
    %66 = vector.load %arg14[%65, %c0_43] : memref<64x512xf32, #tpu.memory_space<vmem>>, vector<8x512xf32>
    %cst_44 = arith.constant dense<0.000000e+00> : vector<8x512xf32>
    %67 = tpu.matmul %21, %18, %cst_44 {dimension_numbers = #tpu.dot_dimension_numbers<[1], [0], [0], [1], [0, 0, 1, 1], [], []>} : vector<8x128xf32>, vector<128x512xf32>, vector<8x512xf32> -> vector<8x512xf32>
    %68 = arith.addf %66, %67 : vector<8x512xf32>
    %69 = vector.extract_strided_slice %68 {offsets = [0, 0], sizes = [8, 128], strides = [1, 1]} : vector<8x512xf32> to vector<8x128xf32>
    %cst_45 = arith.constant 5.000000e-01 : f32
    %70 = vector.broadcast %cst_45 : f32 to vector<8x128xf32>
    %71 = arith.mulf %70, %69 : vector<8x128xf32>
    %72 = math.tanh %71 : vector<8x128xf32>
    %cst_46 = arith.constant 5.000000e-01 : f32
    %73 = vector.broadcast %cst_46 : f32 to vector<8x128xf32>
    %74 = arith.mulf %73, %72 : vector<8x128xf32>
    %cst_47 = arith.constant 5.000000e-01 : f32
    %75 = vector.broadcast %cst_47 : f32 to vector<8x128xf32>
    %76 = arith.addf %74, %75 : vector<8x128xf32>
    %77 = vector.extract_strided_slice %68 {offsets = [0, 128], sizes = [8, 128], strides = [1, 1]} : vector<8x512xf32> to vector<8x128xf32>
    %cst_48 = arith.constant 5.000000e-01 : f32
    %78 = vector.broadcast %cst_48 : f32 to vector<8x128xf32>
    %79 = arith.mulf %78, %77 : vector<8x128xf32>
    %80 = math.tanh %79 : vector<8x128xf32>
    %cst_49 = arith.constant 5.000000e-01 : f32
    %81 = vector.broadcast %cst_49 : f32 to vector<8x128xf32>
    %82 = arith.mulf %81, %80 : vector<8x128xf32>
    %cst_50 = arith.constant 5.000000e-01 : f32
    %83 = vector.broadcast %cst_50 : f32 to vector<8x128xf32>
    %84 = arith.addf %82, %83 : vector<8x128xf32>
    %85 = vector.extract_strided_slice %68 {offsets = [0, 256], sizes = [8, 128], strides = [1, 1]} : vector<8x512xf32> to vector<8x128xf32>
    %86 = math.tanh %85 : vector<8x128xf32>
    %87 = vector.extract_strided_slice %68 {offsets = [0, 384], sizes = [8, 128], strides = [1, 1]} : vector<8x512xf32> to vector<8x128xf32>
    %cst_51 = arith.constant 5.000000e-01 : f32
    %88 = vector.broadcast %cst_51 : f32 to vector<8x128xf32>
    %89 = arith.mulf %88, %87 : vector<8x128xf32>
    %90 = math.tanh %89 : vector<8x128xf32>
    %cst_52 = arith.constant 5.000000e-01 : f32
    %91 = vector.broadcast %cst_52 : f32 to vector<8x128xf32>
    %92 = arith.mulf %91, %90 : vector<8x128xf32>
    %cst_53 = arith.constant 5.000000e-01 : f32
    %93 = vector.broadcast %cst_53 : f32 to vector<8x128xf32>
    %94 = arith.addf %92, %93 : vector<8x128xf32>
    %95 = arith.mulf %84, %22 : vector<8x128xf32>
    %96 = arith.mulf %76, %86 : vector<8x128xf32>
    %97 = arith.addf %95, %96 : vector<8x128xf32>
    %98 = math.tanh %97 : vector<8x128xf32>
    %99 = arith.mulf %94, %98 : vector<8x128xf32>
    %100 = arith.index_cast %27 : i32 to index
    %c0_54 = arith.constant 0 : index
    %101 = vector.load %arg16[%100, %c0_54] : memref<64x128xf32, #tpu.memory_space<vmem>>, vector<8x128xf32>
    tpu.vector_store %arg16[%100, %c0_54], %99 {strides = array<i32>} : memref<64x128xf32, #tpu.memory_space<vmem>>, vector<8x128xf32>,
    %c1_i32 = arith.constant 1 : i32
    %c8_i32_55 = arith.constant 8 : i32
    %102 = arith.muli %c1_i32, %c8_i32_55 : i32
    %103 = tpu.assume_multiple %102, 8 : i32
    %c7_i32_56 = arith.constant 7 : i32
    %104 = arith.subi %c7_i32_56, %c1_i32 : i32
    %c8_i32_57 = arith.constant 8 : i32
    %105 = arith.muli %104, %c8_i32_57 : i32
    %106 = tpu.assume_multiple %105, 8 : i32
    %107 = arith.index_cast %103 : i32 to index
    %c0_58 = arith.constant 0 : index
    %108 = vector.load %arg13[%107, %c0_58] : memref<64x512xf32, #tpu.memory_space<vmem>>, vector<8x512xf32>
    %cst_59 = arith.constant dense<0.000000e+00> : vector<8x512xf32>
    %109 = tpu.matmul %62, %17, %cst_59 {dimension_numbers = #tpu.dot_dimension_numbers<[1], [0], [0], [1], [0, 0, 1, 1], [], []>} : vector<8x128xf32>, vector<128x512xf32>, vector<8x512xf32> -> vector<8x512xf32>
    %110 = arith.addf %108, %109 : vector<8x512xf32>
    %111 = vector.extract_strided_slice %110 {offsets = [0, 0], sizes = [8, 128], strides = [1, 1]} : vector<8x512xf32> to vector<8x128xf32>
    %cst_60 = arith.constant 5.000000e-01 : f32
    %112 = vector.broadcast %cst_60 : f32 to vector<8x128xf32>
    %113 = arith.mulf %112, %111 : vector<8x128xf32>
    %114 = math.tanh %113 : vector<8x128xf32>
    %cst_61 = arith.constant 5.000000e-01 : f32
    %115 = vector.broadcast %cst_61 : f32 to vector<8x128xf32>
    %116 = arith.mulf %115, %114 : vector<8x128xf32>
    %cst_62 = arith.constant 5.000000e-01 : f32
    %117 = vector.broadcast %cst_62 : f32 to vector<8x128xf32>
    %118 = arith.addf %116, %117 : vector<8x128xf32>
    %119 = vector.extract_strided_slice %110 {offsets = [0, 128], sizes = [8, 128], strides = [1, 1]} : vector<8x512xf32> to vector<8x128xf32>
    %cst_63 = arith.constant 5.000000e-01 : f32
    %120 = vector.broadcast %cst_63 : f32 to vector<8x128xf32>
    %121 = arith.mulf %120, %119 : vector<8x128xf32>
    %122 = math.tanh %121 : vector<8x128xf32>
    %cst_64 = arith.constant 5.000000e-01 : f32
    %123 = vector.broadcast %cst_64 : f32 to vector<8x128xf32>
    %124 = arith.mulf %123, %122 : vector<8x128xf32>
    %cst_65 = arith.constant 5.000000e-01 : f32
    %125 = vector.broadcast %cst_65 : f32 to vector<8x128xf32>
    %126 = arith.addf %124, %125 : vector<8x128xf32>
    %127 = vector.extract_strided_slice %110 {offsets = [0, 256], sizes = [8, 128], strides = [1, 1]} : vector<8x512xf32> to vector<8x128xf32>
    %128 = math.tanh %127 : vector<8x128xf32>
    %129 = vector.extract_strided_slice %110 {offsets = [0, 384], sizes = [8, 128], strides = [1, 1]} : vector<8x512xf32> to vector<8x128xf32>
    %cst_66 = arith.constant 5.000000e-01 : f32
    %130 = vector.broadcast %cst_66 : f32 to vector<8x128xf32>
    %131 = arith.mulf %130, %129 : vector<8x128xf32>
    %132 = math.tanh %131 : vector<8x128xf32>
    %cst_67 = arith.constant 5.000000e-01 : f32
    %133 = vector.broadcast %cst_67 : f32 to vector<8x128xf32>
    %134 = arith.mulf %133, %132 : vector<8x128xf32>
    %cst_68 = arith.constant 5.000000e-01 : f32
    %135 = vector.broadcast %cst_68 : f32 to vector<8x128xf32>
    %136 = arith.addf %134, %135 : vector<8x128xf32>
    %137 = arith.mulf %126, %60 : vector<8x128xf32>
    %138 = arith.mulf %118, %128 : vector<8x128xf32>
    %139 = arith.addf %137, %138 : vector<8x128xf32>
    %140 = math.tanh %139 : vector<8x128xf32>
    %141 = arith.mulf %136, %140 : vector<8x128xf32>
    %142 = arith.index_cast %103 : i32 to index
    %c0_69 = arith.constant 0 : index
    %143 = vector.load %arg15[%142, %c0_69] : memref<64x128xf32, #tpu.memory_space<vmem>>, vector<8x128xf32>
    tpu.vector_store %arg15[%142, %c0_69], %141 {strides = array<i32>} : memref<64x128xf32, #tpu.memory_space<vmem>>, vector<8x128xf32>,
    %144 = arith.index_cast %106 : i32 to index
    %c0_70 = arith.constant 0 : index
    %145 = vector.load %arg14[%144, %c0_70] : memref<64x512xf32, #tpu.memory_space<vmem>>, vector<8x512xf32>
    %cst_71 = arith.constant dense<0.000000e+00> : vector<8x512xf32>
    %146 = tpu.matmul %99, %18, %cst_71 {dimension_numbers = #tpu.dot_dimension_numbers<[1], [0], [0], [1], [0, 0, 1, 1], [], []>} : vector<8x128xf32>, vector<128x512xf32>, vector<8x512xf32> -> vector<8x512xf32>
    %147 = arith.addf %145, %146 : vector<8x512xf32>
    %148 = vector.extract_strided_slice %147 {offsets = [0, 0], sizes = [8, 128], strides = [1, 1]} : vector<8x512xf32> to vector<8x128xf32>
    %cst_72 = arith.constant 5.000000e-01 : f32
    %149 = vector.broadcast %cst_72 : f32 to vector<8x128xf32>
    %150 = arith.mulf %149, %148 : vector<8x128xf32>
    %151 = math.tanh %150 : vector<8x128xf32>
    %cst_73 = arith.constant 5.000000e-01 : f32
    %152 = vector.broadcast %cst_73 : f32 to vector<8x128xf32>
    %153 = arith.mulf %152, %151 : vector<8x128xf32>
    %cst_74 = arith.constant 5.000000e-01 : f32
    %154 = vector.broadcast %cst_74 : f32 to vector<8x128xf32>
    %155 = arith.addf %153, %154 : vector<8x128xf32>
    %156 = vector.extract_strided_slice %147 {offsets = [0, 128], sizes = [8, 128], strides = [1, 1]} : vector<8x512xf32> to vector<8x128xf32>
    %cst_75 = arith.constant 5.000000e-01 : f32
    %157 = vector.broadcast %cst_75 : f32 to vector<8x128xf32>
    %158 = arith.mulf %157, %156 : vector<8x128xf32>
    %159 = math.tanh %158 : vector<8x128xf32>
    %cst_76 = arith.constant 5.000000e-01 : f32
    %160 = vector.broadcast %cst_76 : f32 to vector<8x128xf32>
    %161 = arith.mulf %160, %159 : vector<8x128xf32>
    %cst_77 = arith.constant 5.000000e-01 : f32
    %162 = vector.broadcast %cst_77 : f32 to vector<8x128xf32>
    %163 = arith.addf %161, %162 : vector<8x128xf32>
    %164 = vector.extract_strided_slice %147 {offsets = [0, 256], sizes = [8, 128], strides = [1, 1]} : vector<8x512xf32> to vector<8x128xf32>
    %165 = math.tanh %164 : vector<8x128xf32>
    %166 = vector.extract_strided_slice %147 {offsets = [0, 384], sizes = [8, 128], strides = [1, 1]} : vector<8x512xf32> to vector<8x128xf32>
    %cst_78 = arith.constant 5.000000e-01 : f32
    %167 = vector.broadcast %cst_78 : f32 to vector<8x128xf32>
    %168 = arith.mulf %167, %166 : vector<8x128xf32>
    %169 = math.tanh %168 : vector<8x128xf32>
    %cst_79 = arith.constant 5.000000e-01 : f32
    %170 = vector.broadcast %cst_79 : f32 to vector<8x128xf32>
    %171 = arith.mulf %170, %169 : vector<8x128xf32>
    %cst_80 = arith.constant 5.000000e-01 : f32
    %172 = vector.broadcast %cst_80 : f32 to vector<8x128xf32>
    %173 = arith.addf %171, %172 : vector<8x128xf32>
    %174 = arith.mulf %163, %97 : vector<8x128xf32>
    %175 = arith.mulf %155, %165 : vector<8x128xf32>
    %176 = arith.addf %174, %175 : vector<8x128xf32>
    %177 = math.tanh %176 : vector<8x128xf32>
    %178 = arith.mulf %173, %177 : vector<8x128xf32>
    %179 = arith.index_cast %106 : i32 to index
    %c0_81 = arith.constant 0 : index
    %180 = vector.load %arg16[%179, %c0_81] : memref<64x128xf32, #tpu.memory_space<vmem>>, vector<8x128xf32>
    tpu.vector_store %arg16[%179, %c0_81], %178 {strides = array<i32>} : memref<64x128xf32, #tpu.memory_space<vmem>>, vector<8x128xf32>,
    %c2_i32 = arith.constant 2 : i32
    %c8_i32_82 = arith.constant 8 : i32
    %181 = arith.muli %c2_i32, %c8_i32_82 : i32
    %182 = tpu.assume_multiple %181, 8 : i32
    %c7_i32_83 = arith.constant 7 : i32
    %183 = arith.subi %c7_i32_83, %c2_i32 : i32
    %c8_i32_84 = arith.constant 8 : i32
    %184 = arith.muli %183, %c8_i32_84 : i32
    %185 = tpu.assume_multiple %184, 8 : i32
    %186 = arith.index_cast %182 : i32 to index
    %c0_85 = arith.constant 0 : index
    %187 = vector.load %arg13[%186, %c0_85] : memref<64x512xf32, #tpu.memory_space<vmem>>, vector<8x512xf32>
    %cst_86 = arith.constant dense<0.000000e+00> : vector<8x512xf32>
    %188 = tpu.matmul %141, %17, %cst_86 {dimension_numbers = #tpu.dot_dimension_numbers<[1], [0], [0], [1], [0, 0, 1, 1], [], []>} : vector<8x128xf32>, vector<128x512xf32>, vector<8x512xf32> -> vector<8x512xf32>
    %189 = arith.addf %187, %188 : vector<8x512xf32>
    %190 = vector.extract_strided_slice %189 {offsets = [0, 0], sizes = [8, 128], strides = [1, 1]} : vector<8x512xf32> to vector<8x128xf32>
    %cst_87 = arith.constant 5.000000e-01 : f32
    %191 = vector.broadcast %cst_87 : f32 to vector<8x128xf32>
    %192 = arith.mulf %191, %190 : vector<8x128xf32>
    %193 = math.tanh %192 : vector<8x128xf32>
    %cst_88 = arith.constant 5.000000e-01 : f32
    %194 = vector.broadcast %cst_88 : f32 to vector<8x128xf32>
    %195 = arith.mulf %194, %193 : vector<8x128xf32>
    %cst_89 = arith.constant 5.000000e-01 : f32
    %196 = vector.broadcast %cst_89 : f32 to vector<8x128xf32>
    %197 = arith.addf %195, %196 : vector<8x128xf32>
    %198 = vector.extract_strided_slice %189 {offsets = [0, 128], sizes = [8, 128], strides = [1, 1]} : vector<8x512xf32> to vector<8x128xf32>
    %cst_90 = arith.constant 5.000000e-01 : f32
    %199 = vector.broadcast %cst_90 : f32 to vector<8x128xf32>
    %200 = arith.mulf %199, %198 : vector<8x128xf32>
    %201 = math.tanh %200 : vector<8x128xf32>
    %cst_91 = arith.constant 5.000000e-01 : f32
    %202 = vector.broadcast %cst_91 : f32 to vector<8x128xf32>
    %203 = arith.mulf %202, %201 : vector<8x128xf32>
    %cst_92 = arith.constant 5.000000e-01 : f32
    %204 = vector.broadcast %cst_92 : f32 to vector<8x128xf32>
    %205 = arith.addf %203, %204 : vector<8x128xf32>
    %206 = vector.extract_strided_slice %189 {offsets = [0, 256], sizes = [8, 128], strides = [1, 1]} : vector<8x512xf32> to vector<8x128xf32>
    %207 = math.tanh %206 : vector<8x128xf32>
    %208 = vector.extract_strided_slice %189 {offsets = [0, 384], sizes = [8, 128], strides = [1, 1]} : vector<8x512xf32> to vector<8x128xf32>
    %cst_93 = arith.constant 5.000000e-01 : f32
    %209 = vector.broadcast %cst_93 : f32 to vector<8x128xf32>
    %210 = arith.mulf %209, %208 : vector<8x128xf32>
    %211 = math.tanh %210 : vector<8x128xf32>
    %cst_94 = arith.constant 5.000000e-01 : f32
    %212 = vector.broadcast %cst_94 : f32 to vector<8x128xf32>
    %213 = arith.mulf %212, %211 : vector<8x128xf32>
    %cst_95 = arith.constant 5.000000e-01 : f32
    %214 = vector.broadcast %cst_95 : f32 to vector<8x128xf32>
    %215 = arith.addf %213, %214 : vector<8x128xf32>
    %216 = arith.mulf %205, %139 : vector<8x128xf32>
    %217 = arith.mulf %197, %207 : vector<8x128xf32>
    %218 = arith.addf %216, %217 : vector<8x128xf32>
    %219 = math.tanh %218 : vector<8x128xf32>
    %220 = arith.mulf %215, %219 : vector<8x128xf32>
    %221 = arith.index_cast %182 : i32 to index
    %c0_96 = arith.constant 0 : index
    %222 = vector.load %arg15[%221, %c0_96] : memref<64x128xf32, #tpu.memory_space<vmem>>, vector<8x128xf32>
    tpu.vector_store %arg15[%221, %c0_96], %220 {strides = array<i32>} : memref<64x128xf32, #tpu.memory_space<vmem>>, vector<8x128xf32>,
    %223 = arith.index_cast %185 : i32 to index
    %c0_97 = arith.constant 0 : index
    %224 = vector.load %arg14[%223, %c0_97] : memref<64x512xf32, #tpu.memory_space<vmem>>, vector<8x512xf32>
    %cst_98 = arith.constant dense<0.000000e+00> : vector<8x512xf32>
    %225 = tpu.matmul %178, %18, %cst_98 {dimension_numbers = #tpu.dot_dimension_numbers<[1], [0], [0], [1], [0, 0, 1, 1], [], []>} : vector<8x128xf32>, vector<128x512xf32>, vector<8x512xf32> -> vector<8x512xf32>
    %226 = arith.addf %224, %225 : vector<8x512xf32>
    %227 = vector.extract_strided_slice %226 {offsets = [0, 0], sizes = [8, 128], strides = [1, 1]} : vector<8x512xf32> to vector<8x128xf32>
    %cst_99 = arith.constant 5.000000e-01 : f32
    %228 = vector.broadcast %cst_99 : f32 to vector<8x128xf32>
    %229 = arith.mulf %228, %227 : vector<8x128xf32>
    %230 = math.tanh %229 : vector<8x128xf32>
    %cst_100 = arith.constant 5.000000e-01 : f32
    %231 = vector.broadcast %cst_100 : f32 to vector<8x128xf32>
    %232 = arith.mulf %231, %230 : vector<8x128xf32>
    %cst_101 = arith.constant 5.000000e-01 : f32
    %233 = vector.broadcast %cst_101 : f32 to vector<8x128xf32>
    %234 = arith.addf %232, %233 : vector<8x128xf32>
    %235 = vector.extract_strided_slice %226 {offsets = [0, 128], sizes = [8, 128], strides = [1, 1]} : vector<8x512xf32> to vector<8x128xf32>
    %cst_102 = arith.constant 5.000000e-01 : f32
    %236 = vector.broadcast %cst_102 : f32 to vector<8x128xf32>
    %237 = arith.mulf %236, %235 : vector<8x128xf32>
    %238 = math.tanh %237 : vector<8x128xf32>
    %cst_103 = arith.constant 5.000000e-01 : f32
    %239 = vector.broadcast %cst_103 : f32 to vector<8x128xf32>
    %240 = arith.mulf %239, %238 : vector<8x128xf32>
    %cst_104 = arith.constant 5.000000e-01 : f32
    %241 = vector.broadcast %cst_104 : f32 to vector<8x128xf32>
    %242 = arith.addf %240, %241 : vector<8x128xf32>
    %243 = vector.extract_strided_slice %226 {offsets = [0, 256], sizes = [8, 128], strides = [1, 1]} : vector<8x512xf32> to vector<8x128xf32>
    %244 = math.tanh %243 : vector<8x128xf32>
    %245 = vector.extract_strided_slice %226 {offsets = [0, 384], sizes = [8, 128], strides = [1, 1]} : vector<8x512xf32> to vector<8x128xf32>
    %cst_105 = arith.constant 5.000000e-01 : f32
    %246 = vector.broadcast %cst_105 : f32 to vector<8x128xf32>
    %247 = arith.mulf %246, %245 : vector<8x128xf32>
    %248 = math.tanh %247 : vector<8x128xf32>
    %cst_106 = arith.constant 5.000000e-01 : f32
    %249 = vector.broadcast %cst_106 : f32 to vector<8x128xf32>
    %250 = arith.mulf %249, %248 : vector<8x128xf32>
    %cst_107 = arith.constant 5.000000e-01 : f32
    %251 = vector.broadcast %cst_107 : f32 to vector<8x128xf32>
    %252 = arith.addf %250, %251 : vector<8x128xf32>
    %253 = arith.mulf %242, %176 : vector<8x128xf32>
    %254 = arith.mulf %234, %244 : vector<8x128xf32>
    %255 = arith.addf %253, %254 : vector<8x128xf32>
    %256 = math.tanh %255 : vector<8x128xf32>
    %257 = arith.mulf %252, %256 : vector<8x128xf32>
    %258 = arith.index_cast %185 : i32 to index
    %c0_108 = arith.constant 0 : index
    %259 = vector.load %arg16[%258, %c0_108] : memref<64x128xf32, #tpu.memory_space<vmem>>, vector<8x128xf32>
    tpu.vector_store %arg16[%258, %c0_108], %257 {strides = array<i32>} : memref<64x128xf32, #tpu.memory_space<vmem>>, vector<8x128xf32>,
    %c3_i32 = arith.constant 3 : i32
    %c8_i32_109 = arith.constant 8 : i32
    %260 = arith.muli %c3_i32, %c8_i32_109 : i32
    %261 = tpu.assume_multiple %260, 8 : i32
    %c7_i32_110 = arith.constant 7 : i32
    %262 = arith.subi %c7_i32_110, %c3_i32 : i32
    %c8_i32_111 = arith.constant 8 : i32
    %263 = arith.muli %262, %c8_i32_111 : i32
    %264 = tpu.assume_multiple %263, 8 : i32
    %265 = arith.index_cast %261 : i32 to index
    %c0_112 = arith.constant 0 : index
    %266 = vector.load %arg13[%265, %c0_112] : memref<64x512xf32, #tpu.memory_space<vmem>>, vector<8x512xf32>
    %cst_113 = arith.constant dense<0.000000e+00> : vector<8x512xf32>
    %267 = tpu.matmul %220, %17, %cst_113 {dimension_numbers = #tpu.dot_dimension_numbers<[1], [0], [0], [1], [0, 0, 1, 1], [], []>} : vector<8x128xf32>, vector<128x512xf32>, vector<8x512xf32> -> vector<8x512xf32>
    %268 = arith.addf %266, %267 : vector<8x512xf32>
    %269 = vector.extract_strided_slice %268 {offsets = [0, 0], sizes = [8, 128], strides = [1, 1]} : vector<8x512xf32> to vector<8x128xf32>
    %cst_114 = arith.constant 5.000000e-01 : f32
    %270 = vector.broadcast %cst_114 : f32 to vector<8x128xf32>
    %271 = arith.mulf %270, %269 : vector<8x128xf32>
    %272 = math.tanh %271 : vector<8x128xf32>
    %cst_115 = arith.constant 5.000000e-01 : f32
    %273 = vector.broadcast %cst_115 : f32 to vector<8x128xf32>
    %274 = arith.mulf %273, %272 : vector<8x128xf32>
    %cst_116 = arith.constant 5.000000e-01 : f32
    %275 = vector.broadcast %cst_116 : f32 to vector<8x128xf32>
    %276 = arith.addf %274, %275 : vector<8x128xf32>
    %277 = vector.extract_strided_slice %268 {offsets = [0, 128], sizes = [8, 128], strides = [1, 1]} : vector<8x512xf32> to vector<8x128xf32>
    %cst_117 = arith.constant 5.000000e-01 : f32
    %278 = vector.broadcast %cst_117 : f32 to vector<8x128xf32>
    %279 = arith.mulf %278, %277 : vector<8x128xf32>
    %280 = math.tanh %279 : vector<8x128xf32>
    %cst_118 = arith.constant 5.000000e-01 : f32
    %281 = vector.broadcast %cst_118 : f32 to vector<8x128xf32>
    %282 = arith.mulf %281, %280 : vector<8x128xf32>
    %cst_119 = arith.constant 5.000000e-01 : f32
    %283 = vector.broadcast %cst_119 : f32 to vector<8x128xf32>
    %284 = arith.addf %282, %283 : vector<8x128xf32>
    %285 = vector.extract_strided_slice %268 {offsets = [0, 256], sizes = [8, 128], strides = [1, 1]} : vector<8x512xf32> to vector<8x128xf32>
    %286 = math.tanh %285 : vector<8x128xf32>
    %287 = vector.extract_strided_slice %268 {offsets = [0, 384], sizes = [8, 128], strides = [1, 1]} : vector<8x512xf32> to vector<8x128xf32>
    %cst_120 = arith.constant 5.000000e-01 : f32
    %288 = vector.broadcast %cst_120 : f32 to vector<8x128xf32>
    %289 = arith.mulf %288, %287 : vector<8x128xf32>
    %290 = math.tanh %289 : vector<8x128xf32>
    %cst_121 = arith.constant 5.000000e-01 : f32
    %291 = vector.broadcast %cst_121 : f32 to vector<8x128xf32>
    %292 = arith.mulf %291, %290 : vector<8x128xf32>
    %cst_122 = arith.constant 5.000000e-01 : f32
    %293 = vector.broadcast %cst_122 : f32 to vector<8x128xf32>
    %294 = arith.addf %292, %293 : vector<8x128xf32>
    %295 = arith.mulf %284, %218 : vector<8x128xf32>
    %296 = arith.mulf %276, %286 : vector<8x128xf32>
    %297 = arith.addf %295, %296 : vector<8x128xf32>
    %298 = math.tanh %297 : vector<8x128xf32>
    %299 = arith.mulf %294, %298 : vector<8x128xf32>
    %300 = arith.index_cast %261 : i32 to index
    %c0_123 = arith.constant 0 : index
    %301 = vector.load %arg15[%300, %c0_123] : memref<64x128xf32, #tpu.memory_space<vmem>>, vector<8x128xf32>
    tpu.vector_store %arg15[%300, %c0_123], %299 {strides = array<i32>} : memref<64x128xf32, #tpu.memory_space<vmem>>, vector<8x128xf32>,
    %302 = arith.index_cast %264 : i32 to index
    %c0_124 = arith.constant 0 : index
    %303 = vector.load %arg14[%302, %c0_124] : memref<64x512xf32, #tpu.memory_space<vmem>>, vector<8x512xf32>
    %cst_125 = arith.constant dense<0.000000e+00> : vector<8x512xf32>
    %304 = tpu.matmul %257, %18, %cst_125 {dimension_numbers = #tpu.dot_dimension_numbers<[1], [0], [0], [1], [0, 0, 1, 1], [], []>} : vector<8x128xf32>, vector<128x512xf32>, vector<8x512xf32> -> vector<8x512xf32>
    %305 = arith.addf %303, %304 : vector<8x512xf32>
    %306 = vector.extract_strided_slice %305 {offsets = [0, 0], sizes = [8, 128], strides = [1, 1]} : vector<8x512xf32> to vector<8x128xf32>
    %cst_126 = arith.constant 5.000000e-01 : f32
    %307 = vector.broadcast %cst_126 : f32 to vector<8x128xf32>
    %308 = arith.mulf %307, %306 : vector<8x128xf32>
    %309 = math.tanh %308 : vector<8x128xf32>
    %cst_127 = arith.constant 5.000000e-01 : f32
    %310 = vector.broadcast %cst_127 : f32 to vector<8x128xf32>
    %311 = arith.mulf %310, %309 : vector<8x128xf32>
    %cst_128 = arith.constant 5.000000e-01 : f32
    %312 = vector.broadcast %cst_128 : f32 to vector<8x128xf32>
    %313 = arith.addf %311, %312 : vector<8x128xf32>
    %314 = vector.extract_strided_slice %305 {offsets = [0, 128], sizes = [8, 128], strides = [1, 1]} : vector<8x512xf32> to vector<8x128xf32>
    %cst_129 = arith.constant 5.000000e-01 : f32
    %315 = vector.broadcast %cst_129 : f32 to vector<8x128xf32>
    %316 = arith.mulf %315, %314 : vector<8x128xf32>
    %317 = math.tanh %316 : vector<8x128xf32>
    %cst_130 = arith.constant 5.000000e-01 : f32
    %318 = vector.broadcast %cst_130 : f32 to vector<8x128xf32>
    %319 = arith.mulf %318, %317 : vector<8x128xf32>
    %cst_131 = arith.constant 5.000000e-01 : f32
    %320 = vector.broadcast %cst_131 : f32 to vector<8x128xf32>
    %321 = arith.addf %319, %320 : vector<8x128xf32>
    %322 = vector.extract_strided_slice %305 {offsets = [0, 256], sizes = [8, 128], strides = [1, 1]} : vector<8x512xf32> to vector<8x128xf32>
    %323 = math.tanh %322 : vector<8x128xf32>
    %324 = vector.extract_strided_slice %305 {offsets = [0, 384], sizes = [8, 128], strides = [1, 1]} : vector<8x512xf32> to vector<8x128xf32>
    %cst_132 = arith.constant 5.000000e-01 : f32
    %325 = vector.broadcast %cst_132 : f32 to vector<8x128xf32>
    %326 = arith.mulf %325, %324 : vector<8x128xf32>
    %327 = math.tanh %326 : vector<8x128xf32>
    %cst_133 = arith.constant 5.000000e-01 : f32
    %328 = vector.broadcast %cst_133 : f32 to vector<8x128xf32>
    %329 = arith.mulf %328, %327 : vector<8x128xf32>
    %cst_134 = arith.constant 5.000000e-01 : f32
    %330 = vector.broadcast %cst_134 : f32 to vector<8x128xf32>
    %331 = arith.addf %329, %330 : vector<8x128xf32>
    %332 = arith.mulf %321, %255 : vector<8x128xf32>
    %333 = arith.mulf %313, %323 : vector<8x128xf32>
    %334 = arith.addf %332, %333 : vector<8x128xf32>
    %335 = math.tanh %334 : vector<8x128xf32>
    %336 = arith.mulf %331, %335 : vector<8x128xf32>
    %337 = arith.index_cast %264 : i32 to index
    %c0_135 = arith.constant 0 : index
    %338 = vector.load %arg16[%337, %c0_135] : memref<64x128xf32, #tpu.memory_space<vmem>>, vector<8x128xf32>
    tpu.vector_store %arg16[%337, %c0_135], %336 {strides = array<i32>} : memref<64x128xf32, #tpu.memory_space<vmem>>, vector<8x128xf32>,
    %c4_i32 = arith.constant 4 : i32
    %c8_i32_136 = arith.constant 8 : i32
    %339 = arith.muli %c4_i32, %c8_i32_136 : i32
    %340 = tpu.assume_multiple %339, 8 : i32
    %c7_i32_137 = arith.constant 7 : i32
    %341 = arith.subi %c7_i32_137, %c4_i32 : i32
    %c8_i32_138 = arith.constant 8 : i32
    %342 = arith.muli %341, %c8_i32_138 : i32
    %343 = tpu.assume_multiple %342, 8 : i32
    %344 = arith.index_cast %340 : i32 to index
    %c0_139 = arith.constant 0 : index
    %345 = vector.load %arg13[%344, %c0_139] : memref<64x512xf32, #tpu.memory_space<vmem>>, vector<8x512xf32>
    %cst_140 = arith.constant dense<0.000000e+00> : vector<8x512xf32>
    %346 = tpu.matmul %299, %17, %cst_140 {dimension_numbers = #tpu.dot_dimension_numbers<[1], [0], [0], [1], [0, 0, 1, 1], [], []>} : vector<8x128xf32>, vector<128x512xf32>, vector<8x512xf32> -> vector<8x512xf32>
    %347 = arith.addf %345, %346 : vector<8x512xf32>
    %348 = vector.extract_strided_slice %347 {offsets = [0, 0], sizes = [8, 128], strides = [1, 1]} : vector<8x512xf32> to vector<8x128xf32>
    %cst_141 = arith.constant 5.000000e-01 : f32
    %349 = vector.broadcast %cst_141 : f32 to vector<8x128xf32>
    %350 = arith.mulf %349, %348 : vector<8x128xf32>
    %351 = math.tanh %350 : vector<8x128xf32>
    %cst_142 = arith.constant 5.000000e-01 : f32
    %352 = vector.broadcast %cst_142 : f32 to vector<8x128xf32>
    %353 = arith.mulf %352, %351 : vector<8x128xf32>
    %cst_143 = arith.constant 5.000000e-01 : f32
    %354 = vector.broadcast %cst_143 : f32 to vector<8x128xf32>
    %355 = arith.addf %353, %354 : vector<8x128xf32>
    %356 = vector.extract_strided_slice %347 {offsets = [0, 128], sizes = [8, 128], strides = [1, 1]} : vector<8x512xf32> to vector<8x128xf32>
    %cst_144 = arith.constant 5.000000e-01 : f32
    %357 = vector.broadcast %cst_144 : f32 to vector<8x128xf32>
    %358 = arith.mulf %357, %356 : vector<8x128xf32>
    %359 = math.tanh %358 : vector<8x128xf32>
    %cst_145 = arith.constant 5.000000e-01 : f32
    %360 = vector.broadcast %cst_145 : f32 to vector<8x128xf32>
    %361 = arith.mulf %360, %359 : vector<8x128xf32>
    %cst_146 = arith.constant 5.000000e-01 : f32
    %362 = vector.broadcast %cst_146 : f32 to vector<8x128xf32>
    %363 = arith.addf %361, %362 : vector<8x128xf32>
    %364 = vector.extract_strided_slice %347 {offsets = [0, 256], sizes = [8, 128], strides = [1, 1]} : vector<8x512xf32> to vector<8x128xf32>
    %365 = math.tanh %364 : vector<8x128xf32>
    %366 = vector.extract_strided_slice %347 {offsets = [0, 384], sizes = [8, 128], strides = [1, 1]} : vector<8x512xf32> to vector<8x128xf32>
    %cst_147 = arith.constant 5.000000e-01 : f32
    %367 = vector.broadcast %cst_147 : f32 to vector<8x128xf32>
    %368 = arith.mulf %367, %366 : vector<8x128xf32>
    %369 = math.tanh %368 : vector<8x128xf32>
    %cst_148 = arith.constant 5.000000e-01 : f32
    %370 = vector.broadcast %cst_148 : f32 to vector<8x128xf32>
    %371 = arith.mulf %370, %369 : vector<8x128xf32>
    %cst_149 = arith.constant 5.000000e-01 : f32
    %372 = vector.broadcast %cst_149 : f32 to vector<8x128xf32>
    %373 = arith.addf %371, %372 : vector<8x128xf32>
    %374 = arith.mulf %363, %297 : vector<8x128xf32>
    %375 = arith.mulf %355, %365 : vector<8x128xf32>
    %376 = arith.addf %374, %375 : vector<8x128xf32>
    %377 = math.tanh %376 : vector<8x128xf32>
    %378 = arith.mulf %373, %377 : vector<8x128xf32>
    %379 = arith.index_cast %340 : i32 to index
    %c0_150 = arith.constant 0 : index
    %380 = vector.load %arg15[%379, %c0_150] : memref<64x128xf32, #tpu.memory_space<vmem>>, vector<8x128xf32>
    tpu.vector_store %arg15[%379, %c0_150], %378 {strides = array<i32>} : memref<64x128xf32, #tpu.memory_space<vmem>>, vector<8x128xf32>,
    %381 = arith.index_cast %343 : i32 to index
    %c0_151 = arith.constant 0 : index
    %382 = vector.load %arg14[%381, %c0_151] : memref<64x512xf32, #tpu.memory_space<vmem>>, vector<8x512xf32>
    %cst_152 = arith.constant dense<0.000000e+00> : vector<8x512xf32>
    %383 = tpu.matmul %336, %18, %cst_152 {dimension_numbers = #tpu.dot_dimension_numbers<[1], [0], [0], [1], [0, 0, 1, 1], [], []>} : vector<8x128xf32>, vector<128x512xf32>, vector<8x512xf32> -> vector<8x512xf32>
    %384 = arith.addf %382, %383 : vector<8x512xf32>
    %385 = vector.extract_strided_slice %384 {offsets = [0, 0], sizes = [8, 128], strides = [1, 1]} : vector<8x512xf32> to vector<8x128xf32>
    %cst_153 = arith.constant 5.000000e-01 : f32
    %386 = vector.broadcast %cst_153 : f32 to vector<8x128xf32>
    %387 = arith.mulf %386, %385 : vector<8x128xf32>
    %388 = math.tanh %387 : vector<8x128xf32>
    %cst_154 = arith.constant 5.000000e-01 : f32
    %389 = vector.broadcast %cst_154 : f32 to vector<8x128xf32>
    %390 = arith.mulf %389, %388 : vector<8x128xf32>
    %cst_155 = arith.constant 5.000000e-01 : f32
    %391 = vector.broadcast %cst_155 : f32 to vector<8x128xf32>
    %392 = arith.addf %390, %391 : vector<8x128xf32>
    %393 = vector.extract_strided_slice %384 {offsets = [0, 128], sizes = [8, 128], strides = [1, 1]} : vector<8x512xf32> to vector<8x128xf32>
    %cst_156 = arith.constant 5.000000e-01 : f32
    %394 = vector.broadcast %cst_156 : f32 to vector<8x128xf32>
    %395 = arith.mulf %394, %393 : vector<8x128xf32>
    %396 = math.tanh %395 : vector<8x128xf32>
    %cst_157 = arith.constant 5.000000e-01 : f32
    %397 = vector.broadcast %cst_157 : f32 to vector<8x128xf32>
    %398 = arith.mulf %397, %396 : vector<8x128xf32>
    %cst_158 = arith.constant 5.000000e-01 : f32
    %399 = vector.broadcast %cst_158 : f32 to vector<8x128xf32>
    %400 = arith.addf %398, %399 : vector<8x128xf32>
    %401 = vector.extract_strided_slice %384 {offsets = [0, 256], sizes = [8, 128], strides = [1, 1]} : vector<8x512xf32> to vector<8x128xf32>
    %402 = math.tanh %401 : vector<8x128xf32>
    %403 = vector.extract_strided_slice %384 {offsets = [0, 384], sizes = [8, 128], strides = [1, 1]} : vector<8x512xf32> to vector<8x128xf32>
    %cst_159 = arith.constant 5.000000e-01 : f32
    %404 = vector.broadcast %cst_159 : f32 to vector<8x128xf32>
    %405 = arith.mulf %404, %403 : vector<8x128xf32>
    %406 = math.tanh %405 : vector<8x128xf32>
    %cst_160 = arith.constant 5.000000e-01 : f32
    %407 = vector.broadcast %cst_160 : f32 to vector<8x128xf32>
    %408 = arith.mulf %407, %406 : vector<8x128xf32>
    %cst_161 = arith.constant 5.000000e-01 : f32
    %409 = vector.broadcast %cst_161 : f32 to vector<8x128xf32>
    %410 = arith.addf %408, %409 : vector<8x128xf32>
    %411 = arith.mulf %400, %334 : vector<8x128xf32>
    %412 = arith.mulf %392, %402 : vector<8x128xf32>
    %413 = arith.addf %411, %412 : vector<8x128xf32>
    %414 = math.tanh %413 : vector<8x128xf32>
    %415 = arith.mulf %410, %414 : vector<8x128xf32>
    %416 = arith.index_cast %343 : i32 to index
    %c0_162 = arith.constant 0 : index
    %417 = vector.load %arg16[%416, %c0_162] : memref<64x128xf32, #tpu.memory_space<vmem>>, vector<8x128xf32>
    tpu.vector_store %arg16[%416, %c0_162], %415 {strides = array<i32>} : memref<64x128xf32, #tpu.memory_space<vmem>>, vector<8x128xf32>,
    %c5_i32 = arith.constant 5 : i32
    %c8_i32_163 = arith.constant 8 : i32
    %418 = arith.muli %c5_i32, %c8_i32_163 : i32
    %419 = tpu.assume_multiple %418, 8 : i32
    %c7_i32_164 = arith.constant 7 : i32
    %420 = arith.subi %c7_i32_164, %c5_i32 : i32
    %c8_i32_165 = arith.constant 8 : i32
    %421 = arith.muli %420, %c8_i32_165 : i32
    %422 = tpu.assume_multiple %421, 8 : i32
    %423 = arith.index_cast %419 : i32 to index
    %c0_166 = arith.constant 0 : index
    %424 = vector.load %arg13[%423, %c0_166] : memref<64x512xf32, #tpu.memory_space<vmem>>, vector<8x512xf32>
    %cst_167 = arith.constant dense<0.000000e+00> : vector<8x512xf32>
    %425 = tpu.matmul %378, %17, %cst_167 {dimension_numbers = #tpu.dot_dimension_numbers<[1], [0], [0], [1], [0, 0, 1, 1], [], []>} : vector<8x128xf32>, vector<128x512xf32>, vector<8x512xf32> -> vector<8x512xf32>
    %426 = arith.addf %424, %425 : vector<8x512xf32>
    %427 = vector.extract_strided_slice %426 {offsets = [0, 0], sizes = [8, 128], strides = [1, 1]} : vector<8x512xf32> to vector<8x128xf32>
    %cst_168 = arith.constant 5.000000e-01 : f32
    %428 = vector.broadcast %cst_168 : f32 to vector<8x128xf32>
    %429 = arith.mulf %428, %427 : vector<8x128xf32>
    %430 = math.tanh %429 : vector<8x128xf32>
    %cst_169 = arith.constant 5.000000e-01 : f32
    %431 = vector.broadcast %cst_169 : f32 to vector<8x128xf32>
    %432 = arith.mulf %431, %430 : vector<8x128xf32>
    %cst_170 = arith.constant 5.000000e-01 : f32
    %433 = vector.broadcast %cst_170 : f32 to vector<8x128xf32>
    %434 = arith.addf %432, %433 : vector<8x128xf32>
    %435 = vector.extract_strided_slice %426 {offsets = [0, 128], sizes = [8, 128], strides = [1, 1]} : vector<8x512xf32> to vector<8x128xf32>
    %cst_171 = arith.constant 5.000000e-01 : f32
    %436 = vector.broadcast %cst_171 : f32 to vector<8x128xf32>
    %437 = arith.mulf %436, %435 : vector<8x128xf32>
    %438 = math.tanh %437 : vector<8x128xf32>
    %cst_172 = arith.constant 5.000000e-01 : f32
    %439 = vector.broadcast %cst_172 : f32 to vector<8x128xf32>
    %440 = arith.mulf %439, %438 : vector<8x128xf32>
    %cst_173 = arith.constant 5.000000e-01 : f32
    %441 = vector.broadcast %cst_173 : f32 to vector<8x128xf32>
    %442 = arith.addf %440, %441 : vector<8x128xf32>
    %443 = vector.extract_strided_slice %426 {offsets = [0, 256], sizes = [8, 128], strides = [1, 1]} : vector<8x512xf32> to vector<8x128xf32>
    %444 = math.tanh %443 : vector<8x128xf32>
    %445 = vector.extract_strided_slice %426 {offsets = [0, 384], sizes = [8, 128], strides = [1, 1]} : vector<8x512xf32> to vector<8x128xf32>
    %cst_174 = arith.constant 5.000000e-01 : f32
    %446 = vector.broadcast %cst_174 : f32 to vector<8x128xf32>
    %447 = arith.mulf %446, %445 : vector<8x128xf32>
    %448 = math.tanh %447 : vector<8x128xf32>
    %cst_175 = arith.constant 5.000000e-01 : f32
    %449 = vector.broadcast %cst_175 : f32 to vector<8x128xf32>
    %450 = arith.mulf %449, %448 : vector<8x128xf32>
    %cst_176 = arith.constant 5.000000e-01 : f32
    %451 = vector.broadcast %cst_176 : f32 to vector<8x128xf32>
    %452 = arith.addf %450, %451 : vector<8x128xf32>
    %453 = arith.mulf %442, %376 : vector<8x128xf32>
    %454 = arith.mulf %434, %444 : vector<8x128xf32>
    %455 = arith.addf %453, %454 : vector<8x128xf32>
    %456 = math.tanh %455 : vector<8x128xf32>
    %457 = arith.mulf %452, %456 : vector<8x128xf32>
    %458 = arith.index_cast %419 : i32 to index
    %c0_177 = arith.constant 0 : index
    %459 = vector.load %arg15[%458, %c0_177] : memref<64x128xf32, #tpu.memory_space<vmem>>, vector<8x128xf32>
    tpu.vector_store %arg15[%458, %c0_177], %457 {strides = array<i32>} : memref<64x128xf32, #tpu.memory_space<vmem>>, vector<8x128xf32>,
    %460 = arith.index_cast %422 : i32 to index
    %c0_178 = arith.constant 0 : index
    %461 = vector.load %arg14[%460, %c0_178] : memref<64x512xf32, #tpu.memory_space<vmem>>, vector<8x512xf32>
    %cst_179 = arith.constant dense<0.000000e+00> : vector<8x512xf32>
    %462 = tpu.matmul %415, %18, %cst_179 {dimension_numbers = #tpu.dot_dimension_numbers<[1], [0], [0], [1], [0, 0, 1, 1], [], []>} : vector<8x128xf32>, vector<128x512xf32>, vector<8x512xf32> -> vector<8x512xf32>
    %463 = arith.addf %461, %462 : vector<8x512xf32>
    %464 = vector.extract_strided_slice %463 {offsets = [0, 0], sizes = [8, 128], strides = [1, 1]} : vector<8x512xf32> to vector<8x128xf32>
    %cst_180 = arith.constant 5.000000e-01 : f32
    %465 = vector.broadcast %cst_180 : f32 to vector<8x128xf32>
    %466 = arith.mulf %465, %464 : vector<8x128xf32>
    %467 = math.tanh %466 : vector<8x128xf32>
    %cst_181 = arith.constant 5.000000e-01 : f32
    %468 = vector.broadcast %cst_181 : f32 to vector<8x128xf32>
    %469 = arith.mulf %468, %467 : vector<8x128xf32>
    %cst_182 = arith.constant 5.000000e-01 : f32
    %470 = vector.broadcast %cst_182 : f32 to vector<8x128xf32>
    %471 = arith.addf %469, %470 : vector<8x128xf32>
    %472 = vector.extract_strided_slice %463 {offsets = [0, 128], sizes = [8, 128], strides = [1, 1]} : vector<8x512xf32> to vector<8x128xf32>
    %cst_183 = arith.constant 5.000000e-01 : f32
    %473 = vector.broadcast %cst_183 : f32 to vector<8x128xf32>
    %474 = arith.mulf %473, %472 : vector<8x128xf32>
    %475 = math.tanh %474 : vector<8x128xf32>
    %cst_184 = arith.constant 5.000000e-01 : f32
    %476 = vector.broadcast %cst_184 : f32 to vector<8x128xf32>
    %477 = arith.mulf %476, %475 : vector<8x128xf32>
    %cst_185 = arith.constant 5.000000e-01 : f32
    %478 = vector.broadcast %cst_185 : f32 to vector<8x128xf32>
    %479 = arith.addf %477, %478 : vector<8x128xf32>
    %480 = vector.extract_strided_slice %463 {offsets = [0, 256], sizes = [8, 128], strides = [1, 1]} : vector<8x512xf32> to vector<8x128xf32>
    %481 = math.tanh %480 : vector<8x128xf32>
    %482 = vector.extract_strided_slice %463 {offsets = [0, 384], sizes = [8, 128], strides = [1, 1]} : vector<8x512xf32> to vector<8x128xf32>
    %cst_186 = arith.constant 5.000000e-01 : f32
    %483 = vector.broadcast %cst_186 : f32 to vector<8x128xf32>
    %484 = arith.mulf %483, %482 : vector<8x128xf32>
    %485 = math.tanh %484 : vector<8x128xf32>
    %cst_187 = arith.constant 5.000000e-01 : f32
    %486 = vector.broadcast %cst_187 : f32 to vector<8x128xf32>
    %487 = arith.mulf %486, %485 : vector<8x128xf32>
    %cst_188 = arith.constant 5.000000e-01 : f32
    %488 = vector.broadcast %cst_188 : f32 to vector<8x128xf32>
    %489 = arith.addf %487, %488 : vector<8x128xf32>
    %490 = arith.mulf %479, %413 : vector<8x128xf32>
    %491 = arith.mulf %471, %481 : vector<8x128xf32>
    %492 = arith.addf %490, %491 : vector<8x128xf32>
    %493 = math.tanh %492 : vector<8x128xf32>
    %494 = arith.mulf %489, %493 : vector<8x128xf32>
    %495 = arith.index_cast %422 : i32 to index
    %c0_189 = arith.constant 0 : index
    %496 = vector.load %arg16[%495, %c0_189] : memref<64x128xf32, #tpu.memory_space<vmem>>, vector<8x128xf32>
    tpu.vector_store %arg16[%495, %c0_189], %494 {strides = array<i32>} : memref<64x128xf32, #tpu.memory_space<vmem>>, vector<8x128xf32>,
    %c6_i32 = arith.constant 6 : i32
    %c8_i32_190 = arith.constant 8 : i32
    %497 = arith.muli %c6_i32, %c8_i32_190 : i32
    %498 = tpu.assume_multiple %497, 8 : i32
    %c7_i32_191 = arith.constant 7 : i32
    %499 = arith.subi %c7_i32_191, %c6_i32 : i32
    %c8_i32_192 = arith.constant 8 : i32
    %500 = arith.muli %499, %c8_i32_192 : i32
    %501 = tpu.assume_multiple %500, 8 : i32
    %502 = arith.index_cast %498 : i32 to index
    %c0_193 = arith.constant 0 : index
    %503 = vector.load %arg13[%502, %c0_193] : memref<64x512xf32, #tpu.memory_space<vmem>>, vector<8x512xf32>
    %cst_194 = arith.constant dense<0.000000e+00> : vector<8x512xf32>
    %504 = tpu.matmul %457, %17, %cst_194 {dimension_numbers = #tpu.dot_dimension_numbers<[1], [0], [0], [1], [0, 0, 1, 1], [], []>} : vector<8x128xf32>, vector<128x512xf32>, vector<8x512xf32> -> vector<8x512xf32>
    %505 = arith.addf %503, %504 : vector<8x512xf32>
    %506 = vector.extract_strided_slice %505 {offsets = [0, 0], sizes = [8, 128], strides = [1, 1]} : vector<8x512xf32> to vector<8x128xf32>
    %cst_195 = arith.constant 5.000000e-01 : f32
    %507 = vector.broadcast %cst_195 : f32 to vector<8x128xf32>
    %508 = arith.mulf %507, %506 : vector<8x128xf32>
    %509 = math.tanh %508 : vector<8x128xf32>
    %cst_196 = arith.constant 5.000000e-01 : f32
    %510 = vector.broadcast %cst_196 : f32 to vector<8x128xf32>
    %511 = arith.mulf %510, %509 : vector<8x128xf32>
    %cst_197 = arith.constant 5.000000e-01 : f32
    %512 = vector.broadcast %cst_197 : f32 to vector<8x128xf32>
    %513 = arith.addf %511, %512 : vector<8x128xf32>
    %514 = vector.extract_strided_slice %505 {offsets = [0, 128], sizes = [8, 128], strides = [1, 1]} : vector<8x512xf32> to vector<8x128xf32>
    %cst_198 = arith.constant 5.000000e-01 : f32
    %515 = vector.broadcast %cst_198 : f32 to vector<8x128xf32>
    %516 = arith.mulf %515, %514 : vector<8x128xf32>
    %517 = math.tanh %516 : vector<8x128xf32>
    %cst_199 = arith.constant 5.000000e-01 : f32
    %518 = vector.broadcast %cst_199 : f32 to vector<8x128xf32>
    %519 = arith.mulf %518, %517 : vector<8x128xf32>
    %cst_200 = arith.constant 5.000000e-01 : f32
    %520 = vector.broadcast %cst_200 : f32 to vector<8x128xf32>
    %521 = arith.addf %519, %520 : vector<8x128xf32>
    %522 = vector.extract_strided_slice %505 {offsets = [0, 256], sizes = [8, 128], strides = [1, 1]} : vector<8x512xf32> to vector<8x128xf32>
    %523 = math.tanh %522 : vector<8x128xf32>
    %524 = vector.extract_strided_slice %505 {offsets = [0, 384], sizes = [8, 128], strides = [1, 1]} : vector<8x512xf32> to vector<8x128xf32>
    %cst_201 = arith.constant 5.000000e-01 : f32
    %525 = vector.broadcast %cst_201 : f32 to vector<8x128xf32>
    %526 = arith.mulf %525, %524 : vector<8x128xf32>
    %527 = math.tanh %526 : vector<8x128xf32>
    %cst_202 = arith.constant 5.000000e-01 : f32
    %528 = vector.broadcast %cst_202 : f32 to vector<8x128xf32>
    %529 = arith.mulf %528, %527 : vector<8x128xf32>
    %cst_203 = arith.constant 5.000000e-01 : f32
    %530 = vector.broadcast %cst_203 : f32 to vector<8x128xf32>
    %531 = arith.addf %529, %530 : vector<8x128xf32>
    %532 = arith.mulf %521, %455 : vector<8x128xf32>
    %533 = arith.mulf %513, %523 : vector<8x128xf32>
    %534 = arith.addf %532, %533 : vector<8x128xf32>
    %535 = math.tanh %534 : vector<8x128xf32>
    %536 = arith.mulf %531, %535 : vector<8x128xf32>
    %537 = arith.index_cast %498 : i32 to index
    %c0_204 = arith.constant 0 : index
    %538 = vector.load %arg15[%537, %c0_204] : memref<64x128xf32, #tpu.memory_space<vmem>>, vector<8x128xf32>
    tpu.vector_store %arg15[%537, %c0_204], %536 {strides = array<i32>} : memref<64x128xf32, #tpu.memory_space<vmem>>, vector<8x128xf32>,
    %539 = arith.index_cast %501 : i32 to index
    %c0_205 = arith.constant 0 : index
    %540 = vector.load %arg14[%539, %c0_205] : memref<64x512xf32, #tpu.memory_space<vmem>>, vector<8x512xf32>
    %cst_206 = arith.constant dense<0.000000e+00> : vector<8x512xf32>
    %541 = tpu.matmul %494, %18, %cst_206 {dimension_numbers = #tpu.dot_dimension_numbers<[1], [0], [0], [1], [0, 0, 1, 1], [], []>} : vector<8x128xf32>, vector<128x512xf32>, vector<8x512xf32> -> vector<8x512xf32>
    %542 = arith.addf %540, %541 : vector<8x512xf32>
    %543 = vector.extract_strided_slice %542 {offsets = [0, 0], sizes = [8, 128], strides = [1, 1]} : vector<8x512xf32> to vector<8x128xf32>
    %cst_207 = arith.constant 5.000000e-01 : f32
    %544 = vector.broadcast %cst_207 : f32 to vector<8x128xf32>
    %545 = arith.mulf %544, %543 : vector<8x128xf32>
    %546 = math.tanh %545 : vector<8x128xf32>
    %cst_208 = arith.constant 5.000000e-01 : f32
    %547 = vector.broadcast %cst_208 : f32 to vector<8x128xf32>
    %548 = arith.mulf %547, %546 : vector<8x128xf32>
    %cst_209 = arith.constant 5.000000e-01 : f32
    %549 = vector.broadcast %cst_209 : f32 to vector<8x128xf32>
    %550 = arith.addf %548, %549 : vector<8x128xf32>
    %551 = vector.extract_strided_slice %542 {offsets = [0, 128], sizes = [8, 128], strides = [1, 1]} : vector<8x512xf32> to vector<8x128xf32>
    %cst_210 = arith.constant 5.000000e-01 : f32
    %552 = vector.broadcast %cst_210 : f32 to vector<8x128xf32>
    %553 = arith.mulf %552, %551 : vector<8x128xf32>
    %554 = math.tanh %553 : vector<8x128xf32>
    %cst_211 = arith.constant 5.000000e-01 : f32
    %555 = vector.broadcast %cst_211 : f32 to vector<8x128xf32>
    %556 = arith.mulf %555, %554 : vector<8x128xf32>
    %cst_212 = arith.constant 5.000000e-01 : f32
    %557 = vector.broadcast %cst_212 : f32 to vector<8x128xf32>
    %558 = arith.addf %556, %557 : vector<8x128xf32>
    %559 = vector.extract_strided_slice %542 {offsets = [0, 256], sizes = [8, 128], strides = [1, 1]} : vector<8x512xf32> to vector<8x128xf32>
    %560 = math.tanh %559 : vector<8x128xf32>
    %561 = vector.extract_strided_slice %542 {offsets = [0, 384], sizes = [8, 128], strides = [1, 1]} : vector<8x512xf32> to vector<8x128xf32>
    %cst_213 = arith.constant 5.000000e-01 : f32
    %562 = vector.broadcast %cst_213 : f32 to vector<8x128xf32>
    %563 = arith.mulf %562, %561 : vector<8x128xf32>
    %564 = math.tanh %563 : vector<8x128xf32>
    %cst_214 = arith.constant 5.000000e-01 : f32
    %565 = vector.broadcast %cst_214 : f32 to vector<8x128xf32>
    %566 = arith.mulf %565, %564 : vector<8x128xf32>
    %cst_215 = arith.constant 5.000000e-01 : f32
    %567 = vector.broadcast %cst_215 : f32 to vector<8x128xf32>
    %568 = arith.addf %566, %567 : vector<8x128xf32>
    %569 = arith.mulf %558, %492 : vector<8x128xf32>
    %570 = arith.mulf %550, %560 : vector<8x128xf32>
    %571 = arith.addf %569, %570 : vector<8x128xf32>
    %572 = math.tanh %571 : vector<8x128xf32>
    %573 = arith.mulf %568, %572 : vector<8x128xf32>
    %574 = arith.index_cast %501 : i32 to index
    %c0_216 = arith.constant 0 : index
    %575 = vector.load %arg16[%574, %c0_216] : memref<64x128xf32, #tpu.memory_space<vmem>>, vector<8x128xf32>
    tpu.vector_store %arg16[%574, %c0_216], %573 {strides = array<i32>} : memref<64x128xf32, #tpu.memory_space<vmem>>, vector<8x128xf32>,
    %c7_i32_217 = arith.constant 7 : i32
    %c8_i32_218 = arith.constant 8 : i32
    %576 = arith.muli %c7_i32_217, %c8_i32_218 : i32
    %577 = tpu.assume_multiple %576, 8 : i32
    %c7_i32_219 = arith.constant 7 : i32
    %578 = arith.subi %c7_i32_219, %c7_i32_217 : i32
    %c8_i32_220 = arith.constant 8 : i32
    %579 = arith.muli %578, %c8_i32_220 : i32
    %580 = tpu.assume_multiple %579, 8 : i32
    %581 = arith.index_cast %577 : i32 to index
    %c0_221 = arith.constant 0 : index
    %582 = vector.load %arg13[%581, %c0_221] : memref<64x512xf32, #tpu.memory_space<vmem>>, vector<8x512xf32>
    %cst_222 = arith.constant dense<0.000000e+00> : vector<8x512xf32>
    %583 = tpu.matmul %536, %17, %cst_222 {dimension_numbers = #tpu.dot_dimension_numbers<[1], [0], [0], [1], [0, 0, 1, 1], [], []>} : vector<8x128xf32>, vector<128x512xf32>, vector<8x512xf32> -> vector<8x512xf32>
    %584 = arith.addf %582, %583 : vector<8x512xf32>
    %585 = vector.extract_strided_slice %584 {offsets = [0, 0], sizes = [8, 128], strides = [1, 1]} : vector<8x512xf32> to vector<8x128xf32>
    %cst_223 = arith.constant 5.000000e-01 : f32
    %586 = vector.broadcast %cst_223 : f32 to vector<8x128xf32>
    %587 = arith.mulf %586, %585 : vector<8x128xf32>
    %588 = math.tanh %587 : vector<8x128xf32>
    %cst_224 = arith.constant 5.000000e-01 : f32
    %589 = vector.broadcast %cst_224 : f32 to vector<8x128xf32>
    %590 = arith.mulf %589, %588 : vector<8x128xf32>
    %cst_225 = arith.constant 5.000000e-01 : f32
    %591 = vector.broadcast %cst_225 : f32 to vector<8x128xf32>
    %592 = arith.addf %590, %591 : vector<8x128xf32>
    %593 = vector.extract_strided_slice %584 {offsets = [0, 128], sizes = [8, 128], strides = [1, 1]} : vector<8x512xf32> to vector<8x128xf32>
    %cst_226 = arith.constant 5.000000e-01 : f32
    %594 = vector.broadcast %cst_226 : f32 to vector<8x128xf32>
    %595 = arith.mulf %594, %593 : vector<8x128xf32>
    %596 = math.tanh %595 : vector<8x128xf32>
    %cst_227 = arith.constant 5.000000e-01 : f32
    %597 = vector.broadcast %cst_227 : f32 to vector<8x128xf32>
    %598 = arith.mulf %597, %596 : vector<8x128xf32>
    %cst_228 = arith.constant 5.000000e-01 : f32
    %599 = vector.broadcast %cst_228 : f32 to vector<8x128xf32>
    %600 = arith.addf %598, %599 : vector<8x128xf32>
    %601 = vector.extract_strided_slice %584 {offsets = [0, 256], sizes = [8, 128], strides = [1, 1]} : vector<8x512xf32> to vector<8x128xf32>
    %602 = math.tanh %601 : vector<8x128xf32>
    %603 = vector.extract_strided_slice %584 {offsets = [0, 384], sizes = [8, 128], strides = [1, 1]} : vector<8x512xf32> to vector<8x128xf32>
    %cst_229 = arith.constant 5.000000e-01 : f32
    %604 = vector.broadcast %cst_229 : f32 to vector<8x128xf32>
    %605 = arith.mulf %604, %603 : vector<8x128xf32>
    %606 = math.tanh %605 : vector<8x128xf32>
    %cst_230 = arith.constant 5.000000e-01 : f32
    %607 = vector.broadcast %cst_230 : f32 to vector<8x128xf32>
    %608 = arith.mulf %607, %606 : vector<8x128xf32>
    %cst_231 = arith.constant 5.000000e-01 : f32
    %609 = vector.broadcast %cst_231 : f32 to vector<8x128xf32>
    %610 = arith.addf %608, %609 : vector<8x128xf32>
    %611 = arith.mulf %600, %534 : vector<8x128xf32>
    %612 = arith.mulf %592, %602 : vector<8x128xf32>
    %613 = arith.addf %611, %612 : vector<8x128xf32>
    %614 = math.tanh %613 : vector<8x128xf32>
    %615 = arith.mulf %610, %614 : vector<8x128xf32>
    %616 = arith.index_cast %577 : i32 to index
    %c0_232 = arith.constant 0 : index
    %617 = vector.load %arg15[%616, %c0_232] : memref<64x128xf32, #tpu.memory_space<vmem>>, vector<8x128xf32>
    tpu.vector_store %arg15[%616, %c0_232], %615 {strides = array<i32>} : memref<64x128xf32, #tpu.memory_space<vmem>>, vector<8x128xf32>,
    %618 = arith.index_cast %580 : i32 to index
    %c0_233 = arith.constant 0 : index
    %619 = vector.load %arg14[%618, %c0_233] : memref<64x512xf32, #tpu.memory_space<vmem>>, vector<8x512xf32>
    %cst_234 = arith.constant dense<0.000000e+00> : vector<8x512xf32>
    %620 = tpu.matmul %573, %18, %cst_234 {dimension_numbers = #tpu.dot_dimension_numbers<[1], [0], [0], [1], [0, 0, 1, 1], [], []>} : vector<8x128xf32>, vector<128x512xf32>, vector<8x512xf32> -> vector<8x512xf32>
    %621 = arith.addf %619, %620 : vector<8x512xf32>
    %622 = vector.extract_strided_slice %621 {offsets = [0, 0], sizes = [8, 128], strides = [1, 1]} : vector<8x512xf32> to vector<8x128xf32>
    %cst_235 = arith.constant 5.000000e-01 : f32
    %623 = vector.broadcast %cst_235 : f32 to vector<8x128xf32>
    %624 = arith.mulf %623, %622 : vector<8x128xf32>
    %625 = math.tanh %624 : vector<8x128xf32>
    %cst_236 = arith.constant 5.000000e-01 : f32
    %626 = vector.broadcast %cst_236 : f32 to vector<8x128xf32>
    %627 = arith.mulf %626, %625 : vector<8x128xf32>
    %cst_237 = arith.constant 5.000000e-01 : f32
    %628 = vector.broadcast %cst_237 : f32 to vector<8x128xf32>
    %629 = arith.addf %627, %628 : vector<8x128xf32>
    %630 = vector.extract_strided_slice %621 {offsets = [0, 128], sizes = [8, 128], strides = [1, 1]} : vector<8x512xf32> to vector<8x128xf32>
    %cst_238 = arith.constant 5.000000e-01 : f32
    %631 = vector.broadcast %cst_238 : f32 to vector<8x128xf32>
    %632 = arith.mulf %631, %630 : vector<8x128xf32>
    %633 = math.tanh %632 : vector<8x128xf32>
    %cst_239 = arith.constant 5.000000e-01 : f32
    %634 = vector.broadcast %cst_239 : f32 to vector<8x128xf32>
    %635 = arith.mulf %634, %633 : vector<8x128xf32>
    %cst_240 = arith.constant 5.000000e-01 : f32
    %636 = vector.broadcast %cst_240 : f32 to vector<8x128xf32>
    %637 = arith.addf %635, %636 : vector<8x128xf32>
    %638 = vector.extract_strided_slice %621 {offsets = [0, 256], sizes = [8, 128], strides = [1, 1]} : vector<8x512xf32> to vector<8x128xf32>
    %639 = math.tanh %638 : vector<8x128xf32>
    %640 = vector.extract_strided_slice %621 {offsets = [0, 384], sizes = [8, 128], strides = [1, 1]} : vector<8x512xf32> to vector<8x128xf32>
    %cst_241 = arith.constant 5.000000e-01 : f32
    %641 = vector.broadcast %cst_241 : f32 to vector<8x128xf32>
    %642 = arith.mulf %641, %640 : vector<8x128xf32>
    %643 = math.tanh %642 : vector<8x128xf32>
    %cst_242 = arith.constant 5.000000e-01 : f32
    %644 = vector.broadcast %cst_242 : f32 to vector<8x128xf32>
    %645 = arith.mulf %644, %643 : vector<8x128xf32>
    %cst_243 = arith.constant 5.000000e-01 : f32
    %646 = vector.broadcast %cst_243 : f32 to vector<8x128xf32>
    %647 = arith.addf %645, %646 : vector<8x128xf32>
    %648 = arith.mulf %637, %571 : vector<8x128xf32>
    %649 = arith.mulf %629, %639 : vector<8x128xf32>
    %650 = arith.addf %648, %649 : vector<8x128xf32>
    %651 = math.tanh %650 : vector<8x128xf32>
    %652 = arith.mulf %647, %651 : vector<8x128xf32>
    %653 = arith.index_cast %580 : i32 to index
    %c0_244 = arith.constant 0 : index
    %654 = vector.load %arg16[%653, %c0_244] : memref<64x128xf32, #tpu.memory_space<vmem>>, vector<8x128xf32>
    tpu.vector_store %arg16[%653, %c0_244], %652 {strides = array<i32>} : memref<64x128xf32, #tpu.memory_space<vmem>>, vector<8x128xf32>,
    %c8_i32_245 = arith.constant 8 : i32
    %c0_246 = arith.constant 0 : index
    %c0_247 = arith.constant 0 : index
    %655 = vector.load %arg17[%c0_246, %c0_247] : memref<8x128xf32, #tpu.memory_space<vmem>>, vector<8x128xf32>
    tpu.vector_store %arg17[%c0_246, %c0_247], %615 {strides = array<i32>} : memref<8x128xf32, #tpu.memory_space<vmem>>, vector<8x128xf32>,
    %c0_248 = arith.constant 0 : index
    %c0_249 = arith.constant 0 : index
    %656 = vector.load %arg18[%c0_248, %c0_249] : memref<8x128xf32, #tpu.memory_space<vmem>>, vector<8x128xf32>
    tpu.vector_store %arg18[%c0_248, %c0_249], %613 {strides = array<i32>} : memref<8x128xf32, #tpu.memory_space<vmem>>, vector<8x128xf32>,
    %c0_250 = arith.constant 0 : index
    %c0_251 = arith.constant 0 : index
    %657 = vector.load %arg19[%c0_250, %c0_251] : memref<8x128xf32, #tpu.memory_space<vmem>>, vector<8x128xf32>
    tpu.vector_store %arg19[%c0_250, %c0_251], %652 {strides = array<i32>} : memref<8x128xf32, #tpu.memory_space<vmem>>, vector<8x128xf32>,
    %c0_252 = arith.constant 0 : index
    %c0_253 = arith.constant 0 : index
    %658 = vector.load %arg20[%c0_252, %c0_253] : memref<8x128xf32, #tpu.memory_space<vmem>>, vector<8x128xf32>
    tpu.vector_store %arg20[%c0_252, %c0_253], %650 {strides = array<i32>} : memref<8x128xf32, #tpu.memory_space<vmem>>, vector<8x128xf32>,
    %c0_254 = arith.constant 0 : index
    %c0_255 = arith.constant 0 : index
    %659 = vector.load %arg15[%c0_254, %c0_255] : memref<64x128xf32, #tpu.memory_space<vmem>>, vector<64x128xf32>
    %c0_256 = arith.constant 0 : index
    %c0_257 = arith.constant 0 : index
    %660 = vector.load %arg8[%c0_256, %c0_257] : memref<128x128xf32, #tpu.memory_space<vmem>>, vector<128x128xf32>
    %cst_258 = arith.constant dense<0.000000e+00> : vector<64x128xf32>
    %661 = tpu.matmul %659, %660, %cst_258 {dimension_numbers = #tpu.dot_dimension_numbers<[1], [0], [0], [1], [0, 0, 1, 1], [], []>} : vector<64x128xf32>, vector<128x128xf32>, vector<64x128xf32> -> vector<64x128xf32>
    %c0_259 = arith.constant 0 : index
    %c0_260 = arith.constant 0 : index
    %662 = vector.load %arg10[%c0_259, %c0_260] : memref<1x128xf32, #tpu.memory_space<vmem>>, vector<1x128xf32>
    %663 = vector.broadcast %662 : vector<1x128xf32> to vector<64x128xf32>
    %664 = arith.addf %661, %663 : vector<64x128xf32>
    %c0_261 = arith.constant 0 : index
    %c0_262 = arith.constant 0 : index
    %665 = vector.load %arg11[%c0_261, %c0_262] : memref<64x128xf32, #tpu.memory_space<vmem>>, vector<64x128xf32>
    tpu.vector_store %arg11[%c0_261, %c0_262], %664 {strides = array<i32>} : memref<64x128xf32, #tpu.memory_space<vmem>>, vector<64x128xf32>,
    %c0_263 = arith.constant 0 : index
    %c0_264 = arith.constant 0 : index
    %666 = vector.load %arg16[%c0_263, %c0_264] : memref<64x128xf32, #tpu.memory_space<vmem>>, vector<64x128xf32>
    %c0_265 = arith.constant 0 : index
    %c0_266 = arith.constant 0 : index
    %667 = vector.load %arg9[%c0_265, %c0_266] : memref<128x128xf32, #tpu.memory_space<vmem>>, vector<128x128xf32>
    %cst_267 = arith.constant dense<0.000000e+00> : vector<64x128xf32>
    %668 = tpu.matmul %666, %667, %cst_267 {dimension_numbers = #tpu.dot_dimension_numbers<[1], [0], [0], [1], [0, 0, 1, 1], [], []>} : vector<64x128xf32>, vector<128x128xf32>, vector<64x128xf32> -> vector<64x128xf32>
    %c0_268 = arith.constant 0 : index
    %c0_269 = arith.constant 0 : index
    %669 = vector.load %arg12[%c0_268, %c0_269] : memref<64x128xf32, #tpu.memory_space<vmem>>, vector<64x128xf32>
    tpu.vector_store %arg12[%c0_268, %c0_269], %668 {strides = array<i32>} : memref<64x128xf32, #tpu.memory_space<vmem>>, vector<64x128xf32>,
    return
  }
  func.func @transform_0(%arg0: i32) -> (i32, i32) {
    %c0_i32 = arith.constant 0 : i32
    %c0_i32_0 = arith.constant 0 : i32
    return %arg0, %c0_i32 : i32, i32
  }
  func.func @transform_1(%arg0: i32) -> (i32, i32) {
    %c0_i32 = arith.constant 0 : i32
    %c0_i32_0 = arith.constant 0 : i32
    %c0_i32_1 = arith.constant 0 : i32
    return %c0_i32, %c0_i32_0 : i32, i32
  }
  func.func @transform_2(%arg0: i32) -> (i32, i32) {
    %c0_i32 = arith.constant 0 : i32
    %c0_i32_0 = arith.constant 0 : i32
    %c0_i32_1 = arith.constant 0 : i32
    return %c0_i32, %c0_i32_0 : i32, i32
  }
  func.func @transform_3(%arg0: i32) -> (i32, i32) {
    %c0_i32 = arith.constant 0 : i32
    %c0_i32_0 = arith.constant 0 : i32
    %c0_i32_1 = arith.constant 0 : i32
    return %c0_i32, %c0_i32_0 : i32, i32
  }
  func.func @transform_4(%arg0: i32) -> (i32, i32) {
    %c0_i32 = arith.constant 0 : i32
    %c0_i32_0 = arith.constant 0 : i32
    %c0_i32_1 = arith.constant 0 : i32
    return %c0_i32, %c0_i32_0 : i32, i32
  }
  func.func @transform_5(%arg0: i32) -> (i32, i32) {
    %c0_i32 = arith.constant 0 : i32
    %c0_i32_0 = arith.constant 0 : i32
    %c0_i32_1 = arith.constant 0 : i32
    return %c0_i32, %c0_i32_0 : i32, i32
  }
  func.func @transform_6(%arg0: i32) -> (i32, i32) {
    %c0_i32 = arith.constant 0 : i32
    %c0_i32_0 = arith.constant 0 : i32
    %c0_i32_1 = arith.constant 0 : i32
    return %c0_i32, %c0_i32_0 : i32, i32
  }
  func.func @transform_7(%arg0: i32) -> (i32, i32) {
    %c0_i32 = arith.constant 0 : i32
    %c0_i32_0 = arith.constant 0 : i32
    %c0_i32_1 = arith.constant 0 : i32
    return %c0_i32, %c0_i32_0 : i32, i32
  }
  func.func @transform_8(%arg0: i32) -> (i32, i32) {
    %c0_i32 = arith.constant 0 : i32
    %c0_i32_0 = arith.constant 0 : i32
    %c0_i32_1 = arith.constant 0 : i32
    return %c0_i32, %c0_i32_0 : i32, i32
  }
  func.func @transform_9(%arg0: i32) -> (i32, i32) {
    %c0_i32 = arith.constant 0 : i32
    %c0_i32_0 = arith.constant 0 : i32
    %c0_i32_1 = arith.constant 0 : i32
    return %c0_i32, %c0_i32_0 : i32, i32
  }
  func.func @transform_10(%arg0: i32) -> (i32, i32) {
    %c0_i32 = arith.constant 0 : i32
    %c0_i32_0 = arith.constant 0 : i32
    return %arg0, %c0_i32 : i32, i32
  }
  func.func @transform_11(%arg0: i32) -> (i32, i32) {
    %c0_i32 = arith.constant 0 : i32
    %0 = arith.subi %c0_i32, %arg0 : i32
    %c0_i32_0 = arith.constant 0 : i32
    %c0_i32_1 = arith.constant 0 : i32
    return %0, %c0_i32_0 : i32, i32
  }
}

module attributes {stable_mosaic.version = 11 : i64} {
  func.func @kernel(%arg0: i32, %arg1: memref<64x128xf32, #tpu.memory_space<vmem>>, %arg2: memref<128x512xf32, #tpu.memory_space<vmem>>, %arg3: memref<128x512xf32, #tpu.memory_space<vmem>>, %arg4: memref<1x512xf32, #tpu.memory_space<vmem>>, %arg5: memref<128x512xf32, #tpu.memory_space<vmem>>, %arg6: memref<128x512xf32, #tpu.memory_space<vmem>>, %arg7: memref<1x512xf32, #tpu.memory_space<vmem>>, %arg8: memref<128x128xf32, #tpu.memory_space<vmem>>, %arg9: memref<128x128xf32, #tpu.memory_space<vmem>>, %arg10: memref<1x128xf32, #tpu.memory_space<vmem>>, %arg11: memref<64x128xf32, #tpu.memory_space<vmem>>, %arg12: memref<64x128xf32, #tpu.memory_space<vmem>>, %arg13: memref<64x512xf32, #tpu.memory_space<vmem>>, %arg14: memref<64x512xf32, #tpu.memory_space<vmem>>, %arg15: memref<64x128xf32, #tpu.memory_space<vmem>>, %arg16: memref<64x128xf32, #tpu.memory_space<vmem>>, %arg17: memref<8x128xf32, #tpu.memory_space<vmem>>, %arg18: memref<8x128xf32, #tpu.memory_space<vmem>>, %arg19: memref<8x128xf32, #tpu.memory_space<vmem>>, %arg20: memref<8x128xf32, #tpu.memory_space<vmem>>) attributes {dimension_semantics = [#tpu.dimension_semantics<arbitrary>], iteration_bounds = array<i64: 1>, scalar_prefetch = 0 : i64, scratch_operands = 8 : i64, tpu.core_type = #tpu.core_type<tc>, window_params = [{transform_indices = @transform_0, window_bounds = array<i64: 64, 128>}, {pipeline_mode = #tpu.pipeline_mode<synchronous>, transform_indices = @transform_1, window_bounds = array<i64: 128, 512>}, {pipeline_mode = #tpu.pipeline_mode<synchronous>, transform_indices = @transform_2, window_bounds = array<i64: 128, 512>}, {pipeline_mode = #tpu.pipeline_mode<synchronous>, transform_indices = @transform_3, window_bounds = array<i64: 1, 512>}, {pipeline_mode = #tpu.pipeline_mode<synchronous>, transform_indices = @transform_4, window_bounds = array<i64: 128, 512>}, {pipeline_mode = #tpu.pipeline_mode<synchronous>, transform_indices = @transform_5, window_bounds = array<i64: 128, 512>}, {pipeline_mode = #tpu.pipeline_mode<synchronous>, transform_indices = @transform_6, window_bounds = array<i64: 1, 512>}, {pipeline_mode = #tpu.pipeline_mode<synchronous>, transform_indices = @transform_7, window_bounds = array<i64: 128, 128>}, {pipeline_mode = #tpu.pipeline_mode<synchronous>, transform_indices = @transform_8, window_bounds = array<i64: 128, 128>}, {pipeline_mode = #tpu.pipeline_mode<synchronous>, transform_indices = @transform_9, window_bounds = array<i64: 1, 128>}, {transform_indices = @transform_10, window_bounds = array<i64: 64, 128>}, {transform_indices = @transform_11, window_bounds = array<i64: 64, 128>}]} {
    %c0_i32 = arith.constant 0 : i32
    %0 = arith.cmpi eq, %arg0, %c0_i32 : i32
    %1 = arith.extui %0 : i1 to i32
    %c0_i32_0 = arith.constant 0 : i32
    %2 = arith.cmpi ne, %1, %c0_i32_0 : i32
    scf.if %2 {
      %cst_270 = arith.constant 0.000000e+00 : f32
      %670 = vector.broadcast %cst_270 : f32 to vector<8x128xf32>
      %c0_271 = arith.constant 0 : index
      %c0_272 = arith.constant 0 : index
      %671 = vector.load %arg17[%c0_271, %c0_272] : memref<8x128xf32, #tpu.memory_space<vmem>>, vector<8x128xf32>
      tpu.vector_store %arg17[%c0_271, %c0_272], %670 {strides = array<i32>} : memref<8x128xf32, #tpu.memory_space<vmem>>, vector<8x128xf32>,
      %c0_273 = arith.constant 0 : index
      %c0_274 = arith.constant 0 : index
      %672 = vector.load %arg18[%c0_273, %c0_274] : memref<8x128xf32, #tpu.memory_space<vmem>>, vector<8x128xf32>
      tpu.vector_store %arg18[%c0_273, %c0_274], %670 {strides = array<i32>} : memref<8x128xf32, #tpu.memory_space<vmem>>, vector<8x128xf32>,
      %c0_275 = arith.constant 0 : index
      %c0_276 = arith.constant 0 : index
      %673 = vector.load %arg19[%c0_275, %c0_276] : memref<8x128xf32, #tpu.memory_space<vmem>>, vector<8x128xf32>
      tpu.vector_store %arg19[%c0_275, %c0_276], %670 {strides = array<i32>} : memref<8x128xf32, #tpu.memory_space<vmem>>, vector<8x128xf32>,
      %c0_277 = arith.constant 0 : index
      %c0_278 = arith.constant 0 : index
      %674 = vector.load %arg20[%c0_277, %c0_278] : memref<8x128xf32, #tpu.memory_space<vmem>>, vector<8x128xf32>
      tpu.vector_store %arg20[%c0_277, %c0_278], %670 {strides = array<i32>} : memref<8x128xf32, #tpu.memory_space<vmem>>, vector<8x128xf32>,
    } else {
    }
    %c0 = arith.constant 0 : index
    %c0_1 = arith.constant 0 : index
    %3 = vector.load %arg1[%c0, %c0_1] : memref<64x128xf32, #tpu.memory_space<vmem>>, vector<64x128xf32>
    %c0_2 = arith.constant 0 : index
    %c0_3 = arith.constant 0 : index
    %4 = vector.load %arg2[%c0_2, %c0_3] : memref<128x512xf32, #tpu.memory_space<vmem>>, vector<128x512xf32>
    %cst = arith.constant dense<0.000000e+00> : vector<64x512xf32>
    %5 = tpu.matmul %3, %4, %cst {dimension_numbers = #tpu.dot_dimension_numbers<[1], [0], [0], [1], [0, 0, 1, 1], [], []>} : vector<64x128xf32>, vector<128x512xf32>, vector<64x512xf32> -> vector<64x512xf32>
    %c0_4 = arith.constant 0 : index
    %c0_5 = arith.constant 0 : index
    %6 = vector.load %arg4[%c0_4, %c0_5] : memref<1x512xf32, #tpu.memory_space<vmem>>, vector<1x512xf32>
    %7 = vector.broadcast %6 : vector<1x512xf32> to vector<64x512xf32>
    %8 = arith.addf %5, %7 : vector<64x512xf32>
    %c0_6 = arith.constant 0 : index
    %c0_7 = arith.constant 0 : index
    %9 = vector.load %arg13[%c0_6, %c0_7] : memref<64x512xf32, #tpu.memory_space<vmem>>, vector<64x512xf32>
    tpu.vector_store %arg13[%c0_6, %c0_7], %8 {strides = array<i32>} : memref<64x512xf32, #tpu.memory_space<vmem>>, vector<64x512xf32>,
    %c0_8 = arith.constant 0 : index
    %c0_9 = arith.constant 0 : index
    %10 = vector.load %arg1[%c0_8, %c0_9] : memref<64x128xf32, #tpu.memory_space<vmem>>, vector<64x128xf32>
    %c0_10 = arith.constant 0 : index
    %c0_11 = arith.constant 0 : index
    %11 = vector.load %arg5[%c0_10, %c0_11] : memref<128x512xf32, #tpu.memory_space<vmem>>, vector<128x512xf32>
    %cst_12 = arith.constant dense<0.000000e+00> : vector<64x512xf32>
    %12 = tpu.matmul %10, %11, %cst_12 {dimension_numbers = #tpu.dot_dimension_numbers<[1], [0], [0], [1], [0, 0, 1, 1], [], []>} : vector<64x128xf32>, vector<128x512xf32>, vector<64x512xf32> -> vector<64x512xf32>
    %c0_13 = arith.constant 0 : index
    %c0_14 = arith.constant 0 : index
    %13 = vector.load %arg7[%c0_13, %c0_14] : memref<1x512xf32, #tpu.memory_space<vmem>>, vector<1x512xf32>
    %14 = vector.broadcast %13 : vector<1x512xf32> to vector<64x512xf32>
    %15 = arith.addf %12, %14 : vector<64x512xf32>
    %c0_15 = arith.constant 0 : index
    %c0_16 = arith.constant 0 : index
    %16 = vector.load %arg14[%c0_15, %c0_16] : memref<64x512xf32, #tpu.memory_space<vmem>>, vector<64x512xf32>
    tpu.vector_store %arg14[%c0_15, %c0_16], %15 {strides = array<i32>} : memref<64x512xf32, #tpu.memory_space<vmem>>, vector<64x512xf32>,
    %c0_17 = arith.constant 0 : index
    %c0_18 = arith.constant 0 : index
    %17 = vector.load %arg3[%c0_17, %c0_18] : memref<128x512xf32, #tpu.memory_space<vmem>>, vector<128x512xf32>
    %c0_19 = arith.constant 0 : index
    %c0_20 = arith.constant 0 : index
    %18 = vector.load %arg6[%c0_19, %c0_20] : memref<128x512xf32, #tpu.memory_space<vmem>>, vector<128x512xf32>
    %c0_21 = arith.constant 0 : index
    %c0_22 = arith.constant 0 : index
    %19 = vector.load %arg17[%c0_21, %c0_22] : memref<8x128xf32, #tpu.memory_space<vmem>>, vector<8x128xf32>
    %c0_23 = arith.constant 0 : index
    %c0_24 = arith.constant 0 : index
    %20 = vector.load %arg18[%c0_23, %c0_24] : memref<8x128xf32, #tpu.memory_space<vmem>>, vector<8x128xf32>
    %c0_25 = arith.constant 0 : index
    %c0_26 = arith.constant 0 : index
    %21 = vector.load %arg19[%c0_25, %c0_26] : memref<8x128xf32, #tpu.memory_space<vmem>>, vector<8x128xf32>
    %c0_27 = arith.constant 0 : index
    %c0_28 = arith.constant 0 : index
    %22 = vector.load %arg20[%c0_27, %c0_28] : memref<8x128xf32, #tpu.memory_space<vmem>>, vector<8x128xf32>
    %c0_i32_29 = arith.constant 0 : i32
    %c8_i32 = arith.constant 8 : i32
    %23 = arith.muli %c0_i32_29, %c8_i32 : i32
    %24 = tpu.assume_multiple %23, 8 : i32
    %c7_i32 = arith.constant 7 : i32
    %25 = arith.subi %c7_i32, %c0_i32_29 : i32
    %c8_i32_30 = arith.constant 8 : i32
    %26 = arith.muli %25, %c8_i32_30 : i32
    %27 = tpu.assume_multiple %26, 8 : i32
    %28 = arith.index_cast %24 : i32 to index
    %c0_31 = arith.constant 0 : index
    %29 = vector.load %arg13[%28, %c0_31] : memref<64x512xf32, #tpu.memory_space<vmem>>, vector<8x512xf32>
    %cst_32 = arith.constant dense<0.000000e+00> : vector<8x512xf32>
    %30 = tpu.matmul %19, %17, %cst_32 {dimension_numbers = #tpu.dot_dimension_numbers<[1], [0], [0], [1], [0, 0, 1, 1], [], []>} : vector<8x128xf32>, vector<128x512xf32>, vector<8x512xf32> -> vector<8x512xf32>
    %31 = arith.addf %29, %30 : vector<8x512xf32>
    %32 = vector.extract_strided_slice %31 {offsets = [0, 0], sizes = [8, 128], strides = [1, 1]} : vector<8x512xf32> to vector<8x128xf32>
    %cst_33 = arith.constant 5.000000e-01 : f32
    %33 = vector.broadcast %cst_33 : f32 to vector<8x128xf32>
    %34 = arith.mulf %33, %32 : vector<8x128xf32>
    %35 = math.tanh %34 : vector<8x128xf32>
    %cst_34 = arith.constant 5.000000e-01 : f32
    %36 = vector.broadcast %cst_34 : f32 to vector<8x128xf32>
    %37 = arith.mulf %36, %35 : vector<8x128xf32>
    %cst_35 = arith.constant 5.000000e-01 : f32
    %38 = vector.broadcast %cst_35 : f32 to vector<8x128xf32>
    %39 = arith.addf %37, %38 : vector<8x128xf32>
    %40 = vector.extract_strided_slice %31 {offsets = [0, 128], sizes = [8, 128], strides = [1, 1]} : vector<8x512xf32> to vector<8x128xf32>
    %cst_36 = arith.constant 5.000000e-01 : f32
    %41 = vector.broadcast %cst_36 : f32 to vector<8x128xf32>
    %42 = arith.mulf %41, %40 : vector<8x128xf32>
    %43 = math.tanh %42 : vector<8x128xf32>
    %cst_37 = arith.constant 5.000000e-01 : f32
    %44 = vector.broadcast %cst_37 : f32 to vector<8x128xf32>
    %45 = arith.mulf %44, %43 : vector<8x128xf32>
    %cst_38 = arith.constant 5.000000e-01 : f32
    %46 = vector.broadcast %cst_38 : f32 to vector<8x128xf32>
    %47 = arith.addf %45, %46 : vector<8x128xf32>
    %48 = vector.extract_strided_slice %31 {offsets = [0, 256], sizes = [8, 128], strides = [1, 1]} : vector<8x512xf32> to vector<8x128xf32>
    %49 = math.tanh %48 : vector<8x128xf32>
    %50 = vector.extract_strided_slice %31 {offsets = [0, 384], sizes = [8, 128], strides = [1, 1]} : vector<8x512xf32> to vector<8x128xf32>
    %cst_39 = arith.constant 5.000000e-01 : f32
    %51 = vector.broadcast %cst_39 : f32 to vector<8x128xf32>
    %52 = arith.mulf %51, %50 : vector<8x128xf32>
    %53 = math.tanh %52 : vector<8x128xf32>
    %cst_40 = arith.constant 5.000000e-01 : f32
    %54 = vector.broadcast %cst_40 : f32 to vector<8x128xf32>
    %55 = arith.mulf %54, %53 : vector<8x128xf32>
    %cst_41 = arith.constant 5.000000e-01 : f32
    %56 = vector.broadcast %cst_41 : f32 to vector<8x128xf32>
    %57 = arith.addf %55, %56 : vector<8x128xf32>
    %58 = arith.mulf %47, %20 : vector<8x128xf32>
    %59 = arith.mulf %39, %49 : vector<8x128xf32>
    %60 = arith.addf %58, %59 : vector<8x128xf32>
    %61 = math.tanh %60 : vector<8x128xf32>
    %62 = arith.mulf %57, %61 : vector<8x128xf32>
    %63 = arith.index_cast %24 : i32 to index
    %c0_42 = arith.constant 0 : index
    %64 = vector.load %arg15[%63, %c0_42] : memref<64x128xf32, #tpu.memory_space<vmem>>, vector<8x128xf32>
    tpu.vector_store %arg15[%63, %c0_42], %62 {strides = array<i32>} : memref<64x128xf32, #tpu.memory_space<vmem>>, vector<8x128xf32>,
    %65 = arith.index_cast %27 : i32 to index
    %c0_43 = arith.constant 0 : index
    %66 = vector.load %arg14[%65, %c0_43] : memref<64x512xf32, #tpu.memory_space<vmem>>, vector<8x512xf32>
    %cst_44 = arith.constant dense<0.000000e+00> : vector<8x512xf32>
    %67 = tpu.matmul %21, %18, %cst_44 {dimension_numbers = #tpu.dot_dimension_numbers<[1], [0], [0], [1], [0, 0, 1, 1], [], []>} : vector<8x128xf32>, vector<128x512xf32>, vector<8x512xf32> -> vector<8x512xf32>
    %68 = arith.addf %66, %67 : vector<8x512xf32>
    %69 = vector.extract_strided_slice %68 {offsets = [0, 0], sizes = [8, 128], strides = [1, 1]} : vector<8x512xf32> to vector<8x128xf32>
    %cst_45 = arith.constant 5.000000e-01 : f32
    %70 = vector.broadcast %cst_45 : f32 to vector<8x128xf32>
    %71 = arith.mulf %70, %69 : vector<8x128xf32>
    %72 = math.tanh %71 : vector<8x128xf32>
    %cst_46 = arith.constant 5.000000e-01 : f32
    %73 = vector.broadcast %cst_46 : f32 to vector<8x128xf32>
    %74 = arith.mulf %73, %72 : vector<8x128xf32>
    %cst_47 = arith.constant 5.000000e-01 : f32
    %75 = vector.broadcast %cst_47 : f32 to vector<8x128xf32>
    %76 = arith.addf %74, %75 : vector<8x128xf32>
    %77 = vector.extract_strided_slice %68 {offsets = [0, 128], sizes = [8, 128], strides = [1, 1]} : vector<8x512xf32> to vector<8x128xf32>
    %cst_48 = arith.constant 5.000000e-01 : f32
    %78 = vector.broadcast %cst_48 : f32 to vector<8x128xf32>
    %79 = arith.mulf %78, %77 : vector<8x128xf32>
    %80 = math.tanh %79 : vector<8x128xf32>
    %cst_49 = arith.constant 5.000000e-01 : f32
    %81 = vector.broadcast %cst_49 : f32 to vector<8x128xf32>
    %82 = arith.mulf %81, %80 : vector<8x128xf32>
    %cst_50 = arith.constant 5.000000e-01 : f32
    %83 = vector.broadcast %cst_50 : f32 to vector<8x128xf32>
    %84 = arith.addf %82, %83 : vector<8x128xf32>
    %85 = vector.extract_strided_slice %68 {offsets = [0, 256], sizes = [8, 128], strides = [1, 1]} : vector<8x512xf32> to vector<8x128xf32>
    %86 = math.tanh %85 : vector<8x128xf32>
    %87 = vector.extract_strided_slice %68 {offsets = [0, 384], sizes = [8, 128], strides = [1, 1]} : vector<8x512xf32> to vector<8x128xf32>
    %cst_51 = arith.constant 5.000000e-01 : f32
    %88 = vector.broadcast %cst_51 : f32 to vector<8x128xf32>
    %89 = arith.mulf %88, %87 : vector<8x128xf32>
    %90 = math.tanh %89 : vector<8x128xf32>
    %cst_52 = arith.constant 5.000000e-01 : f32
    %91 = vector.broadcast %cst_52 : f32 to vector<8x128xf32>
    %92 = arith.mulf %91, %90 : vector<8x128xf32>
    %cst_53 = arith.constant 5.000000e-01 : f32
    %93 = vector.broadcast %cst_53 : f32 to vector<8x128xf32>
    %94 = arith.addf %92, %93 : vector<8x128xf32>
    %95 = arith.mulf %84, %22 : vector<8x128xf32>
    %96 = arith.mulf %76, %86 : vector<8x128xf32>
    %97 = arith.addf %95, %96 : vector<8x128xf32>
    %98 = math.tanh %97 : vector<8x128xf32>
    %99 = arith.mulf %94, %98 : vector<8x128xf32>
    %100 = arith.index_cast %27 : i32 to index
    %c0_54 = arith.constant 0 : index
    %101 = vector.load %arg16[%100, %c0_54] : memref<64x128xf32, #tpu.memory_space<vmem>>, vector<8x128xf32>
    tpu.vector_store %arg16[%100, %c0_54], %99 {strides = array<i32>} : memref<64x128xf32, #tpu.memory_space<vmem>>, vector<8x128xf32>,
    %c1_i32 = arith.constant 1 : i32
    %c8_i32_55 = arith.constant 8 : i32
    %102 = arith.muli %c1_i32, %c8_i32_55 : i32
    %103 = tpu.assume_multiple %102, 8 : i32
    %c7_i32_56 = arith.constant 7 : i32
    %104 = arith.subi %c7_i32_56, %c1_i32 : i32
    %c8_i32_57 = arith.constant 8 : i32
    %105 = arith.muli %104, %c8_i32_57 : i32
    %106 = tpu.assume_multiple %105, 8 : i32
    %107 = arith.index_cast %103 : i32 to index
    %c0_58 = arith.constant 0 : index
    %108 = vector.load %arg13[%107, %c0_58] : memref<64x512xf32, #tpu.memory_space<vmem>>, vector<8x512xf32>
    %cst_59 = arith.constant dense<0.000000e+00> : vector<8x512xf32>
    %109 = tpu.matmul %62, %17, %cst_59 {dimension_numbers = #tpu.dot_dimension_numbers<[1], [0], [0], [1], [0, 0, 1, 1], [], []>} : vector<8x128xf32>, vector<128x512xf32>, vector<8x512xf32> -> vector<8x512xf32>
    %110 = arith.addf %108, %109 : vector<8x512xf32>
    %111 = vector.extract_strided_slice %110 {offsets = [0, 0], sizes = [8, 128], strides = [1, 1]} : vector<8x512xf32> to vector<8x128xf32>
    %cst_60 = arith.constant 5.000000e-01 : f32
    %112 = vector.broadcast %cst_60 : f32 to vector<8x128xf32>
    %113 = arith.mulf %112, %111 : vector<8x128xf32>
    %114 = math.tanh %113 : vector<8x128xf32>
    %cst_61 = arith.constant 5.000000e-01 : f32
    %115 = vector.broadcast %cst_61 : f32 to vector<8x128xf32>
    %116 = arith.mulf %115, %114 : vector<8x128xf32>
    %cst_62 = arith.constant 5.000000e-01 : f32
    %117 = vector.broadcast %cst_62 : f32 to vector<8x128xf32>
    %118 = arith.addf %116, %117 : vector<8x128xf32>
    %119 = vector.extract_strided_slice %110 {offsets = [0, 128], sizes = [8, 128], strides = [1, 1]} : vector<8x512xf32> to vector<8x128xf32>
    %cst_63 = arith.constant 5.000000e-01 : f32
    %120 = vector.broadcast %cst_63 : f32 to vector<8x128xf32>
    %121 = arith.mulf %120, %119 : vector<8x128xf32>
    %122 = math.tanh %121 : vector<8x128xf32>
    %cst_64 = arith.constant 5.000000e-01 : f32
    %123 = vector.broadcast %cst_64 : f32 to vector<8x128xf32>
    %124 = arith.mulf %123, %122 : vector<8x128xf32>
    %cst_65 = arith.constant 5.000000e-01 : f32
    %125 = vector.broadcast %cst_65 : f32 to vector<8x128xf32>
    %126 = arith.addf %124, %125 : vector<8x128xf32>
    %127 = vector.extract_strided_slice %110 {offsets = [0, 256], sizes = [8, 128], strides = [1, 1]} : vector<8x512xf32> to vector<8x128xf32>
    %128 = math.tanh %127 : vector<8x128xf32>
    %129 = vector.extract_strided_slice %110 {offsets = [0, 384], sizes = [8, 128], strides = [1, 1]} : vector<8x512xf32> to vector<8x128xf32>
    %cst_66 = arith.constant 5.000000e-01 : f32
    %130 = vector.broadcast %cst_66 : f32 to vector<8x128xf32>
    %131 = arith.mulf %130, %129 : vector<8x128xf32>
    %132 = math.tanh %131 : vector<8x128xf32>
    %cst_67 = arith.constant 5.000000e-01 : f32
    %133 = vector.broadcast %cst_67 : f32 to vector<8x128xf32>
    %134 = arith.mulf %133, %132 : vector<8x128xf32>
    %cst_68 = arith.constant 5.000000e-01 : f32
    %135 = vector.broadcast %cst_68 : f32 to vector<8x128xf32>
    %136 = arith.addf %134, %135 : vector<8x128xf32>
    %137 = arith.mulf %126, %60 : vector<8x128xf32>
    %138 = arith.mulf %118, %128 : vector<8x128xf32>
    %139 = arith.addf %137, %138 : vector<8x128xf32>
    %140 = math.tanh %139 : vector<8x128xf32>
    %141 = arith.mulf %136, %140 : vector<8x128xf32>
    %142 = arith.index_cast %103 : i32 to index
    %c0_69 = arith.constant 0 : index
    %143 = vector.load %arg15[%142, %c0_69] : memref<64x128xf32, #tpu.memory_space<vmem>>, vector<8x128xf32>
    tpu.vector_store %arg15[%142, %c0_69], %141 {strides = array<i32>} : memref<64x128xf32, #tpu.memory_space<vmem>>, vector<8x128xf32>,
    %144 = arith.index_cast %106 : i32 to index
    %c0_70 = arith.constant 0 : index
    %145 = vector.load %arg14[%144, %c0_70] : memref<64x512xf32, #tpu.memory_space<vmem>>, vector<8x512xf32>
    %cst_71 = arith.constant dense<0.000000e+00> : vector<8x512xf32>
    %146 = tpu.matmul %99, %18, %cst_71 {dimension_numbers = #tpu.dot_dimension_numbers<[1], [0], [0], [1], [0, 0, 1, 1], [], []>} : vector<8x128xf32>, vector<128x512xf32>, vector<8x512xf32> -> vector<8x512xf32>
    %147 = arith.addf %145, %146 : vector<8x512xf32>
    %148 = vector.extract_strided_slice %147 {offsets = [0, 0], sizes = [8, 128], strides = [1, 1]} : vector<8x512xf32> to vector<8x128xf32>
    %cst_72 = arith.constant 5.000000e-01 : f32
    %149 = vector.broadcast %cst_72 : f32 to vector<8x128xf32>
    %150 = arith.mulf %149, %148 : vector<8x128xf32>
    %151 = math.tanh %150 : vector<8x128xf32>
    %cst_73 = arith.constant 5.000000e-01 : f32
    %152 = vector.broadcast %cst_73 : f32 to vector<8x128xf32>
    %153 = arith.mulf %152, %151 : vector<8x128xf32>
    %cst_74 = arith.constant 5.000000e-01 : f32
    %154 = vector.broadcast %cst_74 : f32 to vector<8x128xf32>
    %155 = arith.addf %153, %154 : vector<8x128xf32>
    %156 = vector.extract_strided_slice %147 {offsets = [0, 128], sizes = [8, 128], strides = [1, 1]} : vector<8x512xf32> to vector<8x128xf32>
    %cst_75 = arith.constant 5.000000e-01 : f32
    %157 = vector.broadcast %cst_75 : f32 to vector<8x128xf32>
    %158 = arith.mulf %157, %156 : vector<8x128xf32>
    %159 = math.tanh %158 : vector<8x128xf32>
    %cst_76 = arith.constant 5.000000e-01 : f32
    %160 = vector.broadcast %cst_76 : f32 to vector<8x128xf32>
    %161 = arith.mulf %160, %159 : vector<8x128xf32>
    %cst_77 = arith.constant 5.000000e-01 : f32
    %162 = vector.broadcast %cst_77 : f32 to vector<8x128xf32>
    %163 = arith.addf %161, %162 : vector<8x128xf32>
    %164 = vector.extract_strided_slice %147 {offsets = [0, 256], sizes = [8, 128], strides = [1, 1]} : vector<8x512xf32> to vector<8x128xf32>
    %165 = math.tanh %164 : vector<8x128xf32>
    %166 = vector.extract_strided_slice %147 {offsets = [0, 384], sizes = [8, 128], strides = [1, 1]} : vector<8x512xf32> to vector<8x128xf32>
    %cst_78 = arith.constant 5.000000e-01 : f32
    %167 = vector.broadcast %cst_78 : f32 to vector<8x128xf32>
    %168 = arith.mulf %167, %166 : vector<8x128xf32>
    %169 = math.tanh %168 : vector<8x128xf32>
    %cst_79 = arith.constant 5.000000e-01 : f32
    %170 = vector.broadcast %cst_79 : f32 to vector<8x128xf32>
    %171 = arith.mulf %170, %169 : vector<8x128xf32>
    %cst_80 = arith.constant 5.000000e-01 : f32
    %172 = vector.broadcast %cst_80 : f32 to vector<8x128xf32>
    %173 = arith.addf %171, %172 : vector<8x128xf32>
    %174 = arith.mulf %163, %97 : vector<8x128xf32>
    %175 = arith.mulf %155, %165 : vector<8x128xf32>
    %176 = arith.addf %174, %175 : vector<8x128xf32>
    %177 = math.tanh %176 : vector<8x128xf32>
    %178 = arith.mulf %173, %177 : vector<8x128xf32>
    %179 = arith.index_cast %106 : i32 to index
    %c0_81 = arith.constant 0 : index
    %180 = vector.load %arg16[%179, %c0_81] : memref<64x128xf32, #tpu.memory_space<vmem>>, vector<8x128xf32>
    tpu.vector_store %arg16[%179, %c0_81], %178 {strides = array<i32>} : memref<64x128xf32, #tpu.memory_space<vmem>>, vector<8x128xf32>,
    %c2_i32 = arith.constant 2 : i32
    %c8_i32_82 = arith.constant 8 : i32
    %181 = arith.muli %c2_i32, %c8_i32_82 : i32
    %182 = tpu.assume_multiple %181, 8 : i32
    %c7_i32_83 = arith.constant 7 : i32
    %183 = arith.subi %c7_i32_83, %c2_i32 : i32
    %c8_i32_84 = arith.constant 8 : i32
    %184 = arith.muli %183, %c8_i32_84 : i32
    %185 = tpu.assume_multiple %184, 8 : i32
    %186 = arith.index_cast %182 : i32 to index
    %c0_85 = arith.constant 0 : index
    %187 = vector.load %arg13[%186, %c0_85] : memref<64x512xf32, #tpu.memory_space<vmem>>, vector<8x512xf32>
    %cst_86 = arith.constant dense<0.000000e+00> : vector<8x512xf32>
    %188 = tpu.matmul %141, %17, %cst_86 {dimension_numbers = #tpu.dot_dimension_numbers<[1], [0], [0], [1], [0, 0, 1, 1], [], []>} : vector<8x128xf32>, vector<128x512xf32>, vector<8x512xf32> -> vector<8x512xf32>
    %189 = arith.addf %187, %188 : vector<8x512xf32>
    %190 = vector.extract_strided_slice %189 {offsets = [0, 0], sizes = [8, 128], strides = [1, 1]} : vector<8x512xf32> to vector<8x128xf32>
    %cst_87 = arith.constant 5.000000e-01 : f32
    %191 = vector.broadcast %cst_87 : f32 to vector<8x128xf32>
    %192 = arith.mulf %191, %190 : vector<8x128xf32>
    %193 = math.tanh %192 : vector<8x128xf32>
    %cst_88 = arith.constant 5.000000e-01 : f32
    %194 = vector.broadcast %cst_88 : f32 to vector<8x128xf32>
    %195 = arith.mulf %194, %193 : vector<8x128xf32>
    %cst_89 = arith.constant 5.000000e-01 : f32
    %196 = vector.broadcast %cst_89 : f32 to vector<8x128xf32>
    %197 = arith.addf %195, %196 : vector<8x128xf32>
    %198 = vector.extract_strided_slice %189 {offsets = [0, 128], sizes = [8, 128], strides = [1, 1]} : vector<8x512xf32> to vector<8x128xf32>
    %cst_90 = arith.constant 5.000000e-01 : f32
    %199 = vector.broadcast %cst_90 : f32 to vector<8x128xf32>
    %200 = arith.mulf %199, %198 : vector<8x128xf32>
    %201 = math.tanh %200 : vector<8x128xf32>
    %cst_91 = arith.constant 5.000000e-01 : f32
    %202 = vector.broadcast %cst_91 : f32 to vector<8x128xf32>
    %203 = arith.mulf %202, %201 : vector<8x128xf32>
    %cst_92 = arith.constant 5.000000e-01 : f32
    %204 = vector.broadcast %cst_92 : f32 to vector<8x128xf32>
    %205 = arith.addf %203, %204 : vector<8x128xf32>
    %206 = vector.extract_strided_slice %189 {offsets = [0, 256], sizes = [8, 128], strides = [1, 1]} : vector<8x512xf32> to vector<8x128xf32>
    %207 = math.tanh %206 : vector<8x128xf32>
    %208 = vector.extract_strided_slice %189 {offsets = [0, 384], sizes = [8, 128], strides = [1, 1]} : vector<8x512xf32> to vector<8x128xf32>
    %cst_93 = arith.constant 5.000000e-01 : f32
    %209 = vector.broadcast %cst_93 : f32 to vector<8x128xf32>
    %210 = arith.mulf %209, %208 : vector<8x128xf32>
    %211 = math.tanh %210 : vector<8x128xf32>
    %cst_94 = arith.constant 5.000000e-01 : f32
    %212 = vector.broadcast %cst_94 : f32 to vector<8x128xf32>
    %213 = arith.mulf %212, %211 : vector<8x128xf32>
    %cst_95 = arith.constant 5.000000e-01 : f32
    %214 = vector.broadcast %cst_95 : f32 to vector<8x128xf32>
    %215 = arith.addf %213, %214 : vector<8x128xf32>
    %216 = arith.mulf %205, %139 : vector<8x128xf32>
    %217 = arith.mulf %197, %207 : vector<8x128xf32>
    %218 = arith.addf %216, %217 : vector<8x128xf32>
    %219 = math.tanh %218 : vector<8x128xf32>
    %220 = arith.mulf %215, %219 : vector<8x128xf32>
    %221 = arith.index_cast %182 : i32 to index
    %c0_96 = arith.constant 0 : index
    %222 = vector.load %arg15[%221, %c0_96] : memref<64x128xf32, #tpu.memory_space<vmem>>, vector<8x128xf32>
    tpu.vector_store %arg15[%221, %c0_96], %220 {strides = array<i32>} : memref<64x128xf32, #tpu.memory_space<vmem>>, vector<8x128xf32>,
    %223 = arith.index_cast %185 : i32 to index
    %c0_97 = arith.constant 0 : index
    %224 = vector.load %arg14[%223, %c0_97] : memref<64x512xf32, #tpu.memory_space<vmem>>, vector<8x512xf32>
    %cst_98 = arith.constant dense<0.000000e+00> : vector<8x512xf32>
    %225 = tpu.matmul %178, %18, %cst_98 {dimension_numbers = #tpu.dot_dimension_numbers<[1], [0], [0], [1], [0, 0, 1, 1], [], []>} : vector<8x128xf32>, vector<128x512xf32>, vector<8x512xf32> -> vector<8x512xf32>
    %226 = arith.addf %224, %225 : vector<8x512xf32>
    %227 = vector.extract_strided_slice %226 {offsets = [0, 0], sizes = [8, 128], strides = [1, 1]} : vector<8x512xf32> to vector<8x128xf32>
    %cst_99 = arith.constant 5.000000e-01 : f32
    %228 = vector.broadcast %cst_99 : f32 to vector<8x128xf32>
    %229 = arith.mulf %228, %227 : vector<8x128xf32>
    %230 = math.tanh %229 : vector<8x128xf32>
    %cst_100 = arith.constant 5.000000e-01 : f32
    %231 = vector.broadcast %cst_100 : f32 to vector<8x128xf32>
    %232 = arith.mulf %231, %230 : vector<8x128xf32>
    %cst_101 = arith.constant 5.000000e-01 : f32
    %233 = vector.broadcast %cst_101 : f32 to vector<8x128xf32>
    %234 = arith.addf %232, %233 : vector<8x128xf32>
    %235 = vector.extract_strided_slice %226 {offsets = [0, 128], sizes = [8, 128], strides = [1, 1]} : vector<8x512xf32> to vector<8x128xf32>
    %cst_102 = arith.constant 5.000000e-01 : f32
    %236 = vector.broadcast %cst_102 : f32 to vector<8x128xf32>
    %237 = arith.mulf %236, %235 : vector<8x128xf32>
    %238 = math.tanh %237 : vector<8x128xf32>
    %cst_103 = arith.constant 5.000000e-01 : f32
    %239 = vector.broadcast %cst_103 : f32 to vector<8x128xf32>
    %240 = arith.mulf %239, %238 : vector<8x128xf32>
    %cst_104 = arith.constant 5.000000e-01 : f32
    %241 = vector.broadcast %cst_104 : f32 to vector<8x128xf32>
    %242 = arith.addf %240, %241 : vector<8x128xf32>
    %243 = vector.extract_strided_slice %226 {offsets = [0, 256], sizes = [8, 128], strides = [1, 1]} : vector<8x512xf32> to vector<8x128xf32>
    %244 = math.tanh %243 : vector<8x128xf32>
    %245 = vector.extract_strided_slice %226 {offsets = [0, 384], sizes = [8, 128], strides = [1, 1]} : vector<8x512xf32> to vector<8x128xf32>
    %cst_105 = arith.constant 5.000000e-01 : f32
    %246 = vector.broadcast %cst_105 : f32 to vector<8x128xf32>
    %247 = arith.mulf %246, %245 : vector<8x128xf32>
    %248 = math.tanh %247 : vector<8x128xf32>
    %cst_106 = arith.constant 5.000000e-01 : f32
    %249 = vector.broadcast %cst_106 : f32 to vector<8x128xf32>
    %250 = arith.mulf %249, %248 : vector<8x128xf32>
    %cst_107 = arith.constant 5.000000e-01 : f32
    %251 = vector.broadcast %cst_107 : f32 to vector<8x128xf32>
    %252 = arith.addf %250, %251 : vector<8x128xf32>
    %253 = arith.mulf %242, %176 : vector<8x128xf32>
    %254 = arith.mulf %234, %244 : vector<8x128xf32>
    %255 = arith.addf %253, %254 : vector<8x128xf32>
    %256 = math.tanh %255 : vector<8x128xf32>
    %257 = arith.mulf %252, %256 : vector<8x128xf32>
    %258 = arith.index_cast %185 : i32 to index
    %c0_108 = arith.constant 0 : index
    %259 = vector.load %arg16[%258, %c0_108] : memref<64x128xf32, #tpu.memory_space<vmem>>, vector<8x128xf32>
    tpu.vector_store %arg16[%258, %c0_108], %257 {strides = array<i32>} : memref<64x128xf32, #tpu.memory_space<vmem>>, vector<8x128xf32>,
    %c3_i32 = arith.constant 3 : i32
    %c8_i32_109 = arith.constant 8 : i32
    %260 = arith.muli %c3_i32, %c8_i32_109 : i32
    %261 = tpu.assume_multiple %260, 8 : i32
    %c7_i32_110 = arith.constant 7 : i32
    %262 = arith.subi %c7_i32_110, %c3_i32 : i32
    %c8_i32_111 = arith.constant 8 : i32
    %263 = arith.muli %262, %c8_i32_111 : i32
    %264 = tpu.assume_multiple %263, 8 : i32
    %265 = arith.index_cast %261 : i32 to index
    %c0_112 = arith.constant 0 : index
    %266 = vector.load %arg13[%265, %c0_112] : memref<64x512xf32, #tpu.memory_space<vmem>>, vector<8x512xf32>
    %cst_113 = arith.constant dense<0.000000e+00> : vector<8x512xf32>
    %267 = tpu.matmul %220, %17, %cst_113 {dimension_numbers = #tpu.dot_dimension_numbers<[1], [0], [0], [1], [0, 0, 1, 1], [], []>} : vector<8x128xf32>, vector<128x512xf32>, vector<8x512xf32> -> vector<8x512xf32>
    %268 = arith.addf %266, %267 : vector<8x512xf32>
    %269 = vector.extract_strided_slice %268 {offsets = [0, 0], sizes = [8, 128], strides = [1, 1]} : vector<8x512xf32> to vector<8x128xf32>
    %cst_114 = arith.constant 5.000000e-01 : f32
    %270 = vector.broadcast %cst_114 : f32 to vector<8x128xf32>
    %271 = arith.mulf %270, %269 : vector<8x128xf32>
    %272 = math.tanh %271 : vector<8x128xf32>
    %cst_115 = arith.constant 5.000000e-01 : f32
    %273 = vector.broadcast %cst_115 : f32 to vector<8x128xf32>
    %274 = arith.mulf %273, %272 : vector<8x128xf32>
    %cst_116 = arith.constant 5.000000e-01 : f32
    %275 = vector.broadcast %cst_116 : f32 to vector<8x128xf32>
    %276 = arith.addf %274, %275 : vector<8x128xf32>
    %277 = vector.extract_strided_slice %268 {offsets = [0, 128], sizes = [8, 128], strides = [1, 1]} : vector<8x512xf32> to vector<8x128xf32>
    %cst_117 = arith.constant 5.000000e-01 : f32
    %278 = vector.broadcast %cst_117 : f32 to vector<8x128xf32>
    %279 = arith.mulf %278, %277 : vector<8x128xf32>
    %280 = math.tanh %279 : vector<8x128xf32>
    %cst_118 = arith.constant 5.000000e-01 : f32
    %281 = vector.broadcast %cst_118 : f32 to vector<8x128xf32>
    %282 = arith.mulf %281, %280 : vector<8x128xf32>
    %cst_119 = arith.constant 5.000000e-01 : f32
    %283 = vector.broadcast %cst_119 : f32 to vector<8x128xf32>
    %284 = arith.addf %282, %283 : vector<8x128xf32>
    %285 = vector.extract_strided_slice %268 {offsets = [0, 256], sizes = [8, 128], strides = [1, 1]} : vector<8x512xf32> to vector<8x128xf32>
    %286 = math.tanh %285 : vector<8x128xf32>
    %287 = vector.extract_strided_slice %268 {offsets = [0, 384], sizes = [8, 128], strides = [1, 1]} : vector<8x512xf32> to vector<8x128xf32>
    %cst_120 = arith.constant 5.000000e-01 : f32
    %288 = vector.broadcast %cst_120 : f32 to vector<8x128xf32>
    %289 = arith.mulf %288, %287 : vector<8x128xf32>
    %290 = math.tanh %289 : vector<8x128xf32>
    %cst_121 = arith.constant 5.000000e-01 : f32
    %291 = vector.broadcast %cst_121 : f32 to vector<8x128xf32>
    %292 = arith.mulf %291, %290 : vector<8x128xf32>
    %cst_122 = arith.constant 5.000000e-01 : f32
    %293 = vector.broadcast %cst_122 : f32 to vector<8x128xf32>
    %294 = arith.addf %292, %293 : vector<8x128xf32>
    %295 = arith.mulf %284, %218 : vector<8x128xf32>
    %296 = arith.mulf %276, %286 : vector<8x128xf32>
    %297 = arith.addf %295, %296 : vector<8x128xf32>
    %298 = math.tanh %297 : vector<8x128xf32>
    %299 = arith.mulf %294, %298 : vector<8x128xf32>
    %300 = arith.index_cast %261 : i32 to index
    %c0_123 = arith.constant 0 : index
    %301 = vector.load %arg15[%300, %c0_123] : memref<64x128xf32, #tpu.memory_space<vmem>>, vector<8x128xf32>
    tpu.vector_store %arg15[%300, %c0_123], %299 {strides = array<i32>} : memref<64x128xf32, #tpu.memory_space<vmem>>, vector<8x128xf32>,
    %302 = arith.index_cast %264 : i32 to index
    %c0_124 = arith.constant 0 : index
    %303 = vector.load %arg14[%302, %c0_124] : memref<64x512xf32, #tpu.memory_space<vmem>>, vector<8x512xf32>
    %cst_125 = arith.constant dense<0.000000e+00> : vector<8x512xf32>
    %304 = tpu.matmul %257, %18, %cst_125 {dimension_numbers = #tpu.dot_dimension_numbers<[1], [0], [0], [1], [0, 0, 1, 1], [], []>} : vector<8x128xf32>, vector<128x512xf32>, vector<8x512xf32> -> vector<8x512xf32>
    %305 = arith.addf %303, %304 : vector<8x512xf32>
    %306 = vector.extract_strided_slice %305 {offsets = [0, 0], sizes = [8, 128], strides = [1, 1]} : vector<8x512xf32> to vector<8x128xf32>
    %cst_126 = arith.constant 5.000000e-01 : f32
    %307 = vector.broadcast %cst_126 : f32 to vector<8x128xf32>
    %308 = arith.mulf %307, %306 : vector<8x128xf32>
    %309 = math.tanh %308 : vector<8x128xf32>
    %cst_127 = arith.constant 5.000000e-01 : f32
    %310 = vector.broadcast %cst_127 : f32 to vector<8x128xf32>
    %311 = arith.mulf %310, %309 : vector<8x128xf32>
    %cst_128 = arith.constant 5.000000e-01 : f32
    %312 = vector.broadcast %cst_128 : f32 to vector<8x128xf32>
    %313 = arith.addf %311, %312 : vector<8x128xf32>
    %314 = vector.extract_strided_slice %305 {offsets = [0, 128], sizes = [8, 128], strides = [1, 1]} : vector<8x512xf32> to vector<8x128xf32>
    %cst_129 = arith.constant 5.000000e-01 : f32
    %315 = vector.broadcast %cst_129 : f32 to vector<8x128xf32>
    %316 = arith.mulf %315, %314 : vector<8x128xf32>
    %317 = math.tanh %316 : vector<8x128xf32>
    %cst_130 = arith.constant 5.000000e-01 : f32
    %318 = vector.broadcast %cst_130 : f32 to vector<8x128xf32>
    %319 = arith.mulf %318, %317 : vector<8x128xf32>
    %cst_131 = arith.constant 5.000000e-01 : f32
    %320 = vector.broadcast %cst_131 : f32 to vector<8x128xf32>
    %321 = arith.addf %319, %320 : vector<8x128xf32>
    %322 = vector.extract_strided_slice %305 {offsets = [0, 256], sizes = [8, 128], strides = [1, 1]} : vector<8x512xf32> to vector<8x128xf32>
    %323 = math.tanh %322 : vector<8x128xf32>
    %324 = vector.extract_strided_slice %305 {offsets = [0, 384], sizes = [8, 128], strides = [1, 1]} : vector<8x512xf32> to vector<8x128xf32>
    %cst_132 = arith.constant 5.000000e-01 : f32
    %325 = vector.broadcast %cst_132 : f32 to vector<8x128xf32>
    %326 = arith.mulf %325, %324 : vector<8x128xf32>
    %327 = math.tanh %326 : vector<8x128xf32>
    %cst_133 = arith.constant 5.000000e-01 : f32
    %328 = vector.broadcast %cst_133 : f32 to vector<8x128xf32>
    %329 = arith.mulf %328, %327 : vector<8x128xf32>
    %cst_134 = arith.constant 5.000000e-01 : f32
    %330 = vector.broadcast %cst_134 : f32 to vector<8x128xf32>
    %331 = arith.addf %329, %330 : vector<8x128xf32>
    %332 = arith.mulf %321, %255 : vector<8x128xf32>
    %333 = arith.mulf %313, %323 : vector<8x128xf32>
    %334 = arith.addf %332, %333 : vector<8x128xf32>
    %335 = math.tanh %334 : vector<8x128xf32>
    %336 = arith.mulf %331, %335 : vector<8x128xf32>
    %337 = arith.index_cast %264 : i32 to index
    %c0_135 = arith.constant 0 : index
    %338 = vector.load %arg16[%337, %c0_135] : memref<64x128xf32, #tpu.memory_space<vmem>>, vector<8x128xf32>
    tpu.vector_store %arg16[%337, %c0_135], %336 {strides = array<i32>} : memref<64x128xf32, #tpu.memory_space<vmem>>, vector<8x128xf32>,
    %c4_i32 = arith.constant 4 : i32
    %c8_i32_136 = arith.constant 8 : i32
    %339 = arith.muli %c4_i32, %c8_i32_136 : i32
    %340 = tpu.assume_multiple %339, 8 : i32
    %c7_i32_137 = arith.constant 7 : i32
    %341 = arith.subi %c7_i32_137, %c4_i32 : i32
    %c8_i32_138 = arith.constant 8 : i32
    %342 = arith.muli %341, %c8_i32_138 : i32
    %343 = tpu.assume_multiple %342, 8 : i32
    %344 = arith.index_cast %340 : i32 to index
    %c0_139 = arith.constant 0 : index
    %345 = vector.load %arg13[%344, %c0_139] : memref<64x512xf32, #tpu.memory_space<vmem>>, vector<8x512xf32>
    %cst_140 = arith.constant dense<0.000000e+00> : vector<8x512xf32>
    %346 = tpu.matmul %299, %17, %cst_140 {dimension_numbers = #tpu.dot_dimension_numbers<[1], [0], [0], [1], [0, 0, 1, 1], [], []>} : vector<8x128xf32>, vector<128x512xf32>, vector<8x512xf32> -> vector<8x512xf32>
    %347 = arith.addf %345, %346 : vector<8x512xf32>
    %348 = vector.extract_strided_slice %347 {offsets = [0, 0], sizes = [8, 128], strides = [1, 1]} : vector<8x512xf32> to vector<8x128xf32>
    %cst_141 = arith.constant 5.000000e-01 : f32
    %349 = vector.broadcast %cst_141 : f32 to vector<8x128xf32>
    %350 = arith.mulf %349, %348 : vector<8x128xf32>
    %351 = math.tanh %350 : vector<8x128xf32>
    %cst_142 = arith.constant 5.000000e-01 : f32
    %352 = vector.broadcast %cst_142 : f32 to vector<8x128xf32>
    %353 = arith.mulf %352, %351 : vector<8x128xf32>
    %cst_143 = arith.constant 5.000000e-01 : f32
    %354 = vector.broadcast %cst_143 : f32 to vector<8x128xf32>
    %355 = arith.addf %353, %354 : vector<8x128xf32>
    %356 = vector.extract_strided_slice %347 {offsets = [0, 128], sizes = [8, 128], strides = [1, 1]} : vector<8x512xf32> to vector<8x128xf32>
    %cst_144 = arith.constant 5.000000e-01 : f32
    %357 = vector.broadcast %cst_144 : f32 to vector<8x128xf32>
    %358 = arith.mulf %357, %356 : vector<8x128xf32>
    %359 = math.tanh %358 : vector<8x128xf32>
    %cst_145 = arith.constant 5.000000e-01 : f32
    %360 = vector.broadcast %cst_145 : f32 to vector<8x128xf32>
    %361 = arith.mulf %360, %359 : vector<8x128xf32>
    %cst_146 = arith.constant 5.000000e-01 : f32
    %362 = vector.broadcast %cst_146 : f32 to vector<8x128xf32>
    %363 = arith.addf %361, %362 : vector<8x128xf32>
    %364 = vector.extract_strided_slice %347 {offsets = [0, 256], sizes = [8, 128], strides = [1, 1]} : vector<8x512xf32> to vector<8x128xf32>
    %365 = math.tanh %364 : vector<8x128xf32>
    %366 = vector.extract_strided_slice %347 {offsets = [0, 384], sizes = [8, 128], strides = [1, 1]} : vector<8x512xf32> to vector<8x128xf32>
    %cst_147 = arith.constant 5.000000e-01 : f32
    %367 = vector.broadcast %cst_147 : f32 to vector<8x128xf32>
    %368 = arith.mulf %367, %366 : vector<8x128xf32>
    %369 = math.tanh %368 : vector<8x128xf32>
    %cst_148 = arith.constant 5.000000e-01 : f32
    %370 = vector.broadcast %cst_148 : f32 to vector<8x128xf32>
    %371 = arith.mulf %370, %369 : vector<8x128xf32>
    %cst_149 = arith.constant 5.000000e-01 : f32
    %372 = vector.broadcast %cst_149 : f32 to vector<8x128xf32>
    %373 = arith.addf %371, %372 : vector<8x128xf32>
    %374 = arith.mulf %363, %297 : vector<8x128xf32>
    %375 = arith.mulf %355, %365 : vector<8x128xf32>
    %376 = arith.addf %374, %375 : vector<8x128xf32>
    %377 = math.tanh %376 : vector<8x128xf32>
    %378 = arith.mulf %373, %377 : vector<8x128xf32>
    %379 = arith.index_cast %340 : i32 to index
    %c0_150 = arith.constant 0 : index
    %380 = vector.load %arg15[%379, %c0_150] : memref<64x128xf32, #tpu.memory_space<vmem>>, vector<8x128xf32>
    tpu.vector_store %arg15[%379, %c0_150], %378 {strides = array<i32>} : memref<64x128xf32, #tpu.memory_space<vmem>>, vector<8x128xf32>,
    %381 = arith.index_cast %343 : i32 to index
    %c0_151 = arith.constant 0 : index
    %382 = vector.load %arg14[%381, %c0_151] : memref<64x512xf32, #tpu.memory_space<vmem>>, vector<8x512xf32>
    %cst_152 = arith.constant dense<0.000000e+00> : vector<8x512xf32>
    %383 = tpu.matmul %336, %18, %cst_152 {dimension_numbers = #tpu.dot_dimension_numbers<[1], [0], [0], [1], [0, 0, 1, 1], [], []>} : vector<8x128xf32>, vector<128x512xf32>, vector<8x512xf32> -> vector<8x512xf32>
    %384 = arith.addf %382, %383 : vector<8x512xf32>
    %385 = vector.extract_strided_slice %384 {offsets = [0, 0], sizes = [8, 128], strides = [1, 1]} : vector<8x512xf32> to vector<8x128xf32>
    %cst_153 = arith.constant 5.000000e-01 : f32
    %386 = vector.broadcast %cst_153 : f32 to vector<8x128xf32>
    %387 = arith.mulf %386, %385 : vector<8x128xf32>
    %388 = math.tanh %387 : vector<8x128xf32>
    %cst_154 = arith.constant 5.000000e-01 : f32
    %389 = vector.broadcast %cst_154 : f32 to vector<8x128xf32>
    %390 = arith.mulf %389, %388 : vector<8x128xf32>
    %cst_155 = arith.constant 5.000000e-01 : f32
    %391 = vector.broadcast %cst_155 : f32 to vector<8x128xf32>
    %392 = arith.addf %390, %391 : vector<8x128xf32>
    %393 = vector.extract_strided_slice %384 {offsets = [0, 128], sizes = [8, 128], strides = [1, 1]} : vector<8x512xf32> to vector<8x128xf32>
    %cst_156 = arith.constant 5.000000e-01 : f32
    %394 = vector.broadcast %cst_156 : f32 to vector<8x128xf32>
    %395 = arith.mulf %394, %393 : vector<8x128xf32>
    %396 = math.tanh %395 : vector<8x128xf32>
    %cst_157 = arith.constant 5.000000e-01 : f32
    %397 = vector.broadcast %cst_157 : f32 to vector<8x128xf32>
    %398 = arith.mulf %397, %396 : vector<8x128xf32>
    %cst_158 = arith.constant 5.000000e-01 : f32
    %399 = vector.broadcast %cst_158 : f32 to vector<8x128xf32>
    %400 = arith.addf %398, %399 : vector<8x128xf32>
    %401 = vector.extract_strided_slice %384 {offsets = [0, 256], sizes = [8, 128], strides = [1, 1]} : vector<8x512xf32> to vector<8x128xf32>
    %402 = math.tanh %401 : vector<8x128xf32>
    %403 = vector.extract_strided_slice %384 {offsets = [0, 384], sizes = [8, 128], strides = [1, 1]} : vector<8x512xf32> to vector<8x128xf32>
    %cst_159 = arith.constant 5.000000e-01 : f32
    %404 = vector.broadcast %cst_159 : f32 to vector<8x128xf32>
    %405 = arith.mulf %404, %403 : vector<8x128xf32>
    %406 = math.tanh %405 : vector<8x128xf32>
    %cst_160 = arith.constant 5.000000e-01 : f32
    %407 = vector.broadcast %cst_160 : f32 to vector<8x128xf32>
    %408 = arith.mulf %407, %406 : vector<8x128xf32>
    %cst_161 = arith.constant 5.000000e-01 : f32
    %409 = vector.broadcast %cst_161 : f32 to vector<8x128xf32>
    %410 = arith.addf %408, %409 : vector<8x128xf32>
    %411 = arith.mulf %400, %334 : vector<8x128xf32>
    %412 = arith.mulf %392, %402 : vector<8x128xf32>
    %413 = arith.addf %411, %412 : vector<8x128xf32>
    %414 = math.tanh %413 : vector<8x128xf32>
    %415 = arith.mulf %410, %414 : vector<8x128xf32>
    %416 = arith.index_cast %343 : i32 to index
    %c0_162 = arith.constant 0 : index
    %417 = vector.load %arg16[%416, %c0_162] : memref<64x128xf32, #tpu.memory_space<vmem>>, vector<8x128xf32>
    tpu.vector_store %arg16[%416, %c0_162], %415 {strides = array<i32>} : memref<64x128xf32, #tpu.memory_space<vmem>>, vector<8x128xf32>,
    %c5_i32 = arith.constant 5 : i32
    %c8_i32_163 = arith.constant 8 : i32
    %418 = arith.muli %c5_i32, %c8_i32_163 : i32
    %419 = tpu.assume_multiple %418, 8 : i32
    %c7_i32_164 = arith.constant 7 : i32
    %420 = arith.subi %c7_i32_164, %c5_i32 : i32
    %c8_i32_165 = arith.constant 8 : i32
    %421 = arith.muli %420, %c8_i32_165 : i32
    %422 = tpu.assume_multiple %421, 8 : i32
    %423 = arith.index_cast %419 : i32 to index
    %c0_166 = arith.constant 0 : index
    %424 = vector.load %arg13[%423, %c0_166] : memref<64x512xf32, #tpu.memory_space<vmem>>, vector<8x512xf32>
    %cst_167 = arith.constant dense<0.000000e+00> : vector<8x512xf32>
    %425 = tpu.matmul %378, %17, %cst_167 {dimension_numbers = #tpu.dot_dimension_numbers<[1], [0], [0], [1], [0, 0, 1, 1], [], []>} : vector<8x128xf32>, vector<128x512xf32>, vector<8x512xf32> -> vector<8x512xf32>
    %426 = arith.addf %424, %425 : vector<8x512xf32>
    %427 = vector.extract_strided_slice %426 {offsets = [0, 0], sizes = [8, 128], strides = [1, 1]} : vector<8x512xf32> to vector<8x128xf32>
    %cst_168 = arith.constant 5.000000e-01 : f32
    %428 = vector.broadcast %cst_168 : f32 to vector<8x128xf32>
    %429 = arith.mulf %428, %427 : vector<8x128xf32>
    %430 = math.tanh %429 : vector<8x128xf32>
    %cst_169 = arith.constant 5.000000e-01 : f32
    %431 = vector.broadcast %cst_169 : f32 to vector<8x128xf32>
    %432 = arith.mulf %431, %430 : vector<8x128xf32>
    %cst_170 = arith.constant 5.000000e-01 : f32
    %433 = vector.broadcast %cst_170 : f32 to vector<8x128xf32>
    %434 = arith.addf %432, %433 : vector<8x128xf32>
    %435 = vector.extract_strided_slice %426 {offsets = [0, 128], sizes = [8, 128], strides = [1, 1]} : vector<8x512xf32> to vector<8x128xf32>
    %cst_171 = arith.constant 5.000000e-01 : f32
    %436 = vector.broadcast %cst_171 : f32 to vector<8x128xf32>
    %437 = arith.mulf %436, %435 : vector<8x128xf32>
    %438 = math.tanh %437 : vector<8x128xf32>
    %cst_172 = arith.constant 5.000000e-01 : f32
    %439 = vector.broadcast %cst_172 : f32 to vector<8x128xf32>
    %440 = arith.mulf %439, %438 : vector<8x128xf32>
    %cst_173 = arith.constant 5.000000e-01 : f32
    %441 = vector.broadcast %cst_173 : f32 to vector<8x128xf32>
    %442 = arith.addf %440, %441 : vector<8x128xf32>
    %443 = vector.extract_strided_slice %426 {offsets = [0, 256], sizes = [8, 128], strides = [1, 1]} : vector<8x512xf32> to vector<8x128xf32>
    %444 = math.tanh %443 : vector<8x128xf32>
    %445 = vector.extract_strided_slice %426 {offsets = [0, 384], sizes = [8, 128], strides = [1, 1]} : vector<8x512xf32> to vector<8x128xf32>
    %cst_174 = arith.constant 5.000000e-01 : f32
    %446 = vector.broadcast %cst_174 : f32 to vector<8x128xf32>
    %447 = arith.mulf %446, %445 : vector<8x128xf32>
    %448 = math.tanh %447 : vector<8x128xf32>
    %cst_175 = arith.constant 5.000000e-01 : f32
    %449 = vector.broadcast %cst_175 : f32 to vector<8x128xf32>
    %450 = arith.mulf %449, %448 : vector<8x128xf32>
    %cst_176 = arith.constant 5.000000e-01 : f32
    %451 = vector.broadcast %cst_176 : f32 to vector<8x128xf32>
    %452 = arith.addf %450, %451 : vector<8x128xf32>
    %453 = arith.mulf %442, %376 : vector<8x128xf32>
    %454 = arith.mulf %434, %444 : vector<8x128xf32>
    %455 = arith.addf %453, %454 : vector<8x128xf32>
    %456 = math.tanh %455 : vector<8x128xf32>
    %457 = arith.mulf %452, %456 : vector<8x128xf32>
    %458 = arith.index_cast %419 : i32 to index
    %c0_177 = arith.constant 0 : index
    %459 = vector.load %arg15[%458, %c0_177] : memref<64x128xf32, #tpu.memory_space<vmem>>, vector<8x128xf32>
    tpu.vector_store %arg15[%458, %c0_177], %457 {strides = array<i32>} : memref<64x128xf32, #tpu.memory_space<vmem>>, vector<8x128xf32>,
    %460 = arith.index_cast %422 : i32 to index
    %c0_178 = arith.constant 0 : index
    %461 = vector.load %arg14[%460, %c0_178] : memref<64x512xf32, #tpu.memory_space<vmem>>, vector<8x512xf32>
    %cst_179 = arith.constant dense<0.000000e+00> : vector<8x512xf32>
    %462 = tpu.matmul %415, %18, %cst_179 {dimension_numbers = #tpu.dot_dimension_numbers<[1], [0], [0], [1], [0, 0, 1, 1], [], []>} : vector<8x128xf32>, vector<128x512xf32>, vector<8x512xf32> -> vector<8x512xf32>
    %463 = arith.addf %461, %462 : vector<8x512xf32>
    %464 = vector.extract_strided_slice %463 {offsets = [0, 0], sizes = [8, 128], strides = [1, 1]} : vector<8x512xf32> to vector<8x128xf32>
    %cst_180 = arith.constant 5.000000e-01 : f32
    %465 = vector.broadcast %cst_180 : f32 to vector<8x128xf32>
    %466 = arith.mulf %465, %464 : vector<8x128xf32>
    %467 = math.tanh %466 : vector<8x128xf32>
    %cst_181 = arith.constant 5.000000e-01 : f32
    %468 = vector.broadcast %cst_181 : f32 to vector<8x128xf32>
    %469 = arith.mulf %468, %467 : vector<8x128xf32>
    %cst_182 = arith.constant 5.000000e-01 : f32
    %470 = vector.broadcast %cst_182 : f32 to vector<8x128xf32>
    %471 = arith.addf %469, %470 : vector<8x128xf32>
    %472 = vector.extract_strided_slice %463 {offsets = [0, 128], sizes = [8, 128], strides = [1, 1]} : vector<8x512xf32> to vector<8x128xf32>
    %cst_183 = arith.constant 5.000000e-01 : f32
    %473 = vector.broadcast %cst_183 : f32 to vector<8x128xf32>
    %474 = arith.mulf %473, %472 : vector<8x128xf32>
    %475 = math.tanh %474 : vector<8x128xf32>
    %cst_184 = arith.constant 5.000000e-01 : f32
    %476 = vector.broadcast %cst_184 : f32 to vector<8x128xf32>
    %477 = arith.mulf %476, %475 : vector<8x128xf32>
    %cst_185 = arith.constant 5.000000e-01 : f32
    %478 = vector.broadcast %cst_185 : f32 to vector<8x128xf32>
    %479 = arith.addf %477, %478 : vector<8x128xf32>
    %480 = vector.extract_strided_slice %463 {offsets = [0, 256], sizes = [8, 128], strides = [1, 1]} : vector<8x512xf32> to vector<8x128xf32>
    %481 = math.tanh %480 : vector<8x128xf32>
    %482 = vector.extract_strided_slice %463 {offsets = [0, 384], sizes = [8, 128], strides = [1, 1]} : vector<8x512xf32> to vector<8x128xf32>
    %cst_186 = arith.constant 5.000000e-01 : f32
    %483 = vector.broadcast %cst_186 : f32 to vector<8x128xf32>
    %484 = arith.mulf %483, %482 : vector<8x128xf32>
    %485 = math.tanh %484 : vector<8x128xf32>
    %cst_187 = arith.constant 5.000000e-01 : f32
    %486 = vector.broadcast %cst_187 : f32 to vector<8x128xf32>
    %487 = arith.mulf %486, %485 : vector<8x128xf32>
    %cst_188 = arith.constant 5.000000e-01 : f32
    %488 = vector.broadcast %cst_188 : f32 to vector<8x128xf32>
    %489 = arith.addf %487, %488 : vector<8x128xf32>
    %490 = arith.mulf %479, %413 : vector<8x128xf32>
    %491 = arith.mulf %471, %481 : vector<8x128xf32>
    %492 = arith.addf %490, %491 : vector<8x128xf32>
    %493 = math.tanh %492 : vector<8x128xf32>
    %494 = arith.mulf %489, %493 : vector<8x128xf32>
    %495 = arith.index_cast %422 : i32 to index
    %c0_189 = arith.constant 0 : index
    %496 = vector.load %arg16[%495, %c0_189] : memref<64x128xf32, #tpu.memory_space<vmem>>, vector<8x128xf32>
    tpu.vector_store %arg16[%495, %c0_189], %494 {strides = array<i32>} : memref<64x128xf32, #tpu.memory_space<vmem>>, vector<8x128xf32>,
    %c6_i32 = arith.constant 6 : i32
    %c8_i32_190 = arith.constant 8 : i32
    %497 = arith.muli %c6_i32, %c8_i32_190 : i32
    %498 = tpu.assume_multiple %497, 8 : i32
    %c7_i32_191 = arith.constant 7 : i32
    %499 = arith.subi %c7_i32_191, %c6_i32 : i32
    %c8_i32_192 = arith.constant 8 : i32
    %500 = arith.muli %499, %c8_i32_192 : i32
    %501 = tpu.assume_multiple %500, 8 : i32
    %502 = arith.index_cast %498 : i32 to index
    %c0_193 = arith.constant 0 : index
    %503 = vector.load %arg13[%502, %c0_193] : memref<64x512xf32, #tpu.memory_space<vmem>>, vector<8x512xf32>
    %cst_194 = arith.constant dense<0.000000e+00> : vector<8x512xf32>
    %504 = tpu.matmul %457, %17, %cst_194 {dimension_numbers = #tpu.dot_dimension_numbers<[1], [0], [0], [1], [0, 0, 1, 1], [], []>} : vector<8x128xf32>, vector<128x512xf32>, vector<8x512xf32> -> vector<8x512xf32>
    %505 = arith.addf %503, %504 : vector<8x512xf32>
    %506 = vector.extract_strided_slice %505 {offsets = [0, 0], sizes = [8, 128], strides = [1, 1]} : vector<8x512xf32> to vector<8x128xf32>
    %cst_195 = arith.constant 5.000000e-01 : f32
    %507 = vector.broadcast %cst_195 : f32 to vector<8x128xf32>
    %508 = arith.mulf %507, %506 : vector<8x128xf32>
    %509 = math.tanh %508 : vector<8x128xf32>
    %cst_196 = arith.constant 5.000000e-01 : f32
    %510 = vector.broadcast %cst_196 : f32 to vector<8x128xf32>
    %511 = arith.mulf %510, %509 : vector<8x128xf32>
    %cst_197 = arith.constant 5.000000e-01 : f32
    %512 = vector.broadcast %cst_197 : f32 to vector<8x128xf32>
    %513 = arith.addf %511, %512 : vector<8x128xf32>
    %514 = vector.extract_strided_slice %505 {offsets = [0, 128], sizes = [8, 128], strides = [1, 1]} : vector<8x512xf32> to vector<8x128xf32>
    %cst_198 = arith.constant 5.000000e-01 : f32
    %515 = vector.broadcast %cst_198 : f32 to vector<8x128xf32>
    %516 = arith.mulf %515, %514 : vector<8x128xf32>
    %517 = math.tanh %516 : vector<8x128xf32>
    %cst_199 = arith.constant 5.000000e-01 : f32
    %518 = vector.broadcast %cst_199 : f32 to vector<8x128xf32>
    %519 = arith.mulf %518, %517 : vector<8x128xf32>
    %cst_200 = arith.constant 5.000000e-01 : f32
    %520 = vector.broadcast %cst_200 : f32 to vector<8x128xf32>
    %521 = arith.addf %519, %520 : vector<8x128xf32>
    %522 = vector.extract_strided_slice %505 {offsets = [0, 256], sizes = [8, 128], strides = [1, 1]} : vector<8x512xf32> to vector<8x128xf32>
    %523 = math.tanh %522 : vector<8x128xf32>
    %524 = vector.extract_strided_slice %505 {offsets = [0, 384], sizes = [8, 128], strides = [1, 1]} : vector<8x512xf32> to vector<8x128xf32>
    %cst_201 = arith.constant 5.000000e-01 : f32
    %525 = vector.broadcast %cst_201 : f32 to vector<8x128xf32>
    %526 = arith.mulf %525, %524 : vector<8x128xf32>
    %527 = math.tanh %526 : vector<8x128xf32>
    %cst_202 = arith.constant 5.000000e-01 : f32
    %528 = vector.broadcast %cst_202 : f32 to vector<8x128xf32>
    %529 = arith.mulf %528, %527 : vector<8x128xf32>
    %cst_203 = arith.constant 5.000000e-01 : f32
    %530 = vector.broadcast %cst_203 : f32 to vector<8x128xf32>
    %531 = arith.addf %529, %530 : vector<8x128xf32>
    %532 = arith.mulf %521, %455 : vector<8x128xf32>
    %533 = arith.mulf %513, %523 : vector<8x128xf32>
    %534 = arith.addf %532, %533 : vector<8x128xf32>
    %535 = math.tanh %534 : vector<8x128xf32>
    %536 = arith.mulf %531, %535 : vector<8x128xf32>
    %537 = arith.index_cast %498 : i32 to index
    %c0_204 = arith.constant 0 : index
    %538 = vector.load %arg15[%537, %c0_204] : memref<64x128xf32, #tpu.memory_space<vmem>>, vector<8x128xf32>
    tpu.vector_store %arg15[%537, %c0_204], %536 {strides = array<i32>} : memref<64x128xf32, #tpu.memory_space<vmem>>, vector<8x128xf32>,
    %539 = arith.index_cast %501 : i32 to index
    %c0_205 = arith.constant 0 : index
    %540 = vector.load %arg14[%539, %c0_205] : memref<64x512xf32, #tpu.memory_space<vmem>>, vector<8x512xf32>
    %cst_206 = arith.constant dense<0.000000e+00> : vector<8x512xf32>
    %541 = tpu.matmul %494, %18, %cst_206 {dimension_numbers = #tpu.dot_dimension_numbers<[1], [0], [0], [1], [0, 0, 1, 1], [], []>} : vector<8x128xf32>, vector<128x512xf32>, vector<8x512xf32> -> vector<8x512xf32>
    %542 = arith.addf %540, %541 : vector<8x512xf32>
    %543 = vector.extract_strided_slice %542 {offsets = [0, 0], sizes = [8, 128], strides = [1, 1]} : vector<8x512xf32> to vector<8x128xf32>
    %cst_207 = arith.constant 5.000000e-01 : f32
    %544 = vector.broadcast %cst_207 : f32 to vector<8x128xf32>
    %545 = arith.mulf %544, %543 : vector<8x128xf32>
    %546 = math.tanh %545 : vector<8x128xf32>
    %cst_208 = arith.constant 5.000000e-01 : f32
    %547 = vector.broadcast %cst_208 : f32 to vector<8x128xf32>
    %548 = arith.mulf %547, %546 : vector<8x128xf32>
    %cst_209 = arith.constant 5.000000e-01 : f32
    %549 = vector.broadcast %cst_209 : f32 to vector<8x128xf32>
    %550 = arith.addf %548, %549 : vector<8x128xf32>
    %551 = vector.extract_strided_slice %542 {offsets = [0, 128], sizes = [8, 128], strides = [1, 1]} : vector<8x512xf32> to vector<8x128xf32>
    %cst_210 = arith.constant 5.000000e-01 : f32
    %552 = vector.broadcast %cst_210 : f32 to vector<8x128xf32>
    %553 = arith.mulf %552, %551 : vector<8x128xf32>
    %554 = math.tanh %553 : vector<8x128xf32>
    %cst_211 = arith.constant 5.000000e-01 : f32
    %555 = vector.broadcast %cst_211 : f32 to vector<8x128xf32>
    %556 = arith.mulf %555, %554 : vector<8x128xf32>
    %cst_212 = arith.constant 5.000000e-01 : f32
    %557 = vector.broadcast %cst_212 : f32 to vector<8x128xf32>
    %558 = arith.addf %556, %557 : vector<8x128xf32>
    %559 = vector.extract_strided_slice %542 {offsets = [0, 256], sizes = [8, 128], strides = [1, 1]} : vector<8x512xf32> to vector<8x128xf32>
    %560 = math.tanh %559 : vector<8x128xf32>
    %561 = vector.extract_strided_slice %542 {offsets = [0, 384], sizes = [8, 128], strides = [1, 1]} : vector<8x512xf32> to vector<8x128xf32>
    %cst_213 = arith.constant 5.000000e-01 : f32
    %562 = vector.broadcast %cst_213 : f32 to vector<8x128xf32>
    %563 = arith.mulf %562, %561 : vector<8x128xf32>
    %564 = math.tanh %563 : vector<8x128xf32>
    %cst_214 = arith.constant 5.000000e-01 : f32
    %565 = vector.broadcast %cst_214 : f32 to vector<8x128xf32>
    %566 = arith.mulf %565, %564 : vector<8x128xf32>
    %cst_215 = arith.constant 5.000000e-01 : f32
    %567 = vector.broadcast %cst_215 : f32 to vector<8x128xf32>
    %568 = arith.addf %566, %567 : vector<8x128xf32>
    %569 = arith.mulf %558, %492 : vector<8x128xf32>
    %570 = arith.mulf %550, %560 : vector<8x128xf32>
    %571 = arith.addf %569, %570 : vector<8x128xf32>
    %572 = math.tanh %571 : vector<8x128xf32>
    %573 = arith.mulf %568, %572 : vector<8x128xf32>
    %574 = arith.index_cast %501 : i32 to index
    %c0_216 = arith.constant 0 : index
    %575 = vector.load %arg16[%574, %c0_216] : memref<64x128xf32, #tpu.memory_space<vmem>>, vector<8x128xf32>
    tpu.vector_store %arg16[%574, %c0_216], %573 {strides = array<i32>} : memref<64x128xf32, #tpu.memory_space<vmem>>, vector<8x128xf32>,
    %c7_i32_217 = arith.constant 7 : i32
    %c8_i32_218 = arith.constant 8 : i32
    %576 = arith.muli %c7_i32_217, %c8_i32_218 : i32
    %577 = tpu.assume_multiple %576, 8 : i32
    %c7_i32_219 = arith.constant 7 : i32
    %578 = arith.subi %c7_i32_219, %c7_i32_217 : i32
    %c8_i32_220 = arith.constant 8 : i32
    %579 = arith.muli %578, %c8_i32_220 : i32
    %580 = tpu.assume_multiple %579, 8 : i32
    %581 = arith.index_cast %577 : i32 to index
    %c0_221 = arith.constant 0 : index
    %582 = vector.load %arg13[%581, %c0_221] : memref<64x512xf32, #tpu.memory_space<vmem>>, vector<8x512xf32>
    %cst_222 = arith.constant dense<0.000000e+00> : vector<8x512xf32>
    %583 = tpu.matmul %536, %17, %cst_222 {dimension_numbers = #tpu.dot_dimension_numbers<[1], [0], [0], [1], [0, 0, 1, 1], [], []>} : vector<8x128xf32>, vector<128x512xf32>, vector<8x512xf32> -> vector<8x512xf32>
    %584 = arith.addf %582, %583 : vector<8x512xf32>
    %585 = vector.extract_strided_slice %584 {offsets = [0, 0], sizes = [8, 128], strides = [1, 1]} : vector<8x512xf32> to vector<8x128xf32>
    %cst_223 = arith.constant 5.000000e-01 : f32
    %586 = vector.broadcast %cst_223 : f32 to vector<8x128xf32>
    %587 = arith.mulf %586, %585 : vector<8x128xf32>
    %588 = math.tanh %587 : vector<8x128xf32>
    %cst_224 = arith.constant 5.000000e-01 : f32
    %589 = vector.broadcast %cst_224 : f32 to vector<8x128xf32>
    %590 = arith.mulf %589, %588 : vector<8x128xf32>
    %cst_225 = arith.constant 5.000000e-01 : f32
    %591 = vector.broadcast %cst_225 : f32 to vector<8x128xf32>
    %592 = arith.addf %590, %591 : vector<8x128xf32>
    %593 = vector.extract_strided_slice %584 {offsets = [0, 128], sizes = [8, 128], strides = [1, 1]} : vector<8x512xf32> to vector<8x128xf32>
    %cst_226 = arith.constant 5.000000e-01 : f32
    %594 = vector.broadcast %cst_226 : f32 to vector<8x128xf32>
    %595 = arith.mulf %594, %593 : vector<8x128xf32>
    %596 = math.tanh %595 : vector<8x128xf32>
    %cst_227 = arith.constant 5.000000e-01 : f32
    %597 = vector.broadcast %cst_227 : f32 to vector<8x128xf32>
    %598 = arith.mulf %597, %596 : vector<8x128xf32>
    %cst_228 = arith.constant 5.000000e-01 : f32
    %599 = vector.broadcast %cst_228 : f32 to vector<8x128xf32>
    %600 = arith.addf %598, %599 : vector<8x128xf32>
    %601 = vector.extract_strided_slice %584 {offsets = [0, 256], sizes = [8, 128], strides = [1, 1]} : vector<8x512xf32> to vector<8x128xf32>
    %602 = math.tanh %601 : vector<8x128xf32>
    %603 = vector.extract_strided_slice %584 {offsets = [0, 384], sizes = [8, 128], strides = [1, 1]} : vector<8x512xf32> to vector<8x128xf32>
    %cst_229 = arith.constant 5.000000e-01 : f32
    %604 = vector.broadcast %cst_229 : f32 to vector<8x128xf32>
    %605 = arith.mulf %604, %603 : vector<8x128xf32>
    %606 = math.tanh %605 : vector<8x128xf32>
    %cst_230 = arith.constant 5.000000e-01 : f32
    %607 = vector.broadcast %cst_230 : f32 to vector<8x128xf32>
    %608 = arith.mulf %607, %606 : vector<8x128xf32>
    %cst_231 = arith.constant 5.000000e-01 : f32
    %609 = vector.broadcast %cst_231 : f32 to vector<8x128xf32>
    %610 = arith.addf %608, %609 : vector<8x128xf32>
    %611 = arith.mulf %600, %534 : vector<8x128xf32>
    %612 = arith.mulf %592, %602 : vector<8x128xf32>
    %613 = arith.addf %611, %612 : vector<8x128xf32>
    %614 = math.tanh %613 : vector<8x128xf32>
    %615 = arith.mulf %610, %614 : vector<8x128xf32>
    %616 = arith.index_cast %577 : i32 to index
    %c0_232 = arith.constant 0 : index
    %617 = vector.load %arg15[%616, %c0_232] : memref<64x128xf32, #tpu.memory_space<vmem>>, vector<8x128xf32>
    tpu.vector_store %arg15[%616, %c0_232], %615 {strides = array<i32>} : memref<64x128xf32, #tpu.memory_space<vmem>>, vector<8x128xf32>,
    %618 = arith.index_cast %580 : i32 to index
    %c0_233 = arith.constant 0 : index
    %619 = vector.load %arg14[%618, %c0_233] : memref<64x512xf32, #tpu.memory_space<vmem>>, vector<8x512xf32>
    %cst_234 = arith.constant dense<0.000000e+00> : vector<8x512xf32>
    %620 = tpu.matmul %573, %18, %cst_234 {dimension_numbers = #tpu.dot_dimension_numbers<[1], [0], [0], [1], [0, 0, 1, 1], [], []>} : vector<8x128xf32>, vector<128x512xf32>, vector<8x512xf32> -> vector<8x512xf32>
    %621 = arith.addf %619, %620 : vector<8x512xf32>
    %622 = vector.extract_strided_slice %621 {offsets = [0, 0], sizes = [8, 128], strides = [1, 1]} : vector<8x512xf32> to vector<8x128xf32>
    %cst_235 = arith.constant 5.000000e-01 : f32
    %623 = vector.broadcast %cst_235 : f32 to vector<8x128xf32>
    %624 = arith.mulf %623, %622 : vector<8x128xf32>
    %625 = math.tanh %624 : vector<8x128xf32>
    %cst_236 = arith.constant 5.000000e-01 : f32
    %626 = vector.broadcast %cst_236 : f32 to vector<8x128xf32>
    %627 = arith.mulf %626, %625 : vector<8x128xf32>
    %cst_237 = arith.constant 5.000000e-01 : f32
    %628 = vector.broadcast %cst_237 : f32 to vector<8x128xf32>
    %629 = arith.addf %627, %628 : vector<8x128xf32>
    %630 = vector.extract_strided_slice %621 {offsets = [0, 128], sizes = [8, 128], strides = [1, 1]} : vector<8x512xf32> to vector<8x128xf32>
    %cst_238 = arith.constant 5.000000e-01 : f32
    %631 = vector.broadcast %cst_238 : f32 to vector<8x128xf32>
    %632 = arith.mulf %631, %630 : vector<8x128xf32>
    %633 = math.tanh %632 : vector<8x128xf32>
    %cst_239 = arith.constant 5.000000e-01 : f32
    %634 = vector.broadcast %cst_239 : f32 to vector<8x128xf32>
    %635 = arith.mulf %634, %633 : vector<8x128xf32>
    %cst_240 = arith.constant 5.000000e-01 : f32
    %636 = vector.broadcast %cst_240 : f32 to vector<8x128xf32>
    %637 = arith.addf %635, %636 : vector<8x128xf32>
    %638 = vector.extract_strided_slice %621 {offsets = [0, 256], sizes = [8, 128], strides = [1, 1]} : vector<8x512xf32> to vector<8x128xf32>
    %639 = math.tanh %638 : vector<8x128xf32>
    %640 = vector.extract_strided_slice %621 {offsets = [0, 384], sizes = [8, 128], strides = [1, 1]} : vector<8x512xf32> to vector<8x128xf32>
    %cst_241 = arith.constant 5.000000e-01 : f32
    %641 = vector.broadcast %cst_241 : f32 to vector<8x128xf32>
    %642 = arith.mulf %641, %640 : vector<8x128xf32>
    %643 = math.tanh %642 : vector<8x128xf32>
    %cst_242 = arith.constant 5.000000e-01 : f32
    %644 = vector.broadcast %cst_242 : f32 to vector<8x128xf32>
    %645 = arith.mulf %644, %643 : vector<8x128xf32>
    %cst_243 = arith.constant 5.000000e-01 : f32
    %646 = vector.broadcast %cst_243 : f32 to vector<8x128xf32>
    %647 = arith.addf %645, %646 : vector<8x128xf32>
    %648 = arith.mulf %637, %571 : vector<8x128xf32>
    %649 = arith.mulf %629, %639 : vector<8x128xf32>
    %650 = arith.addf %648, %649 : vector<8x128xf32>
    %651 = math.tanh %650 : vector<8x128xf32>
    %652 = arith.mulf %647, %651 : vector<8x128xf32>
    %653 = arith.index_cast %580 : i32 to index
    %c0_244 = arith.constant 0 : index
    %654 = vector.load %arg16[%653, %c0_244] : memref<64x128xf32, #tpu.memory_space<vmem>>, vector<8x128xf32>
    tpu.vector_store %arg16[%653, %c0_244], %652 {strides = array<i32>} : memref<64x128xf32, #tpu.memory_space<vmem>>, vector<8x128xf32>,
    %c8_i32_245 = arith.constant 8 : i32
    %c0_246 = arith.constant 0 : index
    %c0_247 = arith.constant 0 : index
    %655 = vector.load %arg17[%c0_246, %c0_247] : memref<8x128xf32, #tpu.memory_space<vmem>>, vector<8x128xf32>
    tpu.vector_store %arg17[%c0_246, %c0_247], %615 {strides = array<i32>} : memref<8x128xf32, #tpu.memory_space<vmem>>, vector<8x128xf32>,
    %c0_248 = arith.constant 0 : index
    %c0_249 = arith.constant 0 : index
    %656 = vector.load %arg18[%c0_248, %c0_249] : memref<8x128xf32, #tpu.memory_space<vmem>>, vector<8x128xf32>
    tpu.vector_store %arg18[%c0_248, %c0_249], %613 {strides = array<i32>} : memref<8x128xf32, #tpu.memory_space<vmem>>, vector<8x128xf32>,
    %c0_250 = arith.constant 0 : index
    %c0_251 = arith.constant 0 : index
    %657 = vector.load %arg19[%c0_250, %c0_251] : memref<8x128xf32, #tpu.memory_space<vmem>>, vector<8x128xf32>
    tpu.vector_store %arg19[%c0_250, %c0_251], %652 {strides = array<i32>} : memref<8x128xf32, #tpu.memory_space<vmem>>, vector<8x128xf32>,
    %c0_252 = arith.constant 0 : index
    %c0_253 = arith.constant 0 : index
    %658 = vector.load %arg20[%c0_252, %c0_253] : memref<8x128xf32, #tpu.memory_space<vmem>>, vector<8x128xf32>
    tpu.vector_store %arg20[%c0_252, %c0_253], %650 {strides = array<i32>} : memref<8x128xf32, #tpu.memory_space<vmem>>, vector<8x128xf32>,
    %c0_254 = arith.constant 0 : index
    %c0_255 = arith.constant 0 : index
    %659 = vector.load %arg15[%c0_254, %c0_255] : memref<64x128xf32, #tpu.memory_space<vmem>>, vector<64x128xf32>
    %c0_256 = arith.constant 0 : index
    %c0_257 = arith.constant 0 : index
    %660 = vector.load %arg8[%c0_256, %c0_257] : memref<128x128xf32, #tpu.memory_space<vmem>>, vector<128x128xf32>
    %cst_258 = arith.constant dense<0.000000e+00> : vector<64x128xf32>
    %661 = tpu.matmul %659, %660, %cst_258 {dimension_numbers = #tpu.dot_dimension_numbers<[1], [0], [0], [1], [0, 0, 1, 1], [], []>} : vector<64x128xf32>, vector<128x128xf32>, vector<64x128xf32> -> vector<64x128xf32>
    %c0_259 = arith.constant 0 : index
    %c0_260 = arith.constant 0 : index
    %662 = vector.load %arg10[%c0_259, %c0_260] : memref<1x128xf32, #tpu.memory_space<vmem>>, vector<1x128xf32>
    %663 = vector.broadcast %662 : vector<1x128xf32> to vector<64x128xf32>
    %664 = arith.addf %661, %663 : vector<64x128xf32>
    %c0_261 = arith.constant 0 : index
    %c0_262 = arith.constant 0 : index
    %665 = vector.load %arg11[%c0_261, %c0_262] : memref<64x128xf32, #tpu.memory_space<vmem>>, vector<64x128xf32>
    tpu.vector_store %arg11[%c0_261, %c0_262], %664 {strides = array<i32>} : memref<64x128xf32, #tpu.memory_space<vmem>>, vector<64x128xf32>,
    %c0_263 = arith.constant 0 : index
    %c0_264 = arith.constant 0 : index
    %666 = vector.load %arg16[%c0_263, %c0_264] : memref<64x128xf32, #tpu.memory_space<vmem>>, vector<64x128xf32>
    %c0_265 = arith.constant 0 : index
    %c0_266 = arith.constant 0 : index
    %667 = vector.load %arg9[%c0_265, %c0_266] : memref<128x128xf32, #tpu.memory_space<vmem>>, vector<128x128xf32>
    %cst_267 = arith.constant dense<0.000000e+00> : vector<64x128xf32>
    %668 = tpu.matmul %666, %667, %cst_267 {dimension_numbers = #tpu.dot_dimension_numbers<[1], [0], [0], [1], [0, 0, 1, 1], [], []>} : vector<64x128xf32>, vector<128x128xf32>, vector<64x128xf32> -> vector<64x128xf32>
    %c0_268 = arith.constant 0 : index
    %c0_269 = arith.constant 0 : index
    %669 = vector.load %arg12[%c0_268, %c0_269] : memref<64x128xf32, #tpu.memory_space<vmem>>, vector<64x128xf32>
    tpu.vector_store %arg12[%c0_268, %c0_269], %668 {strides = array<i32>} : memref<64x128xf32, #tpu.memory_space<vmem>>, vector<64x128xf32>,
    return
  }
  func.func @transform_0(%arg0: i32) -> (i32, i32) {
    %c0_i32 = arith.constant 0 : i32
    %c0_i32_0 = arith.constant 0 : i32
    return %arg0, %c0_i32 : i32, i32
  }
  func.func @transform_1(%arg0: i32) -> (i32, i32) {
    %c0_i32 = arith.constant 0 : i32
    %c0_i32_0 = arith.constant 0 : i32
    %c0_i32_1 = arith.constant 0 : i32
    return %c0_i32, %c0_i32_0 : i32, i32
  }
  func.func @transform_2(%arg0: i32) -> (i32, i32) {
    %c0_i32 = arith.constant 0 : i32
    %c0_i32_0 = arith.constant 0 : i32
    %c0_i32_1 = arith.constant 0 : i32
    return %c0_i32, %c0_i32_0 : i32, i32
  }
  func.func @transform_3(%arg0: i32) -> (i32, i32) {
    %c0_i32 = arith.constant 0 : i32
    %c0_i32_0 = arith.constant 0 : i32
    %c0_i32_1 = arith.constant 0 : i32
    return %c0_i32, %c0_i32_0 : i32, i32
  }
  func.func @transform_4(%arg0: i32) -> (i32, i32) {
    %c0_i32 = arith.constant 0 : i32
    %c0_i32_0 = arith.constant 0 : i32
    %c0_i32_1 = arith.constant 0 : i32
    return %c0_i32, %c0_i32_0 : i32, i32
  }
  func.func @transform_5(%arg0: i32) -> (i32, i32) {
    %c0_i32 = arith.constant 0 : i32
    %c0_i32_0 = arith.constant 0 : i32
    %c0_i32_1 = arith.constant 0 : i32
    return %c0_i32, %c0_i32_0 : i32, i32
  }
  func.func @transform_6(%arg0: i32) -> (i32, i32) {
    %c0_i32 = arith.constant 0 : i32
    %c0_i32_0 = arith.constant 0 : i32
    %c0_i32_1 = arith.constant 0 : i32
    return %c0_i32, %c0_i32_0 : i32, i32
  }
  func.func @transform_7(%arg0: i32) -> (i32, i32) {
    %c0_i32 = arith.constant 0 : i32
    %c0_i32_0 = arith.constant 0 : i32
    %c0_i32_1 = arith.constant 0 : i32
    return %c0_i32, %c0_i32_0 : i32, i32
  }
  func.func @transform_8(%arg0: i32) -> (i32, i32) {
    %c0_i32 = arith.constant 0 : i32
    %c0_i32_0 = arith.constant 0 : i32
    %c0_i32_1 = arith.constant 0 : i32
    return %c0_i32, %c0_i32_0 : i32, i32
  }
  func.func @transform_9(%arg0: i32) -> (i32, i32) {
    %c0_i32 = arith.constant 0 : i32
    %c0_i32_0 = arith.constant 0 : i32
    %c0_i32_1 = arith.constant 0 : i32
    return %c0_i32, %c0_i32_0 : i32, i32
  }
  func.func @transform_10(%arg0: i32) -> (i32, i32) {
    %c0_i32 = arith.constant 0 : i32
    %c0_i32_0 = arith.constant 0 : i32
    return %arg0, %c0_i32 : i32, i32
  }
  func.func @transform_11(%arg0: i32) -> (i32, i32) {
    %c0_i32 = arith.constant 0 : i32
    %0 = arith.subi %c0_i32, %arg0 : i32
    %c0_i32_0 = arith.constant 0 : i32
    %c0_i32_1 = arith.constant 0 : i32
    return %0, %c0_i32_0 : i32, i32
  }
}

</mosaic_0001>

<bundles_post_ra>
// kernel: encoder_with_cascade_rnn.3
= control target key start
LH: loop header
LB: loop body
LE: loop exit
PB: predicated region body
PF: predicated region fallthrough
CT: control target
= control target key end

     0   :  { %v7604_v3 = vmov 0.0   ;;  %s7592_s1 = inlined_call_operand.vmem [shape: f32[128,512], index: 1, kind: input, shape index: {}]   ;;  %s7593_s4 = inlined_call_operand.vmem [shape: f32[128,512], index: 4, kind: input, shape index: {}]   ;;  %s7594_s0 = inlined_call_operand.vmem [shape: f32[64,128], index: 0, kind: input, shape index: {}]   ;;  %s7595_s2 = inlined_call_operand.vmem [shape: f32[128,512], index: 2, kind: input, shape index: {}]   ;;  %s7596_s5 = inlined_call_operand.vmem [shape: f32[128,512], index: 5, kind: input, shape index: {}]   ;;  %s7597_s3 = inlined_call_operand.vmem [shape: f32[1,512], index: 3, kind: input, shape index: {}]   ;;  %s7598_s6 = inlined_call_operand.vmem [shape: f32[1,512], index: 6, kind: input, shape index: {}]   ;;  %s7599_s7 = inlined_call_operand.vmem [shape: f32[128,128], index: 7, kind: input, shape index: {}]   ;;  %s7600_s8 = inlined_call_operand.vmem [shape: f32[128,128], index: 8, kind: input, shape index: {}]   ;;  %s7601_s9 = inlined_call_operand.vmem [shape: f32[1,128], index: 9, kind: input, shape index: {}]   ;;  %s7602_s10 = inlined_call_operand.vmem [shape: f32[64,128], index: 10, kind: output, shape index: {0}]   ;;  %s7603_s11 = inlined_call_operand.vmem [shape: f32[64,128], index: 11, kind: output, shape index: {1}]  }
   0x1   :  { %v68_v0 = vld [vmem:[%s7592_s1 + $0x8] sm:$0xff]  ;;  %v70_v2 = vld [vmem:[%s7592_s1 + $0x18] sm:$0xff]  ;;  %217 = vmatprep.mubr.f32.mxu0 %v7604_v3  ;;  %330 = vmatprep.mubr.f32.mxu1 %v7604_v3  ;;  %v67_v6 = vld [vmem:[%s7592_s1] sm:$0xff] }
   0x2   :  { %v72_v1 = vld [vmem:[%s7592_s1 + $0x28] sm:$0xff]  ;;  %v74_v5 = vld [vmem:[%s7592_s1 + $0x38] sm:$0xff]  ;;  %v71_v7 = vld [vmem:[%s7592_s1 + $0x20] sm:$0xff] }
   0x3   :  { %v4119_v4 = vpack.c.bf16 %v72_v1, %v68_v0  ;;  %v4151_v8 = vpack.c.bf16 %v74_v5, %v70_v2  ;;  %v4121_v9 = vpack.c.bf16 %v71_v7, %v67_v6  ;;  %v69_v10 = vld [vmem:[%s7592_s1 + $0x10] sm:$0xff]  ;;  %v76_v12 = vld [vmem:[%s7592_s1 + $0x48] sm:$0xff]  ;;  %v78_v15 = vld [vmem:[%s7592_s1 + $0x58] sm:$0xff] }
   0x4   :  { %v73_v11 = vld [vmem:[%s7592_s1 + $0x30] sm:$0xff]  ;;  %v80_v14 = vld [vmem:[%s7592_s1 + $0x68] sm:$0xff]  ;;  %v82_v16 = vld [vmem:[%s7592_s1 + $0x78] sm:$0xff] }
   0x5   :  { %4120 = vmatprep.subr.bf16.mxu0 %v4119_v4  ;;  %v4153_v13 = vpack.c.bf16 %v73_v11, %v69_v10  ;;  %4152 = vmatprep.subr.bf16.mxu1 %v4151_v8  ;;  %v4123_v17 = vpack.c.bf16 %v80_v14, %v76_v12  ;;  %v4155_v18 = vpack.c.bf16 %v82_v16, %v78_v15  ;;  %v75_v19 = vld [vmem:[%s7592_s1 + $0x40] sm:$0xff]  ;;  %v77_v21 = vld [vmem:[%s7592_s1 + $0x50] sm:$0xff]  ;;  %v84_v24 = vld [vmem:[%s7592_s1 + $0x88] sm:$0xff] }
   0x6   :  { %4122 = vmatpush1.bf16.msra.mxu0 %v4121_v9  ;;  %v79_v20 = vld [vmem:[%s7592_s1 + $0x60] sm:$0xff]  ;;  %v81_v23 = vld [vmem:[%s7592_s1 + $0x70] sm:$0xff]  ;;  %v88_v25 = vld [vmem:[%s7592_s1 + $0xa8] sm:$0xff] }
   0x7   :  { %4154 = vmatpush1.bf16.msra.mxu1 %v4153_v13  ;;  %v4125_v22 = vpack.c.bf16 %v79_v20, %v75_v19  ;;  %4124 = vmatprep.subr.bf16.mxu0 %v4123_v17  ;;  %v4157_v26 = vpack.c.bf16 %v81_v23, %v77_v21  ;;  %v4127_v27 = vpack.c.bf16 %v88_v25, %v84_v24  ;;  %v86_v28 = vld [vmem:[%s7592_s1 + $0x98] sm:$0xff]  ;;  %v83_v30 = vld [vmem:[%s7592_s1 + $0x80] sm:$0xff]  ;;  %v85_v33 = vld [vmem:[%s7592_s1 + $0x90] sm:$0xff] }
   0x8   :  { %4156 = vmatprep.subr.bf16.mxu1 %v4155_v18  ;;  %v90_v29 = vld [vmem:[%s7592_s1 + $0xb8] sm:$0xff]  ;;  %v87_v32 = vld [vmem:[%s7592_s1 + $0xa0] sm:$0xff]  ;;  %v89_v34 = vld [vmem:[%s7592_s1 + $0xb0] sm:$0xff] }
   0x9   :  { %v4159_v31 = vpack.c.bf16 %v90_v29, %v86_v28  ;;  %v4129_v35 = vpack.c.bf16 %v87_v32, %v83_v30  ;;  %v92_v36 = vld [vmem:[%s7592_s1 + $0xc8] sm:$0xff]  ;;  %v94_v38 = vld [vmem:[%s7592_s1 + $0xd8] sm:$0xff]  ;;  %v4161_v39 = vpack.c.bf16 %v89_v34, %v85_v33  ;;  %v91_v42 = vld [vmem:[%s7592_s1 + $0xc0] sm:$0xff] }
   0xa   :  { %4126 = vmatpush1.bf16.msra.mxu0 %v4125_v22  ;;  %v96_v37 = vld [vmem:[%s7592_s1 + $0xe8] sm:$0xff]  ;;  %v98_v41 = vld [vmem:[%s7592_s1 + $0xf8] sm:$0xff]  ;;  %v95_v43 = vld [vmem:[%s7592_s1 + $0xe0] sm:$0xff] }
   0xb   :  { %4158 = vmatpush1.bf16.msra.mxu1 %v4157_v26  ;;  %4128 = vmatprep.subr.bf16.mxu0 %v4127_v27  ;;  %v4131_v40 = vpack.c.bf16 %v96_v37, %v92_v36  ;;  %v4163_v44 = vpack.c.bf16 %v98_v41, %v94_v38  ;;  %v93_v45 = vld [vmem:[%s7592_s1 + $0xd0] sm:$0xff]  ;;  %v100_v47 = vld [vmem:[%s7592_s1 + $0x108] sm:$0xff]  ;;  %v102_v49 = vld [vmem:[%s7592_s1 + $0x118] sm:$0xff]  ;;  %v4133_v51 = vpack.c.bf16 %v95_v43, %v91_v42 }
   0xc   :  { %4160 = vmatprep.subr.bf16.mxu1 %v4159_v31  ;;  %v97_v46 = vld [vmem:[%s7592_s1 + $0xf0] sm:$0xff]  ;;  %v104_v48 = vld [vmem:[%s7592_s1 + $0x128] sm:$0xff]  ;;  %v106_v50 = vld [vmem:[%s7592_s1 + $0x138] sm:$0xff] }
   0xd   :  { %v4165_v52 = vpack.c.bf16 %v97_v46, %v93_v45  ;;  %v4135_v53 = vpack.c.bf16 %v104_v48, %v100_v47  ;;  %v99_v54 = vld [vmem:[%s7592_s1 + $0x100] sm:$0xff]  ;;  %v101_v56 = vld [vmem:[%s7592_s1 + $0x110] sm:$0xff]  ;;  %v4167_v57 = vpack.c.bf16 %v106_v50, %v102_v49  ;;  %v108_v59 = vld [vmem:[%s7592_s1 + $0x148] sm:$0xff] }
   0xe   :  { %4130 = vmatpush1.bf16.msra.mxu0 %v4129_v35  ;;  %v103_v55 = vld [vmem:[%s7592_s1 + $0x120] sm:$0xff]  ;;  %v105_v58 = vld [vmem:[%s7592_s1 + $0x130] sm:$0xff]  ;;  %v112_v60 = vld [vmem:[%s7592_s1 + $0x168] sm:$0xff] }
   0xf   :  { %4162 = vmatpush1.bf16.msra.mxu1 %v4161_v39  ;;  %4132 = vmatprep.subr.bf16.mxu0 %v4131_v40  ;;  %v110_v61 = vld [vmem:[%s7592_s1 + $0x158] sm:$0xff]  ;;  %v4137_v63 = vpack.c.bf16 %v103_v55, %v99_v54  ;;  %v4169_v0 = vpack.c.bf16 %v105_v58, %v101_v56  ;;  %v4139_v1 = vpack.c.bf16 %v112_v60, %v108_v59  ;;  %v107_v2 = vld [vmem:[%s7592_s1 + $0x140] sm:$0xff]  ;;  %v109_v5 = vld [vmem:[%s7592_s1 + $0x150] sm:$0xff] }
  0x10   :  { %4164 = vmatprep.subr.bf16.mxu1 %v4163_v44  ;;  %v114_v62 = vld [vmem:[%s7592_s1 + $0x178] sm:$0xff]  ;;  %v111_v4 = vld [vmem:[%s7592_s1 + $0x160] sm:$0xff]  ;;  %v113_v7 = vld [vmem:[%s7592_s1 + $0x170] sm:$0xff] }
  0x11   :  { %v4171_v6 = vpack.c.bf16 %v114_v62, %v110_v61  ;;  %v116_v8 = vld [vmem:[%s7592_s1 + $0x188] sm:$0xff]  ;;  %v118_v10 = vld [vmem:[%s7592_s1 + $0x198] sm:$0xff]  ;;  %v4141_v12 = vpack.c.bf16 %v111_v4, %v107_v2  ;;  %v4173_v13 = vpack.c.bf16 %v113_v7, %v109_v5  ;;  %v115_v15 = vld [vmem:[%s7592_s1 + $0x180] sm:$0xff] }
  0x12   :  { %4134 = vmatpush1.bf16.msra.mxu0 %v4133_v51  ;;  %v120_v9 = vld [vmem:[%s7592_s1 + $0x1a8] sm:$0xff]  ;;  %v122_v11 = vld [vmem:[%s7592_s1 + $0x1b8] sm:$0xff]  ;;  %v119_v16 = vld [vmem:[%s7592_s1 + $0x1a0] sm:$0xff] }
  0x13   :  { %4166 = vmatpush1.bf16.msra.mxu1 %v4165_v52  ;;  %4136 = vmatprep.subr.bf16.mxu0 %v4135_v53  ;;  %v4143_v14 = vpack.c.bf16 %v120_v9, %v116_v8  ;;  %v117_v17 = vld [vmem:[%s7592_s1 + $0x190] sm:$0xff]  ;;  %v4175_v18 = vpack.c.bf16 %v122_v11, %v118_v10  ;;  %v124_v20 = vld [vmem:[%s7592_s1 + $0x1c8] sm:$0xff]  ;;  %v126_v22 = vld [vmem:[%s7592_s1 + $0x1d8] sm:$0xff]  ;;  %v4145_v24 = vpack.c.bf16 %v119_v16, %v115_v15 }
  0x14   :  { %4168 = vmatprep.subr.bf16.mxu1 %v4167_v57  ;;  %v121_v19 = vld [vmem:[%s7592_s1 + $0x1b0] sm:$0xff]  ;;  %v128_v21 = vld [vmem:[%s7592_s1 + $0x1e8] sm:$0xff]  ;;  %v130_v23 = vld [vmem:[%s7592_s1 + $0x1f8] sm:$0xff] }
  0x15   :  { %v4177_v25 = vpack.c.bf16 %v121_v19, %v117_v17  ;;  %v4147_v26 = vpack.c.bf16 %v128_v21, %v124_v20  ;;  %v123_v27 = vld [vmem:[%s7592_s1 + $0x1c0] sm:$0xff]  ;;  %v125_v29 = vld [vmem:[%s7592_s1 + $0x1d0] sm:$0xff]  ;;  %v4179_v30 = vpack.c.bf16 %v130_v23, %v126_v22  ;;  %v420_v32 = vld [vmem:[%s7593_s4 + $0x8] sm:$0xff] }
  0x16   :  { %4138 = vmatpush1.bf16.msra.mxu0 %v4137_v63  ;;  %v127_v28 = vld [vmem:[%s7592_s1 + $0x1e0] sm:$0xff]  ;;  %v129_v31 = vld [vmem:[%s7592_s1 + $0x1f0] sm:$0xff]  ;;  %v424_v33 = vld [vmem:[%s7593_s4 + $0x28] sm:$0xff] }
  0x17   :  { %4170 = vmatpush1.bf16.msra.mxu1 %v4169_v0  ;;  %4140 = vmatprep.subr.bf16.mxu0 %v4139_v1  ;;  %v422_v34 = vld [vmem:[%s7593_s4 + $0x18] sm:$0xff]  ;;  %v4149_v36 = vpack.c.bf16 %v127_v28, %v123_v27  ;;  %v4181_v37 = vpack.c.bf16 %v129_v31, %v125_v29  ;;  %v4183_v38 = vpack.c.bf16 %v424_v33, %v420_v32  ;;  %v419_v39 = vld [vmem:[%s7593_s4] sm:$0xff]  ;;  %v421_v42 = vld [vmem:[%s7593_s4 + $0x10] sm:$0xff] }
  0x18   :  { %4172 = vmatprep.subr.bf16.mxu1 %v4171_v6  ;;  %v426_v35 = vld [vmem:[%s7593_s4 + $0x38] sm:$0xff]  ;;  %v423_v40 = vld [vmem:[%s7593_s4 + $0x20] sm:$0xff]  ;;  %v425_v43 = vld [vmem:[%s7593_s4 + $0x30] sm:$0xff] }
  0x19   :  { %v4215_v41 = vpack.c.bf16 %v426_v35, %v422_v34  ;;  %v428_v44 = vld [vmem:[%s7593_s4 + $0x48] sm:$0xff]  ;;  %v5912_v46 = vld [vmem:[%s7594_s0] sm:$0xff]  ;;  %v4185_v47 = vpack.c.bf16 %v423_v40, %v419_v39  ;;  %v430_v48 = vld [vmem:[%s7593_s4 + $0x58] sm:$0xff]  ;;  %v4217_v50 = vpack.c.bf16 %v425_v43, %v421_v42 }
  0x1a   :  { %4142 = vmatpush1.bf16.msra.mxu0 %v4141_v12  ;;  %v432_v45 = vld [vmem:[%s7593_s4 + $0x68] sm:$0xff]  ;;  %v434_v49 = vld [vmem:[%s7593_s4 + $0x78] sm:$0xff]  ;;  %v427_v51 = vld [vmem:[%s7593_s4 + $0x40] sm:$0xff] }
  0x1b   :  { %4174 = vmatpush1.bf16.msra.mxu1 %v4173_v13  ;;  %4144 = vmatprep.subr.bf16.mxu0 %v4143_v14  ;;  %v431_v52 = vld [vmem:[%s7593_s4 + $0x60] sm:$0xff]  ;;  %v4187_v53 = vpack.c.bf16 %v432_v45, %v428_v44  ;;  %v429_v54 = vld [vmem:[%s7593_s4 + $0x50] sm:$0xff]  ;;  %v4219_v56 = vpack.c.bf16 %v434_v49, %v430_v48  ;;  %v436_v57 = vld [vmem:[%s7593_s4 + $0x88] sm:$0xff] }
  0x1c   :  { %4176 = vmatprep.subr.bf16.mxu1 %v4175_v18  ;;  %v433_v55 = vld [vmem:[%s7593_s4 + $0x70] sm:$0xff]  ;;  %v440_v58 = vld [vmem:[%s7593_s4 + $0xa8] sm:$0xff]  ;;  %v4189_v60 = vpack.c.bf16 %v431_v52, %v427_v51  ;;  %v438_v61 = vld [vmem:[%s7593_s4 + $0x98] sm:$0xff] }
  0x1d   :  { %v5943_v59 = vld [vmem:[%s7594_s0 + $0x8] sm:$0xff]  ;;  %v442_v62 = vld [vmem:[%s7593_s4 + $0xb8] sm:$0xff]  ;;  %v4221_v63 = vpack.c.bf16 %v433_v55, %v429_v54  ;;  %v435_v0 = vld [vmem:[%s7593_s4 + $0x80] sm:$0xff]  ;;  %v4191_v2 = vpack.c.bf16 %v440_v58, %v436_v57 }
  0x1e   :  { %4146 = vmatpush1.bf16.msra.mxu0 %v4145_v24  ;;  %v439_v1 = vld [vmem:[%s7593_s4 + $0xa0] sm:$0xff]  ;;  %v437_v4 = vld [vmem:[%s7593_s4 + $0x90] sm:$0xff]  ;;  %v4223_v6 = vpack.c.bf16 %v442_v62, %v438_v61  ;;  %v444_v7 = vld [vmem:[%s7593_s4 + $0xc8] sm:$0xff] }
  0x1f   :  { %4178 = vmatpush1.bf16.msra.mxu1 %v4177_v25  ;;  %4148 = vmatprep.subr.bf16.mxu0 %v4147_v26  ;;  %v441_v5 = vld [vmem:[%s7593_s4 + $0xb0] sm:$0xff]  ;;  %v448_v8 = vld [vmem:[%s7593_s4 + $0xe8] sm:$0xff]  ;;  %v4193_v10 = vpack.c.bf16 %v439_v1, %v435_v0  ;;  %v446_v11 = vld [vmem:[%s7593_s4 + $0xd8] sm:$0xff] }
  0x20   :  { %4180 = vmatprep.subr.bf16.mxu1 %v4179_v30  ;;  %v5976_v9 = vld [vmem:[%s7594_s0 + $0x10] sm:$0xff]  ;;  %v450_v12 = vld [vmem:[%s7593_s4 + $0xf8] sm:$0xff]  ;;  %v4225_v13 = vpack.c.bf16 %v441_v5, %v437_v4  ;;  %v443_v14 = vld [vmem:[%s7593_s4 + $0xc0] sm:$0xff]  ;;  %v4195_v16 = vpack.c.bf16 %v448_v8, %v444_v7 }
  0x21   :  { %v447_v15 = vld [vmem:[%s7593_s4 + $0xe0] sm:$0xff]  ;;  %v445_v17 = vld [vmem:[%s7593_s4 + $0xd0] sm:$0xff]  ;;  %v4227_v19 = vpack.c.bf16 %v450_v12, %v446_v11  ;;  %v452_v20 = vld [vmem:[%s7593_s4 + $0x108] sm:$0xff] }
  0x22   :  { %4150 = vmatpush1.bf16.msra.mxu0 %v4149_v36  ;;  %v449_v18 = vld [vmem:[%s7593_s4 + $0xf0] sm:$0xff]  ;;  %v456_v21 = vld [vmem:[%s7593_s4 + $0x128] sm:$0xff]  ;;  %v6009_v22 = vld [vmem:[%s7594_s0 + $0x18] sm:$0xff]  ;;  %v4197_v23 = vpack.c.bf16 %v447_v15, %v443_v14 }
  0x23   :  { %4182 = vmatpush1.bf16.msra.mxu1 %v4181_v37  ;;  %4184 = vmatprep.subr.bf16.mxu0 %v4183_v38  ;;  %v454_v24 = vld [vmem:[%s7593_s4 + $0x118] sm:$0xff]  ;;  %v4229_v26 = vpack.c.bf16 %v449_v18, %v445_v17  ;;  %v451_v27 = vld [vmem:[%s7593_s4 + $0x100] sm:$0xff]  ;;  %v4199_v29 = vpack.c.bf16 %v456_v21, %v452_v20  ;;  %v453_v30 = vld [vmem:[%s7593_s4 + $0x110] sm:$0xff] }
  0x24   :  { %4216 = vmatprep.subr.bf16.mxu1 %v4215_v41  ;;  %v458_v25 = vld [vmem:[%s7593_s4 + $0x138] sm:$0xff]  ;;  %v455_v28 = vld [vmem:[%s7593_s4 + $0x120] sm:$0xff]  ;;  %v457_v31 = vld [vmem:[%s7593_s4 + $0x130] sm:$0xff] }
  0x25   :  { %218 = vmatmul.mubr.f32.vlgmr.msra.gmra.mrb[0].mxu0 %v5912_v46  ;;  %v4231_v32 = vpack.c.bf16 %v458_v25, %v454_v24  ;;  %v460_v33 = vld [vmem:[%s7593_s4 + $0x148] sm:$0xff]  ;;  %v6042_v35 = vld [vmem:[%s7594_s0 + $0x20] sm:$0xff]  ;;  %v4201_v36 = vpack.c.bf16 %v455_v28, %v451_v27  ;;  %v462_v37 = vld [vmem:[%s7593_s4 + $0x158] sm:$0xff]  ;;  %v4233_v39 = vpack.c.bf16 %v457_v31, %v453_v30 }
  0x26   :  { %331 = vmatmul.mubr.f32.vlgmr.msra.gmra.mrb[0].mxu1 %v5912_v46  ;;  %4186 = vmatpush1.bf16.msra.mxu0 %v4185_v47  ;;  %v464_v34 = vld [vmem:[%s7593_s4 + $0x168] sm:$0xff]  ;;  %v466_v38 = vld [vmem:[%s7593_s4 + $0x178] sm:$0xff]  ;;  %v459_v40 = vld [vmem:[%s7593_s4 + $0x140] sm:$0xff] }
  0x27   :  { %4218 = vmatpush1.bf16.msra.mxu1 %v4217_v50  ;;  %223 = vmatprep.mubr.f32.mxu0 %v7604_v3  ;;  %v463_v41 = vld [vmem:[%s7593_s4 + $0x160] sm:$0xff]  ;;  %v4203_v42 = vpack.c.bf16 %v464_v34, %v460_v33  ;;  %v461_v43 = vld [vmem:[%s7593_s4 + $0x150] sm:$0xff]  ;;  %v4235_v45 = vpack.c.bf16 %v466_v38, %v462_v37  ;;  %v468_v47 = vld [vmem:[%s7593_s4 + $0x188] sm:$0xff] }
  0x28   :  { %336 = vmatprep.mubr.f32.mxu1 %v7604_v3  ;;  %4188 = vmatprep.subr.bf16.mxu0 %v4187_v53  ;;  %v465_v44 = vld [vmem:[%s7593_s4 + $0x170] sm:$0xff]  ;;  %v472_v48 = vld [vmem:[%s7593_s4 + $0x1a8] sm:$0xff]  ;;  %v4205_v50 = vpack.c.bf16 %v463_v41, %v459_v40  ;;  %v470_v51 = vld [vmem:[%s7593_s4 + $0x198] sm:$0xff] }
  0x29   :  { %224 = vmatmul.mubr.f32.gmra.mrb[2].mxu0 %v5943_v59  ;;  %4220 = vmatprep.subr.bf16.mxu1 %v4219_v56  ;;  %v6075_v49 = vld [vmem:[%s7594_s0 + $0x28] sm:$0xff]  ;;  %v474_v52 = vld [vmem:[%s7593_s4 + $0x1b8] sm:$0xff]  ;;  %v4237_v53 = vpack.c.bf16 %v465_v44, %v461_v43  ;;  %v467_v54 = vld [vmem:[%s7593_s4 + $0x180] sm:$0xff]  ;;  %v4207_v56 = vpack.c.bf16 %v472_v48, %v468_v47 }
  0x2a   :  { %337 = vmatmul.mubr.f32.gmra.mrb[2].mxu1 %v5943_v59  ;;  %4190 = vmatpush1.bf16.msra.mxu0 %v4189_v60  ;;  %v471_v55 = vld [vmem:[%s7593_s4 + $0x1a0] sm:$0xff]  ;;  %v469_v57 = vld [vmem:[%s7593_s4 + $0x190] sm:$0xff]  ;;  %v4239_v60 = vpack.c.bf16 %v474_v52, %v470_v51  ;;  %v476_v61 = vld [vmem:[%s7593_s4 + $0x1c8] sm:$0xff] }
  0x2b   :  { %4222 = vmatpush1.bf16.msra.mxu1 %v4221_v63  ;;  %229 = vmatprep.mubr.f32.mxu0 %v7604_v3  ;;  %v473_v58 = vld [vmem:[%s7593_s4 + $0x1b0] sm:$0xff]  ;;  %v480_v62 = vld [vmem:[%s7593_s4 + $0x1e8] sm:$0xff]  ;;  %v4209_v0 = vpack.c.bf16 %v471_v55, %v467_v54  ;;  %v478_v1 = vld [vmem:[%s7593_s4 + $0x1d8] sm:$0xff] }
  0x2c   :  { %342 = vmatprep.mubr.f32.mxu1 %v7604_v3  ;;  %4192 = vmatprep.subr.bf16.mxu0 %v4191_v2  ;;  %v6108_v63 = vld [vmem:[%s7594_s0 + $0x30] sm:$0xff]  ;;  %v482_v2 = vld [vmem:[%s7593_s4 + $0x1f8] sm:$0xff]  ;;  %v4241_v4 = vpack.c.bf16 %v473_v58, %v469_v57  ;;  %v475_v5 = vld [vmem:[%s7593_s4 + $0x1c0] sm:$0xff]  ;;  %v4211_v7 = vpack.c.bf16 %v480_v62, %v476_v61 }
  0x2d   :  { %230 = vmatmul.mubr.f32.gmra.mrb[4].mxu0 %v5976_v9  ;;  %4224 = vmatprep.subr.bf16.mxu1 %v4223_v6  ;;  %v479_v6 = vld [vmem:[%s7593_s4 + $0x1e0] sm:$0xff]  ;;  %v477_v8 = vld [vmem:[%s7593_s4 + $0x1d0] sm:$0xff]  ;;  %v4243_v11 = vpack.c.bf16 %v482_v2, %v478_v1  ;;  %v764_v12 = vld [vmem:[%s7595_s2 + $0x8] sm:$0xff] }
  0x2e   :  { %343 = vmatmul.mubr.f32.gmra.mrb[4].mxu1 %v5976_v9  ;;  %4194 = vmatpush1.bf16.msra.mxu0 %v4193_v10  ;;  %v481_v10 = vld [vmem:[%s7593_s4 + $0x1f0] sm:$0xff]  ;;  %v6141_v14 = vld [vmem:[%s7594_s0 + $0x38] sm:$0xff]  ;;  %v4213_v15 = vpack.c.bf16 %v479_v6, %v475_v5  ;;  %v767_v20 = vld [vmem:[%s7595_s2 + $0x20] sm:$0xff] }
  0x2f   :  { %4226 = vmatpush1.bf16.msra.mxu1 %v4225_v13  ;;  %235 = vmatprep.mubr.f32.mxu0 %v7604_v3  ;;  %v768_v13 = vld [vmem:[%s7595_s2 + $0x28] sm:$0xff]  ;;  %v770_v17 = vld [vmem:[%s7595_s2 + $0x38] sm:$0xff]  ;;  %v4245_v18 = vpack.c.bf16 %v481_v10, %v477_v8  ;;  %v769_v24 = vld [vmem:[%s7595_s2 + $0x30] sm:$0xff] }
  0x30   :  { %348 = vmatprep.mubr.f32.mxu1 %v7604_v3  ;;  %4196 = vmatprep.subr.bf16.mxu0 %v4195_v16  ;;  %v766_v16 = vld [vmem:[%s7595_s2 + $0x18] sm:$0xff]  ;;  %v6157_v21 = vpack.c.bf16 %v768_v13, %v764_v12  ;;  %v776_v27 = vld [vmem:[%s7595_s2 + $0x68] sm:$0xff]  ;;  %v775_v33 = vld [vmem:[%s7595_s2 + $0x60] sm:$0xff] }
  0x31   :  { %236 = vmatmul.mubr.f32.gmra.mrb[6].mxu0 %v6009_v22  ;;  %4228 = vmatprep.subr.bf16.mxu1 %v4227_v19  ;;  %v763_v19 = vld [vmem:[%s7595_s2] sm:$0xff]  ;;  %v6166_v25 = vpack.c.bf16 %v770_v17, %v766_v16  ;;  %v778_v30 = vld [vmem:[%s7595_s2 + $0x78] sm:$0xff]  ;;  %v777_v37 = vld [vmem:[%s7595_s2 + $0x70] sm:$0xff] }
  0x32   :  { %349 = vmatmul.mubr.f32.gmra.mrb[6].mxu1 %v6009_v22  ;;  %4198 = vmatpush1.bf16.msra.mxu0 %v4197_v23  ;;  %v765_v23 = vld [vmem:[%s7595_s2 + $0x10] sm:$0xff]  ;;  %v6175_v28 = vpack.c.bf16 %v767_v20, %v763_v19  ;;  %v784_v40 = vld [vmem:[%s7595_s2 + $0xa8] sm:$0xff]  ;;  %v786_v43 = vld [vmem:[%s7595_s2 + $0xb8] sm:$0xff] }
  0x33   :  { %4230 = vmatpush1.bf16.msra.mxu1 %v4229_v26  ;;  %241 = vmatprep.mubr.f32.mxu0 %v7604_v3  ;;  %v772_v26 = vld [vmem:[%s7595_s2 + $0x48] sm:$0xff]  ;;  %v6184_v31 = vpack.c.bf16 %v769_v24, %v765_v23  ;;  %v781_v48 = vld [vmem:[%s7595_s2 + $0x90] sm:$0xff]  ;;  %v790_v55 = vld [vmem:[%s7595_s2 + $0xd8] sm:$0xff] }
  0x34   :  { %354 = vmatprep.mubr.f32.mxu1 %v7604_v3  ;;  %4200 = vmatprep.subr.bf16.mxu0 %v4199_v29  ;;  %v774_v29 = vld [vmem:[%s7595_s2 + $0x58] sm:$0xff]  ;;  %v6194_v34 = vpack.c.bf16 %v776_v27, %v772_v26  ;;  %v788_v52 = vld [vmem:[%s7595_s2 + $0xc8] sm:$0xff]  ;;  %v791_v58 = vld [vmem:[%s7595_s2 + $0xe0] sm:$0xff] }
  0x35   :  { %242 = vmatmul.mubr.f32.gmra.mrb[8].mxu0 %v6042_v35  ;;  %4232 = vmatprep.subr.bf16.mxu1 %v4231_v32  ;;  %v771_v32 = vld [vmem:[%s7595_s2 + $0x40] sm:$0xff]  ;;  %v6204_v38 = vpack.c.bf16 %v778_v30, %v774_v29  ;;  %v789_v61 = vld [vmem:[%s7595_s2 + $0xd0] sm:$0xff]  ;;  %v796_v1 = vld [vmem:[%s7595_s2 + $0x108] sm:$0xff] }
  0x36   :  { %355 = vmatmul.mubr.f32.gmra.mrb[8].mxu1 %v6042_v35  ;;  %4202 = vmatpush1.bf16.msra.mxu0 %v4201_v36  ;;  %v773_v36 = vld [vmem:[%s7595_s2 + $0x50] sm:$0xff]  ;;  %v6214_v41 = vpack.c.bf16 %v775_v33, %v771_v32  ;;  %v800_v2 = vld [vmem:[%s7595_s2 + $0x128] sm:$0xff]  ;;  %v798_v5 = vld [vmem:[%s7595_s2 + $0x118] sm:$0xff] }
  0x37   :  { %4234 = vmatpush1.bf16.msra.mxu1 %v4233_v39  ;;  %247 = vmatprep.mubr.f32.mxu0 %v7604_v3  ;;  %v780_v39 = vld [vmem:[%s7595_s2 + $0x88] sm:$0xff]  ;;  %v6224_v44 = vpack.c.bf16 %v777_v37, %v773_v36  ;;  %v793_v62 = vld [vmem:[%s7595_s2 + $0xf0] sm:$0xff]  ;;  %v802_v6 = vld [vmem:[%s7595_s2 + $0x138] sm:$0xff]  ;;  %v6314_v10 = vpack.c.bf16 %v800_v2, %v796_v1 }
  0x38   :  { %360 = vmatprep.mubr.f32.mxu1 %v7604_v3  ;;  %4204 = vmatprep.subr.bf16.mxu0 %v4203_v42  ;;  %7690 = vst [vmem:[#allocation10_spill] sm:$0xff] %v6214_v41  ;;  %v782_v42 = vld [vmem:[%s7595_s2 + $0x98] sm:$0xff]  ;;  %v6234_v47 = vpack.c.bf16 %v784_v40, %v780_v39  ;;  %v799_v8 = vld [vmem:[%s7595_s2 + $0x120] sm:$0xff]  ;;  %v801_v12 = vld [vmem:[%s7595_s2 + $0x130] sm:$0xff]  ;;  %v6324_v13 = vpack.c.bf16 %v802_v6, %v798_v5 }
  0x39   :  { %248 = vmatmul.mubr.f32.gmra.mrb[10].mxu0 %v6075_v49  ;;  %4236 = vmatprep.subr.bf16.mxu1 %v4235_v45  ;;  %7691 = vst [vmem:[#allocation11_spill] sm:$0xff] %v6224_v44  ;;  %v783_v45 = vld [vmem:[%s7595_s2 + $0xa0] sm:$0xff]  ;;  %v6244_v51 = vpack.c.bf16 %v786_v43, %v782_v42  ;;  %7700 = vst [vmem:[#allocation20_spill] sm:$0xff] %v6314_v10  ;;  %v808_v16 = vld [vmem:[%s7595_s2 + $0x168] sm:$0xff] }
  0x3a   :  { %361 = vmatmul.mubr.f32.gmra.mrb[10].mxu1 %v6075_v49  ;;  %4206 = vmatpush1.bf16.msra.mxu0 %v4205_v50  ;;  %7692 = vst [vmem:[#allocation12_spill] sm:$0xff] %v6234_v47  ;;  %v785_v50 = vld [vmem:[%s7595_s2 + $0xb0] sm:$0xff]  ;;  %7701 = vst [vmem:[#allocation21_spill] sm:$0xff] %v6324_v13  ;;  %v810_v19 = vld [vmem:[%s7595_s2 + $0x178] sm:$0xff] }
  0x3b   :  { %4238 = vmatpush1.bf16.msra.mxu1 %v4237_v53  ;;  %253 = vmatprep.mubr.f32.mxu0 %v7604_v3  ;;  %7693 = vst [vmem:[#allocation13_spill] sm:$0xff] %v6244_v51  ;;  %v792_v53 = vld [vmem:[%s7595_s2 + $0xe8] sm:$0xff]  ;;  %v6264_v57 = vpack.c.bf16 %v785_v50, %v781_v48  ;;  %v807_v23 = vld [vmem:[%s7595_s2 + $0x160] sm:$0xff]  ;;  %v805_v26 = vld [vmem:[%s7595_s2 + $0x150] sm:$0xff] }
  0x3c   :  { %366 = vmatprep.mubr.f32.mxu1 %v7604_v3  ;;  %4208 = vmatprep.subr.bf16.mxu0 %v4207_v56  ;;  %v794_v56 = vld [vmem:[%s7595_s2 + $0xf8] sm:$0xff]  ;;  %v809_v27 = vld [vmem:[%s7595_s2 + $0x170] sm:$0xff]  ;;  %v812_v30 = vld [vmem:[%s7595_s2 + $0x188] sm:$0xff] }
  0x3d   :  { %254 = vmatmul.mubr.f32.gmra.mrb[12].mxu0 %v6108_v63  ;;  %4240 = vmatprep.subr.bf16.mxu1 %v4239_v60  ;;  %7695 = vst [vmem:[#allocation15_spill] sm:$0xff] %v6264_v57  ;;  %v6274_v60 = vpack.c.bf16 %v792_v53, %v788_v52  ;;  %v816_v32 = vld [vmem:[%s7595_s2 + $0x1a8] sm:$0xff]  ;;  %v814_v36 = vld [vmem:[%s7595_s2 + $0x198] sm:$0xff]  ;;  %v6384_v39 = vpack.c.bf16 %v809_v27, %v805_v26  ;;  %v815_v40 = vld [vmem:[%s7595_s2 + $0x1a0] sm:$0xff] }
  0x3e   :  { %367 = vmatmul.mubr.f32.gmra.mrb[12].mxu1 %v6108_v63  ;;  %4210 = vmatpush1.bf16.msra.mxu0 %v4209_v0  ;;  %v6284_v0 = vpack.c.bf16 %v794_v56, %v790_v55  ;;  %v818_v37 = vld [vmem:[%s7595_s2 + $0x1b8] sm:$0xff]  ;;  %v6394_v42 = vpack.c.bf16 %v816_v32, %v812_v30  ;;  %v813_v43 = vld [vmem:[%s7595_s2 + $0x190] sm:$0xff]  ;;  %v820_v48 = vld [vmem:[%s7595_s2 + $0x1c8] sm:$0xff] }
  0x3f   :  { %4242 = vmatpush1.bf16.msra.mxu1 %v4241_v4  ;;  %259 = vmatprep.mubr.f32.mxu0 %v7604_v3  ;;  %7696 = vst [vmem:[#allocation16_spill] sm:$0xff] %v6274_v60  ;;  %7707 = vst [vmem:[#allocation27_spill] sm:$0xff] %v6384_v39  ;;  %v824_v50 = vld [vmem:[%s7595_s2 + $0x1e8] sm:$0xff]  ;;  %v822_v53 = vld [vmem:[%s7595_s2 + $0x1d8] sm:$0xff] }
  0x40   :  { %372 = vmatprep.mubr.f32.mxu1 %v7604_v3  ;;  %4212 = vmatprep.subr.bf16.mxu0 %v4211_v7  ;;  %7697 = vst [vmem:[#allocation17_spill] sm:$0xff] %v6284_v0  ;;  %v6304_v7 = vpack.c.bf16 %v793_v62, %v789_v61  ;;  %7708 = vst [vmem:[#allocation28_spill] sm:$0xff] %v6394_v42  ;;  %v826_v55 = vld [vmem:[%s7595_s2 + $0x1f8] sm:$0xff]  ;;  %v821_v61 = vld [vmem:[%s7595_s2 + $0x1d0] sm:$0xff] }
  0x41   :  { %260 = vmatmul.mubr.f32.gmra.mrb[14].mxu0 %v6141_v14  ;;  %4244 = vmatprep.subr.bf16.mxu1 %v4243_v11  ;;  %v797_v11 = vld [vmem:[%s7595_s2 + $0x110] sm:$0xff]  ;;  %v6444_v1 = vpack.c.bf16 %v826_v55, %v822_v53  ;;  %v828_v2 = vld [vmem:[%s7596_s5 + $0x8] sm:$0xff]  ;;  %v838_v26 = vld [vmem:[%s7596_s5 + $0x58] sm:$0xff] }
  0x42   :  { %373 = vmatmul.mubr.f32.gmra.mrb[14].mxu1 %v6141_v14  ;;  %4214 = vmatpush1.bf16.msra.mxu0 %v4213_v15  ;;  %7699 = vst [vmem:[#allocation19_spill] sm:$0xff] %v6304_v7  ;;  %v804_v15 = vld [vmem:[%s7595_s2 + $0x148] sm:$0xff]  ;;  %v6344_v20 = vpack.c.bf16 %v801_v12, %v797_v11  ;;  %v825_v62 = vld [vmem:[%s7595_s2 + $0x1f0] sm:$0xff]  ;;  %v831_v12 = vld [vmem:[%s7596_s5 + $0x20] sm:$0xff] }
  0x43   :  { %4246 = vmatpush1.bf16.msra.mxu1 %v4245_v18  ;;  %569 = vmatprep.mubr.f32.mxu0 %v7604_v3  ;;  %v806_v18 = vld [vmem:[%s7595_s2 + $0x158] sm:$0xff]  ;;  %v6354_v24 = vpack.c.bf16 %v808_v16, %v804_v15  ;;  %7713 = vst [vmem:[#allocation33_spill] sm:$0xff] %v6444_v1  ;;  %v832_v5 = vld [vmem:[%s7596_s5 + $0x28] sm:$0xff]  ;;  %v6464_v11 = vpack.c.bf16 %v825_v62, %v821_v61  ;;  %v829_v15 = vld [vmem:[%s7596_s5 + $0x10] sm:$0xff] }
  0x44   :  { %682 = vmatprep.mubr.f32.mxu1 %v7604_v3  ;;  %4248 = vmatprep.subr.bf16.mxu0 %v6157_v21  ;;  %7703 = vst [vmem:[#allocation23_spill] sm:$0xff] %v6344_v20  ;;  %v6364_v29 = vpack.c.bf16 %v810_v19, %v806_v18  ;;  %v6477_v16 = vpack.c.bf16 %v832_v5, %v828_v2  ;;  %v833_v18 = vld [vmem:[%s7596_s5 + $0x30] sm:$0xff]  ;;  %v836_v19 = vld [vmem:[%s7596_s5 + $0x48] sm:$0xff]  ;;  %v842_v27 = vld [vmem:[%s7596_s5 + $0x78] sm:$0xff] }
  0x45   :  { %570 = vmatmul.mubr.f32.vlgmr.msra.gmra.mrb[16].mxu0 %v5912_v46  ;;  %4280 = vmatprep.subr.bf16.mxu1 %v6166_v25  ;;  %7704 = vst [vmem:[#allocation24_spill] sm:$0xff] %v6354_v24  ;;  %7715 = vst [vmem:[#allocation35_spill] sm:$0xff] %v6464_v11  ;;  %v6504_v32 = vpack.c.bf16 %v833_v18, %v829_v15  ;;  %v850_v53 = vld [vmem:[%s7596_s5 + $0xb8] sm:$0xff]  ;;  %v843_v61 = vld [vmem:[%s7596_s5 + $0x80] sm:$0xff] }
  0x46   :  { %683 = vmatmul.mubr.f32.vlgmr.msra.gmra.mrb[16].mxu1 %v5912_v46  ;;  %4250 = vmatpush1.bf16.msra.mxu0 %v6175_v28  ;;  %v779_v46 = vld [vmem:[%s7595_s2 + $0x80] sm:$0xff]  ;;  %7705 = vst [vmem:[#allocation25_spill] sm:$0xff] %v6364_v29  ;;  %7716 = vst [vmem:[#allocation36_spill] sm:$0xff] %v6477_v16  ;;  %v845_v2 = vld [vmem:[%s7596_s5 + $0x90] sm:$0xff] }
  0x47   :  { %4282 = vmatpush1.bf16.msra.mxu1 %v6184_v31  ;;  %575 = vmatprep.mubr.f32.mxu0 %v7604_v3  ;;  %v6254_v54 = vpack.c.bf16 %v783_v45, %v779_v46  ;;  %v817_v46 = vld [vmem:[%s7595_s2 + $0x1b0] sm:$0xff]  ;;  %v6404_v45 = vpack.c.bf16 %v818_v37, %v814_v36  ;;  %v835_v37 = vld [vmem:[%s7596_s5 + $0x40] sm:$0xff]  ;;  %v858_v15 = vld [vmem:[%s7596_s5 + $0xf8] sm:$0xff] }
  0x48   :  { %688 = vmatprep.mubr.f32.mxu1 %v7604_v3  ;;  %4252 = vmatprep.subr.bf16.mxu0 %v6194_v34  ;;  %v6424_v56 = vpack.c.bf16 %v817_v46, %v813_v43  ;;  %v841_v43 = vld [vmem:[%s7596_s5 + $0x70] sm:$0xff]  ;;  %v844_v46 = vld [vmem:[%s7596_s5 + $0x88] sm:$0xff]  ;;  %v847_v62 = vld [vmem:[%s7596_s5 + $0xa0] sm:$0xff] }
  0x49   :  { %576 = vmatmul.mubr.f32.gmra.mrb[18].mxu0 %v5943_v59  ;;  %4284 = vmatprep.subr.bf16.mxu1 %v6204_v38  ;;  %7694 = vst [vmem:[#allocation14_spill] sm:$0xff] %v6254_v54  ;;  %7709 = vst [vmem:[#allocation29_spill] sm:$0xff] %v6404_v45  ;;  %v6578_v18 = vpack.c.bf16 %v847_v62, %v843_v61 }
  0x4a   :  { %689 = vmatmul.mubr.f32.gmra.mrb[18].mxu1 %v5943_v59  ;;  %4254 = vmatpush1.bf16.msra.mxu0 %v6214_v41  ;;  %v787_v59 = vld [vmem:[%s7595_s2 + $0xc0] sm:$0xff]  ;;  %7711 = vst [vmem:[#allocation31_spill] sm:$0xff] %v6424_v56 }
  0x4b   :  { %4286 = vmatpush1.bf16.msra.mxu1 %v6224_v44  ;;  %581 = vmatprep.mubr.f32.mxu0 %v7604_v3  ;;  %v6294_v4 = vpack.c.bf16 %v791_v58, %v787_v59  ;;  %v823_v59 = vld [vmem:[%s7595_s2 + $0x1e0] sm:$0xff]  ;;  %v6434_v58 = vpack.c.bf16 %v824_v50, %v820_v48  ;;  %v848_v48 = vld [vmem:[%s7596_s5 + $0xa8] sm:$0xff]  ;;  %v846_v50 = vld [vmem:[%s7596_s5 + $0x98] sm:$0xff] }
  0x4c   :  { %694 = vmatprep.mubr.f32.mxu1 %v7604_v3  ;;  %4256 = vmatprep.subr.bf16.mxu0 %v6234_v47  ;;  %v6558_v5 = vpack.c.bf16 %v850_v53, %v846_v50  ;;  %v866_v50 = vld [vmem:[%s7596_s5 + $0x138] sm:$0xff] }
  0x4d   :  { %582 = vmatmul.mubr.f32.gmra.mrb[20].mxu0 %v5976_v9  ;;  %4288 = vmatprep.subr.bf16.mxu1 %v6244_v51  ;;  %7698 = vst [vmem:[#allocation18_spill] sm:$0xff] %v6294_v4  ;;  %7712 = vst [vmem:[#allocation32_spill] sm:$0xff] %v6434_v58 }
  0x4e   :  { %695 = vmatmul.mubr.f32.gmra.mrb[20].mxu1 %v5976_v9  ;;  %4258 = vmatpush1.bf16.msra.mxu0 %v6254_v54  ;;  %v795_v9 = vld [vmem:[%s7595_s2 + $0x100] sm:$0xff] }
  0x4f   :  { %4290 = vmatpush1.bf16.msra.mxu1 %v6264_v57  ;;  %587 = vmatprep.mubr.f32.mxu0 %v7604_v3  ;;  %v6334_v17 = vpack.c.bf16 %v799_v8, %v795_v9  ;;  %v830_v9 = vld [vmem:[%s7596_s5 + $0x18] sm:$0xff] }
  0x50   :  { %700 = vmatprep.mubr.f32.mxu1 %v7604_v3  ;;  %4260 = vmatprep.subr.bf16.mxu0 %v6274_v60  ;;  %v834_v8 = vld [vmem:[%s7596_s5 + $0x38] sm:$0xff] }
  0x51   :  { %588 = vmatmul.mubr.f32.gmra.mrb[22].mxu0 %v6009_v22  ;;  %4292 = vmatprep.subr.bf16.mxu1 %v6284_v0  ;;  %7702 = vst [vmem:[#allocation22_spill] sm:$0xff] %v6334_v17 }
  0x52   :  { %701 = vmatmul.mubr.f32.gmra.mrb[22].mxu1 %v6009_v22  ;;  %4262 = vmatpush1.bf16.msra.mxu0 %v6294_v4  ;;  %v803_v22 = vld [vmem:[%s7595_s2 + $0x140] sm:$0xff] }
  0x53   :  { %4294 = vmatpush1.bf16.msra.mxu1 %v6304_v7  ;;  %593 = vmatprep.mubr.f32.mxu0 %v7604_v3  ;;  %v6374_v33 = vpack.c.bf16 %v807_v23, %v803_v22  ;;  %v840_v22 = vld [vmem:[%s7596_s5 + $0x68] sm:$0xff]  ;;  %v6490_v23 = vpack.c.bf16 %v834_v8, %v830_v9  ;;  %v849_v9 = vld [vmem:[%s7596_s5 + $0xb0] sm:$0xff] }
  0x54   :  { %706 = vmatprep.mubr.f32.mxu1 %v7604_v3  ;;  %4264 = vmatprep.subr.bf16.mxu0 %v6314_v10  ;;  %v6506_v36 = vpack.c.bf16 %v840_v22, %v836_v19  ;;  %v852_v8 = vld [vmem:[%s7596_s5 + $0xc8] sm:$0xff]  ;;  %v6582_v19 = vpack.c.bf16 %v849_v9, %v845_v2  ;;  %v859_v2 = vld [vmem:[%s7596_s5 + $0x100] sm:$0xff] }
  0x55   :  { %594 = vmatmul.mubr.f32.gmra.mrb[24].mxu0 %v6042_v35  ;;  %4296 = vmatprep.subr.bf16.mxu1 %v6324_v13  ;;  %7706 = vst [vmem:[#allocation26_spill] sm:$0xff] %v6374_v33  ;;  %7717 = vst [vmem:[#allocation37_spill] sm:$0xff] %v6490_v23  ;;  %v863_v9 = vld [vmem:[%s7596_s5 + $0x120] sm:$0xff] }
  0x56   :  { %707 = vmatmul.mubr.f32.gmra.mrb[24].mxu1 %v6042_v35  ;;  %4266 = vmatpush1.bf16.msra.mxu0 %v6334_v17  ;;  %v811_v35 = vld [vmem:[%s7595_s2 + $0x180] sm:$0xff] }
  0x57   :  { %4298 = vmatpush1.bf16.msra.mxu1 %v6344_v20  ;;  %599 = vmatprep.mubr.f32.mxu0 %v7604_v3  ;;  %v6414_v52 = vpack.c.bf16 %v815_v40, %v811_v35  ;;  %v837_v35 = vld [vmem:[%s7596_s5 + $0x50] sm:$0xff]  ;;  %v6519_v40 = vpack.c.bf16 %v842_v27, %v838_v26  ;;  %v851_v26 = vld [vmem:[%s7596_s5 + $0xc0] sm:$0xff] }
  0x58   :  { %712 = vmatprep.mubr.f32.mxu1 %v7604_v3  ;;  %4268 = vmatprep.subr.bf16.mxu0 %v6354_v24  ;;  %v855_v27 = vld [vmem:[%s7596_s5 + $0xe0] sm:$0xff] }
  0x59   :  { %600 = vmatmul.mubr.f32.gmra.mrb[26].mxu0 %v6075_v49  ;;  %4300 = vmatprep.subr.bf16.mxu1 %v6364_v29  ;;  %7710 = vst [vmem:[#allocation30_spill] sm:$0xff] %v6414_v52  ;;  %v6614_v53 = vpack.c.bf16 %v855_v27, %v851_v26  ;;  %v872_v26 = vld [vmem:[%s7596_s5 + $0x168] sm:$0xff]  ;;  %v870_v27 = vld [vmem:[%s7596_s5 + $0x158] sm:$0xff] }
  0x5a   :  { %713 = vmatmul.mubr.f32.gmra.mrb[26].mxu1 %v6075_v49  ;;  %4270 = vmatpush1.bf16.msra.mxu0 %v6374_v33  ;;  %v819_v49 = vld [vmem:[%s7595_s2 + $0x1c0] sm:$0xff] }
  0x5b   :  { %4302 = vmatpush1.bf16.msra.mxu1 %v6384_v39  ;;  %605 = vmatprep.mubr.f32.mxu0 %v7604_v3  ;;  %v6454_v6 = vpack.c.bf16 %v823_v59, %v819_v49  ;;  %v6544_v49 = vpack.c.bf16 %v841_v43, %v837_v35  ;;  %v6546_v59 = vpack.c.bf16 %v848_v48, %v844_v46  ;;  %v857_v35 = vld [vmem:[%s7596_s5 + $0xf0] sm:$0xff]  ;;  %v860_v43 = vld [vmem:[%s7596_s5 + $0x108] sm:$0xff]  ;;  %v862_v48 = vld [vmem:[%s7596_s5 + $0x118] sm:$0xff] }
  0x5c   :  { %718 = vmatprep.mubr.f32.mxu1 %v7604_v3  ;;  %4272 = vmatprep.subr.bf16.mxu0 %v6394_v42  ;;  %v864_v46 = vld [vmem:[%s7596_s5 + $0x128] sm:$0xff] }
  0x5d   :  { %606 = vmatmul.mubr.f32.gmra.mrb[28].mxu0 %v6108_v63  ;;  %4304 = vmatprep.subr.bf16.mxu1 %v6404_v45  ;;  %7714 = vst [vmem:[#allocation34_spill] sm:$0xff] %v6454_v6  ;;  %v6620_v62 = vpack.c.bf16 %v864_v46, %v860_v43 }
  0x5e   :  { %719 = vmatmul.mubr.f32.gmra.mrb[28].mxu1 %v6108_v63  ;;  %4274 = vmatpush1.bf16.msra.mxu0 %v6414_v52  ;;  %v827_v63 = vld [vmem:[%s7596_s5] sm:$0xff] }
  0x5f   :  { %4306 = vmatpush1.bf16.msra.mxu1 %v6424_v56  ;;  %611 = vmatprep.mubr.f32.mxu0 %v7604_v3  ;;  %v6500_v30 = vpack.c.bf16 %v831_v12, %v827_v63  ;;  %v856_v63 = vld [vmem:[%s7596_s5 + $0xe8] sm:$0xff]  ;;  %v854_v12 = vld [vmem:[%s7596_s5 + $0xd8] sm:$0xff]  ;;  %7719 = vst [vmem:[#allocation39_spill] sm:$0xff] %v6620_v62 }
  0x60   :  { %724 = vmatprep.mubr.f32.mxu1 %v7604_v3  ;;  %4276 = vmatprep.subr.bf16.mxu0 %v6434_v58  ;;  %v6584_v22 = vpack.c.bf16 %v856_v63, %v852_v8  ;;  %v861_v8 = vld [vmem:[%s7596_s5 + $0x110] sm:$0xff]  ;;  %v6632_v63 = vpack.c.bf16 %v866_v50, %v862_v48  ;;  %v867_v48 = vld [vmem:[%s7596_s5 + $0x140] sm:$0xff] }
  0x61   :  { %612 = vmatmul.mubr.f32.gmra.mrb[30].mxu0 %v6141_v14  ;;  %4308 = vmatprep.subr.bf16.mxu1 %v6444_v1  ;;  %v871_v50 = vld [vmem:[%s7596_s5 + $0x160] sm:$0xff] }
  0x62   :  { %725 = vmatmul.mubr.f32.gmra.mrb[30].mxu1 %v6141_v14  ;;  %4278 = vmatpush1.bf16.msra.mxu0 %v6454_v6  ;;  %v839_v14 = vld [vmem:[%s7596_s5 + $0x60] sm:$0xff]  ;;  %7720 = vst [vmem:[#allocation40_spill] sm:$0xff] %v6632_v63 }
  0x63   :  { %4310 = vmatpush1.bf16.msra.mxu1 %v6464_v11  ;;  %966 = vmatprep.mubr.f32.mxu0 %v7604_v3  ;;  %v6540_v55 = vpack.c.bf16 %v839_v14, %v835_v37  ;;  %v853_v37 = vld [vmem:[%s7596_s5 + $0xd0] sm:$0xff]  ;;  %v6596_v14 = vpack.c.bf16 %v858_v15, %v854_v12  ;;  %v868_v15 = vld [vmem:[%s7596_s5 + $0x148] sm:$0xff] }
  0x64   :  { %1037 = vmatprep.mubr.f32.mxu1 %v7604_v3  ;;  %4312 = vmatprep.subr.bf16.mxu0 %v6477_v16  ;;  %v6618_v61 = vpack.c.bf16 %v857_v35, %v853_v37  ;;  %v865_v12 = vld [vmem:[%s7596_s5 + $0x130] sm:$0xff]  ;;  %v874_v37 = vld [vmem:[%s7596_s5 + $0x178] sm:$0xff]  ;;  %v6650_v35 = vpack.c.bf16 %v863_v9, %v859_v2  ;;  %v6656_v46 = vpack.c.bf16 %v872_v26, %v868_v15  ;;  %v880_v15 = vld [vmem:[%s7596_s5 + $0x1a8] sm:$0xff] }
  0x65   :  { %967 = vmatmul.mubr.f32.vlgmr.msra.gmra.mrb[0].mxu0 %v7604_v3  ;;  %4344 = vmatprep.subr.bf16.mxu1 %v6490_v23  ;;  %v6654_v43 = vpack.c.bf16 %v865_v12, %v861_v8  ;;  %v869_v2 = vld [vmem:[%s7596_s5 + $0x150] sm:$0xff]  ;;  %v6668_v9 = vpack.c.bf16 %v874_v37, %v870_v27  ;;  %v876_v12 = vld [vmem:[%s7596_s5 + $0x188] sm:$0xff]  ;;  %v878_v26 = vld [vmem:[%s7596_s5 + $0x198] sm:$0xff]  ;;  %v6686_v37 = vpack.c.bf16 %v871_v50, %v867_v48 }
  0x66   :  { %1038 = vmatmul.mubr.f32.vlgmr.msra.gmra.mrb[0].mxu1 %v7604_v3  ;;  %4314 = vmatpush1.bf16.msra.mxu0 %v6500_v30  ;;  %7718 = vst [vmem:[#allocation38_spill] sm:$0xff] %v6618_v61  ;;  %7721 = vst [vmem:[#allocation41_spill] sm:$0xff] %v6650_v35  ;;  %v873_v8 = vld [vmem:[%s7596_s5 + $0x170] sm:$0xff]  ;;  %v882_v27 = vld [vmem:[%s7596_s5 + $0x1b8] sm:$0xff] }
  0x67   :  { %4346 = vmatpush1.bf16.msra.mxu1 %v6504_v32  ;;  %4316 = vmatprep.subr.bf16.mxu0 %v6506_v36  ;;  %7722 = vst [vmem:[#allocation42_spill] sm:$0xff] %v6654_v43  ;;  %7723 = vst [vmem:[#allocation43_spill] sm:$0xff] %v6656_v46  ;;  %v877_v48 = vld [vmem:[%s7596_s5 + $0x190] sm:$0xff]  ;;  %v6704_v50 = vpack.c.bf16 %v882_v27, %v878_v26  ;;  %v890_v26 = vld [vmem:[%s7596_s5 + $0x1f8] sm:$0xff] }
  0x68   :  { %4348 = vmatprep.subr.bf16.mxu1 %v6519_v40  ;;  %1138 = vmatprep.mubr.f32.mxu0 %v7604_v3  ;;  %7724 = vst [vmem:[#allocation44_spill] sm:$0xff] %v6668_v9 }
  0x69   :  { %1209 = vmatprep.mubr.f32.mxu1 %v7604_v3  ;;  %v6690_v3 = vpack.c.bf16 %v873_v8, %v869_v2  ;;  %v881_v2 = vld [vmem:[%s7596_s5 + $0x1b0] sm:$0xff]  ;;  %v884_v8 = vld [vmem:[%s7596_s5 + $0x1c8] sm:$0xff] }
  0x6a   :  { %4318 = vmatpush1.bf16.msra.mxu0 %v6540_v55 }
  0x6b   :  { %4350 = vmatpush1.bf16.msra.mxu1 %v6544_v49  ;;  %4320 = vmatprep.subr.bf16.mxu0 %v6546_v59 }
  0x6c   :  { %4352 = vmatprep.subr.bf16.mxu1 %v6558_v5 }
  0x6e   :  { %4322 = vmatpush1.bf16.msra.mxu0 %v6578_v18 }
  0x6f   :  { %4354 = vmatpush1.bf16.msra.mxu1 %v6582_v19  ;;  %4324 = vmatprep.subr.bf16.mxu0 %v6584_v22 }
  0x70   :  { %4356 = vmatprep.subr.bf16.mxu1 %v6596_v14 }
  0x72   :  { %4326 = vmatpush1.bf16.msra.mxu0 %v6614_v53 }
  0x73   :  { %4358 = vmatpush1.bf16.msra.mxu1 %v6618_v61  ;;  %4328 = vmatprep.subr.bf16.mxu0 %v6620_v62  ;;  %v875_v62 = vld [vmem:[%s7596_s5 + $0x180] sm:$0xff] }
  0x74   :  { %4360 = vmatprep.subr.bf16.mxu1 %v6632_v63  ;;  %v6692_v63 = vpack.c.bf16 %v880_v15, %v876_v12  ;;  %v879_v61 = vld [vmem:[%s7596_s5 + $0x1a0] sm:$0xff]  ;;  %v888_v12 = vld [vmem:[%s7596_s5 + $0x1e8] sm:$0xff]  ;;  %v886_v15 = vld [vmem:[%s7596_s5 + $0x1d8] sm:$0xff] }
  0x75   :  { %v6722_v27 = vpack.c.bf16 %v879_v61, %v875_v62  ;;  %v6737_v61 = vpack.c.bf16 %v890_v26, %v886_v15  ;;  %v885_v62 = vld [vmem:[%s7596_s5 + $0x1d0] sm:$0xff]  ;;  %v131_v26 = vld [vmem:[%s7597_s3] sm:$0xf] }
  0x76   :  { %4330 = vmatpush1.bf16.msra.mxu0 %v6650_v35  ;;  %v887_v35 = vld [vmem:[%s7596_s5 + $0x1e0] sm:$0xff] }
  0x77   :  { %4362 = vmatpush1.bf16.msra.mxu1 %v6654_v43  ;;  %4332 = vmatprep.subr.bf16.mxu0 %v6656_v46  ;;  %v6728_v46 = vpack.c.bf16 %v888_v12, %v884_v8  ;;  %v883_v43 = vld [vmem:[%s7596_s5 + $0x1c0] sm:$0xff]  ;;  %v7725_v12 = vmov 0.0  }
  0x78   :  { %4364 = vmatprep.subr.bf16.mxu1 %v6668_v9  ;;  %v6726_v9 = vpack.c.bf16 %v881_v2, %v877_v48  ;;  %v889_v48 = vld [vmem:[%s7596_s5 + $0x1f0] sm:$0xff]  ;;  %v6746_v2 = vpack.c.bf16 %v887_v35, %v883_v43  ;;  %v133_v35 = vlaneseq }
  0x79   :  { %v6750_v8 = vpack.c.bf16 %v889_v48, %v885_v62 }
  0x7a   :  { %4334 = vmatpush1.bf16.msra.mxu0 %v6686_v37  ;;  %v134_v43 = vshrl.u32 %v133_v35, 7 }
  0x7b   :  { %4366 = vmatpush1.bf16.msra.mxu1 %v6690_v3  ;;  %4336 = vmatprep.subr.bf16.mxu0 %v6692_v63 }
  0x7c   :  { %4368 = vmatprep.subr.bf16.mxu1 %v6704_v50  ;;  %v135_v15 = vsub.s32 0, %v134_v43  ;;  %v139_v62 = vsub.s32 1, %v134_v43 }
  0x7e   :  { %4338 = vmatpush1.bf16.msra.mxu0 %v6722_v27  ;;  %v6796_v48 = vrot.slane %v131_v26, %v135_v15 }
  0x7f   :  { %4370 = vmatpush1.bf16.msra.mxu1 %v6726_v9  ;;  %4340 = vmatprep.subr.bf16.mxu0 %v6728_v46 }
  0x80   :  { %4372 = vmatprep.subr.bf16.mxu1 %v6737_v61  ;;  %7726 = vst [vmem:[#allocation45_spill] sm:$0xff] %v6796_v48 }
  0x82   :  { %4342 = vmatpush1.bf16.msra.mxu0 %v6746_v2 }
  0x83   :  { %4374 = vmatpush1.bf16.msra.mxu1 %v6750_v8  ;;  %4376 = vmatprep.subr.bf16.mxu0 %v6157_v21 }
  0x84   :  { %4408 = vmatprep.subr.bf16.mxu1 %v6166_v25 }
  0x85   :  { %1139 = vmatmul.mubr.f32.vlgmr.msra.gmra.mrb[30].mxu0 %v7725_v12 }
  0x86   :  { %1210 = vmatmul.mubr.f32.vlgmr.msra.gmra.mrb[30].mxu1 %v7725_v12  ;;  %4378 = vmatpush1.bf16.msra.mxu0 %v6175_v28 }
  0x87   :  { %4410 = vmatpush1.bf16.msra.mxu1 %v6184_v31  ;;  %4380 = vmatprep.subr.bf16.mxu0 %v6194_v34 }
  0x88   :  { %4412 = vmatprep.subr.bf16.mxu1 %v6204_v38  ;;  %1311 = vmatprep.mubr.f32.mxu0 %v7725_v12 }
  0x89   :  { %1382 = vmatprep.mubr.f32.mxu1 %v7725_v12 }
  0x8a   :  { %4382 = vmatpush1.bf16.msra.mxu0 %v6214_v41 }
  0x8b   :  { %4414 = vmatpush1.bf16.msra.mxu1 %v6224_v44  ;;  %4384 = vmatprep.subr.bf16.mxu0 %v6234_v47 }
  0x8c   :  { %4416 = vmatprep.subr.bf16.mxu1 %v6244_v51 }
  0x8e   :  { %4386 = vmatpush1.bf16.msra.mxu0 %v6254_v54 }
  0x8f   :  { %4418 = vmatpush1.bf16.msra.mxu1 %v6264_v57  ;;  %4388 = vmatprep.subr.bf16.mxu0 %v6274_v60 }
  0x90   :  { %4420 = vmatprep.subr.bf16.mxu1 %v6284_v0 }
  0x92   :  { %4390 = vmatpush1.bf16.msra.mxu0 %v6294_v4 }
  0x93   :  { %4422 = vmatpush1.bf16.msra.mxu1 %v6304_v7  ;;  %4392 = vmatprep.subr.bf16.mxu0 %v6314_v10 }
  0x94   :  { %4424 = vmatprep.subr.bf16.mxu1 %v6324_v13 }
  0x96   :  { %4394 = vmatpush1.bf16.msra.mxu0 %v6334_v17 }
  0x97   :  { %4426 = vmatpush1.bf16.msra.mxu1 %v6344_v20  ;;  %4396 = vmatprep.subr.bf16.mxu0 %v6354_v24 }
  0x98   :  { %4428 = vmatprep.subr.bf16.mxu1 %v6364_v29 }
  0x9a   :  { %4398 = vmatpush1.bf16.msra.mxu0 %v6374_v33 }
  0x9b   :  { %4430 = vmatpush1.bf16.msra.mxu1 %v6384_v39  ;;  %4400 = vmatprep.subr.bf16.mxu0 %v6394_v42 }
  0x9c   :  { %4432 = vmatprep.subr.bf16.mxu1 %v6404_v45 }
  0x9e   :  { %4402 = vmatpush1.bf16.msra.mxu0 %v6414_v52  ;;  %v147_v52 = vsub.s32 3, %v134_v43 }
  0x9f   :  { %4434 = vmatpush1.bf16.msra.mxu1 %v6424_v56  ;;  %4404 = vmatprep.subr.bf16.mxu0 %v6434_v58  ;;  %v143_v58 = vsub.s32 2, %v134_v43 }
  0xa0   :  { %4436 = vmatprep.subr.bf16.mxu1 %v6444_v1  ;;  %v6798_v1 = vrot.slane %v131_v26, %v139_v62  ;;  %v6805_v29 = vrot.slane %v131_v26, %v147_v52 }
  0xa1   :  { %v6801_v56 = vrot.slane %v131_v26, %v143_v58 }
  0xa2   :  { %4406 = vmatpush1.bf16.msra.mxu0 %v6454_v6  ;;  %7727 = vst [vmem:[#allocation46_spill] sm:$0xff] %v6798_v1 }
  0xa3   :  { %4438 = vmatpush1.bf16.msra.mxu1 %v6464_v11  ;;  %4440 = vmatprep.subr.bf16.mxu0 %v6477_v16 }
  0xa4   :  { %4472 = vmatprep.subr.bf16.mxu1 %v6490_v23 }
 0x138   :  { %v968_v6 = vpop.f32.mrb[0].mxu0 }
 0x139   :  { %v5335_v11 = vadd.f32 %v968_v6, %v6796_v48  ;;  %v1039_v16 = vpop.f32.mrb[0].mxu1  ;;  %v970_v23 = vpop.f32.mrb[1].mxu0 }
 0x13a   :  { %v5336_v35 = vadd.f32 %v970_v23, %v6798_v1  ;;  %v1041_v45 = vpop.f32.mrb[1].mxu1  ;;  %v5351_v33 = vadd.f32 %v1039_v16, %v6801_v56 }
 0x13b   :  { %v1048_v42 = vmul.f32 0.5, %v5335_v11  ;;  %v5352_v24 = vadd.f32 %v1041_v45, %v6805_v29 }
 0x13c   :  { %v1052_v39 = vmul.f32 0.5, %v5336_v35 }
 0x13d   :  { %5464 = vtanh.f32 %v1048_v42  ;;  %v1057_v6 = vmul.f32 0.5, %v5352_v24 }
 0x13e   :  { %5466 = vtanh.f32 %v1052_v39 }
 0x13f   :  { %5468 = vtanh.f32 %v5351_v33  ;;  %v483_v33 = vld [vmem:[%s7598_s6] sm:$0xf] }
 0x140   :  { %5470 = vtanh.f32 %v1057_v6  ;;  %v6814_v24 = vrot.slane %v483_v33, %v135_v15  ;;  %v6816_v16 = vrot.slane %v483_v33, %v139_v62 }
 0x147   :  { %v5465_v48 = vpop.eup %5464 }
 0x148   :  { %v5467_v20 = vpop.eup %5466  ;;  %v1050_v17 = vmul.f32 0.5, %v5465_v48 }
 0x149   :  { %v1054_v13 = vmul.f32 0.5, %v5467_v20  ;;  %v5469_v23 = vpop.eup %5468 }
 0x14a   :  { %v1051_v43 = vadd.f32 0.5, %v1050_v17  ;;  %v5471_v39 = vpop.eup %5470 }
 0x14b   :  { %v1055_v1 = vadd.f32 0.5, %v1054_v13  ;;  %v1059_v45 = vmul.f32 0.5, %v5471_v39  ;;  %v6819_v13 = vrot.slane %v483_v33, %v143_v58  ;;  %v6825_v39 = vrot.slane %v483_v33, %v147_v52 }
 0x14c   :  { %v1062_v11 = vmul.f32 %v5469_v23, %v1051_v43 }
 0x14d   :  { %v1061_v35 = vmul.f32 0.0, %v1055_v1  ;;  %v1060_v48 = vadd.f32 0.5, %v1059_v45 }
 0x14f   :  { %v6808_v42 = vadd.f32 %v1062_v11, %v1061_v35 }
 0x151   :  { %5472 = vtanh.f32 %v6808_v42 }
 0x158   :  { %v1140_v20 = vpop.f32.mrb[30].mxu0 }
 0x159   :  { %v5381_v17 = vadd.f32 %v1140_v20, %v6814_v24  ;;  %v1211_v1 = vpop.f32.mrb[30].mxu1  ;;  %v1142_v26 = vpop.f32.mrb[31].mxu0 }
 0x15a   :  { %v5382_v6 = vadd.f32 %v1142_v26, %v6816_v16  ;;  %v1213_v43 = vpop.f32.mrb[31].mxu1  ;;  %v5397_v62 = vadd.f32 %v1211_v1, %v6819_v13 }
 0x15b   :  { %v5473_v23 = vpop.eup %5472  ;;  %v1220_v11 = vmul.f32 0.5, %v5381_v17  ;;  %v5398_v58 = vadd.f32 %v1213_v43, %v6825_v39 }
 0x15c   :  { %v6822_v35 = vmul.f32 %v5473_v23, %v1060_v48  ;;  %v1224_v15 = vmul.f32 0.5, %v5382_v6  ;;  %v7729_v6 = vld [vmem:[#allocation38_spill] sm:$0xff]  ;;  %v7730_v23 = vld [vmem:[#allocation39_spill] sm:$0xff] }
 0x15d   :  { %5474 = vtanh.f32 %v1220_v11  ;;  %v1229_v52 = vmul.f32 0.5, %v5398_v58  ;;  %v7731_v11 = vld [vmem:[#allocation40_spill] sm:$0xff]  ;;  %v7732_v58 = vld [vmem:[#allocation41_spill] sm:$0xff] }
 0x15e   :  { %7728 = vst [vmem:[#allocation47_spill] sm:$0xff] %v6822_v35  ;;  %5476 = vtanh.f32 %v1224_v15  ;;  %1312 = vmatmul.mubr.f32.vlgmr.msra.gmra.mrb[2].mxu0 %v6822_v35  ;;  %1383 = vmatmul.mubr.f32.vlgmr.msra.gmra.mrb[2].mxu1 %v6822_v35  ;;  %v7744_v35 = vld [vmem:[#allocation28_spill] sm:$0xff] }
 0x15f   :  { %4442 = vmatpush1.bf16.msra.mxu0 %v6500_v30  ;;  %4474 = vmatpush1.bf16.msra.mxu1 %v6504_v32  ;;  %5478 = vtanh.f32 %v5397_v62 }
 0x160   :  { %4444 = vmatprep.subr.bf16.mxu0 %v6506_v36  ;;  %4476 = vmatprep.subr.bf16.mxu1 %v6519_v40  ;;  %5480 = vtanh.f32 %v1229_v52  ;;  %v7734_v52 = vld [vmem:[#allocation43_spill] sm:$0xff] }
 0x161   :  { %1484 = vmatprep.mubr.f32.mxu0 %v7725_v12  ;;  %1555 = vmatprep.mubr.f32.mxu1 %v7725_v12 }
 0x163   :  { %4446 = vmatpush1.bf16.msra.mxu0 %v6540_v55  ;;  %4478 = vmatpush1.bf16.msra.mxu1 %v6544_v49 }
 0x164   :  { %4448 = vmatprep.subr.bf16.mxu0 %v6546_v59  ;;  %4480 = vmatprep.subr.bf16.mxu1 %v6558_v5 }
 0x167   :  { %v5475_v33 = vpop.eup %5474  ;;  %4450 = vmatpush1.bf16.msra.mxu0 %v6578_v18  ;;  %4482 = vmatpush1.bf16.msra.mxu1 %v6582_v19 }
 0x168   :  { %v5477_v45 = vpop.eup %5476  ;;  %v1222_v20 = vmul.f32 0.5, %v5475_v33  ;;  %4452 = vmatprep.subr.bf16.mxu0 %v6584_v22  ;;  %4484 = vmatprep.subr.bf16.mxu1 %v6596_v14  ;;  %v7733_v33 = vld [vmem:[#allocation42_spill] sm:$0xff] }
 0x169   :  { %v1226_v17 = vmul.f32 0.5, %v5477_v45  ;;  %v5479_v26 = vpop.eup %5478  ;;  %v7735_v45 = vld [vmem:[#allocation44_spill] sm:$0xff] }
 0x16a   :  { %v1223_v1 = vadd.f32 0.5, %v1222_v20  ;;  %v5481_v20 = vpop.eup %5480 }
 0x16b   :  { %v1227_v48 = vadd.f32 0.5, %v1226_v17  ;;  %4454 = vmatpush1.bf16.msra.mxu0 %v6614_v53  ;;  %4486 = vmatpush1.bf16.msra.mxu1 %v7729_v6  ;;  %v1231_v17 = vmul.f32 0.5, %v5481_v20  ;;  %v7739_v20 = vld [vmem:[#allocation23_spill] sm:$0xff] }
 0x16c   :  { %v1234_v43 = vmul.f32 %v5479_v26, %v1223_v1  ;;  %4456 = vmatprep.subr.bf16.mxu0 %v7730_v23  ;;  %4488 = vmatprep.subr.bf16.mxu1 %v7731_v11 }
 0x16d   :  { %v1233_v15 = vmul.f32 0.0, %v1227_v48  ;;  %v1232_v1 = vadd.f32 0.5, %v1231_v17  ;;  %v7740_v17 = vld [vmem:[#allocation24_spill] sm:$0xff] }
 0x16f   :  { %v6848_v62 = vadd.f32 %v1234_v43, %v1233_v15  ;;  %4458 = vmatpush1.bf16.msra.mxu0 %v7732_v58  ;;  %4490 = vmatpush1.bf16.msra.mxu1 %v7733_v33  ;;  %v7737_v43 = vld [vmem:[#allocation21_spill] sm:$0xff]  ;;  %v7738_v15 = vld [vmem:[#allocation22_spill] sm:$0xff] }
 0x170   :  { %4460 = vmatprep.subr.bf16.mxu0 %v7734_v52  ;;  %4492 = vmatprep.subr.bf16.mxu1 %v7735_v45 }
 0x171   :  { %5482 = vtanh.f32 %v6848_v62 }
 0x173   :  { %4462 = vmatpush1.bf16.msra.mxu0 %v6686_v37  ;;  %4494 = vmatpush1.bf16.msra.mxu1 %v6690_v3 }
 0x174   :  { %4464 = vmatprep.subr.bf16.mxu0 %v6692_v63  ;;  %4496 = vmatprep.subr.bf16.mxu1 %v6704_v50 }
 0x177   :  { %4466 = vmatpush1.bf16.msra.mxu0 %v6722_v27  ;;  %4498 = vmatpush1.bf16.msra.mxu1 %v6726_v9 }
 0x178   :  { %4468 = vmatprep.subr.bf16.mxu0 %v6728_v46  ;;  %4500 = vmatprep.subr.bf16.mxu1 %v6737_v61 }
 0x17b   :  { %v5483_v26 = vpop.eup %5482  ;;  %4470 = vmatpush1.bf16.msra.mxu0 %v6746_v2  ;;  %4502 = vmatpush1.bf16.msra.mxu1 %v6750_v8 }
 0x17c   :  { %v6865_v48 = vmul.f32 %v5483_v26, %v1232_v1  ;;  %4504 = vmatprep.subr.bf16.mxu0 %v6157_v21  ;;  %4536 = vmatprep.subr.bf16.mxu1 %v6166_v25  ;;  %v7741_v1 = vld [vmem:[#allocation25_spill] sm:$0xff]  ;;  %v7742_v26 = vld [vmem:[#allocation26_spill] sm:$0xff] }
 0x17e   :  { %7736 = vst [vmem:[#allocation38_spill] sm:$0xff] %v6865_v48  ;;  %1485 = vmatmul.mubr.f32.vlgmr.msra.gmra.mrb[28].mxu0 %v6865_v48  ;;  %1556 = vmatmul.mubr.f32.vlgmr.msra.gmra.mrb[28].mxu1 %v6865_v48  ;;  %v7743_v48 = vld [vmem:[#allocation27_spill] sm:$0xff] }
 0x17f   :  { %4506 = vmatpush1.bf16.msra.mxu0 %v6175_v28  ;;  %4538 = vmatpush1.bf16.msra.mxu1 %v6184_v31 }
 0x180   :  { %4508 = vmatprep.subr.bf16.mxu0 %v6194_v34  ;;  %4540 = vmatprep.subr.bf16.mxu1 %v6204_v38 }
 0x181   :  { %1657 = vmatprep.mubr.f32.mxu0 %v7725_v12  ;;  %1728 = vmatprep.mubr.f32.mxu1 %v7725_v12 }
 0x183   :  { %4510 = vmatpush1.bf16.msra.mxu0 %v6214_v41  ;;  %4542 = vmatpush1.bf16.msra.mxu1 %v6224_v44 }
 0x184   :  { %4512 = vmatprep.subr.bf16.mxu0 %v6234_v47  ;;  %4544 = vmatprep.subr.bf16.mxu1 %v6244_v51 }
 0x187   :  { %4514 = vmatpush1.bf16.msra.mxu0 %v6254_v54  ;;  %4546 = vmatpush1.bf16.msra.mxu1 %v6264_v57  ;;  %v7755_v57 = vld [vmem:[#allocation46_spill] sm:$0xff] }
 0x188   :  { %4516 = vmatprep.subr.bf16.mxu0 %v6274_v60  ;;  %4548 = vmatprep.subr.bf16.mxu1 %v6284_v0  ;;  %v7754_v0 = vld [vmem:[#allocation45_spill] sm:$0xff] }
 0x18b   :  { %4518 = vmatpush1.bf16.msra.mxu0 %v6294_v4  ;;  %4550 = vmatpush1.bf16.msra.mxu1 %v6304_v7  ;;  %v7745_v4 = vld [vmem:[#allocation29_spill] sm:$0xff]  ;;  %v7746_v7 = vld [vmem:[#allocation30_spill] sm:$0xff] }
 0x18c   :  { %4520 = vmatprep.subr.bf16.mxu0 %v6314_v10  ;;  %4552 = vmatprep.subr.bf16.mxu1 %v7737_v43  ;;  %v7747_v10 = vld [vmem:[#allocation31_spill] sm:$0xff]  ;;  %v7748_v43 = vld [vmem:[#allocation32_spill] sm:$0xff] }
 0x18f   :  { %4522 = vmatpush1.bf16.msra.mxu0 %v7738_v15  ;;  %4554 = vmatpush1.bf16.msra.mxu1 %v7739_v20  ;;  %v7749_v15 = vld [vmem:[#allocation33_spill] sm:$0xff]  ;;  %v7750_v20 = vld [vmem:[#allocation34_spill] sm:$0xff] }
 0x190   :  { %4524 = vmatprep.subr.bf16.mxu0 %v7740_v17  ;;  %4556 = vmatprep.subr.bf16.mxu1 %v7741_v1  ;;  %v7751_v17 = vld [vmem:[#allocation35_spill] sm:$0xff]  ;;  %v7752_v1 = vld [vmem:[#allocation36_spill] sm:$0xff] }
 0x193   :  { %4526 = vmatpush1.bf16.msra.mxu0 %v7742_v26  ;;  %4558 = vmatpush1.bf16.msra.mxu1 %v7743_v48  ;;  %v7753_v26 = vld [vmem:[#allocation37_spill] sm:$0xff] }
 0x194   :  { %4528 = vmatprep.subr.bf16.mxu0 %v7744_v35  ;;  %4560 = vmatprep.subr.bf16.mxu1 %v7745_v4 }
 0x197   :  { %4530 = vmatpush1.bf16.msra.mxu0 %v7746_v7  ;;  %4562 = vmatpush1.bf16.msra.mxu1 %v7747_v10 }
 0x198   :  { %4532 = vmatprep.subr.bf16.mxu0 %v7748_v43  ;;  %4564 = vmatprep.subr.bf16.mxu1 %v7749_v15 }
 0x19b   :  { %4534 = vmatpush1.bf16.msra.mxu0 %v7750_v20  ;;  %4566 = vmatpush1.bf16.msra.mxu1 %v7751_v17 }
 0x19c   :  { %4568 = vmatprep.subr.bf16.mxu0 %v7752_v1  ;;  %4600 = vmatprep.subr.bf16.mxu1 %v7753_v26 }
 0x231   :  { %v1313_v48 = vpop.f32.mrb[2].mxu0  ;;  %v1384_v35 = vpop.f32.mrb[2].mxu1 }
 0x232   :  { %v5337_v4 = vadd.f32 %v1313_v48, %v7754_v0  ;;  %v1315_v60 = vpop.f32.mrb[3].mxu0  ;;  %v1386_v7 = vpop.f32.mrb[3].mxu1  ;;  %v5353_v15 = vadd.f32 %v1384_v35, %v6801_v56 }
 0x233   :  { %v5338_v10 = vadd.f32 %v1315_v60, %v7755_v57  ;;  %v5354_v17 = vadd.f32 %v1386_v7, %v6805_v29 }
 0x234   :  { %v1393_v54 = vmul.f32 0.5, %v5337_v4 }
 0x235   :  { %v1397_v43 = vmul.f32 0.5, %v5338_v10  ;;  %v1402_v1 = vmul.f32 0.5, %v5354_v17 }
 0x236   :  { %5484 = vtanh.f32 %v1393_v54 }
 0x237   :  { %5486 = vtanh.f32 %v1397_v43 }
 0x238   :  { %5488 = vtanh.f32 %v5353_v15 }
 0x239   :  { %5490 = vtanh.f32 %v1402_v1 }
 0x240   :  { %v5485_v20 = vpop.eup %5484 }
 0x241   :  { %v5487_v26 = vpop.eup %5486  ;;  %v1395_v51 = vmul.f32 0.5, %v5485_v20 }
 0x242   :  { %v1399_v47 = vmul.f32 0.5, %v5487_v26  ;;  %v5489_v0 = vpop.eup %5488 }
 0x243   :  { %v1396_v48 = vadd.f32 0.5, %v1395_v51  ;;  %v5491_v54 = vpop.eup %5490 }
 0x244   :  { %v1400_v44 = vadd.f32 0.5, %v1399_v47  ;;  %v1404_v10 = vmul.f32 0.5, %v5491_v54 }
 0x245   :  { %v1407_v41 = vmul.f32 %v5489_v0, %v1396_v48 }
 0x246   :  { %v1406_v60 = vmul.f32 %v1400_v44, %v6808_v42  ;;  %v1405_v17 = vadd.f32 0.5, %v1404_v10 }
 0x248   :  { %v6910_v4 = vadd.f32 %v1407_v41, %v1406_v60 }
 0x24a   :  { %5492 = vtanh.f32 %v6910_v4 }
 0x251   :  { %v1486_v35 = vpop.f32.mrb[28].mxu0  ;;  %v1557_v7 = vpop.f32.mrb[28].mxu1 }
 0x252   :  { %v5379_v43 = vadd.f32 %v1486_v35, %v6814_v24  ;;  %v1488_v15 = vpop.f32.mrb[29].mxu0  ;;  %v1559_v20 = vpop.f32.mrb[29].mxu1  ;;  %v5395_v41 = vadd.f32 %v1557_v7, %v6819_v13 }
 0x253   :  { %v5380_v51 = vadd.f32 %v1488_v15, %v6816_v16  ;;  %v5396_v42 = vadd.f32 %v1559_v20, %v6825_v39 }
 0x254   :  { %v5493_v1 = vpop.eup %5492  ;;  %v1566_v47 = vmul.f32 0.5, %v5379_v43 }
 0x255   :  { %v6915_v0 = vmul.f32 %v5493_v1, %v1405_v17  ;;  %v1570_v44 = vmul.f32 0.5, %v5380_v51  ;;  %v1575_v26 = vmul.f32 0.5, %v5396_v42  ;;  %v7759_v42 = vld [vmem:[#allocation11_spill] sm:$0xff] }
 0x256   :  { %5494 = vtanh.f32 %v1566_v47 }
 0x257   :  { %7756 = vst [vmem:[#allocation39_spill] sm:$0xff] %v6915_v0  ;;  %5496 = vtanh.f32 %v1570_v44  ;;  %1658 = vmatmul.mubr.f32.vlgmr.msra.gmra.mrb[4].mxu0 %v6915_v0  ;;  %1729 = vmatmul.mubr.f32.vlgmr.msra.gmra.mrb[4].mxu1 %v6915_v0  ;;  %v7775_v0 = vld [vmem:[#allocation27_spill] sm:$0xff] }
 0x258   :  { %4570 = vmatpush1.bf16.msra.mxu0 %v6500_v30  ;;  %4602 = vmatpush1.bf16.msra.mxu1 %v6504_v32  ;;  %5498 = vtanh.f32 %v5395_v41  ;;  %v7758_v41 = vld [vmem:[#allocation10_spill] sm:$0xff] }
 0x259   :  { %4572 = vmatprep.subr.bf16.mxu0 %v6506_v36  ;;  %4604 = vmatprep.subr.bf16.mxu1 %v6519_v40  ;;  %5500 = vtanh.f32 %v1575_v26  ;;  %v7760_v26 = vld [vmem:[#allocation12_spill] sm:$0xff] }
 0x25a   :  { %1830 = vmatprep.mubr.f32.mxu0 %v7725_v12  ;;  %1901 = vmatprep.mubr.f32.mxu1 %v7725_v12 }
 0x25c   :  { %4574 = vmatpush1.bf16.msra.mxu0 %v6540_v55  ;;  %4606 = vmatpush1.bf16.msra.mxu1 %v6544_v49 }
 0x25d   :  { %4576 = vmatprep.subr.bf16.mxu0 %v6546_v59  ;;  %4608 = vmatprep.subr.bf16.mxu1 %v6558_v5 }
 0x260   :  { %v5495_v48 = vpop.eup %5494  ;;  %4578 = vmatpush1.bf16.msra.mxu0 %v6578_v18  ;;  %4610 = vmatpush1.bf16.msra.mxu1 %v6582_v19 }
 0x261   :  { %v5497_v60 = vpop.eup %5496  ;;  %v1568_v54 = vmul.f32 0.5, %v5495_v48  ;;  %4580 = vmatprep.subr.bf16.mxu0 %v6584_v22  ;;  %4612 = vmatprep.subr.bf16.mxu1 %v6596_v14  ;;  %v7761_v48 = vld [vmem:[#allocation13_spill] sm:$0xff] }
 0x262   :  { %v1572_v10 = vmul.f32 0.5, %v5497_v60  ;;  %v5499_v7 = vpop.eup %5498  ;;  %v7762_v60 = vld [vmem:[#allocation14_spill] sm:$0xff] }
 0x263   :  { %v1569_v35 = vadd.f32 0.5, %v1568_v54  ;;  %v5501_v51 = vpop.eup %5500  ;;  %v7763_v54 = vld [vmem:[#allocation15_spill] sm:$0xff] }
 0x264   :  { %v1573_v43 = vadd.f32 0.5, %v1572_v10  ;;  %4582 = vmatpush1.bf16.msra.mxu0 %v6614_v53  ;;  %4614 = vmatpush1.bf16.msra.mxu1 %v7729_v6  ;;  %v7764_v10 = vld [vmem:[#allocation16_spill] sm:$0xff] }
 0x265   :  { %v1580_v15 = vmul.f32 %v5499_v7, %v1569_v35  ;;  %4584 = vmatprep.subr.bf16.mxu0 %v7730_v23  ;;  %4616 = vmatprep.subr.bf16.mxu1 %v7731_v11  ;;  %v7765_v35 = vld [vmem:[#allocation17_spill] sm:$0xff]  ;;  %v7766_v7 = vld [vmem:[#allocation18_spill] sm:$0xff] }
 0x266   :  { %v1579_v20 = vmul.f32 %v1573_v43, %v6848_v62  ;;  %v1577_v62 = vmul.f32 0.5, %v5501_v51  ;;  %v7767_v43 = vld [vmem:[#allocation19_spill] sm:$0xff]  ;;  %v7770_v51 = vld [vmem:[#allocation22_spill] sm:$0xff] }
 0x268   :  { %v6940_v17 = vadd.f32 %v1580_v15, %v1579_v20  ;;  %4586 = vmatpush1.bf16.msra.mxu0 %v7732_v58  ;;  %4618 = vmatpush1.bf16.msra.mxu1 %v7733_v33  ;;  %v1578_v1 = vadd.f32 0.5, %v1577_v62  ;;  %v7768_v15 = vld [vmem:[#allocation20_spill] sm:$0xff]  ;;  %v7769_v20 = vld [vmem:[#allocation21_spill] sm:$0xff]  ;;  %v7771_v62 = vld [vmem:[#allocation23_spill] sm:$0xff] }
 0x269   :  { %4588 = vmatprep.subr.bf16.mxu0 %v7734_v52  ;;  %4620 = vmatprep.subr.bf16.mxu1 %v7735_v45 }
 0x26a   :  { %5502 = vtanh.f32 %v6940_v17 }
 0x26c   :  { %4590 = vmatpush1.bf16.msra.mxu0 %v6686_v37  ;;  %4622 = vmatpush1.bf16.msra.mxu1 %v6690_v3 }
 0x26d   :  { %4592 = vmatprep.subr.bf16.mxu0 %v6692_v63  ;;  %4624 = vmatprep.subr.bf16.mxu1 %v6704_v50 }
 0x270   :  { %4594 = vmatpush1.bf16.msra.mxu0 %v6722_v27  ;;  %4626 = vmatpush1.bf16.msra.mxu1 %v6726_v9 }
 0x271   :  { %4596 = vmatprep.subr.bf16.mxu0 %v6728_v46  ;;  %4628 = vmatprep.subr.bf16.mxu1 %v6737_v61 }
 0x274   :  { %v5503_v47 = vpop.eup %5502  ;;  %4598 = vmatpush1.bf16.msra.mxu0 %v6746_v2  ;;  %4630 = vmatpush1.bf16.msra.mxu1 %v6750_v8 }
 0x275   :  { %v6957_v44 = vmul.f32 %v5503_v47, %v1578_v1  ;;  %4632 = vmatprep.subr.bf16.mxu0 %v6157_v21  ;;  %4664 = vmatprep.subr.bf16.mxu1 %v6166_v25  ;;  %v7772_v1 = vld [vmem:[#allocation24_spill] sm:$0xff]  ;;  %v7773_v47 = vld [vmem:[#allocation25_spill] sm:$0xff] }
 0x277   :  { %7757 = vst [vmem:[#allocation40_spill] sm:$0xff] %v6957_v44  ;;  %1831 = vmatmul.mubr.f32.vlgmr.msra.gmra.mrb[26].mxu0 %v6957_v44  ;;  %1902 = vmatmul.mubr.f32.vlgmr.msra.gmra.mrb[26].mxu1 %v6957_v44  ;;  %v7774_v44 = vld [vmem:[#allocation26_spill] sm:$0xff] }
 0x278   :  { %4634 = vmatpush1.bf16.msra.mxu0 %v6175_v28  ;;  %4666 = vmatpush1.bf16.msra.mxu1 %v6184_v31 }
 0x279   :  { %4636 = vmatprep.subr.bf16.mxu0 %v6194_v34  ;;  %4668 = vmatprep.subr.bf16.mxu1 %v6204_v38 }
 0x27a   :  { %2003 = vmatprep.mubr.f32.mxu0 %v7725_v12  ;;  %2074 = vmatprep.mubr.f32.mxu1 %v7725_v12 }
 0x27c   :  { %4638 = vmatpush1.bf16.msra.mxu0 %v7758_v41  ;;  %4670 = vmatpush1.bf16.msra.mxu1 %v7759_v42 }
 0x27d   :  { %4640 = vmatprep.subr.bf16.mxu0 %v7760_v26  ;;  %4672 = vmatprep.subr.bf16.mxu1 %v7761_v48 }
 0x280   :  { %4642 = vmatpush1.bf16.msra.mxu0 %v7762_v60  ;;  %4674 = vmatpush1.bf16.msra.mxu1 %v7763_v54 }
 0x281   :  { %4644 = vmatprep.subr.bf16.mxu0 %v7764_v10  ;;  %4676 = vmatprep.subr.bf16.mxu1 %v7765_v35  ;;  %v7776_v35 = vld [vmem:[#allocation28_spill] sm:$0xff]  ;;  %v7786_v10 = vld [vmem:[#allocation45_spill] sm:$0xff] }
 0x284   :  { %4646 = vmatpush1.bf16.msra.mxu0 %v7766_v7  ;;  %4678 = vmatpush1.bf16.msra.mxu1 %v7767_v43  ;;  %v7777_v7 = vld [vmem:[#allocation29_spill] sm:$0xff]  ;;  %v7778_v43 = vld [vmem:[#allocation30_spill] sm:$0xff] }
 0x285   :  { %4648 = vmatprep.subr.bf16.mxu0 %v7768_v15  ;;  %4680 = vmatprep.subr.bf16.mxu1 %v7769_v20  ;;  %v7779_v15 = vld [vmem:[#allocation31_spill] sm:$0xff]  ;;  %v7780_v20 = vld [vmem:[#allocation32_spill] sm:$0xff] }
 0x288   :  { %4650 = vmatpush1.bf16.msra.mxu0 %v7770_v51  ;;  %4682 = vmatpush1.bf16.msra.mxu1 %v7771_v62  ;;  %v7781_v51 = vld [vmem:[#allocation33_spill] sm:$0xff]  ;;  %v7782_v62 = vld [vmem:[#allocation34_spill] sm:$0xff] }
 0x289   :  { %4652 = vmatprep.subr.bf16.mxu0 %v7772_v1  ;;  %4684 = vmatprep.subr.bf16.mxu1 %v7773_v47  ;;  %v7783_v1 = vld [vmem:[#allocation35_spill] sm:$0xff]  ;;  %v7784_v47 = vld [vmem:[#allocation36_spill] sm:$0xff] }
 0x28c   :  { %4654 = vmatpush1.bf16.msra.mxu0 %v7774_v44  ;;  %4686 = vmatpush1.bf16.msra.mxu1 %v7775_v0  ;;  %v7785_v44 = vld [vmem:[#allocation37_spill] sm:$0xff] }
 0x28d   :  { %4656 = vmatprep.subr.bf16.mxu0 %v7776_v35  ;;  %4688 = vmatprep.subr.bf16.mxu1 %v7777_v7 }
 0x290   :  { %4658 = vmatpush1.bf16.msra.mxu0 %v7778_v43  ;;  %4690 = vmatpush1.bf16.msra.mxu1 %v7779_v15 }
 0x291   :  { %4660 = vmatprep.subr.bf16.mxu0 %v7780_v20  ;;  %4692 = vmatprep.subr.bf16.mxu1 %v7781_v51 }
 0x294   :  { %4662 = vmatpush1.bf16.msra.mxu0 %v7782_v62  ;;  %4694 = vmatpush1.bf16.msra.mxu1 %v7783_v1 }
 0x295   :  { %4696 = vmatprep.subr.bf16.mxu0 %v7784_v47  ;;  %4728 = vmatprep.subr.bf16.mxu1 %v7785_v44 }
 0x32a   :  { %v1659_v0 = vpop.f32.mrb[4].mxu0  ;;  %v1730_v35 = vpop.f32.mrb[4].mxu1 }
 0x32b   :  { %v5339_v7 = vadd.f32 %v1659_v0, %v7786_v10  ;;  %v1661_v54 = vpop.f32.mrb[5].mxu0  ;;  %v1732_v43 = vpop.f32.mrb[5].mxu1  ;;  %v5355_v51 = vadd.f32 %v1730_v35, %v6801_v56 }
 0x32c   :  { %v5340_v15 = vadd.f32 %v1661_v54, %v7755_v57  ;;  %v5356_v1 = vadd.f32 %v1732_v43, %v6805_v29 }
 0x32d   :  { %v1739_v60 = vmul.f32 0.5, %v5339_v7 }
 0x32e   :  { %v1743_v20 = vmul.f32 0.5, %v5340_v15  ;;  %v1748_v47 = vmul.f32 0.5, %v5356_v1 }
 0x32f   :  { %5504 = vtanh.f32 %v1739_v60 }
 0x330   :  { %5506 = vtanh.f32 %v1743_v20 }
 0x331   :  { %5508 = vtanh.f32 %v5355_v51 }
 0x332   :  { %5510 = vtanh.f32 %v1748_v47 }
 0x339   :  { %v5505_v62 = vpop.eup %5504 }
 0x33a   :  { %v5507_v44 = vpop.eup %5506  ;;  %v1741_v48 = vmul.f32 0.5, %v5505_v62 }
 0x33b   :  { %v1745_v26 = vmul.f32 0.5, %v5507_v44  ;;  %v5509_v10 = vpop.eup %5508 }
 0x33c   :  { %v1742_v0 = vadd.f32 0.5, %v1741_v48  ;;  %v5511_v60 = vpop.eup %5510 }
 0x33d   :  { %v1746_v42 = vadd.f32 0.5, %v1745_v26  ;;  %v1750_v35 = vmul.f32 0.5, %v5511_v60 }
 0x33e   :  { %v1753_v41 = vmul.f32 %v5509_v10, %v1742_v0 }
 0x33f   :  { %v1752_v54 = vmul.f32 %v1746_v42, %v6910_v4  ;;  %v1751_v44 = vadd.f32 0.5, %v1750_v35 }
 0x341   :  { %v7002_v7 = vadd.f32 %v1753_v41, %v1752_v54 }
 0x343   :  { %5512 = vtanh.f32 %v7002_v7 }
 0x34a   :  { %v1832_v15 = vpop.f32.mrb[26].mxu0  ;;  %v1903_v43 = vpop.f32.mrb[26].mxu1 }
 0x34b   :  { %v5377_v20 = vadd.f32 %v1832_v15, %v6814_v24  ;;  %v1834_v51 = vpop.f32.mrb[27].mxu0  ;;  %v1905_v62 = vpop.f32.mrb[27].mxu1  ;;  %v5393_v41 = vadd.f32 %v1903_v43, %v6819_v13 }
 0x34c   :  { %v5378_v48 = vadd.f32 %v1834_v51, %v6816_v16  ;;  %v5394_v42 = vadd.f32 %v1905_v62, %v6825_v39 }
 0x34d   :  { %v5513_v1 = vpop.eup %5512  ;;  %v1912_v26 = vmul.f32 0.5, %v5377_v20 }
 0x34e   :  { %v7007_v10 = vmul.f32 %v5513_v1, %v1751_v44  ;;  %v1916_v4 = vmul.f32 0.5, %v5378_v48  ;;  %v1921_v47 = vmul.f32 0.5, %v5394_v42  ;;  %v7790_v42 = vld [vmem:[#allocation11_spill] sm:$0xff] }
 0x34f   :  { %5514 = vtanh.f32 %v1912_v26 }
 0x350   :  { %7787 = vst [vmem:[#allocation41_spill] sm:$0xff] %v7007_v10  ;;  %5516 = vtanh.f32 %v1916_v4  ;;  %2004 = vmatmul.mubr.f32.vlgmr.msra.gmra.mrb[6].mxu0 %v7007_v10  ;;  %2075 = vmatmul.mubr.f32.vlgmr.msra.gmra.mrb[6].mxu1 %v7007_v10  ;;  %v7806_v10 = vld [vmem:[#allocation27_spill] sm:$0xff] }
 0x351   :  { %4698 = vmatpush1.bf16.msra.mxu0 %v6500_v30  ;;  %4730 = vmatpush1.bf16.msra.mxu1 %v6504_v32  ;;  %5518 = vtanh.f32 %v5393_v41  ;;  %v7789_v41 = vld [vmem:[#allocation10_spill] sm:$0xff] }
 0x352   :  { %4700 = vmatprep.subr.bf16.mxu0 %v6506_v36  ;;  %4732 = vmatprep.subr.bf16.mxu1 %v6519_v40  ;;  %5520 = vtanh.f32 %v1921_v47  ;;  %v7791_v47 = vld [vmem:[#allocation12_spill] sm:$0xff] }
 0x353   :  { %2176 = vmatprep.mubr.f32.mxu0 %v7725_v12  ;;  %2247 = vmatprep.mubr.f32.mxu1 %v7725_v12 }
 0x355   :  { %4702 = vmatpush1.bf16.msra.mxu0 %v6540_v55  ;;  %4734 = vmatpush1.bf16.msra.mxu1 %v6544_v49 }
 0x356   :  { %4704 = vmatprep.subr.bf16.mxu0 %v6546_v59  ;;  %4736 = vmatprep.subr.bf16.mxu1 %v6558_v5 }
 0x359   :  { %v5515_v0 = vpop.eup %5514  ;;  %4706 = vmatpush1.bf16.msra.mxu0 %v6578_v18  ;;  %4738 = vmatpush1.bf16.msra.mxu1 %v6582_v19 }
 0x35a   :  { %v5517_v54 = vpop.eup %5516  ;;  %v1914_v60 = vmul.f32 0.5, %v5515_v0  ;;  %4708 = vmatprep.subr.bf16.mxu0 %v6584_v22  ;;  %4740 = vmatprep.subr.bf16.mxu1 %v6596_v14  ;;  %v7792_v0 = vld [vmem:[#allocation13_spill] sm:$0xff] }
 0x35b   :  { %v1918_v35 = vmul.f32 0.5, %v5517_v54  ;;  %v5519_v43 = vpop.eup %5518  ;;  %v7793_v54 = vld [vmem:[#allocation14_spill] sm:$0xff] }
 0x35c   :  { %v1915_v15 = vadd.f32 0.5, %v1914_v60  ;;  %v5521_v48 = vpop.eup %5520  ;;  %v7794_v60 = vld [vmem:[#allocation15_spill] sm:$0xff] }
 0x35d   :  { %v1919_v20 = vadd.f32 0.5, %v1918_v35  ;;  %4710 = vmatpush1.bf16.msra.mxu0 %v6614_v53  ;;  %4742 = vmatpush1.bf16.msra.mxu1 %v7729_v6  ;;  %v7795_v35 = vld [vmem:[#allocation16_spill] sm:$0xff] }
 0x35e   :  { %v1926_v51 = vmul.f32 %v5519_v43, %v1915_v15  ;;  %4712 = vmatprep.subr.bf16.mxu0 %v7730_v23  ;;  %4744 = vmatprep.subr.bf16.mxu1 %v7731_v11  ;;  %v7796_v15 = vld [vmem:[#allocation17_spill] sm:$0xff]  ;;  %v7797_v43 = vld [vmem:[#allocation18_spill] sm:$0xff] }
 0x35f   :  { %v1925_v62 = vmul.f32 %v1919_v20, %v6940_v17  ;;  %v1923_v17 = vmul.f32 0.5, %v5521_v48  ;;  %v7798_v20 = vld [vmem:[#allocation19_spill] sm:$0xff]  ;;  %v7801_v48 = vld [vmem:[#allocation22_spill] sm:$0xff] }
 0x361   :  { %v7032_v44 = vadd.f32 %v1926_v51, %v1925_v62  ;;  %4714 = vmatpush1.bf16.msra.mxu0 %v7732_v58  ;;  %4746 = vmatpush1.bf16.msra.mxu1 %v7733_v33  ;;  %v1924_v1 = vadd.f32 0.5, %v1923_v17  ;;  %v7799_v51 = vld [vmem:[#allocation20_spill] sm:$0xff]  ;;  %v7800_v62 = vld [vmem:[#allocation21_spill] sm:$0xff]  ;;  %v7802_v17 = vld [vmem:[#allocation23_spill] sm:$0xff] }
 0x362   :  { %4716 = vmatprep.subr.bf16.mxu0 %v7734_v52  ;;  %4748 = vmatprep.subr.bf16.mxu1 %v7735_v45 }
 0x363   :  { %5522 = vtanh.f32 %v7032_v44 }
 0x365   :  { %4718 = vmatpush1.bf16.msra.mxu0 %v6686_v37  ;;  %4750 = vmatpush1.bf16.msra.mxu1 %v6690_v3 }
 0x366   :  { %4720 = vmatprep.subr.bf16.mxu0 %v6692_v63  ;;  %4752 = vmatprep.subr.bf16.mxu1 %v6704_v50 }
 0x369   :  { %4722 = vmatpush1.bf16.msra.mxu0 %v6722_v27  ;;  %4754 = vmatpush1.bf16.msra.mxu1 %v6726_v9 }
 0x36a   :  { %4724 = vmatprep.subr.bf16.mxu0 %v6728_v46  ;;  %4756 = vmatprep.subr.bf16.mxu1 %v6737_v61 }
 0x36d   :  { %v5523_v26 = vpop.eup %5522  ;;  %4726 = vmatpush1.bf16.msra.mxu0 %v6746_v2  ;;  %4758 = vmatpush1.bf16.msra.mxu1 %v6750_v8 }
 0x36e   :  { %v7049_v4 = vmul.f32 %v5523_v26, %v1924_v1  ;;  %4760 = vmatprep.subr.bf16.mxu0 %v6157_v21  ;;  %4792 = vmatprep.subr.bf16.mxu1 %v6166_v25  ;;  %v7803_v1 = vld [vmem:[#allocation24_spill] sm:$0xff]  ;;  %v7804_v26 = vld [vmem:[#allocation25_spill] sm:$0xff] }
 0x370   :  { %7788 = vst [vmem:[#allocation42_spill] sm:$0xff] %v7049_v4  ;;  %2177 = vmatmul.mubr.f32.vlgmr.msra.gmra.mrb[24].mxu0 %v7049_v4  ;;  %2248 = vmatmul.mubr.f32.vlgmr.msra.gmra.mrb[24].mxu1 %v7049_v4  ;;  %v7805_v4 = vld [vmem:[#allocation26_spill] sm:$0xff] }
 0x371   :  { %4762 = vmatpush1.bf16.msra.mxu0 %v6175_v28  ;;  %4794 = vmatpush1.bf16.msra.mxu1 %v6184_v31 }
 0x372   :  { %4764 = vmatprep.subr.bf16.mxu0 %v6194_v34  ;;  %4796 = vmatprep.subr.bf16.mxu1 %v6204_v38 }
 0x373   :  { %2348 = vmatprep.mubr.f32.mxu0 %v7725_v12  ;;  %2419 = vmatprep.mubr.f32.mxu1 %v7725_v12 }
 0x375   :  { %4766 = vmatpush1.bf16.msra.mxu0 %v7789_v41  ;;  %4798 = vmatpush1.bf16.msra.mxu1 %v7790_v42 }
 0x376   :  { %4768 = vmatprep.subr.bf16.mxu0 %v7791_v47  ;;  %4800 = vmatprep.subr.bf16.mxu1 %v7792_v0 }
 0x379   :  { %4770 = vmatpush1.bf16.msra.mxu0 %v7793_v54  ;;  %4802 = vmatpush1.bf16.msra.mxu1 %v7794_v60 }
 0x37a   :  { %4772 = vmatprep.subr.bf16.mxu0 %v7795_v35  ;;  %4804 = vmatprep.subr.bf16.mxu1 %v7796_v15  ;;  %v7807_v15 = vld [vmem:[#allocation28_spill] sm:$0xff]  ;;  %v7817_v35 = vld [vmem:[#allocation45_spill] sm:$0xff] }
 0x37d   :  { %4774 = vmatpush1.bf16.msra.mxu0 %v7797_v43  ;;  %4806 = vmatpush1.bf16.msra.mxu1 %v7798_v20  ;;  %v7808_v43 = vld [vmem:[#allocation29_spill] sm:$0xff]  ;;  %v7809_v20 = vld [vmem:[#allocation30_spill] sm:$0xff] }
 0x37e   :  { %4776 = vmatprep.subr.bf16.mxu0 %v7799_v51  ;;  %4808 = vmatprep.subr.bf16.mxu1 %v7800_v62  ;;  %v7810_v51 = vld [vmem:[#allocation31_spill] sm:$0xff]  ;;  %v7811_v62 = vld [vmem:[#allocation32_spill] sm:$0xff] }
 0x381   :  { %4778 = vmatpush1.bf16.msra.mxu0 %v7801_v48  ;;  %4810 = vmatpush1.bf16.msra.mxu1 %v7802_v17  ;;  %v7812_v48 = vld [vmem:[#allocation33_spill] sm:$0xff]  ;;  %v7813_v17 = vld [vmem:[#allocation34_spill] sm:$0xff] }
 0x382   :  { %4780 = vmatprep.subr.bf16.mxu0 %v7803_v1  ;;  %4812 = vmatprep.subr.bf16.mxu1 %v7804_v26  ;;  %v7814_v1 = vld [vmem:[#allocation35_spill] sm:$0xff]  ;;  %v7815_v26 = vld [vmem:[#allocation36_spill] sm:$0xff] }
 0x385   :  { %4782 = vmatpush1.bf16.msra.mxu0 %v7805_v4  ;;  %4814 = vmatpush1.bf16.msra.mxu1 %v7806_v10  ;;  %v7816_v4 = vld [vmem:[#allocation37_spill] sm:$0xff] }
 0x386   :  { %4784 = vmatprep.subr.bf16.mxu0 %v7807_v15  ;;  %4816 = vmatprep.subr.bf16.mxu1 %v7808_v43 }
 0x389   :  { %4786 = vmatpush1.bf16.msra.mxu0 %v7809_v20  ;;  %4818 = vmatpush1.bf16.msra.mxu1 %v7810_v51 }
 0x38a   :  { %4788 = vmatprep.subr.bf16.mxu0 %v7811_v62  ;;  %4820 = vmatprep.subr.bf16.mxu1 %v7812_v48 }
 0x38d   :  { %4790 = vmatpush1.bf16.msra.mxu0 %v7813_v17  ;;  %4822 = vmatpush1.bf16.msra.mxu1 %v7814_v1 }
 0x38e   :  { %4824 = vmatprep.subr.bf16.mxu0 %v7815_v26  ;;  %4856 = vmatprep.subr.bf16.mxu1 %v7816_v4 }
 0x423   :  { %v2005_v10 = vpop.f32.mrb[6].mxu0  ;;  %v2076_v15 = vpop.f32.mrb[6].mxu1 }
 0x424   :  { %v5341_v43 = vadd.f32 %v2005_v10, %v7817_v35  ;;  %v2007_v60 = vpop.f32.mrb[7].mxu0  ;;  %v2078_v20 = vpop.f32.mrb[7].mxu1  ;;  %v5357_v48 = vadd.f32 %v2076_v15, %v6801_v56 }
 0x425   :  { %v5342_v51 = vadd.f32 %v2007_v60, %v7755_v57  ;;  %v5358_v1 = vadd.f32 %v2078_v20, %v6805_v29 }
 0x426   :  { %v2085_v54 = vmul.f32 0.5, %v5341_v43 }
 0x427   :  { %v2089_v62 = vmul.f32 0.5, %v5342_v51  ;;  %v2094_v26 = vmul.f32 0.5, %v5358_v1 }
 0x428   :  { %5524 = vtanh.f32 %v2085_v54 }
 0x429   :  { %5526 = vtanh.f32 %v2089_v62 }
 0x42a   :  { %5528 = vtanh.f32 %v5357_v48 }
 0x42b   :  { %5530 = vtanh.f32 %v2094_v26 }
 0x432   :  { %v5525_v17 = vpop.eup %5524 }
 0x433   :  { %v5527_v4 = vpop.eup %5526  ;;  %v2087_v0 = vmul.f32 0.5, %v5525_v17 }
 0x434   :  { %v2091_v47 = vmul.f32 0.5, %v5527_v4  ;;  %v5529_v35 = vpop.eup %5528 }
 0x435   :  { %v2088_v10 = vadd.f32 0.5, %v2087_v0  ;;  %v5531_v54 = vpop.eup %5530 }
 0x436   :  { %v2092_v42 = vadd.f32 0.5, %v2091_v47  ;;  %v2096_v15 = vmul.f32 0.5, %v5531_v54 }
 0x437   :  { %v2099_v41 = vmul.f32 %v5529_v35, %v2088_v10 }
 0x438   :  { %v2098_v60 = vmul.f32 %v2092_v42, %v7002_v7  ;;  %v2097_v4 = vadd.f32 0.5, %v2096_v15 }
 0x43a   :  { %v7094_v43 = vadd.f32 %v2099_v41, %v2098_v60 }
 0x43c   :  { %5532 = vtanh.f32 %v7094_v43 }
 0x443   :  { %v2178_v51 = vpop.f32.mrb[24].mxu0  ;;  %v2249_v20 = vpop.f32.mrb[24].mxu1 }
 0x444   :  { %v5375_v62 = vadd.f32 %v2178_v51, %v6814_v24  ;;  %v2180_v48 = vpop.f32.mrb[25].mxu0  ;;  %v2251_v17 = vpop.f32.mrb[25].mxu1  ;;  %v5391_v41 = vadd.f32 %v2249_v20, %v6819_v13 }
 0x445   :  { %v5376_v0 = vadd.f32 %v2180_v48, %v6816_v16  ;;  %v5392_v42 = vadd.f32 %v2251_v17, %v6825_v39 }
 0x446   :  { %v5533_v1 = vpop.eup %5532  ;;  %v2258_v47 = vmul.f32 0.5, %v5375_v62 }
 0x447   :  { %v7099_v35 = vmul.f32 %v5533_v1, %v2097_v4  ;;  %v2262_v7 = vmul.f32 0.5, %v5376_v0  ;;  %v2267_v26 = vmul.f32 0.5, %v5392_v42  ;;  %v7821_v42 = vld [vmem:[#allocation11_spill] sm:$0xff] }
 0x448   :  { %5534 = vtanh.f32 %v2258_v47 }
 0x449   :  { %7818 = vst [vmem:[#allocation43_spill] sm:$0xff] %v7099_v35  ;;  %5536 = vtanh.f32 %v2262_v7  ;;  %2349 = vmatmul.mubr.f32.vlgmr.msra.gmra.mrb[8].mxu0 %v7099_v35  ;;  %2420 = vmatmul.mubr.f32.vlgmr.msra.gmra.mrb[8].mxu1 %v7099_v35  ;;  %v7837_v35 = vld [vmem:[#allocation27_spill] sm:$0xff] }
 0x44a   :  { %4826 = vmatpush1.bf16.msra.mxu0 %v6500_v30  ;;  %4858 = vmatpush1.bf16.msra.mxu1 %v6504_v32  ;;  %5538 = vtanh.f32 %v5391_v41  ;;  %v7820_v41 = vld [vmem:[#allocation10_spill] sm:$0xff] }
 0x44b   :  { %4828 = vmatprep.subr.bf16.mxu0 %v6506_v36  ;;  %4860 = vmatprep.subr.bf16.mxu1 %v6519_v40  ;;  %5540 = vtanh.f32 %v2267_v26  ;;  %v7822_v26 = vld [vmem:[#allocation12_spill] sm:$0xff] }
 0x44c   :  { %2520 = vmatprep.mubr.f32.mxu0 %v7725_v12  ;;  %2591 = vmatprep.mubr.f32.mxu1 %v7725_v12 }
 0x44e   :  { %4830 = vmatpush1.bf16.msra.mxu0 %v6540_v55  ;;  %4862 = vmatpush1.bf16.msra.mxu1 %v6544_v49 }
 0x44f   :  { %4832 = vmatprep.subr.bf16.mxu0 %v6546_v59  ;;  %4864 = vmatprep.subr.bf16.mxu1 %v6558_v5 }
 0x452   :  { %v5535_v10 = vpop.eup %5534  ;;  %4834 = vmatpush1.bf16.msra.mxu0 %v6578_v18  ;;  %4866 = vmatpush1.bf16.msra.mxu1 %v6582_v19 }
 0x453   :  { %v5537_v60 = vpop.eup %5536  ;;  %v2260_v54 = vmul.f32 0.5, %v5535_v10  ;;  %4836 = vmatprep.subr.bf16.mxu0 %v6584_v22  ;;  %4868 = vmatprep.subr.bf16.mxu1 %v6596_v14  ;;  %v7823_v10 = vld [vmem:[#allocation13_spill] sm:$0xff] }
 0x454   :  { %v2264_v15 = vmul.f32 0.5, %v5537_v60  ;;  %v5539_v20 = vpop.eup %5538  ;;  %v7824_v60 = vld [vmem:[#allocation14_spill] sm:$0xff] }
 0x455   :  { %v2261_v51 = vadd.f32 0.5, %v2260_v54  ;;  %v5541_v0 = vpop.eup %5540  ;;  %v7825_v54 = vld [vmem:[#allocation15_spill] sm:$0xff] }
 0x456   :  { %v2265_v62 = vadd.f32 0.5, %v2264_v15  ;;  %4838 = vmatpush1.bf16.msra.mxu0 %v6614_v53  ;;  %4870 = vmatpush1.bf16.msra.mxu1 %v7729_v6  ;;  %v7826_v15 = vld [vmem:[#allocation16_spill] sm:$0xff] }
 0x457   :  { %v2272_v48 = vmul.f32 %v5539_v20, %v2261_v51  ;;  %4840 = vmatprep.subr.bf16.mxu0 %v7730_v23  ;;  %4872 = vmatprep.subr.bf16.mxu1 %v7731_v11  ;;  %v7827_v51 = vld [vmem:[#allocation17_spill] sm:$0xff]  ;;  %v7828_v20 = vld [vmem:[#allocation18_spill] sm:$0xff] }
 0x458   :  { %v2271_v17 = vmul.f32 %v2265_v62, %v7032_v44  ;;  %v2269_v44 = vmul.f32 0.5, %v5541_v0  ;;  %v7829_v62 = vld [vmem:[#allocation19_spill] sm:$0xff]  ;;  %v7832_v0 = vld [vmem:[#allocation22_spill] sm:$0xff] }
 0x45a   :  { %v7124_v4 = vadd.f32 %v2272_v48, %v2271_v17  ;;  %4842 = vmatpush1.bf16.msra.mxu0 %v7732_v58  ;;  %4874 = vmatpush1.bf16.msra.mxu1 %v7733_v33  ;;  %v2270_v1 = vadd.f32 0.5, %v2269_v44  ;;  %v7830_v48 = vld [vmem:[#allocation20_spill] sm:$0xff]  ;;  %v7831_v17 = vld [vmem:[#allocation21_spill] sm:$0xff]  ;;  %v7833_v44 = vld [vmem:[#allocation23_spill] sm:$0xff] }
 0x45b   :  { %4844 = vmatprep.subr.bf16.mxu0 %v7734_v52  ;;  %4876 = vmatprep.subr.bf16.mxu1 %v7735_v45 }
 0x45c   :  { %5542 = vtanh.f32 %v7124_v4 }
 0x45e   :  { %4846 = vmatpush1.bf16.msra.mxu0 %v6686_v37  ;;  %4878 = vmatpush1.bf16.msra.mxu1 %v6690_v3 }
 0x45f   :  { %4848 = vmatprep.subr.bf16.mxu0 %v6692_v63  ;;  %4880 = vmatprep.subr.bf16.mxu1 %v6704_v50 }
 0x462   :  { %4850 = vmatpush1.bf16.msra.mxu0 %v6722_v27  ;;  %4882 = vmatpush1.bf16.msra.mxu1 %v6726_v9 }
 0x463   :  { %4852 = vmatprep.subr.bf16.mxu0 %v6728_v46  ;;  %4884 = vmatprep.subr.bf16.mxu1 %v6737_v61 }
 0x466   :  { %v5543_v47 = vpop.eup %5542  ;;  %4854 = vmatpush1.bf16.msra.mxu0 %v6746_v2  ;;  %4886 = vmatpush1.bf16.msra.mxu1 %v6750_v8 }
 0x467   :  { %v7141_v7 = vmul.f32 %v5543_v47, %v2270_v1  ;;  %4888 = vmatprep.subr.bf16.mxu0 %v6157_v21  ;;  %4920 = vmatprep.subr.bf16.mxu1 %v6166_v25  ;;  %v7834_v1 = vld [vmem:[#allocation24_spill] sm:$0xff]  ;;  %v7835_v47 = vld [vmem:[#allocation25_spill] sm:$0xff] }
 0x469   :  { %7819 = vst [vmem:[#allocation44_spill] sm:$0xff] %v7141_v7  ;;  %2521 = vmatmul.mubr.f32.vlgmr.msra.gmra.mrb[22].mxu0 %v7141_v7  ;;  %2592 = vmatmul.mubr.f32.vlgmr.msra.gmra.mrb[22].mxu1 %v7141_v7  ;;  %v7836_v7 = vld [vmem:[#allocation26_spill] sm:$0xff] }
 0x46a   :  { %4890 = vmatpush1.bf16.msra.mxu0 %v6175_v28  ;;  %4922 = vmatpush1.bf16.msra.mxu1 %v6184_v31 }
 0x46b   :  { %4892 = vmatprep.subr.bf16.mxu0 %v6194_v34  ;;  %4924 = vmatprep.subr.bf16.mxu1 %v6204_v38 }
 0x46c   :  { %2692 = vmatprep.mubr.f32.mxu0 %v7725_v12  ;;  %2763 = vmatprep.mubr.f32.mxu1 %v7725_v12 }
 0x46e   :  { %4894 = vmatpush1.bf16.msra.mxu0 %v7820_v41  ;;  %4926 = vmatpush1.bf16.msra.mxu1 %v7821_v42 }
 0x46f   :  { %4896 = vmatprep.subr.bf16.mxu0 %v7822_v26  ;;  %4928 = vmatprep.subr.bf16.mxu1 %v7823_v10 }
 0x472   :  { %4898 = vmatpush1.bf16.msra.mxu0 %v7824_v60  ;;  %4930 = vmatpush1.bf16.msra.mxu1 %v7825_v54 }
 0x473   :  { %4900 = vmatprep.subr.bf16.mxu0 %v7826_v15  ;;  %4932 = vmatprep.subr.bf16.mxu1 %v7827_v51  ;;  %v7838_v51 = vld [vmem:[#allocation28_spill] sm:$0xff]  ;;  %v7848_v15 = vld [vmem:[#allocation45_spill] sm:$0xff] }
 0x476   :  { %4902 = vmatpush1.bf16.msra.mxu0 %v7828_v20  ;;  %4934 = vmatpush1.bf16.msra.mxu1 %v7829_v62  ;;  %v7839_v20 = vld [vmem:[#allocation29_spill] sm:$0xff]  ;;  %v7840_v62 = vld [vmem:[#allocation30_spill] sm:$0xff] }
 0x477   :  { %4904 = vmatprep.subr.bf16.mxu0 %v7830_v48  ;;  %4936 = vmatprep.subr.bf16.mxu1 %v7831_v17  ;;  %v7841_v48 = vld [vmem:[#allocation31_spill] sm:$0xff]  ;;  %v7842_v17 = vld [vmem:[#allocation32_spill] sm:$0xff] }
 0x47a   :  { %4906 = vmatpush1.bf16.msra.mxu0 %v7832_v0  ;;  %4938 = vmatpush1.bf16.msra.mxu1 %v7833_v44  ;;  %v7843_v0 = vld [vmem:[#allocation33_spill] sm:$0xff]  ;;  %v7844_v44 = vld [vmem:[#allocation34_spill] sm:$0xff] }
 0x47b   :  { %4908 = vmatprep.subr.bf16.mxu0 %v7834_v1  ;;  %4940 = vmatprep.subr.bf16.mxu1 %v7835_v47  ;;  %v7845_v1 = vld [vmem:[#allocation35_spill] sm:$0xff]  ;;  %v7846_v47 = vld [vmem:[#allocation36_spill] sm:$0xff] }
 0x47e   :  { %4910 = vmatpush1.bf16.msra.mxu0 %v7836_v7  ;;  %4942 = vmatpush1.bf16.msra.mxu1 %v7837_v35  ;;  %v7847_v7 = vld [vmem:[#allocation37_spill] sm:$0xff] }
 0x47f   :  { %4912 = vmatprep.subr.bf16.mxu0 %v7838_v51  ;;  %4944 = vmatprep.subr.bf16.mxu1 %v7839_v20 }
 0x482   :  { %4914 = vmatpush1.bf16.msra.mxu0 %v7840_v62  ;;  %4946 = vmatpush1.bf16.msra.mxu1 %v7841_v48 }
 0x483   :  { %4916 = vmatprep.subr.bf16.mxu0 %v7842_v17  ;;  %4948 = vmatprep.subr.bf16.mxu1 %v7843_v0 }
 0x486   :  { %4918 = vmatpush1.bf16.msra.mxu0 %v7844_v44  ;;  %4950 = vmatpush1.bf16.msra.mxu1 %v7845_v1 }
 0x487   :  { %4952 = vmatprep.subr.bf16.mxu0 %v7846_v47  ;;  %4984 = vmatprep.subr.bf16.mxu1 %v7847_v7 }
 0x51c   :  { %v2350_v35 = vpop.f32.mrb[8].mxu0  ;;  %v2421_v51 = vpop.f32.mrb[8].mxu1 }
 0x51d   :  { %v5343_v20 = vadd.f32 %v2350_v35, %v7848_v15  ;;  %v2352_v54 = vpop.f32.mrb[9].mxu0  ;;  %v2423_v62 = vpop.f32.mrb[9].mxu1  ;;  %v5359_v0 = vadd.f32 %v2421_v51, %v6801_v56 }
 0x51e   :  { %v5344_v48 = vadd.f32 %v2352_v54, %v7755_v57  ;;  %v5360_v1 = vadd.f32 %v2423_v62, %v6805_v29 }
 0x51f   :  { %v2430_v60 = vmul.f32 0.5, %v5343_v20 }
 0x520   :  { %v2434_v17 = vmul.f32 0.5, %v5344_v48  ;;  %v2439_v47 = vmul.f32 0.5, %v5360_v1 }
 0x521   :  { %5544 = vtanh.f32 %v2430_v60 }
 0x522   :  { %5546 = vtanh.f32 %v2434_v17 }
 0x523   :  { %5548 = vtanh.f32 %v5359_v0 }
 0x524   :  { %5550 = vtanh.f32 %v2439_v47 }
 0x52b   :  { %v5545_v44 = vpop.eup %5544 }
 0x52c   :  { %v5547_v7 = vpop.eup %5546  ;;  %v2432_v10 = vmul.f32 0.5, %v5545_v44 }
 0x52d   :  { %v2436_v26 = vmul.f32 0.5, %v5547_v7  ;;  %v5549_v15 = vpop.eup %5548 }
 0x52e   :  { %v2433_v35 = vadd.f32 0.5, %v2432_v10  ;;  %v5551_v60 = vpop.eup %5550 }
 0x52f   :  { %v2437_v42 = vadd.f32 0.5, %v2436_v26  ;;  %v2441_v51 = vmul.f32 0.5, %v5551_v60 }
 0x530   :  { %v2444_v41 = vmul.f32 %v5549_v15, %v2433_v35 }
 0x531   :  { %v2443_v54 = vmul.f32 %v2437_v42, %v7094_v43  ;;  %v2442_v7 = vadd.f32 0.5, %v2441_v51 }
 0x533   :  { %v7186_v20 = vadd.f32 %v2444_v41, %v2443_v54 }
 0x535   :  { %5552 = vtanh.f32 %v7186_v20 }
 0x53c   :  { %v2522_v48 = vpop.f32.mrb[22].mxu0  ;;  %v2593_v62 = vpop.f32.mrb[22].mxu1 }
 0x53d   :  { %v5373_v17 = vadd.f32 %v2522_v48, %v6814_v24  ;;  %v2524_v0 = vpop.f32.mrb[23].mxu0  ;;  %v2595_v44 = vpop.f32.mrb[23].mxu1  ;;  %v5389_v41 = vadd.f32 %v2593_v62, %v6819_v13 }
 0x53e   :  { %v5374_v10 = vadd.f32 %v2524_v0, %v6816_v16  ;;  %v5390_v42 = vadd.f32 %v2595_v44, %v6825_v39 }
 0x53f   :  { %v5553_v1 = vpop.eup %5552  ;;  %v2602_v26 = vmul.f32 0.5, %v5373_v17 }
 0x540   :  { %v7191_v15 = vmul.f32 %v5553_v1, %v2442_v7  ;;  %v2606_v43 = vmul.f32 0.5, %v5374_v10  ;;  %v2611_v47 = vmul.f32 0.5, %v5390_v42  ;;  %v7852_v42 = vld [vmem:[#allocation11_spill] sm:$0xff] }
 0x541   :  { %5554 = vtanh.f32 %v2602_v26 }
 0x542   :  { %7849 = vst [vmem:[#allocation46_spill] sm:$0xff] %v7191_v15  ;;  %5556 = vtanh.f32 %v2606_v43  ;;  %2693 = vmatmul.mubr.f32.vlgmr.msra.gmra.mrb[10].mxu0 %v7191_v15  ;;  %2764 = vmatmul.mubr.f32.vlgmr.msra.gmra.mrb[10].mxu1 %v7191_v15  ;;  %v7868_v15 = vld [vmem:[#allocation27_spill] sm:$0xff] }
 0x543   :  { %4954 = vmatpush1.bf16.msra.mxu0 %v6500_v30  ;;  %4986 = vmatpush1.bf16.msra.mxu1 %v6504_v32  ;;  %5558 = vtanh.f32 %v5389_v41  ;;  %v7851_v41 = vld [vmem:[#allocation10_spill] sm:$0xff] }
 0x544   :  { %4956 = vmatprep.subr.bf16.mxu0 %v6506_v36  ;;  %4988 = vmatprep.subr.bf16.mxu1 %v6519_v40  ;;  %5560 = vtanh.f32 %v2611_v47  ;;  %v7853_v47 = vld [vmem:[#allocation12_spill] sm:$0xff] }
 0x545   :  { %2864 = vmatprep.mubr.f32.mxu0 %v7725_v12  ;;  %2935 = vmatprep.mubr.f32.mxu1 %v7725_v12 }
 0x547   :  { %4958 = vmatpush1.bf16.msra.mxu0 %v6540_v55  ;;  %4990 = vmatpush1.bf16.msra.mxu1 %v6544_v49 }
 0x548   :  { %4960 = vmatprep.subr.bf16.mxu0 %v6546_v59  ;;  %4992 = vmatprep.subr.bf16.mxu1 %v6558_v5 }
 0x54b   :  { %v5555_v35 = vpop.eup %5554  ;;  %4962 = vmatpush1.bf16.msra.mxu0 %v6578_v18  ;;  %4994 = vmatpush1.bf16.msra.mxu1 %v6582_v19 }
 0x54c   :  { %v5557_v54 = vpop.eup %5556  ;;  %v2604_v60 = vmul.f32 0.5, %v5555_v35  ;;  %4964 = vmatprep.subr.bf16.mxu0 %v6584_v22  ;;  %4996 = vmatprep.subr.bf16.mxu1 %v6596_v14  ;;  %v7854_v35 = vld [vmem:[#allocation13_spill] sm:$0xff] }
 0x54d   :  { %v2608_v51 = vmul.f32 0.5, %v5557_v54  ;;  %v5559_v62 = vpop.eup %5558  ;;  %v7855_v54 = vld [vmem:[#allocation14_spill] sm:$0xff] }
 0x54e   :  { %v2605_v48 = vadd.f32 0.5, %v2604_v60  ;;  %v5561_v10 = vpop.eup %5560  ;;  %v7856_v60 = vld [vmem:[#allocation15_spill] sm:$0xff] }
 0x54f   :  { %v2609_v17 = vadd.f32 0.5, %v2608_v51  ;;  %4966 = vmatpush1.bf16.msra.mxu0 %v6614_v53  ;;  %4998 = vmatpush1.bf16.msra.mxu1 %v7729_v6  ;;  %v7857_v51 = vld [vmem:[#allocation16_spill] sm:$0xff] }
 0x550   :  { %v2616_v0 = vmul.f32 %v5559_v62, %v2605_v48  ;;  %4968 = vmatprep.subr.bf16.mxu0 %v7730_v23  ;;  %5000 = vmatprep.subr.bf16.mxu1 %v7731_v11  ;;  %v7858_v48 = vld [vmem:[#allocation17_spill] sm:$0xff]  ;;  %v7859_v62 = vld [vmem:[#allocation18_spill] sm:$0xff] }
 0x551   :  { %v2615_v44 = vmul.f32 %v2609_v17, %v7124_v4  ;;  %v2613_v4 = vmul.f32 0.5, %v5561_v10  ;;  %v7860_v17 = vld [vmem:[#allocation19_spill] sm:$0xff]  ;;  %v7863_v10 = vld [vmem:[#allocation22_spill] sm:$0xff] }
 0x553   :  { %v7216_v7 = vadd.f32 %v2616_v0, %v2615_v44  ;;  %4970 = vmatpush1.bf16.msra.mxu0 %v7732_v58  ;;  %5002 = vmatpush1.bf16.msra.mxu1 %v7733_v33  ;;  %v2614_v1 = vadd.f32 0.5, %v2613_v4  ;;  %v7861_v0 = vld [vmem:[#allocation20_spill] sm:$0xff]  ;;  %v7862_v44 = vld [vmem:[#allocation21_spill] sm:$0xff]  ;;  %v7864_v4 = vld [vmem:[#allocation23_spill] sm:$0xff] }
 0x554   :  { %4972 = vmatprep.subr.bf16.mxu0 %v7734_v52  ;;  %5004 = vmatprep.subr.bf16.mxu1 %v7735_v45 }
 0x555   :  { %5562 = vtanh.f32 %v7216_v7 }
 0x557   :  { %4974 = vmatpush1.bf16.msra.mxu0 %v6686_v37  ;;  %5006 = vmatpush1.bf16.msra.mxu1 %v6690_v3 }
 0x558   :  { %4976 = vmatprep.subr.bf16.mxu0 %v6692_v63  ;;  %5008 = vmatprep.subr.bf16.mxu1 %v6704_v50 }
 0x55b   :  { %4978 = vmatpush1.bf16.msra.mxu0 %v6722_v27  ;;  %5010 = vmatpush1.bf16.msra.mxu1 %v6726_v9 }
 0x55c   :  { %4980 = vmatprep.subr.bf16.mxu0 %v6728_v46  ;;  %5012 = vmatprep.subr.bf16.mxu1 %v6737_v61 }
 0x55f   :  { %v5563_v26 = vpop.eup %5562  ;;  %4982 = vmatpush1.bf16.msra.mxu0 %v6746_v2  ;;  %5014 = vmatpush1.bf16.msra.mxu1 %v6750_v8 }
 0x560   :  { %v7233_v43 = vmul.f32 %v5563_v26, %v2614_v1  ;;  %5016 = vmatprep.subr.bf16.mxu0 %v6157_v21  ;;  %5048 = vmatprep.subr.bf16.mxu1 %v6166_v25  ;;  %v7865_v1 = vld [vmem:[#allocation24_spill] sm:$0xff]  ;;  %v7866_v26 = vld [vmem:[#allocation25_spill] sm:$0xff] }
 0x562   :  { %7850 = vst [vmem:[#allocation48_spill] sm:$0xff] %v7233_v43  ;;  %2865 = vmatmul.mubr.f32.vlgmr.msra.gmra.mrb[20].mxu0 %v7233_v43  ;;  %2936 = vmatmul.mubr.f32.vlgmr.msra.gmra.mrb[20].mxu1 %v7233_v43  ;;  %v7867_v43 = vld [vmem:[#allocation26_spill] sm:$0xff] }
 0x563   :  { %5018 = vmatpush1.bf16.msra.mxu0 %v6175_v28  ;;  %5050 = vmatpush1.bf16.msra.mxu1 %v6184_v31 }
 0x564   :  { %5020 = vmatprep.subr.bf16.mxu0 %v6194_v34  ;;  %5052 = vmatprep.subr.bf16.mxu1 %v6204_v38 }
 0x565   :  { %3036 = vmatprep.mubr.f32.mxu0 %v7725_v12  ;;  %3107 = vmatprep.mubr.f32.mxu1 %v7725_v12 }
 0x567   :  { %5022 = vmatpush1.bf16.msra.mxu0 %v7851_v41  ;;  %5054 = vmatpush1.bf16.msra.mxu1 %v7852_v42 }
 0x568   :  { %5024 = vmatprep.subr.bf16.mxu0 %v7853_v47  ;;  %5056 = vmatprep.subr.bf16.mxu1 %v7854_v35 }
 0x56b   :  { %5026 = vmatpush1.bf16.msra.mxu0 %v7855_v54  ;;  %5058 = vmatpush1.bf16.msra.mxu1 %v7856_v60 }
 0x56c   :  { %5028 = vmatprep.subr.bf16.mxu0 %v7857_v51  ;;  %5060 = vmatprep.subr.bf16.mxu1 %v7858_v48  ;;  %v7869_v48 = vld [vmem:[#allocation28_spill] sm:$0xff]  ;;  %v7879_v51 = vld [vmem:[#allocation45_spill] sm:$0xff] }
 0x56f   :  { %5030 = vmatpush1.bf16.msra.mxu0 %v7859_v62  ;;  %5062 = vmatpush1.bf16.msra.mxu1 %v7860_v17  ;;  %v7870_v62 = vld [vmem:[#allocation29_spill] sm:$0xff]  ;;  %v7871_v17 = vld [vmem:[#allocation30_spill] sm:$0xff] }
 0x570   :  { %5032 = vmatprep.subr.bf16.mxu0 %v7861_v0  ;;  %5064 = vmatprep.subr.bf16.mxu1 %v7862_v44  ;;  %v7872_v0 = vld [vmem:[#allocation31_spill] sm:$0xff]  ;;  %v7873_v44 = vld [vmem:[#allocation32_spill] sm:$0xff] }
 0x573   :  { %5034 = vmatpush1.bf16.msra.mxu0 %v7863_v10  ;;  %5066 = vmatpush1.bf16.msra.mxu1 %v7864_v4  ;;  %v7874_v10 = vld [vmem:[#allocation33_spill] sm:$0xff]  ;;  %v7875_v4 = vld [vmem:[#allocation34_spill] sm:$0xff] }
 0x574   :  { %5036 = vmatprep.subr.bf16.mxu0 %v7865_v1  ;;  %5068 = vmatprep.subr.bf16.mxu1 %v7866_v26  ;;  %v7876_v1 = vld [vmem:[#allocation35_spill] sm:$0xff]  ;;  %v7877_v26 = vld [vmem:[#allocation36_spill] sm:$0xff] }
 0x577   :  { %5038 = vmatpush1.bf16.msra.mxu0 %v7867_v43  ;;  %5070 = vmatpush1.bf16.msra.mxu1 %v7868_v15  ;;  %v7878_v43 = vld [vmem:[#allocation37_spill] sm:$0xff] }
 0x578   :  { %5040 = vmatprep.subr.bf16.mxu0 %v7869_v48  ;;  %5072 = vmatprep.subr.bf16.mxu1 %v7870_v62 }
 0x57b   :  { %5042 = vmatpush1.bf16.msra.mxu0 %v7871_v17  ;;  %5074 = vmatpush1.bf16.msra.mxu1 %v7872_v0 }
 0x57c   :  { %5044 = vmatprep.subr.bf16.mxu0 %v7873_v44  ;;  %5076 = vmatprep.subr.bf16.mxu1 %v7874_v10 }
 0x57f   :  { %5046 = vmatpush1.bf16.msra.mxu0 %v7875_v4  ;;  %5078 = vmatpush1.bf16.msra.mxu1 %v7876_v1 }
 0x580   :  { %5080 = vmatprep.subr.bf16.mxu0 %v7877_v26  ;;  %5112 = vmatprep.subr.bf16.mxu1 %v7878_v43 }
 0x615   :  { %v2694_v15 = vpop.f32.mrb[10].mxu0  ;;  %v2765_v48 = vpop.f32.mrb[10].mxu1 }
 0x616   :  { %v5345_v62 = vadd.f32 %v2694_v15, %v7879_v51  ;;  %v2696_v60 = vpop.f32.mrb[11].mxu0  ;;  %v2767_v17 = vpop.f32.mrb[11].mxu1  ;;  %v5361_v10 = vadd.f32 %v2765_v48, %v6801_v56 }
 0x617   :  { %v5346_v0 = vadd.f32 %v2696_v60, %v7755_v57  ;;  %v5362_v1 = vadd.f32 %v2767_v17, %v6805_v29 }
 0x618   :  { %v2774_v54 = vmul.f32 0.5, %v5345_v62 }
 0x619   :  { %v2778_v44 = vmul.f32 0.5, %v5346_v0  ;;  %v2783_v26 = vmul.f32 0.5, %v5362_v1 }
 0x61a   :  { %5564 = vtanh.f32 %v2774_v54 }
 0x61b   :  { %5566 = vtanh.f32 %v2778_v44 }
 0x61c   :  { %5568 = vtanh.f32 %v5361_v10 }
 0x61d   :  { %5570 = vtanh.f32 %v2783_v26 }
 0x624   :  { %v5565_v4 = vpop.eup %5564 }
 0x625   :  { %v5567_v43 = vpop.eup %5566  ;;  %v2776_v35 = vmul.f32 0.5, %v5565_v4 }
 0x626   :  { %v2780_v47 = vmul.f32 0.5, %v5567_v43  ;;  %v5569_v51 = vpop.eup %5568 }
 0x627   :  { %v2777_v15 = vadd.f32 0.5, %v2776_v35  ;;  %v5571_v54 = vpop.eup %5570 }
 0x628   :  { %v2781_v42 = vadd.f32 0.5, %v2780_v47  ;;  %v2785_v48 = vmul.f32 0.5, %v5571_v54 }
 0x629   :  { %v2788_v41 = vmul.f32 %v5569_v51, %v2777_v15 }
 0x62a   :  { %v2787_v60 = vmul.f32 %v2781_v42, %v7186_v20  ;;  %v2786_v43 = vadd.f32 0.5, %v2785_v48 }
 0x62c   :  { %v7278_v62 = vadd.f32 %v2788_v41, %v2787_v60 }
 0x62e   :  { %5572 = vtanh.f32 %v7278_v62 }
 0x635   :  { %v2866_v0 = vpop.f32.mrb[20].mxu0  ;;  %v2937_v17 = vpop.f32.mrb[20].mxu1 }
 0x636   :  { %v5371_v44 = vadd.f32 %v2866_v0, %v6814_v24  ;;  %v2868_v10 = vpop.f32.mrb[21].mxu0  ;;  %v2939_v4 = vpop.f32.mrb[21].mxu1  ;;  %v5387_v41 = vadd.f32 %v2937_v17, %v6819_v13 }
 0x637   :  { %v5372_v35 = vadd.f32 %v2868_v10, %v6816_v16  ;;  %v5388_v42 = vadd.f32 %v2939_v4, %v6825_v39 }
 0x638   :  { %v5573_v1 = vpop.eup %5572  ;;  %v2946_v47 = vmul.f32 0.5, %v5371_v44 }
 0x639   :  { %v7283_v51 = vmul.f32 %v5573_v1, %v2786_v43  ;;  %v2950_v20 = vmul.f32 0.5, %v5372_v35  ;;  %v2955_v26 = vmul.f32 0.5, %v5388_v42  ;;  %v7883_v42 = vld [vmem:[#allocation13_spill] sm:$0xff] }
 0x63a   :  { %5574 = vtanh.f32 %v2946_v47 }
 0x63b   :  { %5576 = vtanh.f32 %v2950_v20  ;;  %3037 = vmatmul.mubr.f32.vlgmr.msra.gmra.mrb[12].mxu0 %v7283_v51  ;;  %3108 = vmatmul.mubr.f32.vlgmr.msra.gmra.mrb[12].mxu1 %v7283_v51 }
 0x63c   :  { %5082 = vmatpush1.bf16.msra.mxu0 %v6500_v30  ;;  %5114 = vmatpush1.bf16.msra.mxu1 %v6504_v32  ;;  %5578 = vtanh.f32 %v5387_v41  ;;  %v7880_v41 = vld [vmem:[#allocation10_spill] sm:$0xff] }
 0x63d   :  { %5084 = vmatprep.subr.bf16.mxu0 %v6506_v36  ;;  %5116 = vmatprep.subr.bf16.mxu1 %v6519_v40  ;;  %5580 = vtanh.f32 %v2955_v26  ;;  %v7884_v26 = vld [vmem:[#allocation14_spill] sm:$0xff] }
 0x63e   :  { %3208 = vmatprep.mubr.f32.mxu0 %v7725_v12  ;;  %3279 = vmatprep.mubr.f32.mxu1 %v7725_v12 }
 0x640   :  { %5086 = vmatpush1.bf16.msra.mxu0 %v6540_v55  ;;  %5118 = vmatpush1.bf16.msra.mxu1 %v6544_v49 }
 0x641   :  { %5088 = vmatprep.subr.bf16.mxu0 %v6546_v59  ;;  %5120 = vmatprep.subr.bf16.mxu1 %v6558_v5 }
 0x644   :  { %v5575_v15 = vpop.eup %5574  ;;  %5090 = vmatpush1.bf16.msra.mxu0 %v6578_v18  ;;  %5122 = vmatpush1.bf16.msra.mxu1 %v6582_v19 }
 0x645   :  { %v5577_v60 = vpop.eup %5576  ;;  %v2948_v54 = vmul.f32 0.5, %v5575_v15  ;;  %5092 = vmatprep.subr.bf16.mxu0 %v6584_v22  ;;  %5124 = vmatprep.subr.bf16.mxu1 %v6596_v14  ;;  %v7889_v15 = vld [vmem:[#allocation19_spill] sm:$0xff] }
 0x646   :  { %v2952_v48 = vmul.f32 0.5, %v5577_v60  ;;  %v5579_v17 = vpop.eup %5578  ;;  %v7890_v60 = vld [vmem:[#allocation20_spill] sm:$0xff] }
 0x647   :  { %v2949_v0 = vadd.f32 0.5, %v2948_v54  ;;  %v5581_v35 = vpop.eup %5580  ;;  %v7891_v54 = vld [vmem:[#allocation21_spill] sm:$0xff] }
 0x648   :  { %v2953_v44 = vadd.f32 0.5, %v2952_v48  ;;  %5094 = vmatpush1.bf16.msra.mxu0 %v6614_v53  ;;  %5126 = vmatpush1.bf16.msra.mxu1 %v7729_v6  ;;  %v7892_v48 = vld [vmem:[#allocation22_spill] sm:$0xff] }
 0x649   :  { %v2960_v10 = vmul.f32 %v5579_v17, %v2949_v0  ;;  %5096 = vmatprep.subr.bf16.mxu0 %v7730_v23  ;;  %5128 = vmatprep.subr.bf16.mxu1 %v7731_v11  ;;  %v7893_v0 = vld [vmem:[#allocation23_spill] sm:$0xff]  ;;  %v7894_v17 = vld [vmem:[#allocation24_spill] sm:$0xff] }
 0x64a   :  { %v2959_v4 = vmul.f32 %v2953_v44, %v7216_v7  ;;  %v2957_v7 = vmul.f32 0.5, %v5581_v35  ;;  %v7895_v44 = vld [vmem:[#allocation25_spill] sm:$0xff]  ;;  %v7898_v35 = vld [vmem:[#allocation28_spill] sm:$0xff] }
 0x64c   :  { %v7308_v43 = vadd.f32 %v2960_v10, %v2959_v4  ;;  %5098 = vmatpush1.bf16.msra.mxu0 %v7732_v58  ;;  %5130 = vmatpush1.bf16.msra.mxu1 %v7733_v33  ;;  %v2958_v1 = vadd.f32 0.5, %v2957_v7  ;;  %v7896_v10 = vld [vmem:[#allocation26_spill] sm:$0xff]  ;;  %v7897_v4 = vld [vmem:[#allocation27_spill] sm:$0xff]  ;;  %v7899_v7 = vld [vmem:[#allocation29_spill] sm:$0xff] }
 0x64d   :  { %5100 = vmatprep.subr.bf16.mxu0 %v7734_v52  ;;  %5132 = vmatprep.subr.bf16.mxu1 %v7735_v45 }
 0x64e   :  { %5582 = vtanh.f32 %v7308_v43 }
 0x650   :  { %5102 = vmatpush1.bf16.msra.mxu0 %v6686_v37  ;;  %5134 = vmatpush1.bf16.msra.mxu1 %v6690_v3 }
 0x651   :  { %5104 = vmatprep.subr.bf16.mxu0 %v6692_v63  ;;  %5136 = vmatprep.subr.bf16.mxu1 %v6704_v50 }
 0x654   :  { %5106 = vmatpush1.bf16.msra.mxu0 %v6722_v27  ;;  %5138 = vmatpush1.bf16.msra.mxu1 %v6726_v9 }
 0x655   :  { %5108 = vmatprep.subr.bf16.mxu0 %v6728_v46  ;;  %5140 = vmatprep.subr.bf16.mxu1 %v6737_v61 }
 0x658   :  { %v5583_v47 = vpop.eup %5582  ;;  %5110 = vmatpush1.bf16.msra.mxu0 %v6746_v2  ;;  %5142 = vmatpush1.bf16.msra.mxu1 %v6750_v8 }
 0x659   :  { %v7325_v20 = vmul.f32 %v5583_v47, %v2958_v1  ;;  %5144 = vmatprep.subr.bf16.mxu0 %v6157_v21  ;;  %5176 = vmatprep.subr.bf16.mxu1 %v6166_v25  ;;  %v7881_v21 = vld [vmem:[#allocation11_spill] sm:$0xff]  ;;  %v7882_v25 = vld [vmem:[#allocation12_spill] sm:$0xff]  ;;  %v7900_v1 = vld [vmem:[#allocation30_spill] sm:$0xff] }
 0x65a   :  { %v7901_v47 = vld [vmem:[#allocation31_spill] sm:$0xff] }
 0x65b   :  { %3209 = vmatmul.mubr.f32.vlgmr.msra.gmra.mrb[18].mxu0 %v7325_v20  ;;  %3280 = vmatmul.mubr.f32.vlgmr.msra.gmra.mrb[18].mxu1 %v7325_v20 }
 0x65c   :  { %5146 = vmatpush1.bf16.msra.mxu0 %v6175_v28  ;;  %5178 = vmatpush1.bf16.msra.mxu1 %v6184_v31  ;;  %v7885_v28 = vld [vmem:[#allocation15_spill] sm:$0xff]  ;;  %v7886_v31 = vld [vmem:[#allocation16_spill] sm:$0xff] }
 0x65d   :  { %5148 = vmatprep.subr.bf16.mxu0 %v6194_v34  ;;  %5180 = vmatprep.subr.bf16.mxu1 %v6204_v38  ;;  %v7887_v34 = vld [vmem:[#allocation17_spill] sm:$0xff]  ;;  %v7888_v38 = vld [vmem:[#allocation18_spill] sm:$0xff] }
 0x65e   :  { %3380 = vmatprep.mubr.f32.mxu0 %v7725_v12  ;;  %3451 = vmatprep.mubr.f32.mxu1 %v7725_v12 }
 0x660   :  { %5150 = vmatpush1.bf16.msra.mxu0 %v7880_v41  ;;  %5182 = vmatpush1.bf16.msra.mxu1 %v7881_v21  ;;  %v7902_v41 = vld [vmem:[#allocation32_spill] sm:$0xff]  ;;  %v7903_v21 = vld [vmem:[#allocation33_spill] sm:$0xff] }
 0x661   :  { %5152 = vmatprep.subr.bf16.mxu0 %v7882_v25  ;;  %5184 = vmatprep.subr.bf16.mxu1 %v7883_v42  ;;  %v7904_v25 = vld [vmem:[#allocation34_spill] sm:$0xff]  ;;  %v7905_v42 = vld [vmem:[#allocation35_spill] sm:$0xff] }
 0x664   :  { %5154 = vmatpush1.bf16.msra.mxu0 %v7884_v26  ;;  %5186 = vmatpush1.bf16.msra.mxu1 %v7885_v28  ;;  %v7906_v26 = vld [vmem:[#allocation36_spill] sm:$0xff]  ;;  %v7907_v28 = vld [vmem:[#allocation37_spill] sm:$0xff] }
 0x665   :  { %5156 = vmatprep.subr.bf16.mxu0 %v7886_v31  ;;  %5188 = vmatprep.subr.bf16.mxu1 %v7887_v34 }
 0x668   :  { %5158 = vmatpush1.bf16.msra.mxu0 %v7888_v38  ;;  %5190 = vmatpush1.bf16.msra.mxu1 %v7889_v15  ;;  %v7908_v38 = vld [vmem:[#allocation45_spill] sm:$0xff] }
 0x669   :  { %5160 = vmatprep.subr.bf16.mxu0 %v7890_v60  ;;  %5192 = vmatprep.subr.bf16.mxu1 %v7891_v54 }
 0x66c   :  { %5162 = vmatpush1.bf16.msra.mxu0 %v7892_v48  ;;  %5194 = vmatpush1.bf16.msra.mxu1 %v7893_v0 }
 0x66d   :  { %5164 = vmatprep.subr.bf16.mxu0 %v7894_v17  ;;  %5196 = vmatprep.subr.bf16.mxu1 %v7895_v44 }
 0x670   :  { %5166 = vmatpush1.bf16.msra.mxu0 %v7896_v10  ;;  %5198 = vmatpush1.bf16.msra.mxu1 %v7897_v4 }
 0x671   :  { %5168 = vmatprep.subr.bf16.mxu0 %v7898_v35  ;;  %5200 = vmatprep.subr.bf16.mxu1 %v7899_v7 }
 0x674   :  { %5170 = vmatpush1.bf16.msra.mxu0 %v7900_v1  ;;  %5202 = vmatpush1.bf16.msra.mxu1 %v7901_v47 }
 0x675   :  { %5172 = vmatprep.subr.bf16.mxu0 %v7902_v41  ;;  %5204 = vmatprep.subr.bf16.mxu1 %v7903_v21 }
 0x678   :  { %5174 = vmatpush1.bf16.msra.mxu0 %v7904_v25  ;;  %5206 = vmatpush1.bf16.msra.mxu1 %v7905_v42 }
 0x679   :  { %5208 = vmatprep.subr.bf16.mxu0 %v7906_v26  ;;  %5240 = vmatprep.subr.bf16.mxu1 %v7907_v28 }
 0x70e   :  { %v3038_v31 = vpop.f32.mrb[12].mxu0  ;;  %v3109_v34 = vpop.f32.mrb[12].mxu1 }
 0x70f   :  { %v5347_v15 = vadd.f32 %v3038_v31, %v7908_v38  ;;  %v3040_v60 = vpop.f32.mrb[13].mxu0  ;;  %v3111_v54 = vpop.f32.mrb[13].mxu1  ;;  %v5363_v44 = vadd.f32 %v3109_v34, %v6801_v56 }
 0x710   :  { %v5348_v48 = vadd.f32 %v3040_v60, %v7755_v57  ;;  %v5364_v10 = vadd.f32 %v3111_v54, %v6805_v29 }
 0x711   :  { %v3118_v0 = vmul.f32 0.5, %v5347_v15 }
 0x712   :  { %v3122_v17 = vmul.f32 0.5, %v5348_v48  ;;  %v3127_v4 = vmul.f32 0.5, %v5364_v10 }
 0x713   :  { %5584 = vtanh.f32 %v3118_v0 }
 0x714   :  { %5586 = vtanh.f32 %v3122_v17 }
 0x715   :  { %5588 = vtanh.f32 %v5363_v44 }
 0x716   :  { %5590 = vtanh.f32 %v3127_v4 }
 0x71d   :  { %v5585_v35 = vpop.eup %5584 }
 0x71e   :  { %v5587_v7 = vpop.eup %5586  ;;  %v3120_v1 = vmul.f32 0.5, %v5585_v35 }
 0x71f   :  { %v3124_v47 = vmul.f32 0.5, %v5587_v7  ;;  %v5589_v21 = vpop.eup %5588 }
 0x720   :  { %v3121_v41 = vadd.f32 0.5, %v3120_v1  ;;  %v5591_v31 = vpop.eup %5590 }
 0x721   :  { %v3125_v25 = vadd.f32 0.5, %v3124_v47  ;;  %v3129_v34 = vmul.f32 0.5, %v5591_v31  ;;  %v3679_v31 = vld [vmem:[%s7599_s7 + $0x70] sm:$0xff] }
 0x722   :  { %v3132_v42 = vmul.f32 %v5589_v21, %v3121_v41  ;;  %v3676_v41 = vld [vmem:[%s7599_s7 + $0x58] sm:$0xff] }
 0x723   :  { %v3131_v26 = vmul.f32 %v3125_v25, %v7278_v62  ;;  %v3130_v17 = vadd.f32 0.5, %v3129_v34  ;;  %v3677_v25 = vld [vmem:[%s7599_s7 + $0x60] sm:$0xff]  ;;  %v3680_v34 = vld [vmem:[%s7599_s7 + $0x78] sm:$0xff] }
 0x725   :  { %v7370_v28 = vadd.f32 %v3132_v42, %v3131_v26  ;;  %v3678_v42 = vld [vmem:[%s7599_s7 + $0x68] sm:$0xff] }
 0x726   :  { %v5295_v26 = vpack.c.bf16 %v3678_v42, %v3677_v25 }
 0x727   :  { %5592 = vtanh.f32 %v7370_v28 }
 0x72e   :  { %v3210_v15 = vpop.f32.mrb[18].mxu0  ;;  %v3281_v60 = vpop.f32.mrb[18].mxu1 }
 0x72f   :  { %v5369_v54 = vadd.f32 %v3210_v15, %v6814_v24  ;;  %v3212_v48 = vpop.f32.mrb[19].mxu0  ;;  %v3283_v0 = vpop.f32.mrb[19].mxu1  ;;  %v5385_v7 = vadd.f32 %v3281_v60, %v6819_v13  ;;  %v5299_v15 = vpack.c.bf16 %v3680_v34, %v3679_v31  ;;  %v7910_v60 = vld [vmem:[#allocation39_spill] sm:$0xff] }
 0x730   :  { %v5370_v44 = vadd.f32 %v3212_v48, %v6816_v16  ;;  %v5386_v1 = vadd.f32 %v3283_v0, %v6825_v39  ;;  %v7912_v48 = vld [vmem:[#allocation43_spill] sm:$0xff]  ;;  %v7913_v0 = vld [vmem:[#allocation46_spill] sm:$0xff] }
 0x731   :  { %v5593_v10 = vpop.eup %5592  ;;  %v3290_v4 = vmul.f32 0.5, %v5369_v54  ;;  %v7911_v54 = vld [vmem:[#allocation41_spill] sm:$0xff] }
 0x732   :  { %v7375_v35 = vmul.f32 %v5593_v10, %v3130_v17  ;;  %v3294_v62 = vmul.f32 0.5, %v5370_v44  ;;  %v3809_v17 = vld [vmem:[%s7600_s8] sm:$0xff]  ;;  %v3810_v44 = vld [vmem:[%s7600_s8 + $0x8] sm:$0xff] }
 0x733   :  { %5594 = vtanh.f32 %v3290_v4  ;;  %v5303_v10 = vpack.c.bf16 %v3810_v44, %v3809_v17  ;;  %v3811_v4 = vld [vmem:[%s7600_s8 + $0x10] sm:$0xff] }
 0x734   :  { %5596 = vtanh.f32 %v3294_v62  ;;  %3381 = vmatmul.mubr.f32.vlgmr.msra.gmra.mrb[14].mxu0 %v7375_v35  ;;  %3452 = vmatmul.mubr.f32.vlgmr.msra.gmra.mrb[14].mxu1 %v7375_v35  ;;  %v3813_v62 = vld [vmem:[%s7600_s8 + $0x20] sm:$0xff] }
 0x735   :  { %5210 = vmatpush1.bf16.msra.mxu0 %v6500_v30  ;;  %5242 = vmatpush1.bf16.msra.mxu1 %v6504_v32  ;;  %5598 = vtanh.f32 %v5385_v7  ;;  %v3299_v30 = vmul.f32 0.5, %v5386_v1  ;;  %v3814_v7 = vld [vmem:[%s7600_s8 + $0x28] sm:$0xff] }
 0x736   :  { %5212 = vmatprep.subr.bf16.mxu0 %v6506_v36  ;;  %5244 = vmatprep.subr.bf16.mxu1 %v6519_v40  ;;  %v5311_v1 = vpack.c.bf16 %v3814_v7, %v3813_v62 }
 0x737   :  { %3552 = vmatprep.mubr.f32.mxu0 %v7725_v12  ;;  %3623 = vmatprep.mubr.f32.mxu1 %v7725_v12  ;;  %5600 = vtanh.f32 %v3299_v30  ;;  %v3815_v30 = vld [vmem:[%s7600_s8 + $0x30] sm:$0xff] }
 0x739   :  { %5214 = vmatpush1.bf16.msra.mxu0 %v6540_v55  ;;  %5246 = vmatpush1.bf16.msra.mxu1 %v6544_v49 }
 0x73a   :  { %5216 = vmatprep.subr.bf16.mxu0 %v6546_v59  ;;  %5248 = vmatprep.subr.bf16.mxu1 %v6558_v5 }
 0x73d   :  { %v5595_v32 = vpop.eup %5594  ;;  %5218 = vmatpush1.bf16.msra.mxu0 %v6578_v18  ;;  %5250 = vmatpush1.bf16.msra.mxu1 %v6582_v19 }
 0x73e   :  { %v5597_v36 = vpop.eup %5596  ;;  %v3292_v40 = vmul.f32 0.5, %v5595_v32  ;;  %5220 = vmatprep.subr.bf16.mxu0 %v6584_v22  ;;  %5252 = vmatprep.subr.bf16.mxu1 %v6596_v14  ;;  %v3665_v22 = vld [vmem:[%s7599_s7] sm:$0xff]  ;;  %v3666_v14 = vld [vmem:[%s7599_s7 + $0x8] sm:$0xff]  ;;  %v3816_v32 = vld [vmem:[%s7600_s8 + $0x38] sm:$0xff] }
 0x73f   :  { %v3296_v12 = vmul.f32 0.5, %v5597_v36  ;;  %v5599_v49 = vpop.eup %5598  ;;  %v5315_v36 = vpack.c.bf16 %v3816_v32, %v3815_v30 }
 0x740   :  { %v3293_v55 = vadd.f32 0.5, %v3292_v40  ;;  %v3817_v40 = vld [vmem:[%s7600_s8 + $0x40] sm:$0xff] }
 0x741   :  { %v3297_v47 = vadd.f32 0.5, %v3296_v12  ;;  %5222 = vmatpush1.bf16.msra.mxu0 %v6614_v53  ;;  %5254 = vmatpush1.bf16.msra.mxu1 %v7729_v6  ;;  %v5601_v19 = vpop.eup %5600  ;;  %v3818_v12 = vld [vmem:[%s7600_s8 + $0x48] sm:$0xff] }
 0x742   :  { %v3304_v59 = vmul.f32 %v5599_v49, %v3293_v55  ;;  %5224 = vmatprep.subr.bf16.mxu0 %v7730_v23  ;;  %5256 = vmatprep.subr.bf16.mxu1 %v7731_v11  ;;  %v3301_v53 = vmul.f32 0.5, %v5601_v19  ;;  %v3671_v23 = vld [vmem:[%s7599_s7 + $0x30] sm:$0xff]  ;;  %v3672_v11 = vld [vmem:[%s7599_s7 + $0x38] sm:$0xff]  ;;  %v5319_v55 = vpack.c.bf16 %v3818_v12, %v3817_v40  ;;  %v3822_v19 = vld [vmem:[%s7600_s8 + $0x68] sm:$0xff] }
 0x743   :  { %v3303_v5 = vmul.f32 %v3297_v47, %v7308_v43  ;;  %v3675_v43 = vld [vmem:[%s7599_s7 + $0x50] sm:$0xff]  ;;  %v3820_v47 = vld [vmem:[%s7600_s8 + $0x58] sm:$0xff] }
 0x744   :  { %v5291_v21 = vpack.c.bf16 %v3676_v41, %v3675_v43  ;;  %v3819_v49 = vld [vmem:[%s7600_s8 + $0x50] sm:$0xff] }
 0x745   :  { %v7400_v18 = vadd.f32 %v3304_v59, %v3303_v5  ;;  %5226 = vmatpush1.bf16.msra.mxu0 %v7732_v58  ;;  %5258 = vmatpush1.bf16.msra.mxu1 %v7733_v33  ;;  %v5283_v58 = vpack.c.bf16 %v3672_v11, %v3671_v23  ;;  %v3673_v33 = vld [vmem:[%s7599_s7 + $0x40] sm:$0xff]  ;;  %v5323_v59 = vpack.c.bf16 %v3820_v47, %v3819_v49 }
 0x746   :  { %5228 = vmatprep.subr.bf16.mxu0 %v7734_v52  ;;  %5260 = vmatprep.subr.bf16.mxu1 %v7735_v45  ;;  %v3674_v52 = vld [vmem:[%s7599_s7 + $0x48] sm:$0xff]  ;;  %v3821_v5 = vld [vmem:[%s7600_s8 + $0x60] sm:$0xff] }
 0x747   :  { %5602 = vtanh.f32 %v7400_v18  ;;  %v5287_v45 = vpack.c.bf16 %v3674_v52, %v3673_v33 }
 0x749   :  { %5230 = vmatpush1.bf16.msra.mxu0 %v6686_v37  ;;  %5262 = vmatpush1.bf16.msra.mxu1 %v6690_v3  ;;  %v5271_v3 = vpack.c.bf16 %v3666_v14, %v3665_v22  ;;  %v3668_v37 = vld [vmem:[%s7599_s7 + $0x18] sm:$0xff]  ;;  %v5327_v22 = vpack.c.bf16 %v3822_v19, %v3821_v5  ;;  %v3823_v14 = vld [vmem:[%s7600_s8 + $0x70] sm:$0xff] }
 0x74a   :  { %5232 = vmatprep.subr.bf16.mxu0 %v6692_v63  ;;  %5264 = vmatprep.subr.bf16.mxu1 %v6704_v50  ;;  %v3667_v63 = vld [vmem:[%s7599_s7 + $0x10] sm:$0xff]  ;;  %v3302_v50 = vadd.f32 0.5, %v3301_v53  ;;  %v3824_v53 = vld [vmem:[%s7600_s8 + $0x78] sm:$0xff] }
 0x74d   :  { %5234 = vmatpush1.bf16.msra.mxu0 %v6722_v27  ;;  %5266 = vmatpush1.bf16.msra.mxu1 %v6726_v9  ;;  %v3669_v27 = vld [vmem:[%s7599_s7 + $0x20] sm:$0xff] }
 0x74e   :  { %5236 = vmatprep.subr.bf16.mxu0 %v6728_v46  ;;  %5268 = vmatprep.subr.bf16.mxu1 %v6737_v61  ;;  %v5275_v46 = vpack.c.bf16 %v3668_v37, %v3667_v63  ;;  %v3670_v61 = vld [vmem:[%s7599_s7 + $0x28] sm:$0xff] }
 0x751   :  { %v5603_v6 = vpop.eup %5602  ;;  %5238 = vmatpush1.bf16.msra.mxu0 %v6746_v2  ;;  %5270 = vmatpush1.bf16.msra.mxu1 %v6750_v8  ;;  %v7909_v2 = vld [vmem:[#allocation47_spill] sm:$0xff]  ;;  %v5279_v8 = vpack.c.bf16 %v3670_v61, %v3669_v27 }
 0x752   :  { %v7429_v9 = vmul.f32 %v5603_v6, %v3302_v50  ;;  %5272 = vmatprep.subr.bf16.mxu0 %v5271_v3  ;;  %5304 = vmatprep.subr.bf16.mxu1 %v5303_v10 }
 0x754   :  { %3553 = vmatmul.mubr.f32.vlgmr.msra.gmra.mrb[16].mxu0 %v7429_v9  ;;  %3624 = vmatmul.mubr.f32.vlgmr.msra.gmra.mrb[16].mxu1 %v7429_v9 }
 0x755   :  { %5274 = vmatpush3.bf16.msra.mxu0 %v5271_v3  ;;  %4063 = vmatprep.mubr.f32.mxu0 %v7909_v2  ;;  %v5331_v3 = vpack.c.bf16 %v3824_v53, %v3823_v14 }
 0x756   :  { %5276 = vmatprep.subr.bf16.mxu0 %v5275_v46  ;;  %5306 = vmatpush3.bf16.msra.mxu1 %v5303_v10 }
 0x759   :  { %5278 = vmatpush3.bf16.msra.mxu0 %v5275_v46 }
 0x75a   :  { %5280 = vmatprep.subr.bf16.mxu0 %v5279_v8 }
 0x75d   :  { %5282 = vmatpush3.bf16.msra.mxu0 %v5279_v8 }
 0x75e   :  { %5284 = vmatprep.subr.bf16.mxu0 %v5283_v58 }
 0x761   :  { %5286 = vmatpush3.bf16.msra.mxu0 %v5283_v58 }
 0x762   :  { %5288 = vmatprep.subr.bf16.mxu0 %v5287_v45 }
 0x765   :  { %5290 = vmatpush3.bf16.msra.mxu0 %v5287_v45 }
 0x766   :  { %5292 = vmatprep.subr.bf16.mxu0 %v5291_v21 }
 0x769   :  { %5294 = vmatpush3.bf16.msra.mxu0 %v5291_v21 }
 0x76a   :  { %5296 = vmatprep.subr.bf16.mxu0 %v5295_v26 }
 0x76d   :  { %5298 = vmatpush3.bf16.msra.mxu0 %v5295_v26 }
 0x76e   :  { %5300 = vmatprep.subr.bf16.mxu0 %v5299_v15 }
 0x771   :  { %5302 = vmatpush3.bf16.msra.mxu0 %v5299_v15 }
 0x774   :  { %4064 = vmatmul.mubr.f32.vlgmr.msra.gmra.mrb[32].mxu0 %v7910_v60 }
 0x775   :  { %4066 = vmatprep.mubr.f32.mxu0 %v7911_v54 }
 0x778   :  { %4067 = vmatmul.mubr.f32.gmra.mrb[34].mxu0 %v7912_v48 }
 0x779   :  { %4069 = vmatprep.mubr.f32.mxu0 %v7913_v0 }
 0x77c   :  { %4070 = vmatmul.mubr.f32.gmra.mrb[36].mxu0 %v7283_v51  ;;  %v3812_v51 = vld [vmem:[%s7600_s8 + $0x18] sm:$0xff] }
 0x77d   :  { %4072 = vmatprep.mubr.f32.mxu0 %v7375_v35  ;;  %v5307_v35 = vpack.c.bf16 %v3812_v51, %v3811_v4 }
 0x77f   :  { %5308 = vmatprep.subr.bf16.mxu1 %v5307_v35 }
 0x780   :  { %5310 = vmatpush3.bf16.msra.mxu1 %v5307_v35 }
 0x781   :  { %5312 = vmatprep.subr.bf16.mxu1 %v5311_v1 }
 0x784   :  { %5314 = vmatpush3.bf16.msra.mxu1 %v5311_v1 }
 0x785   :  { %5316 = vmatprep.subr.bf16.mxu1 %v5315_v36 }
 0x788   :  { %5318 = vmatpush3.bf16.msra.mxu1 %v5315_v36 }
 0x789   :  { %5320 = vmatprep.subr.bf16.mxu1 %v5319_v55 }
 0x78c   :  { %5322 = vmatpush3.bf16.msra.mxu1 %v5319_v55 }
 0x78d   :  { %5324 = vmatprep.subr.bf16.mxu1 %v5323_v59 }
 0x790   :  { %5326 = vmatpush3.bf16.msra.mxu1 %v5323_v59 }
 0x791   :  { %5328 = vmatprep.subr.bf16.mxu1 %v5327_v22 }
 0x794   :  { %5330 = vmatpush3.bf16.msra.mxu1 %v5327_v22 }
 0x795   :  { %5332 = vmatprep.subr.bf16.mxu1 %v5331_v3 }
 0x798   :  { %5334 = vmatpush3.bf16.msra.mxu1 %v5331_v3 }
 0x807   :  { %v3382_v63 = vpop.f32.mrb[14].mxu0  ;;  %v3453_v37 = vpop.f32.mrb[14].mxu1 }
 0x808   :  { %v5349_v50 = vadd.f32 %v3382_v63, %v7908_v38  ;;  %v3384_v6 = vpop.f32.mrb[15].mxu0  ;;  %v3455_v46 = vpop.f32.mrb[15].mxu1  ;;  %v5365_v8 = vadd.f32 %v3453_v37, %v6801_v56 }
 0x809   :  { %v5350_v27 = vadd.f32 %v3384_v6, %v7755_v57  ;;  %v5366_v23 = vadd.f32 %v3455_v46, %v6805_v29  ;;  %v7914_v6 = vld [vmem:[#allocation48_spill] sm:$0xff]  ;;  %v7916_v46 = vld [vmem:[#allocation42_spill] sm:$0xff] }
 0x80a   :  { %v3462_v61 = vmul.f32 0.5, %v5349_v50 }
 0x80b   :  { %v3466_v2 = vmul.f32 0.5, %v5350_v27  ;;  %v3471_v11 = vmul.f32 0.5, %v5366_v23  ;;  %v7917_v27 = vld [vmem:[#allocation40_spill] sm:$0xff] }
 0x80c   :  { %5604 = vtanh.f32 %v3462_v61 }
 0x80d   :  { %5606 = vtanh.f32 %v3466_v2 }
 0x80e   :  { %5608 = vtanh.f32 %v5365_v8 }
 0x80f   :  { %5610 = vtanh.f32 %v3471_v11 }
 0x816   :  { %v5605_v58 = vpop.eup %5604 }
 0x817   :  { %v5607_v33 = vpop.eup %5606  ;;  %v3464_v52 = vmul.f32 0.5, %v5605_v58 }
 0x818   :  { %v3468_v45 = vmul.f32 0.5, %v5607_v33  ;;  %v5609_v43 = vpop.eup %5608 }
 0x819   :  { %v3465_v38 = vadd.f32 0.5, %v3464_v52  ;;  %v5611_v42 = vpop.eup %5610 }
 0x81a   :  { %v3469_v41 = vadd.f32 0.5, %v3468_v45  ;;  %v3473_v56 = vmul.f32 0.5, %v5611_v42 }
 0x81b   :  { %v3476_v21 = vmul.f32 %v5609_v43, %v3465_v38 }
 0x81c   :  { %v3475_v57 = vmul.f32 %v3469_v41, %v7370_v28  ;;  %v3474_v60 = vadd.f32 0.5, %v3473_v56 }
 0x81e   :  { %v3477_v25 = vadd.f32 %v3476_v21, %v3475_v57 }
 0x820   :  { %5612 = vtanh.f32 %v3477_v25 }
 0x827   :  { %v3554_v26 = vpop.f32.mrb[16].mxu0  ;;  %v3625_v31 = vpop.f32.mrb[16].mxu1 }
 0x828   :  { %v5367_v29 = vadd.f32 %v3554_v26, %v6814_v24  ;;  %v3556_v34 = vpop.f32.mrb[17].mxu0  ;;  %v3627_v15 = vpop.f32.mrb[17].mxu1  ;;  %v5383_v28 = vadd.f32 %v3625_v31, %v6819_v13 }
 0x829   :  { %v5368_v54 = vadd.f32 %v3556_v34, %v6816_v16  ;;  %v5384_v10 = vadd.f32 %v3627_v15, %v6825_v39  ;;  %v3982_v39 = vld [vmem:[%s7601_s9] ss:$0 sm:$0xff] }
 0x82a   :  { %v5613_v48 = vpop.eup %5612  ;;  %v3634_v0 = vmul.f32 0.5, %v5367_v29 }
 0x82b   :  { %v3638_v17 = vmul.f32 0.5, %v5368_v54  ;;  %v3479_v44 = vmul.f32 %v5613_v48, %v3474_v60  ;;  %v3643_v4 = vmul.f32 0.5, %v5384_v10 }
 0x82c   :  { %5614 = vtanh.f32 %v3634_v0 }
 0x82d   :  { %5616 = vtanh.f32 %v3638_v17  ;;  %4073 = vmatmul.mubr.f32.gmra.mrb[38].mxu0 %v3479_v44 }
 0x82e   :  { %5618 = vtanh.f32 %v5383_v28 }
 0x82f   :  { %5620 = vtanh.f32 %v3643_v4 }
 0x836   :  { %v5615_v51 = vpop.eup %5614 }
 0x837   :  { %v5617_v24 = vpop.eup %5616  ;;  %v3636_v35 = vmul.f32 0.5, %v5615_v51 }
 0x838   :  { %v3640_v62 = vmul.f32 0.5, %v5617_v24  ;;  %v5619_v16 = vpop.eup %5618 }
 0x839   :  { %v3637_v7 = vadd.f32 0.5, %v3636_v35  ;;  %v5621_v13 = vpop.eup %5620 }
 0x83a   :  { %v3641_v1 = vadd.f32 0.5, %v3640_v62  ;;  %v3645_v40 = vmul.f32 0.5, %v5621_v13 }
 0x83b   :  { %v3648_v30 = vmul.f32 %v5619_v16, %v3637_v7 }
 0x83c   :  { %v3647_v32 = vmul.f32 %v3641_v1, %v7400_v18  ;;  %v3646_v47 = vadd.f32 0.5, %v3645_v40 }
 0x83e   :  { %v3649_v36 = vadd.f32 %v3648_v30, %v3647_v32 }
 0x840   :  { %5622 = vtanh.f32 %v3649_v36 }
 0x847   :  { %v4065_v12 = vpop.f32.mrb[32].mxu0 }
 0x848   :  { %v3760_v55 = vadd.f32 %v4065_v12, %v3982_v39  ;;  %v3754_v49 = vpop.f32.mrb[33].mxu0 }
 0x849   :  { %v3755_v59 = vadd.f32 %v3982_v39, %v3754_v49 }
 0x84a   :  { %v5623_v5 = vpop.eup %5622  ;;  %3794 = vst [vmem:[%s7602_s10 + $0x8] sm:$0xff] %v3760_v55 }
 0x84b   :  { %3793 = vst [vmem:[%s7602_s10] sm:$0xff] %v3755_v59  ;;  %v4068_v18 = vpop.f32.mrb[34].mxu0  ;;  %v3651_v19 = vmul.f32 %v5623_v5, %v3646_v47 }
 0x84c   :  { %v3770_v22 = vadd.f32 %v4068_v18, %v3982_v39  ;;  %v3764_v14 = vpop.f32.mrb[35].mxu0 }
 0x84d   :  { %v3765_v53 = vadd.f32 %v3982_v39, %v3764_v14  ;;  %4107 = vmatprep.mubr.f32.mxu1 %v3651_v19 }
 0x84e   :  { %3796 = vst [vmem:[%s7602_s10 + $0x18] sm:$0xff] %v3770_v22  ;;  %4108 = vmatmul.mubr.f32.vlgmr.msra.gmra.mrb[32].mxu1 %v7429_v9  ;;  %v7915_v9 = vld [vmem:[#allocation44_spill] sm:$0xff] }
 0x84f   :  { %3795 = vst [vmem:[%s7602_s10 + $0x10] sm:$0xff] %v3765_v53  ;;  %v4071_v3 = vpop.f32.mrb[36].mxu0  ;;  %4110 = vmatprep.mubr.f32.mxu1 %v7325_v20  ;;  %v7918_v20 = vld [vmem:[#allocation38_spill] sm:$0xff] }
 0x850   :  { %v3780_v63 = vadd.f32 %v4071_v3, %v3982_v39  ;;  %v3774_v37 = vpop.f32.mrb[37].mxu0 }
 0x851   :  { %v3775_v50 = vadd.f32 %v3982_v39, %v3774_v37 }
 0x852   :  { %3798 = vst [vmem:[%s7602_s10 + $0x28] sm:$0xff] %v3780_v63  ;;  %4111 = vmatmul.mubr.f32.gmra.mrb[34].mxu1 %v7914_v6 }
 0x853   :  { %3797 = vst [vmem:[%s7602_s10 + $0x20] sm:$0xff] %v3775_v50  ;;  %4113 = vmatprep.mubr.f32.mxu1 %v7915_v9 }
 0x856   :  { %4114 = vmatmul.mubr.f32.gmra.mrb[36].mxu1 %v7916_v46 }
 0x857   :  { %4116 = vmatprep.mubr.f32.mxu1 %v7917_v27 }
 0x85a   :  { %4117 = vmatmul.mubr.f32.gmra.mrb[38].mxu1 %v7918_v20 }
 0x900   :  { %v4074_v61 = vpop.f32.mrb[38].mxu0 }
 0x901   :  { %v3790_v2 = vadd.f32 %v4074_v61, %v3982_v39  ;;  %v3784_v8 = vpop.f32.mrb[39].mxu0 }
 0x902   :  { %v3785_v23 = vadd.f32 %v3982_v39, %v3784_v8 }
 0x903   :  { %3800 = vst [vmem:[%s7602_s10 + $0x38] sm:$0xff] %v3790_v2 }
 0x904   :  { %3799 = vst [vmem:[%s7602_s10 + $0x30] sm:$0xff] %v3785_v23 }
 0x921   :  { %v4109_v11 = vpop.f32.mrb[32].mxu1 }
 0x922   :  { %3931 = vst [vmem:[%s7603_s11 + $0x8] sm:$0xff] %v4109_v11  ;;  %v3891_v58 = vpop.f32.mrb[33].mxu1 }
 0x923   :  { %3930 = vst [vmem:[%s7603_s11] sm:$0xff] %v3891_v58 }
 0x925   :  { %v4112_v33 = vpop.f32.mrb[34].mxu1 }
 0x926   :  { %3933 = vst [vmem:[%s7603_s11 + $0x18] sm:$0xff] %v4112_v33  ;;  %v3901_v52 = vpop.f32.mrb[35].mxu1 }
 0x927   :  { %3932 = vst [vmem:[%s7603_s11 + $0x10] sm:$0xff] %v3901_v52 }
 0x929   :  { %v4115_v45 = vpop.f32.mrb[36].mxu1 }
 0x92a   :  { %3935 = vst [vmem:[%s7603_s11 + $0x28] sm:$0xff] %v4115_v45  ;;  %v3911_v38 = vpop.f32.mrb[37].mxu1 }
 0x92b   :  { %3934 = vst [vmem:[%s7603_s11 + $0x20] sm:$0xff] %v3911_v38 }
 0x92d   :  { %v4118_v43 = vpop.f32.mrb[38].mxu1 }
 0x92e   :  { %3937 = vst [vmem:[%s7603_s11 + $0x38] sm:$0xff] %v4118_v43  ;;  %v3921_v41 = vpop.f32.mrb[39].mxu1 }
 0x92f   :  { %3936 = vst [vmem:[%s7603_s11 + $0x30] sm:$0xff] %v3921_v41 }

// kernel: encoder_with_cascade_rnn.2
= control target key start
LH: loop header
LB: loop body
LE: loop exit
PB: predicated region body
PF: predicated region fallthrough
CT: control target
= control target key end

     0   :  { %17 = vsyncpa [#allocation11], 0  ;;  %s7067_s0 = inlined_call_operand.vmem [shape: f32[64,128], index: 0, kind: input, shape index: {}]   ;;  %s7068_s1 = inlined_call_operand.hbm [shape: f32[128,512], index: 1, kind: input, shape index: {}]   ;;  %s7069_s2 = inlined_call_operand.hbm [shape: f32[128,512], index: 2, kind: input, shape index: {}]   ;;  %s7070_s3 = inlined_call_operand.vmem [shape: f32[1,512], index: 3, kind: input, shape index: {}]   ;;  %s7071_s4 = inlined_call_operand.hbm [shape: f32[128,512], index: 4, kind: input, shape index: {}]   ;;  %s7072_s5 = inlined_call_operand.hbm [shape: f32[128,512], index: 5, kind: input, shape index: {}]   ;;  %s7073_s6 = inlined_call_operand.vmem [shape: f32[1,512], index: 6, kind: input, shape index: {}]   ;;  %s7074_s7 = inlined_call_operand.hbm [shape: f32[128,128], index: 7, kind: input, shape index: {}]   ;;  %s7075_s8 = inlined_call_operand.vmem [shape: f32[128,128], index: 8, kind: input, shape index: {}]   ;;  %s7076_s9 = inlined_call_operand.vmem [shape: f32[1,128], index: 9, kind: input, shape index: {}]   ;;  %s7077_s10 = inlined_call_operand.vmem [shape: f32[64,128], index: 10, kind: output, shape index: {0}]   ;;  %s7078_s11 = inlined_call_operand.vmem [shape: f32[64,128], index: 11, kind: output, shape index: {1}]  }
   0x1   :  { %18 = vsyncpa [#allocation13], 0 }
   0x2   :  { %19 = vsyncpa [#allocation16], 0  ;;  %s5820_s17 = smov [#allocation12]   ;;  %s5821_s19 = smov [#allocation15]  }
   0x3   :  { %s39_s18 = sshll.u32 %s5820_s17, 4  ;;  %s65_s20 = sshll.u32 %s5821_s19, 4  ;;  %s40_s18 = int_to_ptr.vmem [resolvable:$true] %s39_s18  ;;  %s5890_s20 = int_to_ptr.vmem [resolvable:$true] %s65_s20 }
   0x4   :  { %s5704_s23 = scalar_lea.hbm %s7069_s2, 8192 }
   0x5   :  { %p5705_p0 = scmp.ne.s32.totalorder %s7069_s2, %s5704_s23  ;;  %p5708_p1 = scmp.lt.u32.totalorder %s5704_s23, %s7069_s2 }
   0x7   :  { %p5710_p2 = pnand %p5708_p1, %p5705_p0 }
   0x9   :  { %5713 = shalt.err (!%p5710_p2)
}
   0xa   :  { %s5714_s28 = scalar_lea.vmem %s40_s18, 8192  ;;  %p5719_p4 = scmp.lt.s32.totalorder %s40_s18, %s40_s18 }
   0xb   :  { %p5715_p3 = scmp.ne.s32.totalorder %s40_s18, %s5714_s28  ;;  %p5720_p5 = scmp.lt.s32.totalorder %s5714_s28, %s5714_s28 }
   0xd   :  { %p5721_p6 = por %p5720_p5, %p5719_p4 }
   0xf   :  { %p5722_p7 = pnand %p5721_p6, %p5715_p3 }
  0x11   :  { %5725 = shalt.err (!%p5722_p7)
}
  0x12   :  { %s5822_s29 = smov 512   ;;  %s5823_s30 = smov 32  }
  0x13   :  { %45 = dma.hbm_to_vmem [thread:$0]  %s7069_s2, 8192, %s40_s18, [#allocation13], %s5822_s29, %s5822_s29, %s5823_s30  }
  0x14   :  { %s5726_s16 = scalar_lea.hbm %s7072_s5, 8192 }
  0x15   :  { %p5727_p8 = scmp.ne.s32.totalorder %s7072_s5, %s5726_s16  ;;  %p5730_p9 = scmp.lt.u32.totalorder %s5726_s16, %s7072_s5 }
  0x17   :  { %p5732_p10 = pnand %p5730_p9, %p5727_p8 }
  0x19   :  { %5735 = shalt.err (!%p5732_p10)
}
  0x1a   :  { %s5736_s23 = scalar_lea.vmem %s5890_s20, 8192  ;;  %p5741_p12 = scmp.lt.s32.totalorder %s5890_s20, %s5890_s20 }
  0x1b   :  { %p5737_p11 = scmp.ne.s32.totalorder %s5890_s20, %s5736_s23  ;;  %p5742_p13 = scmp.lt.s32.totalorder %s5736_s23, %s5736_s23 }
  0x1d   :  { %p5743_p0 = por %p5742_p13, %p5741_p12 }
  0x1f   :  { %p5744_p1 = pnand %p5743_p0, %p5737_p11 }
  0x21   :  { %5747 = shalt.err (!%p5744_p1)
}
  0x22   :  { %71 = dma.hbm_to_vmem [thread:$0]  %s7072_s5, 8192, %s5890_s20, [#allocation16], %s5822_s29, %s5822_s29, %s5823_s30  }
  0x23   :  { %s5824_s24 = smov [#allocation10]   ;;  %s5825_s26 = smov [#allocation14]  }
  0x24   :  { %s27_s25 = sshll.u32 %s5824_s24, 4  ;;  %s53_s27 = sshll.u32 %s5825_s26, 4  ;;  %s28_s25 = int_to_ptr.vmem [resolvable:$true] %s27_s25  ;;  %s5927_s27 = int_to_ptr.vmem [resolvable:$true] %s53_s27 }
  0x25   :  { %s5748_s13 = scalar_lea.hbm %s7068_s1, 8192 }
  0x26   :  { %p5749_p2 = scmp.ne.s32.totalorder %s7068_s1, %s5748_s13  ;;  %p5752_p3 = scmp.lt.u32.totalorder %s5748_s13, %s7068_s1 }
  0x28   :  { %p5754_p4 = pnand %p5752_p3, %p5749_p2 }
  0x2a   :  { %5757 = shalt.err (!%p5754_p4)
}
  0x2b   :  { %s5758_s5 = scalar_lea.vmem %s28_s25, 8192  ;;  %p5763_p6 = scmp.lt.s32.totalorder %s28_s25, %s28_s25 }
  0x2c   :  { %p5759_p5 = scmp.ne.s32.totalorder %s28_s25, %s5758_s5  ;;  %p5764_p7 = scmp.lt.s32.totalorder %s5758_s5, %s5758_s5 }
  0x2e   :  { %p5765_p8 = por %p5764_p7, %p5763_p6 }
  0x30   :  { %p5766_p9 = pnand %p5765_p8, %p5759_p5 }
  0x32   :  { %5769 = shalt.err (!%p5766_p9)
}
  0x33   :  { %33 = dma.hbm_to_vmem [thread:$0]  %s7068_s1, 8192, %s28_s25, [#allocation11], %s5822_s29, %s5822_s29, %s5823_s30  }
  0x34   :  { %s5770_s23 = scalar_lea.hbm %s7071_s4, 8192 }
  0x35   :  { %p5771_p10 = scmp.ne.s32.totalorder %s7071_s4, %s5770_s23  ;;  %p5774_p11 = scmp.lt.u32.totalorder %s5770_s23, %s7071_s4 }
  0x37   :  { %p5776_p12 = pnand %p5774_p11, %p5771_p10 }
  0x39   :  { %5779 = shalt.err (!%p5776_p12)
}
  0x3a   :  { %s5780_s28 = scalar_lea.vmem %s5927_s27, 8192  ;;  %p5785_p0 = scmp.lt.s32.totalorder %s5927_s27, %s5927_s27 }
  0x3b   :  { %p5781_p13 = scmp.ne.s32.totalorder %s5927_s27, %s5780_s28  ;;  %p5786_p1 = scmp.lt.s32.totalorder %s5780_s28, %s5780_s28 }
  0x3d   :  { %p5787_p2 = por %p5786_p1, %p5785_p0 }
  0x3f   :  { %p5788_p3 = pnand %p5787_p2, %p5781_p13 }
  0x41   :  { %5791 = shalt.err (!%p5788_p3)
}
  0x42   :  { %59 = dma.hbm_to_vmem [thread:$0]  %s7071_s4, 8192, %s5927_s27, [#allocation13], %s5822_s29, %s5822_s29, %s5823_s30  }
  0x43   :  { %s5826_s12 = smov [#allocation17]   ;;  %s5792_s16 = scalar_lea.hbm %s7074_s7, 2048 }
  0x44   :  { %s79_s13 = sshll.u32 %s5826_s12, 4  ;;  %p5793_p4 = scmp.ne.s32.totalorder %s7074_s7, %s5792_s16  ;;  %s80_s13 = int_to_ptr.vmem [resolvable:$true] %s79_s13 }
  0x45   :  { %p5796_p5 = scmp.lt.u32.totalorder %s5792_s16, %s7074_s7 }
  0x47   :  { %p5798_p6 = pnand %p5796_p5, %p5793_p4 }
  0x49   :  { %5801 = shalt.err (!%p5798_p6)
}
  0x4a   :  { %s5802_s21 = scalar_lea.vmem %s80_s13, 2048  ;;  %p5807_p8 = scmp.lt.s32.totalorder %s80_s13, %s80_s13 }
  0x4b   :  { %p5803_p7 = scmp.ne.s32.totalorder %s80_s13, %s5802_s21  ;;  %p5808_p9 = scmp.lt.s32.totalorder %s5802_s21, %s5802_s21 }
  0x4d   :  { %p5809_p10 = por %p5808_p9, %p5807_p8 }
  0x4f   :  { %p5810_p11 = pnand %p5809_p10, %p5803_p7 }
  0x51   :  { %5813 = shalt.err (!%p5810_p11)
}
  0x52   :  { %s5827_s4 = smov 128   ;;  %s5828_s29 = smov 8  }
  0x53   :  { %85 = dma.hbm_to_vmem [thread:$0]  %s7074_s7, 2048, %s80_s13, [#allocation16], %s5827_s4, %s5827_s4, %s5828_s29  }
  0x54   :  { %5814 = dma.done.wait [#allocation11], 8192  }
  0x55   :  { %5815 = vsyncadd [#allocation11], 4294959104 }
  0x56   :  { %5816 = dma.done.wait [#allocation13], 16384  }
  0x57   :  { %5817 = vsyncadd [#allocation13], 4294950912 }
  0x58   :  { %5818 = dma.done.wait [#allocation16], 10240  }
  0x59   :  { %5819 = vsyncadd [#allocation16], 4294957056  ;;  %v7079_v0 = vmov 0.0   ;;  %v136_v1 = vld [vmem:[#allocation10 + $0x8] sm:$0xff]  ;;  %v138_v3 = vld [vmem:[#allocation10 + $0x18] sm:$0xff] }
  0x5a   :  { %285 = vmatprep.mubr.f32.mxu0 %v7079_v0  ;;  %398 = vmatprep.mubr.f32.mxu1 %v7079_v0  ;;  %v140_v2 = vld [vmem:[#allocation10 + $0x28] sm:$0xff]  ;;  %v142_v5 = vld [vmem:[#allocation10 + $0x38] sm:$0xff]  ;;  %v135_v6 = vld [vmem:[#allocation10] sm:$0xff] }
  0x5b   :  { %v4190_v4 = vpack.c.bf16 %v140_v2, %v136_v1  ;;  %v139_v7 = vld [vmem:[#allocation10 + $0x20] sm:$0xff]  ;;  %v4222_v8 = vpack.c.bf16 %v142_v5, %v138_v3  ;;  %v137_v10 = vld [vmem:[#allocation10 + $0x10] sm:$0xff]  ;;  %v144_v12 = vld [vmem:[#allocation10 + $0x48] sm:$0xff] }
  0x5c   :  { %v4192_v9 = vpack.c.bf16 %v139_v7, %v135_v6  ;;  %v141_v11 = vld [vmem:[#allocation10 + $0x30] sm:$0xff]  ;;  %v148_v14 = vld [vmem:[#allocation10 + $0x68] sm:$0xff]  ;;  %v146_v15 = vld [vmem:[#allocation10 + $0x58] sm:$0xff] }
  0x5d   :  { %4191 = vmatprep.subr.bf16.mxu0 %v4190_v4  ;;  %v4224_v13 = vpack.c.bf16 %v141_v11, %v137_v10  ;;  %v150_v16 = vld [vmem:[#allocation10 + $0x78] sm:$0xff]  ;;  %4223 = vmatprep.subr.bf16.mxu1 %v4222_v8  ;;  %v4194_v17 = vpack.c.bf16 %v148_v14, %v144_v12  ;;  %v143_v19 = vld [vmem:[#allocation10 + $0x40] sm:$0xff]  ;;  %v145_v21 = vld [vmem:[#allocation10 + $0x50] sm:$0xff] }
  0x5e   :  { %4193 = vmatpush1.bf16.msra.mxu0 %v4192_v9  ;;  %v4226_v18 = vpack.c.bf16 %v150_v16, %v146_v15  ;;  %v147_v20 = vld [vmem:[#allocation10 + $0x60] sm:$0xff]  ;;  %v149_v23 = vld [vmem:[#allocation10 + $0x70] sm:$0xff]  ;;  %v152_v24 = vld [vmem:[#allocation10 + $0x88] sm:$0xff] }
  0x5f   :  { %4225 = vmatpush1.bf16.msra.mxu1 %v4224_v13  ;;  %v4196_v22 = vpack.c.bf16 %v147_v20, %v143_v19  ;;  %v156_v25 = vld [vmem:[#allocation10 + $0xa8] sm:$0xff]  ;;  %4195 = vmatprep.subr.bf16.mxu0 %v4194_v17  ;;  %v4228_v26 = vpack.c.bf16 %v149_v23, %v145_v21  ;;  %v154_v28 = vld [vmem:[#allocation10 + $0x98] sm:$0xff]  ;;  %v151_v30 = vld [vmem:[#allocation10 + $0x80] sm:$0xff] }
  0x60   :  { %4227 = vmatprep.subr.bf16.mxu1 %v4226_v18  ;;  %v4198_v27 = vpack.c.bf16 %v156_v25, %v152_v24  ;;  %v158_v29 = vld [vmem:[#allocation10 + $0xb8] sm:$0xff]  ;;  %v155_v32 = vld [vmem:[#allocation10 + $0xa0] sm:$0xff]  ;;  %v153_v33 = vld [vmem:[#allocation10 + $0x90] sm:$0xff] }
  0x61   :  { %v4230_v31 = vpack.c.bf16 %v158_v29, %v154_v28  ;;  %v157_v34 = vld [vmem:[#allocation10 + $0xb0] sm:$0xff]  ;;  %v4200_v35 = vpack.c.bf16 %v155_v32, %v151_v30  ;;  %v160_v36 = vld [vmem:[#allocation10 + $0xc8] sm:$0xff]  ;;  %v162_v38 = vld [vmem:[#allocation10 + $0xd8] sm:$0xff] }
  0x62   :  { %4197 = vmatpush1.bf16.msra.mxu0 %v4196_v22  ;;  %v164_v37 = vld [vmem:[#allocation10 + $0xe8] sm:$0xff]  ;;  %v4232_v39 = vpack.c.bf16 %v157_v34, %v153_v33  ;;  %v166_v41 = vld [vmem:[#allocation10 + $0xf8] sm:$0xff]  ;;  %v159_v42 = vld [vmem:[#allocation10 + $0xc0] sm:$0xff] }
  0x63   :  { %4229 = vmatpush1.bf16.msra.mxu1 %v4228_v26  ;;  %4199 = vmatprep.subr.bf16.mxu0 %v4198_v27  ;;  %v4202_v40 = vpack.c.bf16 %v164_v37, %v160_v36  ;;  %v163_v43 = vld [vmem:[#allocation10 + $0xe0] sm:$0xff]  ;;  %v4234_v44 = vpack.c.bf16 %v166_v41, %v162_v38  ;;  %v161_v45 = vld [vmem:[#allocation10 + $0xd0] sm:$0xff]  ;;  %v168_v47 = vld [vmem:[#allocation10 + $0x108] sm:$0xff] }
  0x64   :  { %4231 = vmatprep.subr.bf16.mxu1 %v4230_v31  ;;  %v165_v46 = vld [vmem:[#allocation10 + $0xf0] sm:$0xff]  ;;  %v172_v48 = vld [vmem:[#allocation10 + $0x128] sm:$0xff]  ;;  %v170_v49 = vld [vmem:[#allocation10 + $0x118] sm:$0xff]  ;;  %v4204_v51 = vpack.c.bf16 %v163_v43, %v159_v42 }
  0x65   :  { %v174_v50 = vld [vmem:[#allocation10 + $0x138] sm:$0xff]  ;;  %v4236_v52 = vpack.c.bf16 %v165_v46, %v161_v45  ;;  %v4206_v53 = vpack.c.bf16 %v172_v48, %v168_v47  ;;  %v167_v54 = vld [vmem:[#allocation10 + $0x100] sm:$0xff]  ;;  %v169_v56 = vld [vmem:[#allocation10 + $0x110] sm:$0xff] }
  0x66   :  { %4201 = vmatpush1.bf16.msra.mxu0 %v4200_v35  ;;  %v171_v55 = vld [vmem:[#allocation10 + $0x120] sm:$0xff]  ;;  %v4238_v57 = vpack.c.bf16 %v174_v50, %v170_v49  ;;  %v173_v58 = vld [vmem:[#allocation10 + $0x130] sm:$0xff]  ;;  %v176_v59 = vld [vmem:[#allocation10 + $0x148] sm:$0xff] }
  0x67   :  { %4233 = vmatpush1.bf16.msra.mxu1 %v4232_v39  ;;  %4203 = vmatprep.subr.bf16.mxu0 %v4202_v40  ;;  %v180_v60 = vld [vmem:[#allocation10 + $0x168] sm:$0xff]  ;;  %v178_v61 = vld [vmem:[#allocation10 + $0x158] sm:$0xff]  ;;  %v4208_v63 = vpack.c.bf16 %v171_v55, %v167_v54  ;;  %v4240_v1 = vpack.c.bf16 %v173_v58, %v169_v56  ;;  %v175_v3 = vld [vmem:[#allocation10 + $0x140] sm:$0xff] }
  0x68   :  { %4235 = vmatprep.subr.bf16.mxu1 %v4234_v44  ;;  %v182_v62 = vld [vmem:[#allocation10 + $0x178] sm:$0xff]  ;;  %v4210_v2 = vpack.c.bf16 %v180_v60, %v176_v59  ;;  %v179_v4 = vld [vmem:[#allocation10 + $0x160] sm:$0xff]  ;;  %v177_v5 = vld [vmem:[#allocation10 + $0x150] sm:$0xff] }
  0x69   :  { %v4242_v6 = vpack.c.bf16 %v182_v62, %v178_v61  ;;  %v181_v7 = vld [vmem:[#allocation10 + $0x170] sm:$0xff]  ;;  %v184_v8 = vld [vmem:[#allocation10 + $0x188] sm:$0xff]  ;;  %v186_v10 = vld [vmem:[#allocation10 + $0x198] sm:$0xff]  ;;  %v4212_v12 = vpack.c.bf16 %v179_v4, %v175_v3 }
  0x6a   :  { %4205 = vmatpush1.bf16.msra.mxu0 %v4204_v51  ;;  %v188_v9 = vld [vmem:[#allocation10 + $0x1a8] sm:$0xff]  ;;  %v190_v11 = vld [vmem:[#allocation10 + $0x1b8] sm:$0xff]  ;;  %v4244_v13 = vpack.c.bf16 %v181_v7, %v177_v5  ;;  %v183_v15 = vld [vmem:[#allocation10 + $0x180] sm:$0xff] }
  0x6b   :  { %4237 = vmatpush1.bf16.msra.mxu1 %v4236_v52  ;;  %4207 = vmatprep.subr.bf16.mxu0 %v4206_v53  ;;  %v4214_v14 = vpack.c.bf16 %v188_v9, %v184_v8  ;;  %v187_v16 = vld [vmem:[#allocation10 + $0x1a0] sm:$0xff]  ;;  %v185_v17 = vld [vmem:[#allocation10 + $0x190] sm:$0xff]  ;;  %v4246_v18 = vpack.c.bf16 %v190_v11, %v186_v10  ;;  %v192_v20 = vld [vmem:[#allocation10 + $0x1c8] sm:$0xff] }
  0x6c   :  { %4239 = vmatprep.subr.bf16.mxu1 %v4238_v57  ;;  %v189_v19 = vld [vmem:[#allocation10 + $0x1b0] sm:$0xff]  ;;  %v196_v21 = vld [vmem:[#allocation10 + $0x1e8] sm:$0xff]  ;;  %v194_v22 = vld [vmem:[#allocation10 + $0x1d8] sm:$0xff]  ;;  %v4216_v24 = vpack.c.bf16 %v187_v16, %v183_v15 }
  0x6d   :  { %v198_v23 = vld [vmem:[#allocation10 + $0x1f8] sm:$0xff]  ;;  %v4248_v25 = vpack.c.bf16 %v189_v19, %v185_v17  ;;  %v4218_v26 = vpack.c.bf16 %v196_v21, %v192_v20  ;;  %v191_v27 = vld [vmem:[#allocation10 + $0x1c0] sm:$0xff]  ;;  %v193_v29 = vld [vmem:[#allocation10 + $0x1d0] sm:$0xff] }
  0x6e   :  { %4209 = vmatpush1.bf16.msra.mxu0 %v4208_v63  ;;  %v195_v28 = vld [vmem:[#allocation10 + $0x1e0] sm:$0xff]  ;;  %v4250_v30 = vpack.c.bf16 %v198_v23, %v194_v22  ;;  %v197_v31 = vld [vmem:[#allocation10 + $0x1f0] sm:$0xff]  ;;  %v488_v32 = vld [vmem:[#allocation14 + $0x8] sm:$0xff] }
  0x6f   :  { %4241 = vmatpush1.bf16.msra.mxu1 %v4240_v1  ;;  %4211 = vmatprep.subr.bf16.mxu0 %v4210_v2  ;;  %v492_v33 = vld [vmem:[#allocation14 + $0x28] sm:$0xff]  ;;  %v490_v34 = vld [vmem:[#allocation14 + $0x18] sm:$0xff]  ;;  %v4220_v36 = vpack.c.bf16 %v195_v28, %v191_v27  ;;  %v4252_v37 = vpack.c.bf16 %v197_v31, %v193_v29  ;;  %v487_v39 = vld [vmem:[#allocation14] sm:$0xff] }
  0x70   :  { %4243 = vmatprep.subr.bf16.mxu1 %v4242_v6  ;;  %v494_v35 = vld [vmem:[#allocation14 + $0x38] sm:$0xff]  ;;  %v4254_v38 = vpack.c.bf16 %v492_v33, %v488_v32  ;;  %v491_v40 = vld [vmem:[#allocation14 + $0x20] sm:$0xff]  ;;  %v489_v42 = vld [vmem:[#allocation14 + $0x10] sm:$0xff] }
  0x71   :  { %v4286_v41 = vpack.c.bf16 %v494_v35, %v490_v34  ;;  %v493_v43 = vld [vmem:[#allocation14 + $0x30] sm:$0xff]  ;;  %v496_v44 = vld [vmem:[#allocation14 + $0x48] sm:$0xff]  ;;  %v5981_v46 = vld [vmem:[%s7067_s0] sm:$0xff]  ;;  %v4256_v47 = vpack.c.bf16 %v491_v40, %v487_v39 }
  0x72   :  { %4213 = vmatpush1.bf16.msra.mxu0 %v4212_v12  ;;  %v500_v45 = vld [vmem:[#allocation14 + $0x68] sm:$0xff]  ;;  %v498_v48 = vld [vmem:[#allocation14 + $0x58] sm:$0xff]  ;;  %v4288_v50 = vpack.c.bf16 %v493_v43, %v489_v42  ;;  %v495_v51 = vld [vmem:[#allocation14 + $0x40] sm:$0xff] }
  0x73   :  { %4245 = vmatpush1.bf16.msra.mxu1 %v4244_v13  ;;  %4215 = vmatprep.subr.bf16.mxu0 %v4214_v14  ;;  %v502_v49 = vld [vmem:[#allocation14 + $0x78] sm:$0xff]  ;;  %v499_v52 = vld [vmem:[#allocation14 + $0x60] sm:$0xff]  ;;  %v4258_v53 = vpack.c.bf16 %v500_v45, %v496_v44  ;;  %v497_v54 = vld [vmem:[#allocation14 + $0x50] sm:$0xff] }
  0x74   :  { %4247 = vmatprep.subr.bf16.mxu1 %v4246_v18  ;;  %v501_v55 = vld [vmem:[#allocation14 + $0x70] sm:$0xff]  ;;  %v4290_v56 = vpack.c.bf16 %v502_v49, %v498_v48  ;;  %v504_v57 = vld [vmem:[#allocation14 + $0x88] sm:$0xff]  ;;  %v4260_v60 = vpack.c.bf16 %v499_v52, %v495_v51  ;;  %v506_v61 = vld [vmem:[#allocation14 + $0x98] sm:$0xff] }
  0x75   :  { %v508_v58 = vld [vmem:[#allocation14 + $0xa8] sm:$0xff]  ;;  %v510_v62 = vld [vmem:[#allocation14 + $0xb8] sm:$0xff]  ;;  %v4292_v63 = vpack.c.bf16 %v501_v55, %v497_v54  ;;  %v503_v1 = vld [vmem:[#allocation14 + $0x80] sm:$0xff] }
  0x76   :  { %4217 = vmatpush1.bf16.msra.mxu0 %v4216_v24  ;;  %v5988_v59 = vld [vmem:[%s7067_s0 + $0x8] sm:$0xff]  ;;  %v507_v2 = vld [vmem:[#allocation14 + $0xa0] sm:$0xff]  ;;  %v4262_v3 = vpack.c.bf16 %v508_v58, %v504_v57  ;;  %v505_v4 = vld [vmem:[#allocation14 + $0x90] sm:$0xff]  ;;  %v4294_v6 = vpack.c.bf16 %v510_v62, %v506_v61 }
  0x77   :  { %4249 = vmatpush1.bf16.msra.mxu1 %v4248_v25  ;;  %4219 = vmatprep.subr.bf16.mxu0 %v4218_v26  ;;  %v509_v5 = vld [vmem:[#allocation14 + $0xb0] sm:$0xff]  ;;  %v512_v7 = vld [vmem:[#allocation14 + $0xc8] sm:$0xff]  ;;  %v4264_v10 = vpack.c.bf16 %v507_v2, %v503_v1  ;;  %v514_v11 = vld [vmem:[#allocation14 + $0xd8] sm:$0xff] }
  0x78   :  { %4251 = vmatprep.subr.bf16.mxu1 %v4250_v30  ;;  %v516_v8 = vld [vmem:[#allocation14 + $0xe8] sm:$0xff]  ;;  %v5997_v9 = vld [vmem:[%s7067_s0 + $0x10] sm:$0xff]  ;;  %v518_v12 = vld [vmem:[#allocation14 + $0xf8] sm:$0xff]  ;;  %v4296_v13 = vpack.c.bf16 %v509_v5, %v505_v4 }
  0x79   :  { %v511_v14 = vld [vmem:[#allocation14 + $0xc0] sm:$0xff]  ;;  %v4266_v16 = vpack.c.bf16 %v516_v8, %v512_v7  ;;  %v513_v17 = vld [vmem:[#allocation14 + $0xd0] sm:$0xff]  ;;  %v4298_v19 = vpack.c.bf16 %v518_v12, %v514_v11  ;;  %v520_v20 = vld [vmem:[#allocation14 + $0x108] sm:$0xff] }
  0x7a   :  { %4221 = vmatpush1.bf16.msra.mxu0 %v4220_v36  ;;  %v515_v15 = vld [vmem:[#allocation14 + $0xe0] sm:$0xff]  ;;  %v517_v18 = vld [vmem:[#allocation14 + $0xf0] sm:$0xff]  ;;  %v524_v21 = vld [vmem:[#allocation14 + $0x128] sm:$0xff] }
  0x7b   :  { %4253 = vmatpush1.bf16.msra.mxu1 %v4252_v37  ;;  %4255 = vmatprep.subr.bf16.mxu0 %v4254_v38  ;;  %v6006_v22 = vld [vmem:[%s7067_s0 + $0x18] sm:$0xff]  ;;  %v4268_v23 = vpack.c.bf16 %v515_v15, %v511_v14  ;;  %v4300_v26 = vpack.c.bf16 %v517_v18, %v513_v17  ;;  %v519_v27 = vld [vmem:[#allocation14 + $0x100] sm:$0xff]  ;;  %v4270_v29 = vpack.c.bf16 %v524_v21, %v520_v20  ;;  %v521_v30 = vld [vmem:[#allocation14 + $0x110] sm:$0xff] }
  0x7c   :  { %4287 = vmatprep.subr.bf16.mxu1 %v4286_v41  ;;  %v522_v24 = vld [vmem:[#allocation14 + $0x118] sm:$0xff]  ;;  %v523_v28 = vld [vmem:[#allocation14 + $0x120] sm:$0xff]  ;;  %v525_v31 = vld [vmem:[#allocation14 + $0x130] sm:$0xff] }
  0x7d   :  { %286 = vmatmul.mubr.f32.vlgmr.msra.gmra.mrb[0].mxu0 %v5981_v46  ;;  %v526_v25 = vld [vmem:[#allocation14 + $0x138] sm:$0xff]  ;;  %v528_v33 = vld [vmem:[#allocation14 + $0x148] sm:$0xff]  ;;  %v6015_v35 = vld [vmem:[%s7067_s0 + $0x20] sm:$0xff]  ;;  %v4272_v36 = vpack.c.bf16 %v523_v28, %v519_v27  ;;  %v4304_v39 = vpack.c.bf16 %v525_v31, %v521_v30 }
  0x7e   :  { %399 = vmatmul.mubr.f32.vlgmr.msra.gmra.mrb[0].mxu1 %v5981_v46  ;;  %4257 = vmatpush1.bf16.msra.mxu0 %v4256_v47  ;;  %v4302_v32 = vpack.c.bf16 %v526_v25, %v522_v24  ;;  %v532_v34 = vld [vmem:[#allocation14 + $0x168] sm:$0xff]  ;;  %v530_v37 = vld [vmem:[#allocation14 + $0x158] sm:$0xff]  ;;  %v527_v40 = vld [vmem:[#allocation14 + $0x140] sm:$0xff] }
  0x7f   :  { %4289 = vmatpush1.bf16.msra.mxu1 %v4288_v50  ;;  %291 = vmatprep.mubr.f32.mxu0 %v7079_v0  ;;  %v534_v38 = vld [vmem:[#allocation14 + $0x178] sm:$0xff]  ;;  %v531_v41 = vld [vmem:[#allocation14 + $0x160] sm:$0xff]  ;;  %v4274_v42 = vpack.c.bf16 %v532_v34, %v528_v33  ;;  %v529_v43 = vld [vmem:[#allocation14 + $0x150] sm:$0xff] }
  0x80   :  { %404 = vmatprep.mubr.f32.mxu1 %v7079_v0  ;;  %4259 = vmatprep.subr.bf16.mxu0 %v4258_v53  ;;  %v533_v44 = vld [vmem:[#allocation14 + $0x170] sm:$0xff]  ;;  %v4306_v45 = vpack.c.bf16 %v534_v38, %v530_v37  ;;  %v536_v47 = vld [vmem:[#allocation14 + $0x188] sm:$0xff]  ;;  %v4276_v50 = vpack.c.bf16 %v531_v41, %v527_v40  ;;  %v538_v51 = vld [vmem:[#allocation14 + $0x198] sm:$0xff] }
  0x81   :  { %292 = vmatmul.mubr.f32.gmra.mrb[2].mxu0 %v5988_v59  ;;  %4291 = vmatprep.subr.bf16.mxu1 %v4290_v56  ;;  %v540_v48 = vld [vmem:[#allocation14 + $0x1a8] sm:$0xff]  ;;  %v542_v52 = vld [vmem:[#allocation14 + $0x1b8] sm:$0xff]  ;;  %v4308_v53 = vpack.c.bf16 %v533_v44, %v529_v43  ;;  %v535_v54 = vld [vmem:[#allocation14 + $0x180] sm:$0xff] }
  0x82   :  { %405 = vmatmul.mubr.f32.gmra.mrb[2].mxu1 %v5988_v59  ;;  %4261 = vmatpush1.bf16.msra.mxu0 %v4260_v60  ;;  %v6024_v49 = vld [vmem:[%s7067_s0 + $0x28] sm:$0xff]  ;;  %v539_v55 = vld [vmem:[#allocation14 + $0x1a0] sm:$0xff]  ;;  %v4278_v56 = vpack.c.bf16 %v540_v48, %v536_v47  ;;  %v537_v57 = vld [vmem:[#allocation14 + $0x190] sm:$0xff]  ;;  %v4310_v60 = vpack.c.bf16 %v542_v52, %v538_v51 }
  0x83   :  { %4293 = vmatpush1.bf16.msra.mxu1 %v4292_v63  ;;  %297 = vmatprep.mubr.f32.mxu0 %v7079_v0  ;;  %v541_v58 = vld [vmem:[#allocation14 + $0x1b0] sm:$0xff]  ;;  %v544_v61 = vld [vmem:[#allocation14 + $0x1c8] sm:$0xff]  ;;  %v4280_v1 = vpack.c.bf16 %v539_v55, %v535_v54  ;;  %v546_v2 = vld [vmem:[#allocation14 + $0x1d8] sm:$0xff] }
  0x84   :  { %410 = vmatprep.mubr.f32.mxu1 %v7079_v0  ;;  %4263 = vmatprep.subr.bf16.mxu0 %v4262_v3  ;;  %v548_v62 = vld [vmem:[#allocation14 + $0x1e8] sm:$0xff]  ;;  %v6033_v63 = vld [vmem:[%s7067_s0 + $0x30] sm:$0xff]  ;;  %v550_v3 = vld [vmem:[#allocation14 + $0x1f8] sm:$0xff]  ;;  %v4312_v4 = vpack.c.bf16 %v541_v58, %v537_v57 }
  0x85   :  { %298 = vmatmul.mubr.f32.gmra.mrb[4].mxu0 %v5997_v9  ;;  %4295 = vmatprep.subr.bf16.mxu1 %v4294_v6  ;;  %v543_v5 = vld [vmem:[#allocation14 + $0x1c0] sm:$0xff]  ;;  %v4282_v7 = vpack.c.bf16 %v548_v62, %v544_v61  ;;  %v545_v8 = vld [vmem:[#allocation14 + $0x1d0] sm:$0xff]  ;;  %v4314_v11 = vpack.c.bf16 %v550_v3, %v546_v2  ;;  %v832_v12 = vld [vmem:[#allocation12 + $0x8] sm:$0xff] }
  0x86   :  { %411 = vmatmul.mubr.f32.gmra.mrb[4].mxu1 %v5997_v9  ;;  %4265 = vmatpush1.bf16.msra.mxu0 %v4264_v10  ;;  %v547_v6 = vld [vmem:[#allocation14 + $0x1e0] sm:$0xff]  ;;  %v549_v10 = vld [vmem:[#allocation14 + $0x1f0] sm:$0xff]  ;;  %v6042_v14 = vld [vmem:[%s7067_s0 + $0x38] sm:$0xff] }
  0x87   :  { %4297 = vmatpush1.bf16.msra.mxu1 %v4296_v13  ;;  %303 = vmatprep.mubr.f32.mxu0 %v7079_v0  ;;  %v836_v13 = vld [vmem:[#allocation12 + $0x28] sm:$0xff]  ;;  %v4284_v15 = vpack.c.bf16 %v547_v6, %v543_v5  ;;  %v838_v17 = vld [vmem:[#allocation12 + $0x38] sm:$0xff]  ;;  %v4316_v18 = vpack.c.bf16 %v549_v10, %v545_v8  ;;  %v835_v20 = vld [vmem:[#allocation12 + $0x20] sm:$0xff] }
  0x88   :  { %416 = vmatprep.mubr.f32.mxu1 %v7079_v0  ;;  %4267 = vmatprep.subr.bf16.mxu0 %v4266_v16  ;;  %v834_v16 = vld [vmem:[#allocation12 + $0x18] sm:$0xff]  ;;  %v6046_v21 = vpack.c.bf16 %v836_v13, %v832_v12  ;;  %v837_v24 = vld [vmem:[#allocation12 + $0x30] sm:$0xff]  ;;  %v844_v27 = vld [vmem:[#allocation12 + $0x68] sm:$0xff] }
  0x89   :  { %304 = vmatmul.mubr.f32.gmra.mrb[6].mxu0 %v6006_v22  ;;  %4299 = vmatprep.subr.bf16.mxu1 %v4298_v19  ;;  %v831_v19 = vld [vmem:[#allocation12] sm:$0xff]  ;;  %v6049_v25 = vpack.c.bf16 %v838_v17, %v834_v16  ;;  %v846_v30 = vld [vmem:[#allocation12 + $0x78] sm:$0xff]  ;;  %v845_v37 = vld [vmem:[#allocation12 + $0x70] sm:$0xff] }
  0x8a   :  { %417 = vmatmul.mubr.f32.gmra.mrb[6].mxu1 %v6006_v22  ;;  %4269 = vmatpush1.bf16.msra.mxu0 %v4268_v23  ;;  %v833_v23 = vld [vmem:[#allocation12 + $0x10] sm:$0xff]  ;;  %v6052_v28 = vpack.c.bf16 %v835_v20, %v831_v19  ;;  %v843_v33 = vld [vmem:[#allocation12 + $0x60] sm:$0xff]  ;;  %v852_v40 = vld [vmem:[#allocation12 + $0xa8] sm:$0xff] }
  0x8b   :  { %4301 = vmatpush1.bf16.msra.mxu1 %v4300_v26  ;;  %309 = vmatprep.mubr.f32.mxu0 %v7079_v0  ;;  %v840_v26 = vld [vmem:[#allocation12 + $0x48] sm:$0xff]  ;;  %v6055_v31 = vpack.c.bf16 %v837_v24, %v833_v23  ;;  %v854_v43 = vld [vmem:[#allocation12 + $0xb8] sm:$0xff]  ;;  %v851_v47 = vld [vmem:[#allocation12 + $0xa0] sm:$0xff] }
  0x8c   :  { %422 = vmatprep.mubr.f32.mxu1 %v7079_v0  ;;  %4271 = vmatprep.subr.bf16.mxu0 %v4270_v29  ;;  %v842_v29 = vld [vmem:[#allocation12 + $0x58] sm:$0xff]  ;;  %v6059_v34 = vpack.c.bf16 %v844_v27, %v840_v26  ;;  %v856_v52 = vld [vmem:[#allocation12 + $0xc8] sm:$0xff]  ;;  %v855_v58 = vld [vmem:[#allocation12 + $0xc0] sm:$0xff] }
  0x8d   :  { %310 = vmatmul.mubr.f32.gmra.mrb[8].mxu0 %v6015_v35  ;;  %4303 = vmatprep.subr.bf16.mxu1 %v4302_v32  ;;  %v839_v32 = vld [vmem:[#allocation12 + $0x40] sm:$0xff]  ;;  %v6063_v38 = vpack.c.bf16 %v846_v30, %v842_v29  ;;  %v858_v55 = vld [vmem:[#allocation12 + $0xd8] sm:$0xff]  ;;  %v861_v62 = vld [vmem:[#allocation12 + $0xf0] sm:$0xff] }
  0x8e   :  { %423 = vmatmul.mubr.f32.gmra.mrb[8].mxu1 %v6015_v35  ;;  %4273 = vmatpush1.bf16.msra.mxu0 %v4272_v36  ;;  %v841_v36 = vld [vmem:[#allocation12 + $0x50] sm:$0xff]  ;;  %v6067_v41 = vpack.c.bf16 %v843_v33, %v839_v32  ;;  %v864_v2 = vld [vmem:[#allocation12 + $0x108] sm:$0xff]  ;;  %v866_v5 = vld [vmem:[#allocation12 + $0x118] sm:$0xff] }
  0x8f   :  { %4305 = vmatpush1.bf16.msra.mxu1 %v4304_v39  ;;  %315 = vmatprep.mubr.f32.mxu0 %v7079_v0  ;;  %v848_v39 = vld [vmem:[#allocation12 + $0x88] sm:$0xff]  ;;  %v6071_v44 = vpack.c.bf16 %v845_v37, %v841_v36  ;;  %v870_v6 = vld [vmem:[#allocation12 + $0x138] sm:$0xff]  ;;  %v863_v8 = vld [vmem:[#allocation12 + $0x100] sm:$0xff] }
  0x90   :  { %428 = vmatprep.mubr.f32.mxu1 %v7079_v0  ;;  %4275 = vmatprep.subr.bf16.mxu0 %v4274_v42  ;;  %7171 = vst [vmem:[#allocation21_spill] sm:$0xff] %v6067_v41  ;;  %v850_v42 = vld [vmem:[#allocation12 + $0x98] sm:$0xff]  ;;  %v6075_v48 = vpack.c.bf16 %v852_v40, %v848_v39  ;;  %v868_v3 = vld [vmem:[#allocation12 + $0x128] sm:$0xff]  ;;  %v867_v10 = vld [vmem:[#allocation12 + $0x120] sm:$0xff]  ;;  %v6111_v13 = vpack.c.bf16 %v870_v6, %v866_v5 }
  0x91   :  { %316 = vmatmul.mubr.f32.gmra.mrb[10].mxu0 %v6024_v49  ;;  %4307 = vmatprep.subr.bf16.mxu1 %v4306_v45  ;;  %7172 = vst [vmem:[#allocation22_spill] sm:$0xff] %v6071_v44  ;;  %v847_v45 = vld [vmem:[#allocation12 + $0x80] sm:$0xff]  ;;  %v6079_v51 = vpack.c.bf16 %v854_v43, %v850_v42  ;;  %v869_v12 = vld [vmem:[#allocation12 + $0x130] sm:$0xff]  ;;  %v876_v16 = vld [vmem:[#allocation12 + $0x168] sm:$0xff]  ;;  %v6115_v17 = vpack.c.bf16 %v867_v10, %v863_v8 }
  0x92   :  { %429 = vmatmul.mubr.f32.gmra.mrb[10].mxu1 %v6024_v49  ;;  %4277 = vmatpush1.bf16.msra.mxu0 %v4276_v50  ;;  %7173 = vst [vmem:[#allocation23_spill] sm:$0xff] %v6075_v48  ;;  %v853_v50 = vld [vmem:[#allocation12 + $0xb0] sm:$0xff]  ;;  %v6083_v54 = vpack.c.bf16 %v851_v47, %v847_v45  ;;  %7182 = vst [vmem:[#allocation32_spill] sm:$0xff] %v6111_v13  ;;  %v878_v19 = vld [vmem:[#allocation12 + $0x178] sm:$0xff] }
  0x93   :  { %4309 = vmatpush1.bf16.msra.mxu1 %v4308_v53  ;;  %321 = vmatprep.mubr.f32.mxu0 %v7079_v0  ;;  %7174 = vst [vmem:[#allocation24_spill] sm:$0xff] %v6079_v51  ;;  %v860_v53 = vld [vmem:[#allocation12 + $0xe8] sm:$0xff]  ;;  %7183 = vst [vmem:[#allocation33_spill] sm:$0xff] %v6115_v17  ;;  %v871_v23 = vld [vmem:[#allocation12 + $0x140] sm:$0xff] }
  0x94   :  { %434 = vmatprep.mubr.f32.mxu1 %v7079_v0  ;;  %4279 = vmatprep.subr.bf16.mxu0 %v4278_v56  ;;  %7175 = vst [vmem:[#allocation25_spill] sm:$0xff] %v6083_v54  ;;  %v862_v56 = vld [vmem:[#allocation12 + $0xf8] sm:$0xff]  ;;  %v6091_v61 = vpack.c.bf16 %v860_v53, %v856_v52  ;;  %v875_v24 = vld [vmem:[#allocation12 + $0x160] sm:$0xff]  ;;  %v877_v27 = vld [vmem:[#allocation12 + $0x170] sm:$0xff] }
  0x95   :  { %322 = vmatmul.mubr.f32.gmra.mrb[12].mxu0 %v6033_v63  ;;  %4311 = vmatprep.subr.bf16.mxu1 %v4310_v60  ;;  %v859_v60 = vld [vmem:[#allocation12 + $0xe0] sm:$0xff]  ;;  %v880_v30 = vld [vmem:[#allocation12 + $0x188] sm:$0xff]  ;;  %v6131_v33 = vpack.c.bf16 %v875_v24, %v871_v23  ;;  %v882_v36 = vld [vmem:[#allocation12 + $0x198] sm:$0xff] }
  0x96   :  { %435 = vmatmul.mubr.f32.gmra.mrb[12].mxu1 %v6033_v63  ;;  %4281 = vmatpush1.bf16.msra.mxu0 %v4280_v1  ;;  %7177 = vst [vmem:[#allocation27_spill] sm:$0xff] %v6091_v61  ;;  %v6095_v1 = vpack.c.bf16 %v862_v56, %v858_v55  ;;  %v884_v32 = vld [vmem:[#allocation12 + $0x1a8] sm:$0xff]  ;;  %v886_v37 = vld [vmem:[#allocation12 + $0x1b8] sm:$0xff]  ;;  %v879_v40 = vld [vmem:[#allocation12 + $0x180] sm:$0xff] }
  0x97   :  { %4313 = vmatpush1.bf16.msra.mxu1 %v4312_v4  ;;  %327 = vmatprep.mubr.f32.mxu0 %v7079_v0  ;;  %v6099_v4 = vpack.c.bf16 %v859_v60, %v855_v58  ;;  %7187 = vst [vmem:[#allocation37_spill] sm:$0xff] %v6131_v33  ;;  %v883_v42 = vld [vmem:[#allocation12 + $0x1a0] sm:$0xff]  ;;  %v6139_v43 = vpack.c.bf16 %v884_v32, %v880_v30  ;;  %v885_v45 = vld [vmem:[#allocation12 + $0x1b0] sm:$0xff]  ;;  %v890_v53 = vld [vmem:[#allocation12 + $0x1d8] sm:$0xff] }
  0x98   :  { %440 = vmatprep.mubr.f32.mxu1 %v7079_v0  ;;  %4283 = vmatprep.subr.bf16.mxu0 %v4282_v7  ;;  %7178 = vst [vmem:[#allocation28_spill] sm:$0xff] %v6095_v1  ;;  %v6143_v47 = vpack.c.bf16 %v886_v37, %v882_v36  ;;  %v6147_v52 = vpack.c.bf16 %v883_v42, %v879_v40  ;;  %v894_v55 = vld [vmem:[#allocation12 + $0x1f8] sm:$0xff]  ;;  %v887_v58 = vld [vmem:[#allocation12 + $0x1c0] sm:$0xff]  ;;  %v900_v5 = vld [vmem:[#allocation15 + $0x28] sm:$0xff] }
  0x99   :  { %328 = vmatmul.mubr.f32.gmra.mrb[14].mxu0 %v6042_v14  ;;  %4315 = vmatprep.subr.bf16.mxu1 %v4314_v11  ;;  %7179 = vst [vmem:[#allocation29_spill] sm:$0xff] %v6099_v4  ;;  %v6107_v11 = vpack.c.bf16 %v868_v3, %v864_v2  ;;  %7189 = vst [vmem:[#allocation39_spill] sm:$0xff] %v6139_v43  ;;  %v891_v60 = vld [vmem:[#allocation12 + $0x1e0] sm:$0xff]  ;;  %v6159_v2 = vpack.c.bf16 %v894_v55, %v890_v53  ;;  %v896_v3 = vld [vmem:[#allocation15 + $0x8] sm:$0xff] }
  0x9a   :  { %441 = vmatmul.mubr.f32.gmra.mrb[14].mxu1 %v6042_v14  ;;  %4285 = vmatpush1.bf16.msra.mxu0 %v4284_v15  ;;  %v872_v15 = vld [vmem:[#allocation12 + $0x148] sm:$0xff]  ;;  %7190 = vst [vmem:[#allocation40_spill] sm:$0xff] %v6143_v47  ;;  %7191 = vst [vmem:[#allocation41_spill] sm:$0xff] %v6147_v52  ;;  %v6163_v6 = vpack.c.bf16 %v891_v60, %v887_v58  ;;  %v898_v8 = vld [vmem:[#allocation15 + $0x18] sm:$0xff] }
  0x9b   :  { %4317 = vmatpush1.bf16.msra.mxu1 %v4316_v18  ;;  %637 = vmatprep.mubr.f32.mxu0 %v7079_v0  ;;  %7181 = vst [vmem:[#allocation31_spill] sm:$0xff] %v6107_v11  ;;  %v874_v18 = vld [vmem:[#allocation12 + $0x158] sm:$0xff]  ;;  %v6123_v26 = vpack.c.bf16 %v876_v16, %v872_v15  ;;  %7194 = vst [vmem:[#allocation44_spill] sm:$0xff] %v6159_v2  ;;  %v899_v15 = vld [vmem:[#allocation15 + $0x20] sm:$0xff] }
  0x9c   :  { %750 = vmatprep.mubr.f32.mxu1 %v7079_v0  ;;  %4319 = vmatprep.subr.bf16.mxu0 %v6046_v21  ;;  %v6127_v29 = vpack.c.bf16 %v878_v19, %v874_v18  ;;  %7195 = vst [vmem:[#allocation45_spill] sm:$0xff] %v6163_v6  ;;  %v902_v10 = vld [vmem:[#allocation15 + $0x38] sm:$0xff]  ;;  %v897_v16 = vld [vmem:[#allocation15 + $0x10] sm:$0xff]  ;;  %v904_v19 = vld [vmem:[#allocation15 + $0x48] sm:$0xff] }
  0x9d   :  { %638 = vmatmul.mubr.f32.vlgmr.msra.gmra.mrb[16].mxu0 %v5981_v46  ;;  %4351 = vmatprep.subr.bf16.mxu1 %v6049_v25  ;;  %7185 = vst [vmem:[#allocation35_spill] sm:$0xff] %v6123_v26  ;;  %v901_v18 = vld [vmem:[#allocation15 + $0x30] sm:$0xff]  ;;  %v908_v23 = vld [vmem:[#allocation15 + $0x68] sm:$0xff]  ;;  %v6175_v24 = vpack.c.bf16 %v902_v10, %v898_v8  ;;  %v903_v37 = vld [vmem:[#allocation15 + $0x40] sm:$0xff] }
  0x9e   :  { %751 = vmatmul.mubr.f32.vlgmr.msra.gmra.mrb[16].mxu1 %v5981_v46  ;;  %4321 = vmatpush1.bf16.msra.mxu0 %v6052_v28  ;;  %v849_v46 = vld [vmem:[#allocation12 + $0x90] sm:$0xff]  ;;  %7186 = vst [vmem:[#allocation36_spill] sm:$0xff] %v6127_v29  ;;  %v6183_v32 = vpack.c.bf16 %v901_v18, %v897_v16  ;;  %v6185_v36 = vpack.c.bf16 %v908_v23, %v904_v19  ;;  %v907_v40 = vld [vmem:[#allocation15 + $0x60] sm:$0xff]  ;;  %v918_v53 = vld [vmem:[#allocation15 + $0xb8] sm:$0xff] }
  0x9f   :  { %4353 = vmatpush1.bf16.msra.mxu1 %v6055_v31  ;;  %643 = vmatprep.mubr.f32.mxu0 %v7079_v0  ;;  %v6087_v57 = vpack.c.bf16 %v853_v50, %v849_v46  ;;  %v888_v46 = vld [vmem:[#allocation12 + $0x1c8] sm:$0xff]  ;;  %7198 = vst [vmem:[#allocation48_spill] sm:$0xff] %v6175_v24  ;;  %v905_v42 = vld [vmem:[#allocation15 + $0x50] sm:$0xff]  ;;  %v6195_v55 = vpack.c.bf16 %v907_v40, %v903_v37  ;;  %v926_v16 = vld [vmem:[#allocation15 + $0xf8] sm:$0xff] }
  0xa0   :  { %756 = vmatprep.mubr.f32.mxu1 %v7079_v0  ;;  %4323 = vmatprep.subr.bf16.mxu0 %v6059_v34  ;;  %v892_v50 = vld [vmem:[#allocation12 + $0x1e8] sm:$0xff]  ;;  %v917_v8 = vld [vmem:[#allocation15 + $0xb0] sm:$0xff] }
  0xa1   :  { %644 = vmatmul.mubr.f32.gmra.mrb[18].mxu0 %v5988_v59  ;;  %4355 = vmatprep.subr.bf16.mxu1 %v6063_v38  ;;  %7176 = vst [vmem:[#allocation26_spill] sm:$0xff] %v6087_v57  ;;  %v920_v10 = vld [vmem:[#allocation15 + $0xc8] sm:$0xff]  ;;  %v921_v37 = vld [vmem:[#allocation15 + $0xd0] sm:$0xff] }
  0xa2   :  { %757 = vmatmul.mubr.f32.gmra.mrb[18].mxu1 %v5988_v59  ;;  %4325 = vmatpush1.bf16.msra.mxu0 %v6067_v41  ;;  %v857_v59 = vld [vmem:[#allocation12 + $0xd0] sm:$0xff] }
  0xa3   :  { %4357 = vmatpush1.bf16.msra.mxu1 %v6071_v44  ;;  %649 = vmatprep.mubr.f32.mxu0 %v7079_v0  ;;  %v6103_v7 = vpack.c.bf16 %v861_v62, %v857_v59  ;;  %v6155_v59 = vpack.c.bf16 %v892_v50, %v888_v46  ;;  %v893_v62 = vld [vmem:[#allocation12 + $0x1f0] sm:$0xff]  ;;  %v916_v46 = vld [vmem:[#allocation15 + $0xa8] sm:$0xff]  ;;  %v914_v50 = vld [vmem:[#allocation15 + $0x98] sm:$0xff] }
  0xa4   :  { %762 = vmatprep.mubr.f32.mxu1 %v7079_v0  ;;  %4327 = vmatprep.subr.bf16.mxu0 %v6075_v48 }
  0xa5   :  { %650 = vmatmul.mubr.f32.gmra.mrb[20].mxu0 %v5997_v9  ;;  %4359 = vmatprep.subr.bf16.mxu1 %v6079_v51  ;;  %7180 = vst [vmem:[#allocation30_spill] sm:$0xff] %v6103_v7  ;;  %7193 = vst [vmem:[#allocation43_spill] sm:$0xff] %v6155_v59 }
  0xa6   :  { %763 = vmatmul.mubr.f32.gmra.mrb[20].mxu1 %v5997_v9  ;;  %4329 = vmatpush1.bf16.msra.mxu0 %v6083_v54  ;;  %v865_v9 = vld [vmem:[#allocation12 + $0x110] sm:$0xff] }
  0xa7   :  { %4361 = vmatpush1.bf16.msra.mxu1 %v6087_v57  ;;  %655 = vmatprep.mubr.f32.mxu0 %v7079_v0  ;;  %v6119_v20 = vpack.c.bf16 %v869_v12, %v865_v9  ;;  %v895_v12 = vld [vmem:[#allocation15] sm:$0xff] }
  0xa8   :  { %768 = vmatprep.mubr.f32.mxu1 %v7079_v0  ;;  %4331 = vmatprep.subr.bf16.mxu0 %v6091_v61  ;;  %v6179_v30 = vpack.c.bf16 %v899_v15, %v895_v12  ;;  %v924_v12 = vld [vmem:[#allocation15 + $0xe8] sm:$0xff]  ;;  %v922_v15 = vld [vmem:[#allocation15 + $0xd8] sm:$0xff] }
  0xa9   :  { %656 = vmatmul.mubr.f32.gmra.mrb[22].mxu0 %v6006_v22  ;;  %4363 = vmatprep.subr.bf16.mxu1 %v6095_v1  ;;  %7184 = vst [vmem:[#allocation34_spill] sm:$0xff] %v6119_v20  ;;  %v6215_v23 = vpack.c.bf16 %v924_v12, %v920_v10  ;;  %v6218_v40 = vpack.c.bf16 %v926_v16, %v922_v15  ;;  %v929_v10 = vld [vmem:[#allocation15 + $0x110] sm:$0xff]  ;;  %v936_v16 = vld [vmem:[#allocation15 + $0x148] sm:$0xff] }
  0xaa   :  { %769 = vmatmul.mubr.f32.gmra.mrb[22].mxu1 %v6006_v22  ;;  %4333 = vmatpush1.bf16.msra.mxu0 %v6099_v4  ;;  %v873_v22 = vld [vmem:[#allocation12 + $0x150] sm:$0xff] }
  0xab   :  { %4365 = vmatpush1.bf16.msra.mxu1 %v6103_v7  ;;  %661 = vmatprep.mubr.f32.mxu0 %v7079_v0  ;;  %v6135_v39 = vpack.c.bf16 %v877_v27, %v873_v22  ;;  %v906_v22 = vld [vmem:[#allocation15 + $0x58] sm:$0xff]  ;;  %7200 = vst [vmem:[#allocation50_spill] sm:$0xff] %v6215_v23  ;;  %7201 = vst [vmem:[#allocation51_spill] sm:$0xff] %v6218_v40  ;;  %v933_v15 = vld [vmem:[#allocation15 + $0x130] sm:$0xff] }
  0xac   :  { %774 = vmatprep.mubr.f32.mxu1 %v7079_v0  ;;  %4335 = vmatprep.subr.bf16.mxu0 %v6107_v11  ;;  %v910_v27 = vld [vmem:[#allocation15 + $0x78] sm:$0xff] }
  0xad   :  { %662 = vmatmul.mubr.f32.gmra.mrb[24].mxu0 %v6015_v35  ;;  %4367 = vmatprep.subr.bf16.mxu1 %v6111_v13  ;;  %7188 = vst [vmem:[#allocation38_spill] sm:$0xff] %v6135_v39 }
  0xae   :  { %775 = vmatmul.mubr.f32.gmra.mrb[24].mxu1 %v6015_v35  ;;  %4337 = vmatpush1.bf16.msra.mxu0 %v6115_v17  ;;  %v881_v35 = vld [vmem:[#allocation12 + $0x190] sm:$0xff] }
  0xaf   :  { %4369 = vmatpush1.bf16.msra.mxu1 %v6119_v20  ;;  %667 = vmatprep.mubr.f32.mxu0 %v7079_v0  ;;  %v6151_v56 = vpack.c.bf16 %v885_v45, %v881_v35  ;;  %v909_v35 = vld [vmem:[#allocation15 + $0x70] sm:$0xff]  ;;  %v912_v45 = vld [vmem:[#allocation15 + $0x88] sm:$0xff] }
  0xb0   :  { %780 = vmatprep.mubr.f32.mxu1 %v7079_v0  ;;  %4339 = vmatprep.subr.bf16.mxu0 %v6123_v26  ;;  %v6199_v58 = vpack.c.bf16 %v909_v35, %v905_v42  ;;  %v6201_v60 = vpack.c.bf16 %v916_v46, %v912_v45  ;;  %v925_v42 = vld [vmem:[#allocation15 + $0xf0] sm:$0xff]  ;;  %v928_v35 = vld [vmem:[#allocation15 + $0x108] sm:$0xff]  ;;  %v930_v46 = vld [vmem:[#allocation15 + $0x118] sm:$0xff] }
  0xb1   :  { %668 = vmatmul.mubr.f32.gmra.mrb[26].mxu0 %v6024_v49  ;;  %4371 = vmatprep.subr.bf16.mxu1 %v6127_v29  ;;  %7192 = vst [vmem:[#allocation42_spill] sm:$0xff] %v6151_v56  ;;  %v932_v45 = vld [vmem:[#allocation15 + $0x128] sm:$0xff] }
  0xb2   :  { %781 = vmatmul.mubr.f32.gmra.mrb[26].mxu1 %v6024_v49  ;;  %4341 = vmatpush1.bf16.msra.mxu0 %v6131_v33  ;;  %v889_v49 = vld [vmem:[#allocation12 + $0x1d0] sm:$0xff] }
  0xb3   :  { %4373 = vmatpush1.bf16.msra.mxu1 %v6135_v39  ;;  %673 = vmatprep.mubr.f32.mxu0 %v7079_v0  ;;  %v6167_v9 = vpack.c.bf16 %v893_v62, %v889_v49  ;;  %v911_v49 = vld [vmem:[#allocation15 + $0x80] sm:$0xff] }
  0xb4   :  { %786 = vmatprep.mubr.f32.mxu1 %v7079_v0  ;;  %4343 = vmatprep.subr.bf16.mxu0 %v6139_v43  ;;  %v915_v62 = vld [vmem:[#allocation15 + $0xa0] sm:$0xff] }
  0xb5   :  { %674 = vmatmul.mubr.f32.gmra.mrb[28].mxu0 %v6033_v63  ;;  %4375 = vmatprep.subr.bf16.mxu1 %v6143_v47  ;;  %7196 = vst [vmem:[#allocation46_spill] sm:$0xff] %v6167_v9  ;;  %v6209_v18 = vpack.c.bf16 %v915_v62, %v911_v49  ;;  %v6225_v49 = vpack.c.bf16 %v925_v42, %v921_v37 }
  0xb6   :  { %787 = vmatmul.mubr.f32.gmra.mrb[28].mxu1 %v6033_v63  ;;  %4345 = vmatpush1.bf16.msra.mxu0 %v6147_v52  ;;  %v6171_v63 = vpack.c.bf16 %v900_v5, %v896_v3  ;;  %v913_v3 = vld [vmem:[#allocation15 + $0x90] sm:$0xff]  ;;  %v6204_v5 = vpack.c.bf16 %v918_v53, %v914_v50  ;;  %v934_v50 = vld [vmem:[#allocation15 + $0x138] sm:$0xff]  ;;  %v6227_v62 = vpack.c.bf16 %v932_v45, %v928_v35  ;;  %v935_v35 = vld [vmem:[#allocation15 + $0x140] sm:$0xff] }
  0xb7   :  { %4377 = vmatpush1.bf16.msra.mxu1 %v6151_v56  ;;  %679 = vmatprep.mubr.f32.mxu0 %v7079_v0  ;;  %v6213_v19 = vpack.c.bf16 %v917_v8, %v913_v3  ;;  %7203 = vst [vmem:[#allocation53_spill] sm:$0xff] %v6225_v49  ;;  %v927_v3 = vld [vmem:[#allocation15 + $0x100] sm:$0xff]  ;;  %v6230_v12 = vpack.c.bf16 %v934_v50, %v930_v46  ;;  %v937_v46 = vld [vmem:[#allocation15 + $0x150] sm:$0xff] }
  0xb8   :  { %792 = vmatprep.mubr.f32.mxu1 %v7079_v0  ;;  %4347 = vmatprep.subr.bf16.mxu0 %v6155_v59  ;;  %7197 = vst [vmem:[#allocation47_spill] sm:$0xff] %v6171_v63  ;;  %7204 = vst [vmem:[#allocation54_spill] sm:$0xff] %v6227_v62  ;;  %v931_v8 = vld [vmem:[#allocation15 + $0x120] sm:$0xff]  ;;  %v6237_v37 = vpack.c.bf16 %v933_v15, %v929_v10 }
  0xb9   :  { %680 = vmatmul.mubr.f32.gmra.mrb[30].mxu0 %v6042_v14  ;;  %4379 = vmatprep.subr.bf16.mxu1 %v6159_v2  ;;  %7199 = vst [vmem:[#allocation49_spill] sm:$0xff] %v6213_v19  ;;  %7205 = vst [vmem:[#allocation55_spill] sm:$0xff] %v6230_v12  ;;  %v939_v45 = vld [vmem:[#allocation15 + $0x160] sm:$0xff] }
  0xba   :  { %793 = vmatmul.mubr.f32.gmra.mrb[30].mxu1 %v6042_v14  ;;  %4349 = vmatpush1.bf16.msra.mxu0 %v6163_v6  ;;  %v6189_v14 = vpack.c.bf16 %v910_v27, %v906_v22  ;;  %v919_v22 = vld [vmem:[#allocation15 + $0xc0] sm:$0xff]  ;;  %7207 = vst [vmem:[#allocation57_spill] sm:$0xff] %v6237_v37 }
  0xbb   :  { %4381 = vmatpush1.bf16.msra.mxu1 %v6167_v9  ;;  %1034 = vmatprep.mubr.f32.mxu0 %v7079_v0  ;;  %v923_v27 = vld [vmem:[#allocation15 + $0xe0] sm:$0xff] }
  0xbc   :  { %1105 = vmatprep.mubr.f32.mxu1 %v7079_v0  ;;  %4383 = vmatprep.subr.bf16.mxu0 %v6171_v63  ;;  %v6221_v53 = vpack.c.bf16 %v923_v27, %v919_v22  ;;  %v938_v22 = vld [vmem:[#allocation15 + $0x158] sm:$0xff]  ;;  %v943_v15 = vld [vmem:[#allocation15 + $0x180] sm:$0xff] }
  0xbd   :  { %1035 = vmatmul.mubr.f32.vlgmr.msra.gmra.mrb[0].mxu0 %v7079_v0  ;;  %4415 = vmatprep.subr.bf16.mxu1 %v6175_v24  ;;  %v942_v27 = vld [vmem:[#allocation15 + $0x178] sm:$0xff] }
  0xbe   :  { %1106 = vmatmul.mubr.f32.vlgmr.msra.gmra.mrb[0].mxu1 %v7079_v0  ;;  %4385 = vmatpush1.bf16.msra.mxu0 %v6179_v30  ;;  %7202 = vst [vmem:[#allocation52_spill] sm:$0xff] %v6221_v53  ;;  %v6242_v50 = vpack.c.bf16 %v942_v27, %v938_v22  ;;  %v945_v22 = vld [vmem:[#allocation15 + $0x190] sm:$0xff] }
  0xbf   :  { %4417 = vmatpush1.bf16.msra.mxu1 %v6183_v32  ;;  %4387 = vmatprep.subr.bf16.mxu0 %v6185_v36 }
  0xc0   :  { %4419 = vmatprep.subr.bf16.mxu1 %v6189_v14  ;;  %1206 = vmatprep.mubr.f32.mxu0 %v7079_v0  ;;  %7208 = vst [vmem:[#allocation58_spill] sm:$0xff] %v6242_v50 }
  0xc1   :  { %1277 = vmatprep.mubr.f32.mxu1 %v7079_v0  ;;  %v940_v0 = vld [vmem:[#allocation15 + $0x168] sm:$0xff] }
  0xc2   :  { %4389 = vmatpush1.bf16.msra.mxu0 %v6195_v55  ;;  %v6239_v42 = vpack.c.bf16 %v940_v0, %v936_v16  ;;  %v947_v16 = vld [vmem:[#allocation15 + $0x1a0] sm:$0xff] }
  0xc3   :  { %4421 = vmatpush1.bf16.msra.mxu1 %v6199_v58  ;;  %4391 = vmatprep.subr.bf16.mxu0 %v6201_v60 }
  0xc4   :  { %4423 = vmatprep.subr.bf16.mxu1 %v6204_v5 }
  0xc6   :  { %4393 = vmatpush1.bf16.msra.mxu0 %v6209_v18 }
  0xc7   :  { %4425 = vmatpush1.bf16.msra.mxu1 %v6213_v19  ;;  %4395 = vmatprep.subr.bf16.mxu0 %v6215_v23  ;;  %v6233_v19 = vpack.c.bf16 %v931_v8, %v927_v3  ;;  %v944_v23 = vld [vmem:[#allocation15 + $0x188] sm:$0xff]  ;;  %v946_v3 = vld [vmem:[#allocation15 + $0x198] sm:$0xff] }
  0xc8   :  { %4427 = vmatprep.subr.bf16.mxu1 %v6218_v40  ;;  %v941_v40 = vld [vmem:[#allocation15 + $0x170] sm:$0xff]  ;;  %v950_v8 = vld [vmem:[#allocation15 + $0x1b8] sm:$0xff] }
  0xc9   :  { %7206 = vst [vmem:[#allocation56_spill] sm:$0xff] %v6233_v19  ;;  %v6249_v0 = vpack.c.bf16 %v941_v40, %v937_v46  ;;  %v6254_v27 = vpack.c.bf16 %v950_v8, %v946_v3  ;;  %v955_v46 = vld [vmem:[#allocation15 + $0x1e0] sm:$0xff]  ;;  %v953_v8 = vld [vmem:[#allocation15 + $0x1d0] sm:$0xff] }
  0xca   :  { %4397 = vmatpush1.bf16.msra.mxu0 %v6221_v53  ;;  %v948_v53 = vld [vmem:[#allocation15 + $0x1a8] sm:$0xff] }
  0xcb   :  { %4429 = vmatpush1.bf16.msra.mxu1 %v6225_v49  ;;  %4399 = vmatprep.subr.bf16.mxu0 %v6227_v62  ;;  %v6245_v49 = vpack.c.bf16 %v939_v45, %v935_v35  ;;  %v6251_v10 = vpack.c.bf16 %v948_v53, %v944_v23  ;;  %v952_v62 = vld [vmem:[#allocation15 + $0x1c8] sm:$0xff]  ;;  %v954_v35 = vld [vmem:[#allocation15 + $0x1d8] sm:$0xff]  ;;  %v951_v53 = vld [vmem:[#allocation15 + $0x1c0] sm:$0xff] }
  0xcc   :  { %4431 = vmatprep.subr.bf16.mxu1 %v6230_v12  ;;  %v949_v12 = vld [vmem:[#allocation15 + $0x1b0] sm:$0xff]  ;;  %v958_v45 = vld [vmem:[#allocation15 + $0x1f8] sm:$0xff] }
  0xcd   :  { %v6261_v23 = vpack.c.bf16 %v949_v12, %v945_v22  ;;  %v6266_v3 = vpack.c.bf16 %v958_v45, %v954_v35  ;;  %v199_v22 = vld [vmem:[%s7070_s3] sm:$0xf] }
  0xce   :  { %4401 = vmatpush1.bf16.msra.mxu0 %v6233_v19  ;;  %v956_v19 = vld [vmem:[#allocation15 + $0x1e8] sm:$0xff] }
  0xcf   :  { %4433 = vmatpush1.bf16.msra.mxu1 %v6237_v37  ;;  %4403 = vmatprep.subr.bf16.mxu0 %v6239_v42  ;;  %v6257_v37 = vpack.c.bf16 %v947_v16, %v943_v15  ;;  %v6263_v40 = vpack.c.bf16 %v956_v19, %v952_v62  ;;  %v6269_v15 = vpack.c.bf16 %v955_v46, %v951_v53  ;;  %v7209_v19 = vmov 0.0  }
  0xd0   :  { %4435 = vmatprep.subr.bf16.mxu1 %v6242_v50  ;;  %v957_v50 = vld [vmem:[#allocation15 + $0x1f0] sm:$0xff]  ;;  %v201_v62 = vlaneseq }
  0xd1   :  { %v6273_v12 = vpack.c.bf16 %v957_v50, %v953_v8 }
  0xd2   :  { %4405 = vmatpush1.bf16.msra.mxu0 %v6245_v49  ;;  %v202_v50 = vshrl.u32 %v201_v62, 7 }
  0xd3   :  { %4437 = vmatpush1.bf16.msra.mxu1 %v6249_v0  ;;  %4407 = vmatprep.subr.bf16.mxu0 %v6251_v10 }
  0xd4   :  { %4439 = vmatprep.subr.bf16.mxu1 %v6254_v27  ;;  %v203_v16 = vsub.s32 0, %v202_v50  ;;  %v207_v35 = vsub.s32 1, %v202_v50  ;;  %v211_v53 = vsub.s32 2, %v202_v50 }
  0xd6   :  { %4409 = vmatpush1.bf16.msra.mxu0 %v6257_v37  ;;  %v6319_v45 = vrot.slane %v199_v22, %v203_v16  ;;  %v6321_v46 = vrot.slane %v199_v22, %v207_v35 }
  0xd7   :  { %4441 = vmatpush1.bf16.msra.mxu1 %v6261_v23  ;;  %4411 = vmatprep.subr.bf16.mxu0 %v6263_v40 }
  0xd8   :  { %4443 = vmatprep.subr.bf16.mxu1 %v6266_v3  ;;  %7210 = vst [vmem:[#allocation59_spill] sm:$0xff] %v6319_v45  ;;  %7211 = vst [vmem:[#allocation60_spill] sm:$0xff] %v6321_v46 }
  0xda   :  { %4413 = vmatpush1.bf16.msra.mxu0 %v6269_v15 }
  0xdb   :  { %4445 = vmatpush1.bf16.msra.mxu1 %v6273_v12  ;;  %4447 = vmatprep.subr.bf16.mxu0 %v6046_v21 }
  0xdc   :  { %4479 = vmatprep.subr.bf16.mxu1 %v6049_v25 }
  0xdd   :  { %1207 = vmatmul.mubr.f32.vlgmr.msra.gmra.mrb[30].mxu0 %v7209_v19 }
  0xde   :  { %1278 = vmatmul.mubr.f32.vlgmr.msra.gmra.mrb[30].mxu1 %v7209_v19  ;;  %4449 = vmatpush1.bf16.msra.mxu0 %v6052_v28 }
  0xdf   :  { %4481 = vmatpush1.bf16.msra.mxu1 %v6055_v31  ;;  %4451 = vmatprep.subr.bf16.mxu0 %v6059_v34 }
  0xe0   :  { %4483 = vmatprep.subr.bf16.mxu1 %v6063_v38  ;;  %1379 = vmatprep.mubr.f32.mxu0 %v7209_v19 }
  0xe1   :  { %1450 = vmatprep.mubr.f32.mxu1 %v7209_v19 }
  0xe2   :  { %4453 = vmatpush1.bf16.msra.mxu0 %v6067_v41 }
  0xe3   :  { %4485 = vmatpush1.bf16.msra.mxu1 %v6071_v44  ;;  %4455 = vmatprep.subr.bf16.mxu0 %v6075_v48 }
  0xe4   :  { %4487 = vmatprep.subr.bf16.mxu1 %v6079_v51 }
  0xe6   :  { %4457 = vmatpush1.bf16.msra.mxu0 %v6083_v54 }
  0xe7   :  { %4489 = vmatpush1.bf16.msra.mxu1 %v6087_v57  ;;  %4459 = vmatprep.subr.bf16.mxu0 %v6091_v61 }
  0xe8   :  { %4491 = vmatprep.subr.bf16.mxu1 %v6095_v1 }
  0xea   :  { %4461 = vmatpush1.bf16.msra.mxu0 %v6099_v4 }
  0xeb   :  { %4493 = vmatpush1.bf16.msra.mxu1 %v6103_v7  ;;  %4463 = vmatprep.subr.bf16.mxu0 %v6107_v11 }
  0xec   :  { %4495 = vmatprep.subr.bf16.mxu1 %v6111_v13 }
  0xee   :  { %4465 = vmatpush1.bf16.msra.mxu0 %v6115_v17 }
  0xef   :  { %4497 = vmatpush1.bf16.msra.mxu1 %v6119_v20  ;;  %4467 = vmatprep.subr.bf16.mxu0 %v6123_v26 }
  0xf0   :  { %4499 = vmatprep.subr.bf16.mxu1 %v6127_v29 }
  0xf2   :  { %4469 = vmatpush1.bf16.msra.mxu0 %v6131_v33 }
  0xf3   :  { %4501 = vmatpush1.bf16.msra.mxu1 %v6135_v39  ;;  %4471 = vmatprep.subr.bf16.mxu0 %v6139_v43 }
  0xf4   :  { %4503 = vmatprep.subr.bf16.mxu1 %v6143_v47 }
  0xf6   :  { %4473 = vmatpush1.bf16.msra.mxu0 %v6147_v52 }
  0xf7   :  { %4505 = vmatpush1.bf16.msra.mxu1 %v6151_v56  ;;  %4475 = vmatprep.subr.bf16.mxu0 %v6155_v59 }
  0xf8   :  { %4507 = vmatprep.subr.bf16.mxu1 %v6159_v2  ;;  %v215_v2 = vsub.s32 3, %v202_v50 }
  0xfa   :  { %4477 = vmatpush1.bf16.msra.mxu0 %v6163_v6  ;;  %v6324_v6 = vrot.slane %v199_v22, %v211_v53  ;;  %v6328_v43 = vrot.slane %v199_v22, %v215_v2 }
  0xfb   :  { %4509 = vmatpush1.bf16.msra.mxu1 %v6167_v9  ;;  %4511 = vmatprep.subr.bf16.mxu0 %v6171_v63 }
  0xfc   :  { %4543 = vmatprep.subr.bf16.mxu1 %v6175_v24 }
 0x190   :  { %v1036_v8 = vpop.f32.mrb[0].mxu0 }
 0x191   :  { %v5406_v9 = vadd.f32 %v1036_v8, %v6319_v45  ;;  %v1107_v63 = vpop.f32.mrb[0].mxu1  ;;  %v1038_v24 = vpop.f32.mrb[1].mxu0 }
 0x192   :  { %v5407_v62 = vadd.f32 %v1038_v24, %v6321_v46  ;;  %v1109_v59 = vpop.f32.mrb[1].mxu1  ;;  %v5422_v47 = vadd.f32 %v1107_v63, %v6324_v6 }
 0x193   :  { %v1116_v56 = vmul.f32 0.5, %v5406_v9  ;;  %v5423_v39 = vadd.f32 %v1109_v59, %v6328_v43 }
 0x194   :  { %v1120_v52 = vmul.f32 0.5, %v5407_v62 }
 0x195   :  { %5544 = vtanh.f32 %v1116_v56  ;;  %v1125_v8 = vmul.f32 0.5, %v5423_v39 }
 0x196   :  { %5546 = vtanh.f32 %v1120_v52 }
 0x197   :  { %5548 = vtanh.f32 %v5422_v47  ;;  %v551_v47 = vld [vmem:[%s7073_s6] sm:$0xf] }
 0x198   :  { %5550 = vtanh.f32 %v1125_v8  ;;  %v6337_v39 = vrot.slane %v551_v47, %v203_v16  ;;  %v6339_v63 = vrot.slane %v551_v47, %v207_v35 }
 0x19f   :  { %v5545_v45 = vpop.eup %5544 }
 0x1a0   :  { %v5547_v33 = vpop.eup %5546  ;;  %v1118_v29 = vmul.f32 0.5, %v5545_v45 }
 0x1a1   :  { %v1122_v26 = vmul.f32 0.5, %v5547_v33  ;;  %v5549_v24 = vpop.eup %5548 }
 0x1a2   :  { %v1119_v50 = vadd.f32 0.5, %v1118_v29  ;;  %v5551_v52 = vpop.eup %5550 }
 0x1a3   :  { %v1123_v46 = vadd.f32 0.5, %v1122_v26  ;;  %v1127_v59 = vmul.f32 0.5, %v5551_v52  ;;  %v6342_v26 = vrot.slane %v551_v47, %v211_v53  ;;  %v6348_v52 = vrot.slane %v551_v47, %v215_v2 }
 0x1a4   :  { %v1130_v9 = vmul.f32 %v5549_v24, %v1119_v50 }
 0x1a5   :  { %v1129_v62 = vmul.f32 0.0, %v1123_v46  ;;  %v1128_v46 = vadd.f32 0.5, %v1127_v59  ;;  %v7213_v59 = vld [vmem:[#allocation49_spill] sm:$0xff] }
 0x1a7   :  { %v6331_v56 = vadd.f32 %v1130_v9, %v1129_v62 }
 0x1a9   :  { %5552 = vtanh.f32 %v6331_v56 }
 0x1b0   :  { %v1208_v33 = vpop.f32.mrb[30].mxu0 }
 0x1b1   :  { %v5452_v29 = vadd.f32 %v1208_v33, %v6337_v39  ;;  %v1279_v22 = vpop.f32.mrb[30].mxu1  ;;  %v1210_v45 = vpop.f32.mrb[31].mxu0 }
 0x1b2   :  { %v5453_v8 = vadd.f32 %v1210_v45, %v6339_v63  ;;  %v1281_v50 = vpop.f32.mrb[31].mxu1  ;;  %v5468_v35 = vadd.f32 %v1279_v22, %v6342_v26  ;;  %v7214_v22 = vld [vmem:[#allocation50_spill] sm:$0xff]  ;;  %v7215_v45 = vld [vmem:[#allocation51_spill] sm:$0xff] }
 0x1b3   :  { %v5553_v24 = vpop.eup %5552  ;;  %v1288_v9 = vmul.f32 0.5, %v5452_v29  ;;  %v5469_v53 = vadd.f32 %v1281_v50, %v6348_v52 }
 0x1b4   :  { %v6345_v62 = vmul.f32 %v5553_v24, %v1128_v46  ;;  %v1292_v16 = vmul.f32 0.5, %v5453_v8 }
 0x1b5   :  { %5554 = vtanh.f32 %v1288_v9  ;;  %v1297_v2 = vmul.f32 0.5, %v5469_v53  ;;  %v7216_v9 = vld [vmem:[#allocation52_spill] sm:$0xff]  ;;  %v7218_v53 = vld [vmem:[#allocation54_spill] sm:$0xff] }
 0x1b6   :  { %7212 = vst [vmem:[#allocation61_spill] sm:$0xff] %v6345_v62  ;;  %5556 = vtanh.f32 %v1292_v16  ;;  %1380 = vmatmul.mubr.f32.vlgmr.msra.gmra.mrb[2].mxu0 %v6345_v62  ;;  %1451 = vmatmul.mubr.f32.vlgmr.msra.gmra.mrb[2].mxu1 %v6345_v62  ;;  %v7217_v16 = vld [vmem:[#allocation53_spill] sm:$0xff]  ;;  %v7219_v62 = vld [vmem:[#allocation55_spill] sm:$0xff] }
 0x1b7   :  { %4513 = vmatpush1.bf16.msra.mxu0 %v6179_v30  ;;  %4545 = vmatpush1.bf16.msra.mxu1 %v6183_v32  ;;  %5558 = vtanh.f32 %v5468_v35 }
 0x1b8   :  { %4515 = vmatprep.subr.bf16.mxu0 %v6185_v36  ;;  %4547 = vmatprep.subr.bf16.mxu1 %v6189_v14  ;;  %5560 = vtanh.f32 %v1297_v2  ;;  %v7222_v2 = vld [vmem:[#allocation58_spill] sm:$0xff] }
 0x1b9   :  { %1552 = vmatprep.mubr.f32.mxu0 %v7209_v19  ;;  %1623 = vmatprep.mubr.f32.mxu1 %v7209_v19 }
 0x1bb   :  { %4517 = vmatpush1.bf16.msra.mxu0 %v6195_v55  ;;  %4549 = vmatpush1.bf16.msra.mxu1 %v6199_v58 }
 0x1bc   :  { %4519 = vmatprep.subr.bf16.mxu0 %v6201_v60  ;;  %4551 = vmatprep.subr.bf16.mxu1 %v6204_v5 }
 0x1bf   :  { %v5555_v47 = vpop.eup %5554  ;;  %4521 = vmatpush1.bf16.msra.mxu0 %v6209_v18  ;;  %4553 = vmatpush1.bf16.msra.mxu1 %v7213_v59 }
 0x1c0   :  { %v5557_v33 = vpop.eup %5556  ;;  %v1290_v29 = vmul.f32 0.5, %v5555_v47  ;;  %4523 = vmatprep.subr.bf16.mxu0 %v7214_v22  ;;  %4555 = vmatprep.subr.bf16.mxu1 %v7215_v45  ;;  %v7220_v22 = vld [vmem:[#allocation56_spill] sm:$0xff]  ;;  %v7221_v45 = vld [vmem:[#allocation57_spill] sm:$0xff] }
 0x1c1   :  { %v1294_v46 = vmul.f32 0.5, %v5557_v33  ;;  %v5559_v50 = vpop.eup %5558 }
 0x1c2   :  { %v1291_v8 = vadd.f32 0.5, %v1290_v29  ;;  %v5561_v33 = vpop.eup %5560 }
 0x1c3   :  { %v1295_v24 = vadd.f32 0.5, %v1294_v46  ;;  %4525 = vmatpush1.bf16.msra.mxu0 %v7216_v9  ;;  %4557 = vmatpush1.bf16.msra.mxu1 %v7217_v16 }
 0x1c4   :  { %v1302_v35 = vmul.f32 %v5559_v50, %v1291_v8  ;;  %4527 = vmatprep.subr.bf16.mxu0 %v7218_v53  ;;  %4559 = vmatprep.subr.bf16.mxu1 %v7219_v62  ;;  %v7224_v50 = vld [vmem:[#allocation35_spill] sm:$0xff] }
 0x1c5   :  { %v1301_v59 = vmul.f32 0.0, %v1295_v24  ;;  %v7225_v24 = vld [vmem:[#allocation36_spill] sm:$0xff] }
 0x1c7   :  { %v6371_v47 = vadd.f32 %v1302_v35, %v1301_v59  ;;  %4529 = vmatpush1.bf16.msra.mxu0 %v7220_v22  ;;  %4561 = vmatpush1.bf16.msra.mxu1 %v7221_v45  ;;  %v1299_v59 = vmul.f32 0.5, %v5561_v33  ;;  %v7226_v35 = vld [vmem:[#allocation37_spill] sm:$0xff]  ;;  %v7227_v33 = vld [vmem:[#allocation38_spill] sm:$0xff] }
 0x1c8   :  { %4531 = vmatprep.subr.bf16.mxu0 %v6239_v42  ;;  %4563 = vmatprep.subr.bf16.mxu1 %v7222_v2 }
 0x1c9   :  { %5562 = vtanh.f32 %v6371_v47  ;;  %v1300_v29 = vadd.f32 0.5, %v1299_v59  ;;  %v7228_v59 = vld [vmem:[#allocation39_spill] sm:$0xff] }
 0x1cb   :  { %4533 = vmatpush1.bf16.msra.mxu0 %v6245_v49  ;;  %4565 = vmatpush1.bf16.msra.mxu1 %v6249_v0 }
 0x1cc   :  { %4535 = vmatprep.subr.bf16.mxu0 %v6251_v10  ;;  %4567 = vmatprep.subr.bf16.mxu1 %v6254_v27 }
 0x1cf   :  { %4537 = vmatpush1.bf16.msra.mxu0 %v6257_v37  ;;  %4569 = vmatpush1.bf16.msra.mxu1 %v6261_v23 }
 0x1d0   :  { %4539 = vmatprep.subr.bf16.mxu0 %v6263_v40  ;;  %4571 = vmatprep.subr.bf16.mxu1 %v6266_v3 }
 0x1d3   :  { %v5563_v46 = vpop.eup %5562  ;;  %4541 = vmatpush1.bf16.msra.mxu0 %v6269_v15  ;;  %4573 = vmatpush1.bf16.msra.mxu1 %v6273_v12 }
 0x1d4   :  { %v6388_v8 = vmul.f32 %v5563_v46, %v1300_v29  ;;  %4575 = vmatprep.subr.bf16.mxu0 %v6046_v21  ;;  %4607 = vmatprep.subr.bf16.mxu1 %v6049_v25  ;;  %v7229_v29 = vld [vmem:[#allocation40_spill] sm:$0xff]  ;;  %v7230_v46 = vld [vmem:[#allocation41_spill] sm:$0xff] }
 0x1d6   :  { %7223 = vst [vmem:[#allocation52_spill] sm:$0xff] %v6388_v8  ;;  %1553 = vmatmul.mubr.f32.vlgmr.msra.gmra.mrb[28].mxu0 %v6388_v8  ;;  %1624 = vmatmul.mubr.f32.vlgmr.msra.gmra.mrb[28].mxu1 %v6388_v8  ;;  %v7231_v8 = vld [vmem:[#allocation42_spill] sm:$0xff] }
 0x1d7   :  { %4577 = vmatpush1.bf16.msra.mxu0 %v6052_v28  ;;  %4609 = vmatpush1.bf16.msra.mxu1 %v6055_v31 }
 0x1d8   :  { %4579 = vmatprep.subr.bf16.mxu0 %v6059_v34  ;;  %4611 = vmatprep.subr.bf16.mxu1 %v6063_v38 }
 0x1d9   :  { %1725 = vmatprep.mubr.f32.mxu0 %v7209_v19  ;;  %1796 = vmatprep.mubr.f32.mxu1 %v7209_v19 }
 0x1db   :  { %4581 = vmatpush1.bf16.msra.mxu0 %v6067_v41  ;;  %4613 = vmatpush1.bf16.msra.mxu1 %v6071_v44 }
 0x1dc   :  { %4583 = vmatprep.subr.bf16.mxu0 %v6075_v48  ;;  %4615 = vmatprep.subr.bf16.mxu1 %v6079_v51 }
 0x1df   :  { %4585 = vmatpush1.bf16.msra.mxu0 %v6083_v54  ;;  %4617 = vmatpush1.bf16.msra.mxu1 %v6087_v57 }
 0x1e0   :  { %4587 = vmatprep.subr.bf16.mxu0 %v6091_v61  ;;  %4619 = vmatprep.subr.bf16.mxu1 %v6095_v1 }
 0x1e3   :  { %4589 = vmatpush1.bf16.msra.mxu0 %v6099_v4  ;;  %4621 = vmatpush1.bf16.msra.mxu1 %v6103_v7  ;;  %v7239_v4 = vld [vmem:[#allocation60_spill] sm:$0xff] }
 0x1e4   :  { %4591 = vmatprep.subr.bf16.mxu0 %v6107_v11  ;;  %4623 = vmatprep.subr.bf16.mxu1 %v6111_v13  ;;  %v7232_v13 = vld [vmem:[#allocation43_spill] sm:$0xff] }
 0x1e5   :  { %v7238_v11 = vld [vmem:[#allocation59_spill] sm:$0xff] }
 0x1e7   :  { %4593 = vmatpush1.bf16.msra.mxu0 %v6115_v17  ;;  %4625 = vmatpush1.bf16.msra.mxu1 %v6119_v20  ;;  %v7233_v17 = vld [vmem:[#allocation44_spill] sm:$0xff]  ;;  %v7234_v20 = vld [vmem:[#allocation45_spill] sm:$0xff] }
 0x1e8   :  { %4595 = vmatprep.subr.bf16.mxu0 %v7224_v50  ;;  %4627 = vmatprep.subr.bf16.mxu1 %v7225_v24  ;;  %v7235_v50 = vld [vmem:[#allocation46_spill] sm:$0xff]  ;;  %v7236_v24 = vld [vmem:[#allocation47_spill] sm:$0xff] }
 0x1eb   :  { %4597 = vmatpush1.bf16.msra.mxu0 %v7226_v35  ;;  %4629 = vmatpush1.bf16.msra.mxu1 %v7227_v33  ;;  %v7237_v35 = vld [vmem:[#allocation48_spill] sm:$0xff] }
 0x1ec   :  { %4599 = vmatprep.subr.bf16.mxu0 %v7228_v59  ;;  %4631 = vmatprep.subr.bf16.mxu1 %v7229_v29 }
 0x1ef   :  { %4601 = vmatpush1.bf16.msra.mxu0 %v7230_v46  ;;  %4633 = vmatpush1.bf16.msra.mxu1 %v7231_v8 }
 0x1f0   :  { %4603 = vmatprep.subr.bf16.mxu0 %v7232_v13  ;;  %4635 = vmatprep.subr.bf16.mxu1 %v7233_v17 }
 0x1f3   :  { %4605 = vmatpush1.bf16.msra.mxu0 %v7234_v20  ;;  %4637 = vmatpush1.bf16.msra.mxu1 %v7235_v50 }
 0x1f4   :  { %4639 = vmatprep.subr.bf16.mxu0 %v7236_v24  ;;  %4671 = vmatprep.subr.bf16.mxu1 %v7237_v35 }
 0x289   :  { %v1381_v33 = vpop.f32.mrb[2].mxu0  ;;  %v1452_v59 = vpop.f32.mrb[2].mxu1 }
 0x28a   :  { %v5408_v29 = vadd.f32 %v1381_v33, %v7238_v11  ;;  %v1383_v7 = vpop.f32.mrb[3].mxu0  ;;  %v1454_v46 = vpop.f32.mrb[3].mxu1  ;;  %v5424_v17 = vadd.f32 %v1452_v59, %v6324_v6 }
 0x28b   :  { %v5409_v8 = vadd.f32 %v1383_v7, %v7239_v4  ;;  %v5425_v50 = vadd.f32 %v1454_v46, %v6328_v43 }
 0x28c   :  { %v1461_v1 = vmul.f32 0.5, %v5408_v29 }
 0x28d   :  { %v1465_v13 = vmul.f32 0.5, %v5409_v8  ;;  %v1470_v24 = vmul.f32 0.5, %v5425_v50 }
 0x28e   :  { %5564 = vtanh.f32 %v1461_v1 }
 0x28f   :  { %5566 = vtanh.f32 %v1465_v13 }
 0x290   :  { %5568 = vtanh.f32 %v5424_v17 }
 0x291   :  { %5570 = vtanh.f32 %v1470_v24 }
 0x298   :  { %v5565_v20 = vpop.eup %5564 }
 0x299   :  { %v5567_v35 = vpop.eup %5566  ;;  %v1463_v61 = vmul.f32 0.5, %v5565_v20 }
 0x29a   :  { %v1467_v57 = vmul.f32 0.5, %v5567_v35  ;;  %v5569_v11 = vpop.eup %5568 }
 0x29b   :  { %v1464_v33 = vadd.f32 0.5, %v1463_v61  ;;  %v5571_v1 = vpop.eup %5570 }
 0x29c   :  { %v1468_v54 = vadd.f32 0.5, %v1467_v57  ;;  %v1472_v13 = vmul.f32 0.5, %v5571_v1 }
 0x29d   :  { %v1475_v51 = vmul.f32 %v5569_v11, %v1464_v33 }
 0x29e   :  { %v1474_v7 = vmul.f32 %v1468_v54, %v6331_v56  ;;  %v1473_v35 = vadd.f32 0.5, %v1472_v13 }
 0x2a0   :  { %v6433_v8 = vadd.f32 %v1475_v51, %v1474_v7  ;;  %v7241_v7 = vld [vmem:[#allocation49_spill] sm:$0xff] }
 0x2a2   :  { %5572 = vtanh.f32 %v6433_v8 }
 0x2a9   :  { %v1554_v17 = vpop.f32.mrb[28].mxu0  ;;  %v1625_v59 = vpop.f32.mrb[28].mxu1 }
 0x2aa   :  { %v5450_v50 = vadd.f32 %v1554_v17, %v6337_v39  ;;  %v1556_v29 = vpop.f32.mrb[29].mxu0  ;;  %v1627_v20 = vpop.f32.mrb[29].mxu1  ;;  %v5466_v51 = vadd.f32 %v1625_v59, %v6342_v26  ;;  %v7242_v17 = vld [vmem:[#allocation50_spill] sm:$0xff]  ;;  %v7243_v59 = vld [vmem:[#allocation51_spill] sm:$0xff] }
 0x2ab   :  { %v5451_v61 = vadd.f32 %v1556_v29, %v6339_v63  ;;  %v5467_v56 = vadd.f32 %v1627_v20, %v6348_v52 }
 0x2ac   :  { %v5573_v24 = vpop.eup %5572  ;;  %v1634_v57 = vmul.f32 0.5, %v5450_v50 }
 0x2ad   :  { %v6438_v11 = vmul.f32 %v5573_v24, %v1473_v35  ;;  %v1638_v54 = vmul.f32 0.5, %v5451_v61  ;;  %v1643_v46 = vmul.f32 0.5, %v5467_v56 }
 0x2ae   :  { %5574 = vtanh.f32 %v1634_v57 }
 0x2af   :  { %7240 = vst [vmem:[#allocation53_spill] sm:$0xff] %v6438_v11  ;;  %5576 = vtanh.f32 %v1638_v54  ;;  %1726 = vmatmul.mubr.f32.vlgmr.msra.gmra.mrb[4].mxu0 %v6438_v11  ;;  %1797 = vmatmul.mubr.f32.vlgmr.msra.gmra.mrb[4].mxu1 %v6438_v11  ;;  %v7259_v11 = vld [vmem:[#allocation38_spill] sm:$0xff] }
 0x2b0   :  { %4641 = vmatpush1.bf16.msra.mxu0 %v6179_v30  ;;  %4673 = vmatpush1.bf16.msra.mxu1 %v6183_v32  ;;  %5578 = vtanh.f32 %v5466_v51 }
 0x2b1   :  { %4643 = vmatprep.subr.bf16.mxu0 %v6185_v36  ;;  %4675 = vmatprep.subr.bf16.mxu1 %v6189_v14  ;;  %5580 = vtanh.f32 %v1643_v46 }
 0x2b2   :  { %1898 = vmatprep.mubr.f32.mxu0 %v7209_v19  ;;  %1969 = vmatprep.mubr.f32.mxu1 %v7209_v19 }
 0x2b4   :  { %4645 = vmatpush1.bf16.msra.mxu0 %v6195_v55  ;;  %4677 = vmatpush1.bf16.msra.mxu1 %v6199_v58 }
 0x2b5   :  { %4647 = vmatprep.subr.bf16.mxu0 %v6201_v60  ;;  %4679 = vmatprep.subr.bf16.mxu1 %v6204_v5 }
 0x2b8   :  { %v5575_v33 = vpop.eup %5574  ;;  %4649 = vmatpush1.bf16.msra.mxu0 %v6209_v18  ;;  %4681 = vmatpush1.bf16.msra.mxu1 %v7241_v7 }
 0x2b9   :  { %v5577_v1 = vpop.eup %5576  ;;  %v1636_v13 = vmul.f32 0.5, %v5575_v33  ;;  %4651 = vmatprep.subr.bf16.mxu0 %v7242_v17  ;;  %4683 = vmatprep.subr.bf16.mxu1 %v7243_v59  ;;  %v7245_v33 = vld [vmem:[#allocation24_spill] sm:$0xff] }
 0x2ba   :  { %v1640_v50 = vmul.f32 0.5, %v5577_v1  ;;  %v5579_v20 = vpop.eup %5578  ;;  %v7246_v1 = vld [vmem:[#allocation25_spill] sm:$0xff] }
 0x2bb   :  { %v1637_v29 = vadd.f32 0.5, %v1636_v13  ;;  %v5581_v54 = vpop.eup %5580  ;;  %v7247_v13 = vld [vmem:[#allocation26_spill] sm:$0xff] }
 0x2bc   :  { %v1641_v35 = vadd.f32 0.5, %v1640_v50  ;;  %4653 = vmatpush1.bf16.msra.mxu0 %v7216_v9  ;;  %4685 = vmatpush1.bf16.msra.mxu1 %v7217_v16  ;;  %v7248_v50 = vld [vmem:[#allocation27_spill] sm:$0xff] }
 0x2bd   :  { %v1648_v61 = vmul.f32 %v5579_v20, %v1637_v29  ;;  %4655 = vmatprep.subr.bf16.mxu0 %v7218_v53  ;;  %4687 = vmatprep.subr.bf16.mxu1 %v7219_v62  ;;  %v7249_v29 = vld [vmem:[#allocation28_spill] sm:$0xff]  ;;  %v7250_v20 = vld [vmem:[#allocation29_spill] sm:$0xff] }
 0x2be   :  { %v1647_v24 = vmul.f32 %v1641_v35, %v6371_v47  ;;  %v1645_v47 = vmul.f32 0.5, %v5581_v54  ;;  %v7251_v35 = vld [vmem:[#allocation30_spill] sm:$0xff]  ;;  %v7254_v54 = vld [vmem:[#allocation33_spill] sm:$0xff] }
 0x2c0   :  { %v6463_v57 = vadd.f32 %v1648_v61, %v1647_v24  ;;  %4657 = vmatpush1.bf16.msra.mxu0 %v7220_v22  ;;  %4689 = vmatpush1.bf16.msra.mxu1 %v7221_v45  ;;  %v1646_v51 = vadd.f32 0.5, %v1645_v47  ;;  %v7252_v61 = vld [vmem:[#allocation31_spill] sm:$0xff]  ;;  %v7253_v24 = vld [vmem:[#allocation32_spill] sm:$0xff]  ;;  %v7255_v47 = vld [vmem:[#allocation34_spill] sm:$0xff] }
 0x2c1   :  { %4659 = vmatprep.subr.bf16.mxu0 %v6239_v42  ;;  %4691 = vmatprep.subr.bf16.mxu1 %v7222_v2 }
 0x2c2   :  { %5582 = vtanh.f32 %v6463_v57 }
 0x2c4   :  { %4661 = vmatpush1.bf16.msra.mxu0 %v6245_v49  ;;  %4693 = vmatpush1.bf16.msra.mxu1 %v6249_v0 }
 0x2c5   :  { %4663 = vmatprep.subr.bf16.mxu0 %v6251_v10  ;;  %4695 = vmatprep.subr.bf16.mxu1 %v6254_v27 }
 0x2c8   :  { %4665 = vmatpush1.bf16.msra.mxu0 %v6257_v37  ;;  %4697 = vmatpush1.bf16.msra.mxu1 %v6261_v23 }
 0x2c9   :  { %4667 = vmatprep.subr.bf16.mxu0 %v6263_v40  ;;  %4699 = vmatprep.subr.bf16.mxu1 %v6266_v3 }
 0x2cc   :  { %v5583_v56 = vpop.eup %5582  ;;  %4669 = vmatpush1.bf16.msra.mxu0 %v6269_v15  ;;  %4701 = vmatpush1.bf16.msra.mxu1 %v6273_v12 }
 0x2cd   :  { %v6480_v46 = vmul.f32 %v5583_v56, %v1646_v51  ;;  %4703 = vmatprep.subr.bf16.mxu0 %v6046_v21  ;;  %4735 = vmatprep.subr.bf16.mxu1 %v6049_v25  ;;  %v7256_v51 = vld [vmem:[#allocation35_spill] sm:$0xff]  ;;  %v7257_v56 = vld [vmem:[#allocation36_spill] sm:$0xff] }
 0x2cf   :  { %7244 = vst [vmem:[#allocation54_spill] sm:$0xff] %v6480_v46  ;;  %1899 = vmatmul.mubr.f32.vlgmr.msra.gmra.mrb[26].mxu0 %v6480_v46  ;;  %1970 = vmatmul.mubr.f32.vlgmr.msra.gmra.mrb[26].mxu1 %v6480_v46  ;;  %v7258_v46 = vld [vmem:[#allocation37_spill] sm:$0xff] }
 0x2d0   :  { %4705 = vmatpush1.bf16.msra.mxu0 %v6052_v28  ;;  %4737 = vmatpush1.bf16.msra.mxu1 %v6055_v31 }
 0x2d1   :  { %4707 = vmatprep.subr.bf16.mxu0 %v6059_v34  ;;  %4739 = vmatprep.subr.bf16.mxu1 %v6063_v38 }
 0x2d2   :  { %2071 = vmatprep.mubr.f32.mxu0 %v7209_v19  ;;  %2142 = vmatprep.mubr.f32.mxu1 %v7209_v19 }
 0x2d4   :  { %4709 = vmatpush1.bf16.msra.mxu0 %v6067_v41  ;;  %4741 = vmatpush1.bf16.msra.mxu1 %v6071_v44 }
 0x2d5   :  { %4711 = vmatprep.subr.bf16.mxu0 %v6075_v48  ;;  %4743 = vmatprep.subr.bf16.mxu1 %v7245_v33 }
 0x2d8   :  { %4713 = vmatpush1.bf16.msra.mxu0 %v7246_v1  ;;  %4745 = vmatpush1.bf16.msra.mxu1 %v7247_v13 }
 0x2d9   :  { %4715 = vmatprep.subr.bf16.mxu0 %v7248_v50  ;;  %4747 = vmatprep.subr.bf16.mxu1 %v7249_v29  ;;  %v7260_v29 = vld [vmem:[#allocation39_spill] sm:$0xff] }
 0x2da   :  { %v7270_v50 = vld [vmem:[#allocation59_spill] sm:$0xff] }
 0x2dc   :  { %4717 = vmatpush1.bf16.msra.mxu0 %v7250_v20  ;;  %4749 = vmatpush1.bf16.msra.mxu1 %v7251_v35  ;;  %v7261_v20 = vld [vmem:[#allocation40_spill] sm:$0xff]  ;;  %v7262_v35 = vld [vmem:[#allocation41_spill] sm:$0xff] }
 0x2dd   :  { %4719 = vmatprep.subr.bf16.mxu0 %v7252_v61  ;;  %4751 = vmatprep.subr.bf16.mxu1 %v7253_v24  ;;  %v7263_v61 = vld [vmem:[#allocation42_spill] sm:$0xff]  ;;  %v7264_v24 = vld [vmem:[#allocation43_spill] sm:$0xff] }
 0x2e0   :  { %4721 = vmatpush1.bf16.msra.mxu0 %v7254_v54  ;;  %4753 = vmatpush1.bf16.msra.mxu1 %v7255_v47  ;;  %v7265_v54 = vld [vmem:[#allocation44_spill] sm:$0xff]  ;;  %v7266_v47 = vld [vmem:[#allocation45_spill] sm:$0xff] }
 0x2e1   :  { %4723 = vmatprep.subr.bf16.mxu0 %v7256_v51  ;;  %4755 = vmatprep.subr.bf16.mxu1 %v7257_v56  ;;  %v7267_v51 = vld [vmem:[#allocation46_spill] sm:$0xff]  ;;  %v7268_v56 = vld [vmem:[#allocation47_spill] sm:$0xff] }
 0x2e4   :  { %4725 = vmatpush1.bf16.msra.mxu0 %v7258_v46  ;;  %4757 = vmatpush1.bf16.msra.mxu1 %v7259_v11  ;;  %v7269_v46 = vld [vmem:[#allocation48_spill] sm:$0xff] }
 0x2e5   :  { %4727 = vmatprep.subr.bf16.mxu0 %v7260_v29  ;;  %4759 = vmatprep.subr.bf16.mxu1 %v7261_v20 }
 0x2e8   :  { %4729 = vmatpush1.bf16.msra.mxu0 %v7262_v35  ;;  %4761 = vmatpush1.bf16.msra.mxu1 %v7263_v61 }
 0x2e9   :  { %4731 = vmatprep.subr.bf16.mxu0 %v7264_v24  ;;  %4763 = vmatprep.subr.bf16.mxu1 %v7265_v54 }
 0x2ec   :  { %4733 = vmatpush1.bf16.msra.mxu0 %v7266_v47  ;;  %4765 = vmatpush1.bf16.msra.mxu1 %v7267_v51 }
 0x2ed   :  { %4767 = vmatprep.subr.bf16.mxu0 %v7268_v56  ;;  %4799 = vmatprep.subr.bf16.mxu1 %v7269_v46 }
 0x382   :  { %v1727_v11 = vpop.f32.mrb[4].mxu0  ;;  %v1798_v29 = vpop.f32.mrb[4].mxu1 }
 0x383   :  { %v5410_v20 = vadd.f32 %v1727_v11, %v7270_v50  ;;  %v1729_v13 = vpop.f32.mrb[5].mxu0  ;;  %v1800_v35 = vpop.f32.mrb[5].mxu1  ;;  %v5426_v54 = vadd.f32 %v1798_v29, %v6324_v6 }
 0x384   :  { %v5411_v61 = vadd.f32 %v1729_v13, %v7239_v4  ;;  %v5427_v51 = vadd.f32 %v1800_v35, %v6328_v43 }
 0x385   :  { %v1807_v1 = vmul.f32 0.5, %v5410_v20 }
 0x386   :  { %v1811_v24 = vmul.f32 0.5, %v5411_v61  ;;  %v1816_v56 = vmul.f32 0.5, %v5427_v51 }
 0x387   :  { %5584 = vtanh.f32 %v1807_v1 }
 0x388   :  { %5586 = vtanh.f32 %v1811_v24 }
 0x389   :  { %5588 = vtanh.f32 %v5426_v54 }
 0x38a   :  { %5590 = vtanh.f32 %v1816_v56 }
 0x391   :  { %v5585_v47 = vpop.eup %5584 }
 0x392   :  { %v5587_v46 = vpop.eup %5586  ;;  %v1809_v33 = vmul.f32 0.5, %v5585_v47 }
 0x393   :  { %v1813_v48 = vmul.f32 0.5, %v5587_v46  ;;  %v5589_v50 = vpop.eup %5588 }
 0x394   :  { %v1810_v11 = vadd.f32 0.5, %v1809_v33  ;;  %v5591_v1 = vpop.eup %5590 }
 0x395   :  { %v1814_v44 = vadd.f32 0.5, %v1813_v48  ;;  %v1818_v29 = vmul.f32 0.5, %v5591_v1 }
 0x396   :  { %v1821_v41 = vmul.f32 %v5589_v50, %v1810_v11 }
 0x397   :  { %v1820_v13 = vmul.f32 %v1814_v44, %v6433_v8  ;;  %v1819_v46 = vadd.f32 0.5, %v1818_v29 }
 0x399   :  { %v6525_v20 = vadd.f32 %v1821_v41, %v1820_v13 }
 0x39b   :  { %5592 = vtanh.f32 %v6525_v20 }
 0x3a2   :  { %v1900_v61 = vpop.f32.mrb[26].mxu0  ;;  %v1971_v35 = vpop.f32.mrb[26].mxu1 }
 0x3a3   :  { %v5448_v24 = vadd.f32 %v1900_v61, %v6337_v39  ;;  %v1902_v54 = vpop.f32.mrb[27].mxu0  ;;  %v1973_v47 = vpop.f32.mrb[27].mxu1  ;;  %v5464_v41 = vadd.f32 %v1971_v35, %v6342_v26 }
 0x3a4   :  { %v5449_v33 = vadd.f32 %v1902_v54, %v6339_v63  ;;  %v5465_v8 = vadd.f32 %v1973_v47, %v6348_v52 }
 0x3a5   :  { %v5593_v51 = vpop.eup %5592  ;;  %v1980_v48 = vmul.f32 0.5, %v5448_v24 }
 0x3a6   :  { %v6530_v50 = vmul.f32 %v5593_v51, %v1819_v46  ;;  %v1984_v44 = vmul.f32 0.5, %v5449_v33  ;;  %v1989_v56 = vmul.f32 0.5, %v5465_v8  ;;  %v7274_v8 = vld [vmem:[#allocation22_spill] sm:$0xff] }
 0x3a7   :  { %5594 = vtanh.f32 %v1980_v48 }
 0x3a8   :  { %7271 = vst [vmem:[#allocation55_spill] sm:$0xff] %v6530_v50  ;;  %5596 = vtanh.f32 %v1984_v44  ;;  %2072 = vmatmul.mubr.f32.vlgmr.msra.gmra.mrb[6].mxu0 %v6530_v50  ;;  %2143 = vmatmul.mubr.f32.vlgmr.msra.gmra.mrb[6].mxu1 %v6530_v50  ;;  %v7290_v50 = vld [vmem:[#allocation38_spill] sm:$0xff] }
 0x3a9   :  { %4769 = vmatpush1.bf16.msra.mxu0 %v6179_v30  ;;  %4801 = vmatpush1.bf16.msra.mxu1 %v6183_v32  ;;  %5598 = vtanh.f32 %v5464_v41  ;;  %v7273_v41 = vld [vmem:[#allocation21_spill] sm:$0xff] }
 0x3aa   :  { %4771 = vmatprep.subr.bf16.mxu0 %v6185_v36  ;;  %4803 = vmatprep.subr.bf16.mxu1 %v6189_v14  ;;  %5600 = vtanh.f32 %v1989_v56  ;;  %v7275_v56 = vld [vmem:[#allocation23_spill] sm:$0xff] }
 0x3ab   :  { %2244 = vmatprep.mubr.f32.mxu0 %v7209_v19  ;;  %2315 = vmatprep.mubr.f32.mxu1 %v7209_v19 }
 0x3ad   :  { %4773 = vmatpush1.bf16.msra.mxu0 %v6195_v55  ;;  %4805 = vmatpush1.bf16.msra.mxu1 %v6199_v58 }
 0x3ae   :  { %4775 = vmatprep.subr.bf16.mxu0 %v6201_v60  ;;  %4807 = vmatprep.subr.bf16.mxu1 %v6204_v5 }
 0x3b1   :  { %v5595_v11 = vpop.eup %5594  ;;  %4777 = vmatpush1.bf16.msra.mxu0 %v6209_v18  ;;  %4809 = vmatpush1.bf16.msra.mxu1 %v7241_v7 }
 0x3b2   :  { %v5597_v13 = vpop.eup %5596  ;;  %v1982_v1 = vmul.f32 0.5, %v5595_v11  ;;  %4779 = vmatprep.subr.bf16.mxu0 %v7242_v17  ;;  %4811 = vmatprep.subr.bf16.mxu1 %v7243_v59  ;;  %v7276_v11 = vld [vmem:[#allocation24_spill] sm:$0xff] }
 0x3b3   :  { %v1986_v29 = vmul.f32 0.5, %v5597_v13  ;;  %v5599_v35 = vpop.eup %5598  ;;  %v7277_v13 = vld [vmem:[#allocation25_spill] sm:$0xff] }
 0x3b4   :  { %v1983_v61 = vadd.f32 0.5, %v1982_v1  ;;  %v5601_v33 = vpop.eup %5600  ;;  %v7278_v1 = vld [vmem:[#allocation26_spill] sm:$0xff] }
 0x3b5   :  { %v1987_v24 = vadd.f32 0.5, %v1986_v29  ;;  %4781 = vmatpush1.bf16.msra.mxu0 %v7216_v9  ;;  %4813 = vmatpush1.bf16.msra.mxu1 %v7217_v16  ;;  %v7279_v29 = vld [vmem:[#allocation27_spill] sm:$0xff] }
 0x3b6   :  { %v1994_v54 = vmul.f32 %v5599_v35, %v1983_v61  ;;  %4783 = vmatprep.subr.bf16.mxu0 %v7218_v53  ;;  %4815 = vmatprep.subr.bf16.mxu1 %v7219_v62  ;;  %v7280_v61 = vld [vmem:[#allocation28_spill] sm:$0xff]  ;;  %v7281_v35 = vld [vmem:[#allocation29_spill] sm:$0xff] }
 0x3b7   :  { %v1993_v47 = vmul.f32 %v1987_v24, %v6463_v57  ;;  %v1991_v57 = vmul.f32 0.5, %v5601_v33  ;;  %v7282_v24 = vld [vmem:[#allocation30_spill] sm:$0xff]  ;;  %v7285_v33 = vld [vmem:[#allocation33_spill] sm:$0xff] }
 0x3b9   :  { %v6555_v46 = vadd.f32 %v1994_v54, %v1993_v47  ;;  %4785 = vmatpush1.bf16.msra.mxu0 %v7220_v22  ;;  %4817 = vmatpush1.bf16.msra.mxu1 %v7221_v45  ;;  %v1992_v51 = vadd.f32 0.5, %v1991_v57  ;;  %v7283_v54 = vld [vmem:[#allocation31_spill] sm:$0xff]  ;;  %v7284_v47 = vld [vmem:[#allocation32_spill] sm:$0xff]  ;;  %v7286_v57 = vld [vmem:[#allocation34_spill] sm:$0xff] }
 0x3ba   :  { %4787 = vmatprep.subr.bf16.mxu0 %v6239_v42  ;;  %4819 = vmatprep.subr.bf16.mxu1 %v7222_v2 }
 0x3bb   :  { %5602 = vtanh.f32 %v6555_v46 }
 0x3bd   :  { %4789 = vmatpush1.bf16.msra.mxu0 %v6245_v49  ;;  %4821 = vmatpush1.bf16.msra.mxu1 %v6249_v0 }
 0x3be   :  { %4791 = vmatprep.subr.bf16.mxu0 %v6251_v10  ;;  %4823 = vmatprep.subr.bf16.mxu1 %v6254_v27 }
 0x3c1   :  { %4793 = vmatpush1.bf16.msra.mxu0 %v6257_v37  ;;  %4825 = vmatpush1.bf16.msra.mxu1 %v6261_v23 }
 0x3c2   :  { %4795 = vmatprep.subr.bf16.mxu0 %v6263_v40  ;;  %4827 = vmatprep.subr.bf16.mxu1 %v6266_v3 }
 0x3c5   :  { %v5603_v48 = vpop.eup %5602  ;;  %4797 = vmatpush1.bf16.msra.mxu0 %v6269_v15  ;;  %4829 = vmatpush1.bf16.msra.mxu1 %v6273_v12 }
 0x3c6   :  { %v6572_v44 = vmul.f32 %v5603_v48, %v1992_v51  ;;  %4831 = vmatprep.subr.bf16.mxu0 %v6046_v21  ;;  %4863 = vmatprep.subr.bf16.mxu1 %v6049_v25  ;;  %v7287_v51 = vld [vmem:[#allocation35_spill] sm:$0xff]  ;;  %v7288_v48 = vld [vmem:[#allocation36_spill] sm:$0xff] }
 0x3c8   :  { %7272 = vst [vmem:[#allocation56_spill] sm:$0xff] %v6572_v44  ;;  %2245 = vmatmul.mubr.f32.vlgmr.msra.gmra.mrb[24].mxu0 %v6572_v44  ;;  %2316 = vmatmul.mubr.f32.vlgmr.msra.gmra.mrb[24].mxu1 %v6572_v44  ;;  %v7289_v44 = vld [vmem:[#allocation37_spill] sm:$0xff] }
 0x3c9   :  { %4833 = vmatpush1.bf16.msra.mxu0 %v6052_v28  ;;  %4865 = vmatpush1.bf16.msra.mxu1 %v6055_v31 }
 0x3ca   :  { %4835 = vmatprep.subr.bf16.mxu0 %v6059_v34  ;;  %4867 = vmatprep.subr.bf16.mxu1 %v6063_v38 }
 0x3cb   :  { %2416 = vmatprep.mubr.f32.mxu0 %v7209_v19  ;;  %2487 = vmatprep.mubr.f32.mxu1 %v7209_v19 }
 0x3cd   :  { %4837 = vmatpush1.bf16.msra.mxu0 %v7273_v41  ;;  %4869 = vmatpush1.bf16.msra.mxu1 %v7274_v8 }
 0x3ce   :  { %4839 = vmatprep.subr.bf16.mxu0 %v7275_v56  ;;  %4871 = vmatprep.subr.bf16.mxu1 %v7276_v11 }
 0x3d1   :  { %4841 = vmatpush1.bf16.msra.mxu0 %v7277_v13  ;;  %4873 = vmatpush1.bf16.msra.mxu1 %v7278_v1 }
 0x3d2   :  { %4843 = vmatprep.subr.bf16.mxu0 %v7279_v29  ;;  %4875 = vmatprep.subr.bf16.mxu1 %v7280_v61  ;;  %v7291_v61 = vld [vmem:[#allocation39_spill] sm:$0xff] }
 0x3d3   :  { %v7301_v29 = vld [vmem:[#allocation59_spill] sm:$0xff] }
 0x3d5   :  { %4845 = vmatpush1.bf16.msra.mxu0 %v7281_v35  ;;  %4877 = vmatpush1.bf16.msra.mxu1 %v7282_v24  ;;  %v7292_v35 = vld [vmem:[#allocation40_spill] sm:$0xff]  ;;  %v7293_v24 = vld [vmem:[#allocation41_spill] sm:$0xff] }
 0x3d6   :  { %4847 = vmatprep.subr.bf16.mxu0 %v7283_v54  ;;  %4879 = vmatprep.subr.bf16.mxu1 %v7284_v47  ;;  %v7294_v54 = vld [vmem:[#allocation42_spill] sm:$0xff]  ;;  %v7295_v47 = vld [vmem:[#allocation43_spill] sm:$0xff] }
 0x3d9   :  { %4849 = vmatpush1.bf16.msra.mxu0 %v7285_v33  ;;  %4881 = vmatpush1.bf16.msra.mxu1 %v7286_v57  ;;  %v7296_v33 = vld [vmem:[#allocation44_spill] sm:$0xff]  ;;  %v7297_v57 = vld [vmem:[#allocation45_spill] sm:$0xff] }
 0x3da   :  { %4851 = vmatprep.subr.bf16.mxu0 %v7287_v51  ;;  %4883 = vmatprep.subr.bf16.mxu1 %v7288_v48  ;;  %v7298_v51 = vld [vmem:[#allocation46_spill] sm:$0xff]  ;;  %v7299_v48 = vld [vmem:[#allocation47_spill] sm:$0xff] }
 0x3dd   :  { %4853 = vmatpush1.bf16.msra.mxu0 %v7289_v44  ;;  %4885 = vmatpush1.bf16.msra.mxu1 %v7290_v50  ;;  %v7300_v44 = vld [vmem:[#allocation48_spill] sm:$0xff] }
 0x3de   :  { %4855 = vmatprep.subr.bf16.mxu0 %v7291_v61  ;;  %4887 = vmatprep.subr.bf16.mxu1 %v7292_v35 }
 0x3e1   :  { %4857 = vmatpush1.bf16.msra.mxu0 %v7293_v24  ;;  %4889 = vmatpush1.bf16.msra.mxu1 %v7294_v54 }
 0x3e2   :  { %4859 = vmatprep.subr.bf16.mxu0 %v7295_v47  ;;  %4891 = vmatprep.subr.bf16.mxu1 %v7296_v33 }
 0x3e5   :  { %4861 = vmatpush1.bf16.msra.mxu0 %v7297_v57  ;;  %4893 = vmatpush1.bf16.msra.mxu1 %v7298_v51 }
 0x3e6   :  { %4895 = vmatprep.subr.bf16.mxu0 %v7299_v48  ;;  %4927 = vmatprep.subr.bf16.mxu1 %v7300_v44 }
 0x47b   :  { %v2073_v50 = vpop.f32.mrb[6].mxu0  ;;  %v2144_v61 = vpop.f32.mrb[6].mxu1 }
 0x47c   :  { %v5412_v35 = vadd.f32 %v2073_v50, %v7301_v29  ;;  %v2075_v1 = vpop.f32.mrb[7].mxu0  ;;  %v2146_v24 = vpop.f32.mrb[7].mxu1  ;;  %v5428_v33 = vadd.f32 %v2144_v61, %v6324_v6 }
 0x47d   :  { %v5413_v54 = vadd.f32 %v2075_v1, %v7239_v4  ;;  %v5429_v51 = vadd.f32 %v2146_v24, %v6328_v43 }
 0x47e   :  { %v2153_v13 = vmul.f32 0.5, %v5412_v35 }
 0x47f   :  { %v2157_v47 = vmul.f32 0.5, %v5413_v54  ;;  %v2162_v48 = vmul.f32 0.5, %v5429_v51 }
 0x480   :  { %5604 = vtanh.f32 %v2153_v13 }
 0x481   :  { %5606 = vtanh.f32 %v2157_v47 }
 0x482   :  { %5608 = vtanh.f32 %v5428_v33 }
 0x483   :  { %5610 = vtanh.f32 %v2162_v48 }
 0x48a   :  { %v5605_v57 = vpop.eup %5604 }
 0x48b   :  { %v5607_v44 = vpop.eup %5606  ;;  %v2155_v11 = vmul.f32 0.5, %v5605_v57 }
 0x48c   :  { %v2159_v56 = vmul.f32 0.5, %v5607_v44  ;;  %v5609_v29 = vpop.eup %5608 }
 0x48d   :  { %v2156_v50 = vadd.f32 0.5, %v2155_v11  ;;  %v5611_v13 = vpop.eup %5610 }
 0x48e   :  { %v2160_v8 = vadd.f32 0.5, %v2159_v56  ;;  %v2164_v61 = vmul.f32 0.5, %v5611_v13 }
 0x48f   :  { %v2167_v41 = vmul.f32 %v5609_v29, %v2156_v50 }
 0x490   :  { %v2166_v1 = vmul.f32 %v2160_v8, %v6525_v20  ;;  %v2165_v44 = vadd.f32 0.5, %v2164_v61 }
 0x492   :  { %v6617_v35 = vadd.f32 %v2167_v41, %v2166_v1 }
 0x494   :  { %5612 = vtanh.f32 %v6617_v35 }
 0x49b   :  { %v2246_v54 = vpop.f32.mrb[24].mxu0  ;;  %v2317_v24 = vpop.f32.mrb[24].mxu1 }
 0x49c   :  { %v5446_v47 = vadd.f32 %v2246_v54, %v6337_v39  ;;  %v2248_v33 = vpop.f32.mrb[25].mxu0  ;;  %v2319_v57 = vpop.f32.mrb[25].mxu1  ;;  %v5462_v41 = vadd.f32 %v2317_v24, %v6342_v26 }
 0x49d   :  { %v5447_v11 = vadd.f32 %v2248_v33, %v6339_v63  ;;  %v5463_v8 = vadd.f32 %v2319_v57, %v6348_v52 }
 0x49e   :  { %v5613_v51 = vpop.eup %5612  ;;  %v2326_v56 = vmul.f32 0.5, %v5446_v47 }
 0x49f   :  { %v6622_v29 = vmul.f32 %v5613_v51, %v2165_v44  ;;  %v2330_v20 = vmul.f32 0.5, %v5447_v11  ;;  %v2335_v48 = vmul.f32 0.5, %v5463_v8  ;;  %v7305_v8 = vld [vmem:[#allocation22_spill] sm:$0xff] }
 0x4a0   :  { %5614 = vtanh.f32 %v2326_v56 }
 0x4a1   :  { %7302 = vst [vmem:[#allocation57_spill] sm:$0xff] %v6622_v29  ;;  %5616 = vtanh.f32 %v2330_v20  ;;  %2417 = vmatmul.mubr.f32.vlgmr.msra.gmra.mrb[8].mxu0 %v6622_v29  ;;  %2488 = vmatmul.mubr.f32.vlgmr.msra.gmra.mrb[8].mxu1 %v6622_v29  ;;  %v7321_v29 = vld [vmem:[#allocation38_spill] sm:$0xff] }
 0x4a2   :  { %4897 = vmatpush1.bf16.msra.mxu0 %v6179_v30  ;;  %4929 = vmatpush1.bf16.msra.mxu1 %v6183_v32  ;;  %5618 = vtanh.f32 %v5462_v41  ;;  %v7304_v41 = vld [vmem:[#allocation21_spill] sm:$0xff] }
 0x4a3   :  { %4899 = vmatprep.subr.bf16.mxu0 %v6185_v36  ;;  %4931 = vmatprep.subr.bf16.mxu1 %v6189_v14  ;;  %5620 = vtanh.f32 %v2335_v48  ;;  %v7306_v48 = vld [vmem:[#allocation23_spill] sm:$0xff] }
 0x4a4   :  { %2588 = vmatprep.mubr.f32.mxu0 %v7209_v19  ;;  %2659 = vmatprep.mubr.f32.mxu1 %v7209_v19 }
 0x4a6   :  { %4901 = vmatpush1.bf16.msra.mxu0 %v6195_v55  ;;  %4933 = vmatpush1.bf16.msra.mxu1 %v6199_v58 }
 0x4a7   :  { %4903 = vmatprep.subr.bf16.mxu0 %v6201_v60  ;;  %4935 = vmatprep.subr.bf16.mxu1 %v6204_v5 }
 0x4aa   :  { %v5615_v50 = vpop.eup %5614  ;;  %4905 = vmatpush1.bf16.msra.mxu0 %v6209_v18  ;;  %4937 = vmatpush1.bf16.msra.mxu1 %v7241_v7 }
 0x4ab   :  { %v5617_v1 = vpop.eup %5616  ;;  %v2328_v13 = vmul.f32 0.5, %v5615_v50  ;;  %4907 = vmatprep.subr.bf16.mxu0 %v7242_v17  ;;  %4939 = vmatprep.subr.bf16.mxu1 %v7243_v59  ;;  %v7307_v50 = vld [vmem:[#allocation24_spill] sm:$0xff] }
 0x4ac   :  { %v2332_v61 = vmul.f32 0.5, %v5617_v1  ;;  %v5619_v24 = vpop.eup %5618  ;;  %v7308_v1 = vld [vmem:[#allocation25_spill] sm:$0xff] }
 0x4ad   :  { %v2329_v54 = vadd.f32 0.5, %v2328_v13  ;;  %v5621_v11 = vpop.eup %5620  ;;  %v7309_v13 = vld [vmem:[#allocation26_spill] sm:$0xff] }
 0x4ae   :  { %v2333_v47 = vadd.f32 0.5, %v2332_v61  ;;  %4909 = vmatpush1.bf16.msra.mxu0 %v7216_v9  ;;  %4941 = vmatpush1.bf16.msra.mxu1 %v7217_v16  ;;  %v7310_v61 = vld [vmem:[#allocation27_spill] sm:$0xff] }
 0x4af   :  { %v2340_v33 = vmul.f32 %v5619_v24, %v2329_v54  ;;  %4911 = vmatprep.subr.bf16.mxu0 %v7218_v53  ;;  %4943 = vmatprep.subr.bf16.mxu1 %v7219_v62  ;;  %v7311_v54 = vld [vmem:[#allocation28_spill] sm:$0xff]  ;;  %v7312_v24 = vld [vmem:[#allocation29_spill] sm:$0xff] }
 0x4b0   :  { %v2339_v57 = vmul.f32 %v2333_v47, %v6555_v46  ;;  %v2337_v46 = vmul.f32 0.5, %v5621_v11  ;;  %v7313_v47 = vld [vmem:[#allocation30_spill] sm:$0xff]  ;;  %v7316_v11 = vld [vmem:[#allocation33_spill] sm:$0xff] }
 0x4b2   :  { %v6647_v44 = vadd.f32 %v2340_v33, %v2339_v57  ;;  %4913 = vmatpush1.bf16.msra.mxu0 %v7220_v22  ;;  %4945 = vmatpush1.bf16.msra.mxu1 %v7221_v45  ;;  %v2338_v51 = vadd.f32 0.5, %v2337_v46  ;;  %v7314_v33 = vld [vmem:[#allocation31_spill] sm:$0xff]  ;;  %v7315_v57 = vld [vmem:[#allocation32_spill] sm:$0xff]  ;;  %v7317_v46 = vld [vmem:[#allocation34_spill] sm:$0xff] }
 0x4b3   :  { %4915 = vmatprep.subr.bf16.mxu0 %v6239_v42  ;;  %4947 = vmatprep.subr.bf16.mxu1 %v7222_v2 }
 0x4b4   :  { %5622 = vtanh.f32 %v6647_v44 }
 0x4b6   :  { %4917 = vmatpush1.bf16.msra.mxu0 %v6245_v49  ;;  %4949 = vmatpush1.bf16.msra.mxu1 %v6249_v0 }
 0x4b7   :  { %4919 = vmatprep.subr.bf16.mxu0 %v6251_v10  ;;  %4951 = vmatprep.subr.bf16.mxu1 %v6254_v27 }
 0x4ba   :  { %4921 = vmatpush1.bf16.msra.mxu0 %v6257_v37  ;;  %4953 = vmatpush1.bf16.msra.mxu1 %v6261_v23 }
 0x4bb   :  { %4923 = vmatprep.subr.bf16.mxu0 %v6263_v40  ;;  %4955 = vmatprep.subr.bf16.mxu1 %v6266_v3 }
 0x4be   :  { %v5623_v56 = vpop.eup %5622  ;;  %4925 = vmatpush1.bf16.msra.mxu0 %v6269_v15  ;;  %4957 = vmatpush1.bf16.msra.mxu1 %v6273_v12 }
 0x4bf   :  { %v6664_v20 = vmul.f32 %v5623_v56, %v2338_v51  ;;  %4959 = vmatprep.subr.bf16.mxu0 %v6046_v21  ;;  %4991 = vmatprep.subr.bf16.mxu1 %v6049_v25  ;;  %v7318_v51 = vld [vmem:[#allocation35_spill] sm:$0xff]  ;;  %v7319_v56 = vld [vmem:[#allocation36_spill] sm:$0xff] }
 0x4c1   :  { %7303 = vst [vmem:[#allocation58_spill] sm:$0xff] %v6664_v20  ;;  %2589 = vmatmul.mubr.f32.vlgmr.msra.gmra.mrb[22].mxu0 %v6664_v20  ;;  %2660 = vmatmul.mubr.f32.vlgmr.msra.gmra.mrb[22].mxu1 %v6664_v20  ;;  %v7320_v20 = vld [vmem:[#allocation37_spill] sm:$0xff] }
 0x4c2   :  { %4961 = vmatpush1.bf16.msra.mxu0 %v6052_v28  ;;  %4993 = vmatpush1.bf16.msra.mxu1 %v6055_v31 }
 0x4c3   :  { %4963 = vmatprep.subr.bf16.mxu0 %v6059_v34  ;;  %4995 = vmatprep.subr.bf16.mxu1 %v6063_v38 }
 0x4c4   :  { %2760 = vmatprep.mubr.f32.mxu0 %v7209_v19  ;;  %2831 = vmatprep.mubr.f32.mxu1 %v7209_v19 }
 0x4c6   :  { %4965 = vmatpush1.bf16.msra.mxu0 %v7304_v41  ;;  %4997 = vmatpush1.bf16.msra.mxu1 %v7305_v8 }
 0x4c7   :  { %4967 = vmatprep.subr.bf16.mxu0 %v7306_v48  ;;  %4999 = vmatprep.subr.bf16.mxu1 %v7307_v50 }
 0x4ca   :  { %4969 = vmatpush1.bf16.msra.mxu0 %v7308_v1  ;;  %5001 = vmatpush1.bf16.msra.mxu1 %v7309_v13 }
 0x4cb   :  { %4971 = vmatprep.subr.bf16.mxu0 %v7310_v61  ;;  %5003 = vmatprep.subr.bf16.mxu1 %v7311_v54  ;;  %v7322_v54 = vld [vmem:[#allocation39_spill] sm:$0xff] }
 0x4cc   :  { %v7332_v61 = vld [vmem:[#allocation59_spill] sm:$0xff] }
 0x4ce   :  { %4973 = vmatpush1.bf16.msra.mxu0 %v7312_v24  ;;  %5005 = vmatpush1.bf16.msra.mxu1 %v7313_v47  ;;  %v7323_v24 = vld [vmem:[#allocation40_spill] sm:$0xff]  ;;  %v7324_v47 = vld [vmem:[#allocation41_spill] sm:$0xff] }
 0x4cf   :  { %4975 = vmatprep.subr.bf16.mxu0 %v7314_v33  ;;  %5007 = vmatprep.subr.bf16.mxu1 %v7315_v57  ;;  %v7325_v33 = vld [vmem:[#allocation42_spill] sm:$0xff]  ;;  %v7326_v57 = vld [vmem:[#allocation43_spill] sm:$0xff] }
 0x4d2   :  { %4977 = vmatpush1.bf16.msra.mxu0 %v7316_v11  ;;  %5009 = vmatpush1.bf16.msra.mxu1 %v7317_v46  ;;  %v7327_v11 = vld [vmem:[#allocation44_spill] sm:$0xff]  ;;  %v7328_v46 = vld [vmem:[#allocation45_spill] sm:$0xff] }
 0x4d3   :  { %4979 = vmatprep.subr.bf16.mxu0 %v7318_v51  ;;  %5011 = vmatprep.subr.bf16.mxu1 %v7319_v56  ;;  %v7329_v51 = vld [vmem:[#allocation46_spill] sm:$0xff]  ;;  %v7330_v56 = vld [vmem:[#allocation47_spill] sm:$0xff] }
 0x4d6   :  { %4981 = vmatpush1.bf16.msra.mxu0 %v7320_v20  ;;  %5013 = vmatpush1.bf16.msra.mxu1 %v7321_v29  ;;  %v7331_v20 = vld [vmem:[#allocation48_spill] sm:$0xff] }
 0x4d7   :  { %4983 = vmatprep.subr.bf16.mxu0 %v7322_v54  ;;  %5015 = vmatprep.subr.bf16.mxu1 %v7323_v24 }
 0x4da   :  { %4985 = vmatpush1.bf16.msra.mxu0 %v7324_v47  ;;  %5017 = vmatpush1.bf16.msra.mxu1 %v7325_v33 }
 0x4db   :  { %4987 = vmatprep.subr.bf16.mxu0 %v7326_v57  ;;  %5019 = vmatprep.subr.bf16.mxu1 %v7327_v11 }
 0x4de   :  { %4989 = vmatpush1.bf16.msra.mxu0 %v7328_v46  ;;  %5021 = vmatpush1.bf16.msra.mxu1 %v7329_v51 }
 0x4df   :  { %5023 = vmatprep.subr.bf16.mxu0 %v7330_v56  ;;  %5055 = vmatprep.subr.bf16.mxu1 %v7331_v20 }
 0x574   :  { %v2418_v29 = vpop.f32.mrb[8].mxu0  ;;  %v2489_v54 = vpop.f32.mrb[8].mxu1 }
 0x575   :  { %v5414_v24 = vadd.f32 %v2418_v29, %v7332_v61  ;;  %v2420_v13 = vpop.f32.mrb[9].mxu0  ;;  %v2491_v47 = vpop.f32.mrb[9].mxu1  ;;  %v5430_v11 = vadd.f32 %v2489_v54, %v6324_v6 }
 0x576   :  { %v5415_v33 = vadd.f32 %v2420_v13, %v7239_v4  ;;  %v5431_v51 = vadd.f32 %v2491_v47, %v6328_v43 }
 0x577   :  { %v2498_v1 = vmul.f32 0.5, %v5414_v24 }
 0x578   :  { %v2502_v57 = vmul.f32 0.5, %v5415_v33  ;;  %v2507_v56 = vmul.f32 0.5, %v5431_v51 }
 0x579   :  { %5624 = vtanh.f32 %v2498_v1 }
 0x57a   :  { %5626 = vtanh.f32 %v2502_v57 }
 0x57b   :  { %5628 = vtanh.f32 %v5430_v11 }
 0x57c   :  { %5630 = vtanh.f32 %v2507_v56 }
 0x583   :  { %v5625_v46 = vpop.eup %5624 }
 0x584   :  { %v5627_v20 = vpop.eup %5626  ;;  %v2500_v50 = vmul.f32 0.5, %v5625_v46 }
 0x585   :  { %v2504_v48 = vmul.f32 0.5, %v5627_v20  ;;  %v5629_v61 = vpop.eup %5628 }
 0x586   :  { %v2501_v29 = vadd.f32 0.5, %v2500_v50  ;;  %v5631_v1 = vpop.eup %5630 }
 0x587   :  { %v2505_v8 = vadd.f32 0.5, %v2504_v48  ;;  %v2509_v54 = vmul.f32 0.5, %v5631_v1 }
 0x588   :  { %v2512_v41 = vmul.f32 %v5629_v61, %v2501_v29 }
 0x589   :  { %v2511_v13 = vmul.f32 %v2505_v8, %v6617_v35  ;;  %v2510_v20 = vadd.f32 0.5, %v2509_v54 }
 0x58b   :  { %v6709_v24 = vadd.f32 %v2512_v41, %v2511_v13 }
 0x58d   :  { %5632 = vtanh.f32 %v6709_v24 }
 0x594   :  { %v2590_v33 = vpop.f32.mrb[22].mxu0  ;;  %v2661_v47 = vpop.f32.mrb[22].mxu1 }
 0x595   :  { %v5444_v57 = vadd.f32 %v2590_v33, %v6337_v39  ;;  %v2592_v11 = vpop.f32.mrb[23].mxu0  ;;  %v2663_v46 = vpop.f32.mrb[23].mxu1  ;;  %v5460_v41 = vadd.f32 %v2661_v47, %v6342_v26 }
 0x596   :  { %v5445_v50 = vadd.f32 %v2592_v11, %v6339_v63  ;;  %v5461_v8 = vadd.f32 %v2663_v46, %v6348_v52 }
 0x597   :  { %v5633_v51 = vpop.eup %5632  ;;  %v2670_v48 = vmul.f32 0.5, %v5444_v57 }
 0x598   :  { %v6714_v61 = vmul.f32 %v5633_v51, %v2510_v20  ;;  %v2674_v35 = vmul.f32 0.5, %v5445_v50  ;;  %v2679_v56 = vmul.f32 0.5, %v5461_v8  ;;  %v7336_v8 = vld [vmem:[#allocation22_spill] sm:$0xff] }
 0x599   :  { %5634 = vtanh.f32 %v2670_v48 }
 0x59a   :  { %7333 = vst [vmem:[#allocation60_spill] sm:$0xff] %v6714_v61  ;;  %5636 = vtanh.f32 %v2674_v35  ;;  %2761 = vmatmul.mubr.f32.vlgmr.msra.gmra.mrb[10].mxu0 %v6714_v61  ;;  %2832 = vmatmul.mubr.f32.vlgmr.msra.gmra.mrb[10].mxu1 %v6714_v61  ;;  %v7352_v61 = vld [vmem:[#allocation38_spill] sm:$0xff] }
 0x59b   :  { %5025 = vmatpush1.bf16.msra.mxu0 %v6179_v30  ;;  %5057 = vmatpush1.bf16.msra.mxu1 %v6183_v32  ;;  %5638 = vtanh.f32 %v5460_v41  ;;  %v7335_v41 = vld [vmem:[#allocation21_spill] sm:$0xff] }
 0x59c   :  { %5027 = vmatprep.subr.bf16.mxu0 %v6185_v36  ;;  %5059 = vmatprep.subr.bf16.mxu1 %v6189_v14  ;;  %5640 = vtanh.f32 %v2679_v56  ;;  %v7337_v56 = vld [vmem:[#allocation23_spill] sm:$0xff] }
 0x59d   :  { %2932 = vmatprep.mubr.f32.mxu0 %v7209_v19  ;;  %3003 = vmatprep.mubr.f32.mxu1 %v7209_v19 }
 0x59f   :  { %5029 = vmatpush1.bf16.msra.mxu0 %v6195_v55  ;;  %5061 = vmatpush1.bf16.msra.mxu1 %v6199_v58 }
 0x5a0   :  { %5031 = vmatprep.subr.bf16.mxu0 %v6201_v60  ;;  %5063 = vmatprep.subr.bf16.mxu1 %v6204_v5 }
 0x5a3   :  { %v5635_v29 = vpop.eup %5634  ;;  %5033 = vmatpush1.bf16.msra.mxu0 %v6209_v18  ;;  %5065 = vmatpush1.bf16.msra.mxu1 %v7241_v7 }
 0x5a4   :  { %v5637_v13 = vpop.eup %5636  ;;  %v2672_v1 = vmul.f32 0.5, %v5635_v29  ;;  %5035 = vmatprep.subr.bf16.mxu0 %v7242_v17  ;;  %5067 = vmatprep.subr.bf16.mxu1 %v7243_v59  ;;  %v7338_v29 = vld [vmem:[#allocation24_spill] sm:$0xff] }
 0x5a5   :  { %v2676_v54 = vmul.f32 0.5, %v5637_v13  ;;  %v5639_v47 = vpop.eup %5638  ;;  %v7339_v13 = vld [vmem:[#allocation25_spill] sm:$0xff] }
 0x5a6   :  { %v2673_v33 = vadd.f32 0.5, %v2672_v1  ;;  %v5641_v50 = vpop.eup %5640  ;;  %v7340_v1 = vld [vmem:[#allocation26_spill] sm:$0xff] }
 0x5a7   :  { %v2677_v57 = vadd.f32 0.5, %v2676_v54  ;;  %5037 = vmatpush1.bf16.msra.mxu0 %v7216_v9  ;;  %5069 = vmatpush1.bf16.msra.mxu1 %v7217_v16  ;;  %v7341_v54 = vld [vmem:[#allocation27_spill] sm:$0xff] }
 0x5a8   :  { %v2684_v11 = vmul.f32 %v5639_v47, %v2673_v33  ;;  %5039 = vmatprep.subr.bf16.mxu0 %v7218_v53  ;;  %5071 = vmatprep.subr.bf16.mxu1 %v7219_v62  ;;  %v7342_v33 = vld [vmem:[#allocation28_spill] sm:$0xff]  ;;  %v7343_v47 = vld [vmem:[#allocation29_spill] sm:$0xff] }
 0x5a9   :  { %v2683_v46 = vmul.f32 %v2677_v57, %v6647_v44  ;;  %v2681_v44 = vmul.f32 0.5, %v5641_v50  ;;  %v7344_v57 = vld [vmem:[#allocation30_spill] sm:$0xff]  ;;  %v7347_v50 = vld [vmem:[#allocation33_spill] sm:$0xff] }
 0x5ab   :  { %v6739_v20 = vadd.f32 %v2684_v11, %v2683_v46  ;;  %5041 = vmatpush1.bf16.msra.mxu0 %v7220_v22  ;;  %5073 = vmatpush1.bf16.msra.mxu1 %v7221_v45  ;;  %v2682_v51 = vadd.f32 0.5, %v2681_v44  ;;  %v7345_v11 = vld [vmem:[#allocation31_spill] sm:$0xff]  ;;  %v7346_v46 = vld [vmem:[#allocation32_spill] sm:$0xff]  ;;  %v7348_v44 = vld [vmem:[#allocation34_spill] sm:$0xff] }
 0x5ac   :  { %5043 = vmatprep.subr.bf16.mxu0 %v6239_v42  ;;  %5075 = vmatprep.subr.bf16.mxu1 %v7222_v2 }
 0x5ad   :  { %5642 = vtanh.f32 %v6739_v20 }
 0x5af   :  { %5045 = vmatpush1.bf16.msra.mxu0 %v6245_v49  ;;  %5077 = vmatpush1.bf16.msra.mxu1 %v6249_v0 }
 0x5b0   :  { %5047 = vmatprep.subr.bf16.mxu0 %v6251_v10  ;;  %5079 = vmatprep.subr.bf16.mxu1 %v6254_v27 }
 0x5b3   :  { %5049 = vmatpush1.bf16.msra.mxu0 %v6257_v37  ;;  %5081 = vmatpush1.bf16.msra.mxu1 %v6261_v23 }
 0x5b4   :  { %5051 = vmatprep.subr.bf16.mxu0 %v6263_v40  ;;  %5083 = vmatprep.subr.bf16.mxu1 %v6266_v3 }
 0x5b7   :  { %v5643_v48 = vpop.eup %5642  ;;  %5053 = vmatpush1.bf16.msra.mxu0 %v6269_v15  ;;  %5085 = vmatpush1.bf16.msra.mxu1 %v6273_v12 }
 0x5b8   :  { %v6756_v35 = vmul.f32 %v5643_v48, %v2682_v51  ;;  %5087 = vmatprep.subr.bf16.mxu0 %v6046_v21  ;;  %5119 = vmatprep.subr.bf16.mxu1 %v6049_v25  ;;  %v7349_v51 = vld [vmem:[#allocation35_spill] sm:$0xff]  ;;  %v7350_v48 = vld [vmem:[#allocation36_spill] sm:$0xff] }
 0x5ba   :  { %7334 = vst [vmem:[#allocation49_spill] sm:$0xff] %v6756_v35  ;;  %2933 = vmatmul.mubr.f32.vlgmr.msra.gmra.mrb[20].mxu0 %v6756_v35  ;;  %3004 = vmatmul.mubr.f32.vlgmr.msra.gmra.mrb[20].mxu1 %v6756_v35  ;;  %v7351_v35 = vld [vmem:[#allocation37_spill] sm:$0xff] }
 0x5bb   :  { %5089 = vmatpush1.bf16.msra.mxu0 %v6052_v28  ;;  %5121 = vmatpush1.bf16.msra.mxu1 %v6055_v31 }
 0x5bc   :  { %5091 = vmatprep.subr.bf16.mxu0 %v6059_v34  ;;  %5123 = vmatprep.subr.bf16.mxu1 %v6063_v38 }
 0x5bd   :  { %3104 = vmatprep.mubr.f32.mxu0 %v7209_v19  ;;  %3175 = vmatprep.mubr.f32.mxu1 %v7209_v19 }
 0x5bf   :  { %5093 = vmatpush1.bf16.msra.mxu0 %v7335_v41  ;;  %5125 = vmatpush1.bf16.msra.mxu1 %v7336_v8 }
 0x5c0   :  { %5095 = vmatprep.subr.bf16.mxu0 %v7337_v56  ;;  %5127 = vmatprep.subr.bf16.mxu1 %v7338_v29 }
 0x5c3   :  { %5097 = vmatpush1.bf16.msra.mxu0 %v7339_v13  ;;  %5129 = vmatpush1.bf16.msra.mxu1 %v7340_v1 }
 0x5c4   :  { %5099 = vmatprep.subr.bf16.mxu0 %v7341_v54  ;;  %5131 = vmatprep.subr.bf16.mxu1 %v7342_v33  ;;  %v7353_v33 = vld [vmem:[#allocation39_spill] sm:$0xff] }
 0x5c5   :  { %v7363_v54 = vld [vmem:[#allocation59_spill] sm:$0xff] }
 0x5c7   :  { %5101 = vmatpush1.bf16.msra.mxu0 %v7343_v47  ;;  %5133 = vmatpush1.bf16.msra.mxu1 %v7344_v57  ;;  %v7354_v47 = vld [vmem:[#allocation40_spill] sm:$0xff]  ;;  %v7355_v57 = vld [vmem:[#allocation41_spill] sm:$0xff] }
 0x5c8   :  { %5103 = vmatprep.subr.bf16.mxu0 %v7345_v11  ;;  %5135 = vmatprep.subr.bf16.mxu1 %v7346_v46  ;;  %v7356_v11 = vld [vmem:[#allocation42_spill] sm:$0xff]  ;;  %v7357_v46 = vld [vmem:[#allocation43_spill] sm:$0xff] }
 0x5cb   :  { %5105 = vmatpush1.bf16.msra.mxu0 %v7347_v50  ;;  %5137 = vmatpush1.bf16.msra.mxu1 %v7348_v44  ;;  %v7358_v50 = vld [vmem:[#allocation44_spill] sm:$0xff]  ;;  %v7359_v44 = vld [vmem:[#allocation45_spill] sm:$0xff] }
 0x5cc   :  { %5107 = vmatprep.subr.bf16.mxu0 %v7349_v51  ;;  %5139 = vmatprep.subr.bf16.mxu1 %v7350_v48  ;;  %v7360_v51 = vld [vmem:[#allocation46_spill] sm:$0xff]  ;;  %v7361_v48 = vld [vmem:[#allocation47_spill] sm:$0xff] }
 0x5cf   :  { %5109 = vmatpush1.bf16.msra.mxu0 %v7351_v35  ;;  %5141 = vmatpush1.bf16.msra.mxu1 %v7352_v61  ;;  %v7362_v35 = vld [vmem:[#allocation48_spill] sm:$0xff] }
 0x5d0   :  { %5111 = vmatprep.subr.bf16.mxu0 %v7353_v33  ;;  %5143 = vmatprep.subr.bf16.mxu1 %v7354_v47 }
 0x5d3   :  { %5113 = vmatpush1.bf16.msra.mxu0 %v7355_v57  ;;  %5145 = vmatpush1.bf16.msra.mxu1 %v7356_v11 }
 0x5d4   :  { %5115 = vmatprep.subr.bf16.mxu0 %v7357_v46  ;;  %5147 = vmatprep.subr.bf16.mxu1 %v7358_v50 }
 0x5d7   :  { %5117 = vmatpush1.bf16.msra.mxu0 %v7359_v44  ;;  %5149 = vmatpush1.bf16.msra.mxu1 %v7360_v51 }
 0x5d8   :  { %5151 = vmatprep.subr.bf16.mxu0 %v7361_v48  ;;  %5183 = vmatprep.subr.bf16.mxu1 %v7362_v35 }
 0x66d   :  { %v2762_v61 = vpop.f32.mrb[10].mxu0  ;;  %v2833_v33 = vpop.f32.mrb[10].mxu1 }
 0x66e   :  { %v5416_v47 = vadd.f32 %v2762_v61, %v7363_v54  ;;  %v2764_v1 = vpop.f32.mrb[11].mxu0  ;;  %v2835_v57 = vpop.f32.mrb[11].mxu1  ;;  %v5432_v50 = vadd.f32 %v2833_v33, %v6324_v6 }
 0x66f   :  { %v5417_v11 = vadd.f32 %v2764_v1, %v7239_v4  ;;  %v5433_v51 = vadd.f32 %v2835_v57, %v6328_v43 }
 0x670   :  { %v2842_v13 = vmul.f32 0.5, %v5416_v47 }
 0x671   :  { %v2846_v46 = vmul.f32 0.5, %v5417_v11  ;;  %v2851_v48 = vmul.f32 0.5, %v5433_v51 }
 0x672   :  { %5644 = vtanh.f32 %v2842_v13 }
 0x673   :  { %5646 = vtanh.f32 %v2846_v46 }
 0x674   :  { %5648 = vtanh.f32 %v5432_v50 }
 0x675   :  { %5650 = vtanh.f32 %v2851_v48 }
 0x67c   :  { %v5645_v44 = vpop.eup %5644 }
 0x67d   :  { %v5647_v35 = vpop.eup %5646  ;;  %v2844_v29 = vmul.f32 0.5, %v5645_v44 }
 0x67e   :  { %v2848_v56 = vmul.f32 0.5, %v5647_v35  ;;  %v5649_v54 = vpop.eup %5648 }
 0x67f   :  { %v2845_v61 = vadd.f32 0.5, %v2844_v29  ;;  %v5651_v13 = vpop.eup %5650 }
 0x680   :  { %v2849_v8 = vadd.f32 0.5, %v2848_v56  ;;  %v2853_v33 = vmul.f32 0.5, %v5651_v13 }
 0x681   :  { %v2856_v41 = vmul.f32 %v5649_v54, %v2845_v61 }
 0x682   :  { %v2855_v1 = vmul.f32 %v2849_v8, %v6709_v24  ;;  %v2854_v35 = vadd.f32 0.5, %v2853_v33 }
 0x684   :  { %v6801_v47 = vadd.f32 %v2856_v41, %v2855_v1 }
 0x686   :  { %5652 = vtanh.f32 %v6801_v47 }
 0x68d   :  { %v2934_v11 = vpop.f32.mrb[20].mxu0  ;;  %v3005_v57 = vpop.f32.mrb[20].mxu1 }
 0x68e   :  { %v5442_v46 = vadd.f32 %v2934_v11, %v6337_v39  ;;  %v2936_v50 = vpop.f32.mrb[21].mxu0  ;;  %v3007_v44 = vpop.f32.mrb[21].mxu1  ;;  %v5458_v41 = vadd.f32 %v3005_v57, %v6342_v26 }
 0x68f   :  { %v5443_v29 = vadd.f32 %v2936_v50, %v6339_v63  ;;  %v5459_v8 = vadd.f32 %v3007_v44, %v6348_v52 }
 0x690   :  { %v5653_v51 = vpop.eup %5652  ;;  %v3014_v56 = vmul.f32 0.5, %v5442_v46 }
 0x691   :  { %v6806_v54 = vmul.f32 %v5653_v51, %v2854_v35  ;;  %v3018_v24 = vmul.f32 0.5, %v5443_v29  ;;  %v3023_v48 = vmul.f32 0.5, %v5459_v8  ;;  %v7367_v8 = vld [vmem:[#allocation24_spill] sm:$0xff] }
 0x692   :  { %5654 = vtanh.f32 %v3014_v56 }
 0x693   :  { %5656 = vtanh.f32 %v3018_v24  ;;  %3105 = vmatmul.mubr.f32.vlgmr.msra.gmra.mrb[12].mxu0 %v6806_v54  ;;  %3176 = vmatmul.mubr.f32.vlgmr.msra.gmra.mrb[12].mxu1 %v6806_v54 }
 0x694   :  { %5153 = vmatpush1.bf16.msra.mxu0 %v6179_v30  ;;  %5185 = vmatpush1.bf16.msra.mxu1 %v6183_v32  ;;  %5658 = vtanh.f32 %v5458_v41  ;;  %v7364_v41 = vld [vmem:[#allocation21_spill] sm:$0xff] }
 0x695   :  { %5155 = vmatprep.subr.bf16.mxu0 %v6185_v36  ;;  %5187 = vmatprep.subr.bf16.mxu1 %v6189_v14  ;;  %5660 = vtanh.f32 %v3023_v48  ;;  %v7368_v48 = vld [vmem:[#allocation25_spill] sm:$0xff] }
 0x696   :  { %3276 = vmatprep.mubr.f32.mxu0 %v7209_v19  ;;  %3347 = vmatprep.mubr.f32.mxu1 %v7209_v19 }
 0x698   :  { %5157 = vmatpush1.bf16.msra.mxu0 %v6195_v55  ;;  %5189 = vmatpush1.bf16.msra.mxu1 %v6199_v58 }
 0x699   :  { %5159 = vmatprep.subr.bf16.mxu0 %v6201_v60  ;;  %5191 = vmatprep.subr.bf16.mxu1 %v6204_v5 }
 0x69c   :  { %v5655_v61 = vpop.eup %5654  ;;  %5161 = vmatpush1.bf16.msra.mxu0 %v6209_v18  ;;  %5193 = vmatpush1.bf16.msra.mxu1 %v7241_v7 }
 0x69d   :  { %v5657_v1 = vpop.eup %5656  ;;  %v3016_v13 = vmul.f32 0.5, %v5655_v61  ;;  %5163 = vmatprep.subr.bf16.mxu0 %v7242_v17  ;;  %5195 = vmatprep.subr.bf16.mxu1 %v7243_v59  ;;  %v7373_v61 = vld [vmem:[#allocation30_spill] sm:$0xff] }
 0x69e   :  { %v3020_v33 = vmul.f32 0.5, %v5657_v1  ;;  %v5659_v57 = vpop.eup %5658  ;;  %v7374_v1 = vld [vmem:[#allocation31_spill] sm:$0xff] }
 0x69f   :  { %v3017_v11 = vadd.f32 0.5, %v3016_v13  ;;  %v5661_v29 = vpop.eup %5660  ;;  %v7375_v13 = vld [vmem:[#allocation32_spill] sm:$0xff] }
 0x6a0   :  { %v3021_v46 = vadd.f32 0.5, %v3020_v33  ;;  %5165 = vmatpush1.bf16.msra.mxu0 %v7216_v9  ;;  %5197 = vmatpush1.bf16.msra.mxu1 %v7217_v16  ;;  %v7376_v33 = vld [vmem:[#allocation33_spill] sm:$0xff] }
 0x6a1   :  { %v3028_v50 = vmul.f32 %v5659_v57, %v3017_v11  ;;  %5167 = vmatprep.subr.bf16.mxu0 %v7218_v53  ;;  %5199 = vmatprep.subr.bf16.mxu1 %v7219_v62  ;;  %v7377_v11 = vld [vmem:[#allocation34_spill] sm:$0xff]  ;;  %v7378_v57 = vld [vmem:[#allocation35_spill] sm:$0xff] }
 0x6a2   :  { %v3027_v44 = vmul.f32 %v3021_v46, %v6739_v20  ;;  %v3025_v20 = vmul.f32 0.5, %v5661_v29  ;;  %v7379_v46 = vld [vmem:[#allocation36_spill] sm:$0xff]  ;;  %v7382_v29 = vld [vmem:[#allocation39_spill] sm:$0xff] }
 0x6a4   :  { %v6831_v35 = vadd.f32 %v3028_v50, %v3027_v44  ;;  %5169 = vmatpush1.bf16.msra.mxu0 %v7220_v22  ;;  %5201 = vmatpush1.bf16.msra.mxu1 %v7221_v45  ;;  %v3026_v51 = vadd.f32 0.5, %v3025_v20  ;;  %v7380_v50 = vld [vmem:[#allocation37_spill] sm:$0xff]  ;;  %v7381_v44 = vld [vmem:[#allocation38_spill] sm:$0xff]  ;;  %v7383_v20 = vld [vmem:[#allocation40_spill] sm:$0xff] }
 0x6a5   :  { %5171 = vmatprep.subr.bf16.mxu0 %v6239_v42  ;;  %5203 = vmatprep.subr.bf16.mxu1 %v7222_v2 }
 0x6a6   :  { %5662 = vtanh.f32 %v6831_v35 }
 0x6a8   :  { %5173 = vmatpush1.bf16.msra.mxu0 %v6245_v49  ;;  %5205 = vmatpush1.bf16.msra.mxu1 %v6249_v0 }
 0x6a9   :  { %5175 = vmatprep.subr.bf16.mxu0 %v6251_v10  ;;  %5207 = vmatprep.subr.bf16.mxu1 %v6254_v27 }
 0x6ac   :  { %5177 = vmatpush1.bf16.msra.mxu0 %v6257_v37  ;;  %5209 = vmatpush1.bf16.msra.mxu1 %v6261_v23 }
 0x6ad   :  { %5179 = vmatprep.subr.bf16.mxu0 %v6263_v40  ;;  %5211 = vmatprep.subr.bf16.mxu1 %v6266_v3 }
 0x6b0   :  { %v5663_v56 = vpop.eup %5662  ;;  %5181 = vmatpush1.bf16.msra.mxu0 %v6269_v15  ;;  %5213 = vmatpush1.bf16.msra.mxu1 %v6273_v12 }
 0x6b1   :  { %v6848_v24 = vmul.f32 %v5663_v56, %v3026_v51  ;;  %5215 = vmatprep.subr.bf16.mxu0 %v6046_v21  ;;  %5247 = vmatprep.subr.bf16.mxu1 %v6049_v25  ;;  %v7365_v21 = vld [vmem:[#allocation22_spill] sm:$0xff]  ;;  %v7366_v25 = vld [vmem:[#allocation23_spill] sm:$0xff]  ;;  %v7384_v51 = vld [vmem:[#allocation41_spill] sm:$0xff] }
 0x6b2   :  { %v7385_v56 = vld [vmem:[#allocation42_spill] sm:$0xff] }
 0x6b3   :  { %3277 = vmatmul.mubr.f32.vlgmr.msra.gmra.mrb[18].mxu0 %v6848_v24  ;;  %3348 = vmatmul.mubr.f32.vlgmr.msra.gmra.mrb[18].mxu1 %v6848_v24 }
 0x6b4   :  { %5217 = vmatpush1.bf16.msra.mxu0 %v6052_v28  ;;  %5249 = vmatpush1.bf16.msra.mxu1 %v6055_v31  ;;  %v7369_v28 = vld [vmem:[#allocation26_spill] sm:$0xff]  ;;  %v7370_v31 = vld [vmem:[#allocation27_spill] sm:$0xff] }
 0x6b5   :  { %5219 = vmatprep.subr.bf16.mxu0 %v6059_v34  ;;  %5251 = vmatprep.subr.bf16.mxu1 %v6063_v38  ;;  %v7371_v34 = vld [vmem:[#allocation28_spill] sm:$0xff]  ;;  %v7372_v38 = vld [vmem:[#allocation29_spill] sm:$0xff] }
 0x6b6   :  { %3448 = vmatprep.mubr.f32.mxu0 %v7209_v19  ;;  %3519 = vmatprep.mubr.f32.mxu1 %v7209_v19 }
 0x6b8   :  { %5221 = vmatpush1.bf16.msra.mxu0 %v7364_v41  ;;  %5253 = vmatpush1.bf16.msra.mxu1 %v7365_v21  ;;  %v7386_v41 = vld [vmem:[#allocation43_spill] sm:$0xff]  ;;  %v7387_v21 = vld [vmem:[#allocation44_spill] sm:$0xff] }
 0x6b9   :  { %5223 = vmatprep.subr.bf16.mxu0 %v7366_v25  ;;  %5255 = vmatprep.subr.bf16.mxu1 %v7367_v8  ;;  %v7388_v25 = vld [vmem:[#allocation45_spill] sm:$0xff]  ;;  %v7389_v8 = vld [vmem:[#allocation46_spill] sm:$0xff] }
 0x6bc   :  { %5225 = vmatpush1.bf16.msra.mxu0 %v7368_v48  ;;  %5257 = vmatpush1.bf16.msra.mxu1 %v7369_v28  ;;  %v7390_v48 = vld [vmem:[#allocation47_spill] sm:$0xff]  ;;  %v7391_v28 = vld [vmem:[#allocation48_spill] sm:$0xff] }
 0x6bd   :  { %5227 = vmatprep.subr.bf16.mxu0 %v7370_v31  ;;  %5259 = vmatprep.subr.bf16.mxu1 %v7371_v34 }
 0x6c0   :  { %5229 = vmatpush1.bf16.msra.mxu0 %v7372_v38  ;;  %5261 = vmatpush1.bf16.msra.mxu1 %v7373_v61  ;;  %v7392_v38 = vld [vmem:[#allocation59_spill] sm:$0xff] }
 0x6c1   :  { %5231 = vmatprep.subr.bf16.mxu0 %v7374_v1  ;;  %5263 = vmatprep.subr.bf16.mxu1 %v7375_v13 }
 0x6c4   :  { %5233 = vmatpush1.bf16.msra.mxu0 %v7376_v33  ;;  %5265 = vmatpush1.bf16.msra.mxu1 %v7377_v11 }
 0x6c5   :  { %5235 = vmatprep.subr.bf16.mxu0 %v7378_v57  ;;  %5267 = vmatprep.subr.bf16.mxu1 %v7379_v46 }
 0x6c8   :  { %5237 = vmatpush1.bf16.msra.mxu0 %v7380_v50  ;;  %5269 = vmatpush1.bf16.msra.mxu1 %v7381_v44 }
 0x6c9   :  { %5239 = vmatprep.subr.bf16.mxu0 %v7382_v29  ;;  %5271 = vmatprep.subr.bf16.mxu1 %v7383_v20 }
 0x6cc   :  { %5241 = vmatpush1.bf16.msra.mxu0 %v7384_v51  ;;  %5273 = vmatpush1.bf16.msra.mxu1 %v7385_v56 }
 0x6cd   :  { %5243 = vmatprep.subr.bf16.mxu0 %v7386_v41  ;;  %5275 = vmatprep.subr.bf16.mxu1 %v7387_v21 }
 0x6d0   :  { %5245 = vmatpush1.bf16.msra.mxu0 %v7388_v25  ;;  %5277 = vmatpush1.bf16.msra.mxu1 %v7389_v8 }
 0x6d1   :  { %5279 = vmatprep.subr.bf16.mxu0 %v7390_v48  ;;  %5311 = vmatprep.subr.bf16.mxu1 %v7391_v28 }
 0x766   :  { %v3106_v31 = vpop.f32.mrb[12].mxu0  ;;  %v3177_v34 = vpop.f32.mrb[12].mxu1 }
 0x767   :  { %v5418_v61 = vadd.f32 %v3106_v31, %v7392_v38  ;;  %v3108_v1 = vpop.f32.mrb[13].mxu0  ;;  %v3179_v13 = vpop.f32.mrb[13].mxu1  ;;  %v5434_v46 = vadd.f32 %v3177_v34, %v6324_v6 }
 0x768   :  { %v5419_v33 = vadd.f32 %v3108_v1, %v7239_v4  ;;  %v5435_v50 = vadd.f32 %v3179_v13, %v6328_v43 }
 0x769   :  { %v3186_v11 = vmul.f32 0.5, %v5418_v61 }
 0x76a   :  { %v3190_v57 = vmul.f32 0.5, %v5419_v33  ;;  %v3195_v44 = vmul.f32 0.5, %v5435_v50 }
 0x76b   :  { %5664 = vtanh.f32 %v3186_v11 }
 0x76c   :  { %5666 = vtanh.f32 %v3190_v57 }
 0x76d   :  { %5668 = vtanh.f32 %v5434_v46 }
 0x76e   :  { %5670 = vtanh.f32 %v3195_v44 }
 0x775   :  { %v5665_v29 = vpop.eup %5664 }
 0x776   :  { %v5667_v20 = vpop.eup %5666  ;;  %v3188_v51 = vmul.f32 0.5, %v5665_v29 }
 0x777   :  { %v3192_v56 = vmul.f32 0.5, %v5667_v20  ;;  %v5669_v21 = vpop.eup %5668 }
 0x778   :  { %v3189_v41 = vadd.f32 0.5, %v3188_v51  ;;  %v5671_v31 = vpop.eup %5670 }
 0x779   :  { %v3193_v25 = vadd.f32 0.5, %v3192_v56  ;;  %v3197_v34 = vmul.f32 0.5, %v5671_v31  ;;  %v3747_v31 = vld [vmem:[#allocation17 + $0x70] sm:$0xff] }
 0x77a   :  { %v3200_v8 = vmul.f32 %v5669_v21, %v3189_v41  ;;  %v3744_v41 = vld [vmem:[#allocation17 + $0x58] sm:$0xff] }
 0x77b   :  { %v3199_v48 = vmul.f32 %v3193_v25, %v6801_v47  ;;  %v3198_v57 = vadd.f32 0.5, %v3197_v34  ;;  %v3745_v25 = vld [vmem:[#allocation17 + $0x60] sm:$0xff]  ;;  %v3748_v34 = vld [vmem:[#allocation17 + $0x78] sm:$0xff] }
 0x77d   :  { %v6893_v28 = vadd.f32 %v3200_v8, %v3199_v48  ;;  %v3746_v8 = vld [vmem:[#allocation17 + $0x68] sm:$0xff] }
 0x77e   :  { %v5366_v48 = vpack.c.bf16 %v3746_v8, %v3745_v25 }
 0x77f   :  { %5672 = vtanh.f32 %v6893_v28 }
 0x786   :  { %v3278_v61 = vpop.f32.mrb[18].mxu0  ;;  %v3349_v1 = vpop.f32.mrb[18].mxu1 }
 0x787   :  { %v5440_v13 = vadd.f32 %v3278_v61, %v6337_v39  ;;  %v3280_v33 = vpop.f32.mrb[19].mxu0  ;;  %v3351_v11 = vpop.f32.mrb[19].mxu1  ;;  %v5456_v20 = vadd.f32 %v3349_v1, %v6342_v26  ;;  %v5370_v61 = vpack.c.bf16 %v3748_v34, %v3747_v31  ;;  %v7394_v1 = vld [vmem:[#allocation53_spill] sm:$0xff] }
 0x788   :  { %v5441_v46 = vadd.f32 %v3280_v33, %v6339_v63  ;;  %v5457_v51 = vadd.f32 %v3351_v11, %v6348_v52  ;;  %v7396_v33 = vld [vmem:[#allocation57_spill] sm:$0xff]  ;;  %v7397_v11 = vld [vmem:[#allocation60_spill] sm:$0xff] }
 0x789   :  { %v5673_v50 = vpop.eup %5672  ;;  %v3358_v44 = vmul.f32 0.5, %v5440_v13  ;;  %v7395_v13 = vld [vmem:[#allocation55_spill] sm:$0xff] }
 0x78a   :  { %v6898_v29 = vmul.f32 %v5673_v50, %v3198_v57  ;;  %v3362_v47 = vmul.f32 0.5, %v5441_v46  ;;  %v3877_v57 = vld [vmem:[%s7075_s8] sm:$0xff]  ;;  %v3878_v46 = vld [vmem:[%s7075_s8 + $0x8] sm:$0xff] }
 0x78b   :  { %5674 = vtanh.f32 %v3358_v44  ;;  %v5374_v50 = vpack.c.bf16 %v3878_v46, %v3877_v57  ;;  %v3879_v44 = vld [vmem:[%s7075_s8 + $0x10] sm:$0xff] }
 0x78c   :  { %5676 = vtanh.f32 %v3362_v47  ;;  %3449 = vmatmul.mubr.f32.vlgmr.msra.gmra.mrb[14].mxu0 %v6898_v29  ;;  %3520 = vmatmul.mubr.f32.vlgmr.msra.gmra.mrb[14].mxu1 %v6898_v29  ;;  %v3881_v47 = vld [vmem:[%s7075_s8 + $0x20] sm:$0xff] }
 0x78d   :  { %5281 = vmatpush1.bf16.msra.mxu0 %v6179_v30  ;;  %5313 = vmatpush1.bf16.msra.mxu1 %v6183_v32  ;;  %5678 = vtanh.f32 %v5456_v20  ;;  %v3367_v30 = vmul.f32 0.5, %v5457_v51  ;;  %v3882_v20 = vld [vmem:[%s7075_s8 + $0x28] sm:$0xff] }
 0x78e   :  { %5283 = vmatprep.subr.bf16.mxu0 %v6185_v36  ;;  %5315 = vmatprep.subr.bf16.mxu1 %v6189_v14  ;;  %v5382_v51 = vpack.c.bf16 %v3882_v20, %v3881_v47 }
 0x78f   :  { %3620 = vmatprep.mubr.f32.mxu0 %v7209_v19  ;;  %3691 = vmatprep.mubr.f32.mxu1 %v7209_v19  ;;  %5680 = vtanh.f32 %v3367_v30  ;;  %v3883_v30 = vld [vmem:[%s7075_s8 + $0x30] sm:$0xff] }
 0x791   :  { %5285 = vmatpush1.bf16.msra.mxu0 %v6195_v55  ;;  %5317 = vmatpush1.bf16.msra.mxu1 %v6199_v58 }
 0x792   :  { %5287 = vmatprep.subr.bf16.mxu0 %v6201_v60  ;;  %5319 = vmatprep.subr.bf16.mxu1 %v6204_v5 }
 0x795   :  { %v5675_v32 = vpop.eup %5674  ;;  %5289 = vmatpush1.bf16.msra.mxu0 %v6209_v18  ;;  %5321 = vmatpush1.bf16.msra.mxu1 %v7241_v7  ;;  %v3740_v7 = vld [vmem:[#allocation17 + $0x38] sm:$0xff] }
 0x796   :  { %v5677_v36 = vpop.eup %5676  ;;  %v3360_v14 = vmul.f32 0.5, %v5675_v32  ;;  %5291 = vmatprep.subr.bf16.mxu0 %v7242_v17  ;;  %5323 = vmatprep.subr.bf16.mxu1 %v7243_v59  ;;  %v3742_v17 = vld [vmem:[#allocation17 + $0x48] sm:$0xff]  ;;  %v3884_v32 = vld [vmem:[%s7075_s8 + $0x38] sm:$0xff] }
 0x797   :  { %v3364_v19 = vmul.f32 0.5, %v5677_v36  ;;  %v5679_v58 = vpop.eup %5678  ;;  %v5386_v36 = vpack.c.bf16 %v3884_v32, %v3883_v30 }
 0x798   :  { %v3361_v55 = vadd.f32 0.5, %v3360_v14  ;;  %v3885_v14 = vld [vmem:[%s7075_s8 + $0x40] sm:$0xff] }
 0x799   :  { %v3365_v56 = vadd.f32 0.5, %v3364_v19  ;;  %5293 = vmatpush1.bf16.msra.mxu0 %v7216_v9  ;;  %5325 = vmatpush1.bf16.msra.mxu1 %v7217_v16  ;;  %v5681_v9 = vpop.eup %5680  ;;  %v3734_v16 = vld [vmem:[#allocation17 + $0x8] sm:$0xff] }
 0x79a   :  { %v3372_v60 = vmul.f32 %v5679_v58, %v3361_v55  ;;  %5295 = vmatprep.subr.bf16.mxu0 %v7218_v53  ;;  %5327 = vmatprep.subr.bf16.mxu1 %v7219_v62  ;;  %v3733_v62 = vld [vmem:[#allocation17] sm:$0xff]  ;;  %v3886_v19 = vld [vmem:[%s7075_s8 + $0x48] sm:$0xff]  ;;  %v3887_v58 = vld [vmem:[%s7075_s8 + $0x50] sm:$0xff] }
 0x79b   :  { %v3371_v5 = vmul.f32 %v3365_v56, %v6831_v35  ;;  %v3743_v35 = vld [vmem:[#allocation17 + $0x50] sm:$0xff]  ;;  %v5390_v55 = vpack.c.bf16 %v3886_v19, %v3885_v14  ;;  %v3888_v56 = vld [vmem:[%s7075_s8 + $0x58] sm:$0xff] }
 0x79c   :  { %v5362_v21 = vpack.c.bf16 %v3744_v41, %v3743_v35 }
 0x79d   :  { %v6923_v18 = vadd.f32 %v3372_v60, %v3371_v5  ;;  %5297 = vmatpush1.bf16.msra.mxu0 %v7220_v22  ;;  %5329 = vmatpush1.bf16.msra.mxu1 %v7221_v45  ;;  %v3369_v22 = vmul.f32 0.5, %v5681_v9  ;;  %v3735_v45 = vld [vmem:[#allocation17 + $0x10] sm:$0xff]  ;;  %v5394_v60 = vpack.c.bf16 %v3888_v56, %v3887_v58  ;;  %v3889_v5 = vld [vmem:[%s7075_s8 + $0x60] sm:$0xff]  ;;  %v3890_v9 = vld [vmem:[%s7075_s8 + $0x68] sm:$0xff] }
 0x79e   :  { %5299 = vmatprep.subr.bf16.mxu0 %v6239_v42  ;;  %5331 = vmatprep.subr.bf16.mxu1 %v7222_v2  ;;  %v5342_v42 = vpack.c.bf16 %v3734_v16, %v3733_v62  ;;  %v3738_v2 = vld [vmem:[#allocation17 + $0x28] sm:$0xff]  ;;  %v5398_v62 = vpack.c.bf16 %v3890_v9, %v3889_v5  ;;  %v3891_v16 = vld [vmem:[%s7075_s8 + $0x70] sm:$0xff] }
 0x79f   :  { %5682 = vtanh.f32 %v6923_v18  ;;  %v3370_v53 = vadd.f32 0.5, %v3369_v22  ;;  %v3892_v22 = vld [vmem:[%s7075_s8 + $0x78] sm:$0xff] }
 0x7a1   :  { %5301 = vmatpush1.bf16.msra.mxu0 %v6245_v49  ;;  %5333 = vmatpush1.bf16.msra.mxu1 %v6249_v0  ;;  %v3736_v49 = vld [vmem:[#allocation17 + $0x18] sm:$0xff] }
 0x7a2   :  { %5303 = vmatprep.subr.bf16.mxu0 %v6251_v10  ;;  %5335 = vmatprep.subr.bf16.mxu1 %v6254_v27  ;;  %v5346_v27 = vpack.c.bf16 %v3736_v49, %v3735_v45 }
 0x7a5   :  { %5305 = vmatpush1.bf16.msra.mxu0 %v6257_v37  ;;  %5337 = vmatpush1.bf16.msra.mxu1 %v6261_v23  ;;  %v3737_v37 = vld [vmem:[#allocation17 + $0x20] sm:$0xff] }
 0x7a6   :  { %5307 = vmatprep.subr.bf16.mxu0 %v6263_v40  ;;  %5339 = vmatprep.subr.bf16.mxu1 %v6266_v3  ;;  %v7393_v23 = vld [vmem:[#allocation61_spill] sm:$0xff]  ;;  %v5350_v40 = vpack.c.bf16 %v3738_v2, %v3737_v37  ;;  %v3739_v3 = vld [vmem:[#allocation17 + $0x30] sm:$0xff] }
 0x7a9   :  { %v5683_v0 = vpop.eup %5682  ;;  %5309 = vmatpush1.bf16.msra.mxu0 %v6269_v15  ;;  %5341 = vmatpush1.bf16.msra.mxu1 %v6273_v12  ;;  %v5354_v15 = vpack.c.bf16 %v3740_v7, %v3739_v3  ;;  %v3741_v12 = vld [vmem:[#allocation17 + $0x40] sm:$0xff] }
 0x7aa   :  { %v6940_v10 = vmul.f32 %v5683_v0, %v3370_v53  ;;  %5343 = vmatprep.subr.bf16.mxu0 %v5342_v42  ;;  %v5358_v59 = vpack.c.bf16 %v3742_v17, %v3741_v12  ;;  %5375 = vmatprep.subr.bf16.mxu1 %v5374_v50 }
 0x7ac   :  { %3621 = vmatmul.mubr.f32.vlgmr.msra.gmra.mrb[16].mxu0 %v6940_v10  ;;  %3692 = vmatmul.mubr.f32.vlgmr.msra.gmra.mrb[16].mxu1 %v6940_v10 }
 0x7ad   :  { %5345 = vmatpush3.bf16.msra.mxu0 %v5342_v42  ;;  %4134 = vmatprep.mubr.f32.mxu0 %v7393_v23  ;;  %v5402_v42 = vpack.c.bf16 %v3892_v22, %v3891_v16 }
 0x7ae   :  { %5347 = vmatprep.subr.bf16.mxu0 %v5346_v27  ;;  %5377 = vmatpush3.bf16.msra.mxu1 %v5374_v50 }
 0x7b1   :  { %5349 = vmatpush3.bf16.msra.mxu0 %v5346_v27 }
 0x7b2   :  { %5351 = vmatprep.subr.bf16.mxu0 %v5350_v40 }
 0x7b5   :  { %5353 = vmatpush3.bf16.msra.mxu0 %v5350_v40 }
 0x7b6   :  { %5355 = vmatprep.subr.bf16.mxu0 %v5354_v15 }
 0x7b9   :  { %5357 = vmatpush3.bf16.msra.mxu0 %v5354_v15 }
 0x7ba   :  { %5359 = vmatprep.subr.bf16.mxu0 %v5358_v59 }
 0x7bd   :  { %5361 = vmatpush3.bf16.msra.mxu0 %v5358_v59 }
 0x7be   :  { %5363 = vmatprep.subr.bf16.mxu0 %v5362_v21 }
 0x7c1   :  { %5365 = vmatpush3.bf16.msra.mxu0 %v5362_v21 }
 0x7c2   :  { %5367 = vmatprep.subr.bf16.mxu0 %v5366_v48 }
 0x7c5   :  { %5369 = vmatpush3.bf16.msra.mxu0 %v5366_v48 }
 0x7c6   :  { %5371 = vmatprep.subr.bf16.mxu0 %v5370_v61 }
 0x7c9   :  { %5373 = vmatpush3.bf16.msra.mxu0 %v5370_v61 }
 0x7cc   :  { %4135 = vmatmul.mubr.f32.vlgmr.msra.gmra.mrb[32].mxu0 %v7394_v1 }
 0x7cd   :  { %4137 = vmatprep.mubr.f32.mxu0 %v7395_v13 }
 0x7d0   :  { %4138 = vmatmul.mubr.f32.gmra.mrb[34].mxu0 %v7396_v33 }
 0x7d1   :  { %4140 = vmatprep.mubr.f32.mxu0 %v7397_v11 }
 0x7d4   :  { %4141 = vmatmul.mubr.f32.gmra.mrb[36].mxu0 %v6806_v54  ;;  %v3880_v54 = vld [vmem:[%s7075_s8 + $0x18] sm:$0xff] }
 0x7d5   :  { %4143 = vmatprep.mubr.f32.mxu0 %v6898_v29  ;;  %v5378_v29 = vpack.c.bf16 %v3880_v54, %v3879_v44 }
 0x7d7   :  { %5379 = vmatprep.subr.bf16.mxu1 %v5378_v29 }
 0x7d8   :  { %5381 = vmatpush3.bf16.msra.mxu1 %v5378_v29 }
 0x7d9   :  { %5383 = vmatprep.subr.bf16.mxu1 %v5382_v51 }
 0x7dc   :  { %5385 = vmatpush3.bf16.msra.mxu1 %v5382_v51 }
 0x7dd   :  { %5387 = vmatprep.subr.bf16.mxu1 %v5386_v36 }
 0x7e0   :  { %5389 = vmatpush3.bf16.msra.mxu1 %v5386_v36 }
 0x7e1   :  { %5391 = vmatprep.subr.bf16.mxu1 %v5390_v55 }
 0x7e4   :  { %5393 = vmatpush3.bf16.msra.mxu1 %v5390_v55 }
 0x7e5   :  { %5395 = vmatprep.subr.bf16.mxu1 %v5394_v60 }
 0x7e8   :  { %5397 = vmatpush3.bf16.msra.mxu1 %v5394_v60 }
 0x7e9   :  { %5399 = vmatprep.subr.bf16.mxu1 %v5398_v62 }
 0x7ec   :  { %5401 = vmatpush3.bf16.msra.mxu1 %v5398_v62 }
 0x7ed   :  { %5403 = vmatprep.subr.bf16.mxu1 %v5402_v42 }
 0x7f0   :  { %5405 = vmatpush3.bf16.msra.mxu1 %v5402_v42 }
 0x85f   :  { %v3450_v45 = vpop.f32.mrb[14].mxu0  ;;  %v3521_v49 = vpop.f32.mrb[14].mxu1 }
 0x860   :  { %v5420_v53 = vadd.f32 %v3450_v45, %v7392_v38  ;;  %v3452_v0 = vpop.f32.mrb[15].mxu0  ;;  %v3523_v27 = vpop.f32.mrb[15].mxu1  ;;  %v5436_v40 = vadd.f32 %v3521_v49, %v6324_v6 }
 0x861   :  { %v5421_v37 = vadd.f32 %v3452_v0, %v7239_v4  ;;  %v5437_v3 = vadd.f32 %v3523_v27, %v6328_v43  ;;  %v7398_v0 = vld [vmem:[#allocation49_spill] sm:$0xff]  ;;  %v7400_v27 = vld [vmem:[#allocation56_spill] sm:$0xff] }
 0x862   :  { %v3530_v2 = vmul.f32 0.5, %v5420_v53 }
 0x863   :  { %v3534_v23 = vmul.f32 0.5, %v5421_v37  ;;  %v3539_v7 = vmul.f32 0.5, %v5437_v3  ;;  %v7401_v37 = vld [vmem:[#allocation54_spill] sm:$0xff] }
 0x864   :  { %5684 = vtanh.f32 %v3530_v2 }
 0x865   :  { %5686 = vtanh.f32 %v3534_v23 }
 0x866   :  { %5688 = vtanh.f32 %v5436_v40 }
 0x867   :  { %5690 = vtanh.f32 %v3539_v7 }
 0x86e   :  { %v5685_v15 = vpop.eup %5684 }
 0x86f   :  { %v5687_v12 = vpop.eup %5686  ;;  %v3532_v17 = vmul.f32 0.5, %v5685_v15 }
 0x870   :  { %v3536_v59 = vmul.f32 0.5, %v5687_v12  ;;  %v5689_v35 = vpop.eup %5688 }
 0x871   :  { %v3533_v38 = vadd.f32 0.5, %v3532_v17  ;;  %v5691_v8 = vpop.eup %5690 }
 0x872   :  { %v3537_v41 = vadd.f32 0.5, %v3536_v59  ;;  %v3541_v6 = vmul.f32 0.5, %v5691_v8 }
 0x873   :  { %v3544_v21 = vmul.f32 %v5689_v35, %v3533_v38 }
 0x874   :  { %v3543_v4 = vmul.f32 %v3537_v41, %v6893_v28  ;;  %v3542_v1 = vadd.f32 0.5, %v3541_v6 }
 0x876   :  { %v3545_v25 = vadd.f32 %v3544_v21, %v3543_v4 }
 0x878   :  { %5692 = vtanh.f32 %v3545_v25 }
 0x87f   :  { %v3622_v48 = vpop.f32.mrb[16].mxu0  ;;  %v3693_v31 = vpop.f32.mrb[16].mxu1 }
 0x880   :  { %v5438_v43 = vadd.f32 %v3622_v48, %v6337_v39  ;;  %v3624_v34 = vpop.f32.mrb[17].mxu0  ;;  %v3695_v61 = vpop.f32.mrb[17].mxu1  ;;  %v5454_v28 = vadd.f32 %v3693_v31, %v6342_v26 }
 0x881   :  { %v5439_v13 = vadd.f32 %v3624_v34, %v6339_v63  ;;  %v5455_v50 = vadd.f32 %v3695_v61, %v6348_v52  ;;  %v4053_v52 = vld [vmem:[%s7076_s9] ss:$0 sm:$0xff] }
 0x882   :  { %v5693_v33 = vpop.eup %5692  ;;  %v3702_v11 = vmul.f32 0.5, %v5438_v43 }
 0x883   :  { %v3706_v57 = vmul.f32 0.5, %v5439_v13  ;;  %v3547_v46 = vmul.f32 %v5693_v33, %v3542_v1  ;;  %v3711_v44 = vmul.f32 0.5, %v5455_v50 }
 0x884   :  { %5694 = vtanh.f32 %v3702_v11 }
 0x885   :  { %5696 = vtanh.f32 %v3706_v57  ;;  %4144 = vmatmul.mubr.f32.gmra.mrb[38].mxu0 %v3547_v46 }
 0x886   :  { %5698 = vtanh.f32 %v5454_v28 }
 0x887   :  { %5700 = vtanh.f32 %v3711_v44 }
 0x88e   :  { %v5695_v54 = vpop.eup %5694 }
 0x88f   :  { %v5697_v39 = vpop.eup %5696  ;;  %v3704_v29 = vmul.f32 0.5, %v5695_v54 }
 0x890   :  { %v3708_v47 = vmul.f32 0.5, %v5697_v39  ;;  %v5699_v63 = vpop.eup %5698 }
 0x891   :  { %v3705_v20 = vadd.f32 0.5, %v3704_v29  ;;  %v5701_v26 = vpop.eup %5700 }
 0x892   :  { %v3709_v51 = vadd.f32 0.5, %v3708_v47  ;;  %v3713_v14 = vmul.f32 0.5, %v5701_v26 }
 0x893   :  { %v3716_v30 = vmul.f32 %v5699_v63, %v3705_v20 }
 0x894   :  { %v3715_v32 = vmul.f32 %v3709_v51, %v6923_v18  ;;  %v3714_v56 = vadd.f32 0.5, %v3713_v14 }
 0x896   :  { %v3717_v36 = vadd.f32 %v3716_v30, %v3715_v32 }
 0x898   :  { %5702 = vtanh.f32 %v3717_v36 }
 0x89f   :  { %v4136_v19 = vpop.f32.mrb[32].mxu0 }
 0x8a0   :  { %v3828_v55 = vadd.f32 %v4136_v19, %v4053_v52  ;;  %v3822_v58 = vpop.f32.mrb[33].mxu0 }
 0x8a1   :  { %v3823_v60 = vadd.f32 %v4053_v52, %v3822_v58 }
 0x8a2   :  { %v5703_v5 = vpop.eup %5702  ;;  %3862 = vst [vmem:[%s7077_s10 + $0x8] sm:$0xff] %v3828_v55 }
 0x8a3   :  { %3861 = vst [vmem:[%s7077_s10] sm:$0xff] %v3823_v60  ;;  %v4139_v18 = vpop.f32.mrb[34].mxu0  ;;  %v3719_v9 = vmul.f32 %v5703_v5, %v3714_v56 }
 0x8a4   :  { %v3838_v62 = vadd.f32 %v4139_v18, %v4053_v52  ;;  %v3832_v16 = vpop.f32.mrb[35].mxu0 }
 0x8a5   :  { %v3833_v22 = vadd.f32 %v4053_v52, %v3832_v16  ;;  %4178 = vmatprep.mubr.f32.mxu1 %v3719_v9 }
 0x8a6   :  { %3864 = vst [vmem:[%s7077_s10 + $0x18] sm:$0xff] %v3838_v62  ;;  %4179 = vmatmul.mubr.f32.vlgmr.msra.gmra.mrb[32].mxu1 %v6940_v10  ;;  %v7399_v10 = vld [vmem:[#allocation58_spill] sm:$0xff] }
 0x8a7   :  { %3863 = vst [vmem:[%s7077_s10 + $0x10] sm:$0xff] %v3833_v22  ;;  %v4142_v42 = vpop.f32.mrb[36].mxu0  ;;  %4181 = vmatprep.mubr.f32.mxu1 %v6848_v24  ;;  %v7402_v24 = vld [vmem:[#allocation52_spill] sm:$0xff] }
 0x8a8   :  { %v3848_v45 = vadd.f32 %v4142_v42, %v4053_v52  ;;  %v3842_v49 = vpop.f32.mrb[37].mxu0 }
 0x8a9   :  { %v3843_v53 = vadd.f32 %v4053_v52, %v3842_v49 }
 0x8aa   :  { %3866 = vst [vmem:[%s7077_s10 + $0x28] sm:$0xff] %v3848_v45  ;;  %4182 = vmatmul.mubr.f32.gmra.mrb[34].mxu1 %v7398_v0 }
 0x8ab   :  { %3865 = vst [vmem:[%s7077_s10 + $0x20] sm:$0xff] %v3843_v53  ;;  %4184 = vmatprep.mubr.f32.mxu1 %v7399_v10 }
 0x8ae   :  { %4185 = vmatmul.mubr.f32.gmra.mrb[36].mxu1 %v7400_v27 }
 0x8af   :  { %4187 = vmatprep.mubr.f32.mxu1 %v7401_v37 }
 0x8b2   :  { %4188 = vmatmul.mubr.f32.gmra.mrb[38].mxu1 %v7402_v24 }
 0x958   :  { %v4145_v2 = vpop.f32.mrb[38].mxu0 }
 0x959   :  { %v3858_v23 = vadd.f32 %v4145_v2, %v4053_v52  ;;  %v3852_v40 = vpop.f32.mrb[39].mxu0 }
 0x95a   :  { %v3853_v3 = vadd.f32 %v4053_v52, %v3852_v40 }
 0x95b   :  { %3868 = vst [vmem:[%s7077_s10 + $0x38] sm:$0xff] %v3858_v23 }
 0x95c   :  { %3867 = vst [vmem:[%s7077_s10 + $0x30] sm:$0xff] %v3853_v3 }
 0x979   :  { %v4180_v7 = vpop.f32.mrb[32].mxu1 }
 0x97a   :  { %3999 = vst [vmem:[%s7078_s11 + $0x8] sm:$0xff] %v4180_v7  ;;  %v3959_v15 = vpop.f32.mrb[33].mxu1 }
 0x97b   :  { %3998 = vst [vmem:[%s7078_s11] sm:$0xff] %v3959_v15 }
 0x97d   :  { %v4183_v12 = vpop.f32.mrb[34].mxu1 }
 0x97e   :  { %4001 = vst [vmem:[%s7078_s11 + $0x18] sm:$0xff] %v4183_v12  ;;  %v3969_v17 = vpop.f32.mrb[35].mxu1 }
 0x97f   :  { %4000 = vst [vmem:[%s7078_s11 + $0x10] sm:$0xff] %v3969_v17 }
 0x981   :  { %v4186_v59 = vpop.f32.mrb[36].mxu1 }
 0x982   :  { %4003 = vst [vmem:[%s7078_s11 + $0x28] sm:$0xff] %v4186_v59  ;;  %v3979_v38 = vpop.f32.mrb[37].mxu1 }
 0x983   :  { %4002 = vst [vmem:[%s7078_s11 + $0x20] sm:$0xff] %v3979_v38 }
 0x985   :  { %v4189_v35 = vpop.f32.mrb[38].mxu1 }
 0x986   :  { %4005 = vst [vmem:[%s7078_s11 + $0x38] sm:$0xff] %v4189_v35  ;;  %v3989_v41 = vpop.f32.mrb[39].mxu1 }
 0x987   :  { %4004 = vst [vmem:[%s7078_s11 + $0x30] sm:$0xff] %v3989_v41 }
 0x988   :  { %4028 = vsyncpa [#allocation11], 1 }
 0x989   :  { %4029 = vsyncpa [#allocation13], 1 }
 0x98a   :  { %4030 = vsyncpa [#allocation16], 1 }

</bundles_post_ra>
